<compile_context>
chip_gen: v7x
topology: tpu7x:2x2x1
jax: 0.10.0
libtpu: 0.0.40
codegen_flags: <defaults>
</compile_context>

<pallas_src>
import jax
import jax.numpy as jnp
from jax.experimental import pallas as pl
from jax.experimental.pallas import tpu as pltpu

TN = 8            # batch tile per grid step (output block = one full (8,128) vreg)
CLS_LANES = 128   # pad the class dim up to a multiple of this (lane-dense stores)


def _round_up(x, m):
    return (x + m - 1) // m * m


def _im2col_stem(x_nhwc, kh, kw, stride, pad):
    """Host-side (XLA) im2col of the raw input only.  Rows ordered
    (n, ho*Wo + wo); K ordered (ki*kw + kj)*Cin + ci, matching
    weight.reshape(kh*kw*Cin, Cout)."""
    N, H, W, C = x_nhwc.shape
    xp = jnp.pad(x_nhwc, ((0, 0), (pad, pad), (pad, pad), (0, 0)))
    Ho = (H + 2 * pad - kh) // stride + 1
    Wo = (W + 2 * pad - kw) // stride + 1
    cols = []
    for i in range(kh):
        for j in range(kw):
            cols.append(xp[:, i:i + Ho * stride:stride, j:j + Wo * stride:stride, :])
    p = jnp.stack(cols, axis=3)                               # (N, Ho, Wo, kh*kw, C)
    return p.reshape(N * Ho * Wo, kh * kw * C), (Ho, Wo)


def _conv_gather_matrix(h_in, w_in, h_out, w_out, ksize, stride, pad):
    """0/1 matrix G of shape (ksize*ksize*h_out*w_out, h_in*w_in) such that for
    tap t = ki*ksize + kj, rows [t*P_out, (t+1)*P_out) gather the input pixels
    feeding that tap (zero rows where the tap falls into the zero-padding).
    Lets the kernel do the backbone conv's im2col as a single MXU matmul."""
    taps = []
    for ki in range(ksize):
        for kj in range(ksize):
            hi = jnp.arange(h_out) * stride + ki - pad
            wi = jnp.arange(w_out) * stride + kj - pad
            vh = ((hi >= 0) & (hi < h_in)).astype(jnp.float32)
            vw = ((wi >= 0) & (wi < w_in)).astype(jnp.float32)
            row = jax.nn.one_hot(jnp.clip(hi, 0, h_in - 1), h_in) * vh[:, None]
            col = jax.nn.one_hot(jnp.clip(wi, 0, w_in - 1), w_in) * vw[:, None]
            a = jnp.einsum('ph,qw->pqhw', row, col)
            taps.append(a.reshape(h_out * w_out, h_in * w_in))
    return jnp.concatenate(taps, axis=0)


def _fold_conv_bn(w, b, bn, eps):
    """Fold eval-mode BatchNorm (+ conv bias) into the conv weights:
       y = scale * conv(x, w) + shift with scale = gamma / sqrt(var + eps),
       shift = beta + scale * (bias - running_mean)."""
    scale = bn['gamma'] / jnp.sqrt(bn['var'] + eps)
    shift = bn['beta'] + scale * (b - bn['mean'])
    return w * scale, shift


class MultiTaskNetworkPallas:
    """Mirrors MultiTaskNetwork._forward_val for a 'clf' dataset:
       stem_dict[dset](images) -> backbone.body(feats) -> head_dict[dset](feats)
       and returns dict(outputs=predictions)."""

    def __init__(self, key, *, in_ch=3, stem_ch=16, backbone_ch=32,
                 num_classes=10, bn_eps=1e-5):
        self.in_ch, self.stem_ch, self.backbone_ch = in_ch, stem_ch, backbone_ch
        self.num_classes, self.bn_eps = num_classes, bn_eps
        k_stem, k_back, k_head = jax.random.split(key, 3)

        # ---- raw parameters, initialised like init_weights():
        #      Conv2d: kaiming_normal_(relu), bias=0; BN: weight=1, bias=0
        #      (fresh running stats mean=0, var=1); Linear: kaiming_uniform_(relu), bias=0.
        fan_in = 9 * in_ch
        self.stem_w = jax.random.normal(k_stem, (3, 3, in_ch, stem_ch), jnp.float32) * \
            jnp.sqrt(2.0 / fan_in)
        self.stem_b = jnp.zeros((stem_ch,), jnp.float32)
        self.stem_bn = dict(gamma=jnp.ones((stem_ch,), jnp.float32),
                            beta=jnp.zeros((stem_ch,), jnp.float32),
                            mean=jnp.zeros((stem_ch,), jnp.float32),
                            var=jnp.ones((stem_ch,), jnp.float32))

        fan_in = 9 * stem_ch
        self.back_w = jax.random.normal(k_back, (3, 3, stem_ch, backbone_ch), jnp.float32) * \
            jnp.sqrt(2.0 / fan_in)
        self.back_b = jnp.zeros((backbone_ch,), jnp.float32)
        self.back_bn = dict(gamma=jnp.ones((backbone_ch,), jnp.float32),
                            beta=jnp.zeros((backbone_ch,), jnp.float32),
                            mean=jnp.zeros((backbone_ch,), jnp.float32),
                            var=jnp.ones((backbone_ch,), jnp.float32))

        bound = jnp.sqrt(6.0 / backbone_ch)        # kaiming_uniform_(nonlinearity='relu')
        self.head_w = jax.random.uniform(k_head, (backbone_ch, num_classes), jnp.float32,
                                         minval=-bound, maxval=bound)
        self.head_b = jnp.zeros((num_classes,), jnp.float32)

        # ---- kernel-side parameters: fold BN + bias, pad, cast MXU operands to bf16 ----
        w1, s1 = _fold_conv_bn(self.stem_w, self.stem_b, self.stem_bn, bn_eps)
        k1 = 9 * in_ch
        self.k1_pad = _round_up(k1, 32)
        self.w1_k = jnp.pad(w1.reshape(k1, stem_ch),
                            ((0, self.k1_pad - k1), (0, 0))).astype(jnp.bfloat16)
        self.s1_k = s1.reshape(1, stem_ch).astype(jnp.float32)

        w2, s2 = _fold_conv_bn(self.back_w, self.back_b, self.back_bn, bn_eps)
        self.w2_k = w2.reshape(9, stem_ch, backbone_ch).astype(jnp.bfloat16)
        self.s2_k = s2.reshape(1, backbone_ch).astype(jnp.float32)

        self.cls_pad = _round_up(num_classes, CLS_LANES)
        self.wh_k = jnp.pad(self.head_w,
                            ((0, 0), (0, self.cls_pad - num_classes))).astype(jnp.bfloat16)
        self.bh_k = jnp.pad(self.head_b, (0, self.cls_pad - num_classes)
                            ).reshape(1, self.cls_pad).astype(jnp.float32)

    def forward(self, images_nchw, kwargs):
        # eval-mode `_forward_val`
        task = list(kwargs.values())[0]
        if task != 'clf':
            # TODO(synk): 'det'/'seg' need detector (RPN/RoI heads) / segmentor
            # modules that are not defined in the provided module source.
            raise KeyError('Not supported task was entered.')

        x = jnp.transpose(images_nchw, (0, 2, 3, 1)).astype(jnp.float32)   # NCHW -> NHWC
        N = x.shape[0]
        C1, C2, CLSP, K1P = self.stem_ch, self.backbone_ch, self.cls_pad, self.k1_pad

        # Host-side prep: im2col of the raw input only (review option (b));
        # everything downstream of the stem stays inside the fused kernel.
        patches, (H1, W1) = _im2col_stem(x, 3, 3, stride=2, pad=1)          # (N*P1, 9*Cin)
        P1 = H1 * W1
        H2 = (H1 + 2 - 3) // 2 + 1
        W2 = (W1 + 2 - 3) // 2 + 1
        P2 = H2 * W2

        patches = jnp.pad(patches, ((0, 0), (0, K1P - patches.shape[1])))
        n_pad = _round_up(N, TN)
        if n_pad != N:
            patches = jnp.pad(patches, ((0, (n_pad - N) * P1), (0, 0)))
        patches = patches.astype(jnp.bfloat16)

        a2 = _conv_gather_matrix(H1, W1, H2, W2, 3, 2, 1).astype(jnp.bfloat16)  # (9*P2, P1)
        pool_row = jnp.full((1, P2), 1.0 / P2, jnp.bfloat16)

        def fused_kernel(p_ref, w1_ref, s1_ref, a2_ref, w2_ref, s2_ref,
                         pool_ref, wh_ref, bh_ref, o_ref):
            # Stem conv (+ folded BN) + ReLU for the whole batch tile: one MXU matmul.
            y1 = jnp.dot(p_ref[...], w1_ref[...], preferred_element_type=jnp.float32)
            y1 = jnp.maximum(y1 + s1_ref[...], 0.0).astype(jnp.bfloat16)    # (TN*P1, C1)

            a2v = a2_ref[...]              # (9*P2, P1) 0/1 gather matrix
            w2v = w2_ref[...]              # (9, C1, C2)
            s2v = s2_ref[...]
            poolv = pool_ref[...]
            whv = wh_ref[...]
            bhv = bh_ref[...]

            rows = []
            for n in range(TN):                                 # static unroll over images
                y1_n = y1[n * P1:(n + 1) * P1, :]               # (P1, C1)
                # Backbone "im2col" of the in-VMEM stem output: one gather matmul;
                # rows [t*P2, (t+1)*P2) hold the pixels feeding tap t.
                g = jnp.dot(a2v, y1_n, preferred_element_type=jnp.float32)
                g = g.astype(jnp.bfloat16)                      # (9*P2, C1)
                acc = jnp.zeros((P2, C2), jnp.float32)
                for t in range(9):
                    acc = acc + jnp.dot(g[t * P2:(t + 1) * P2, :], w2v[t],
                                        preferred_element_type=jnp.float32)
                y2 = jnp.maximum(acc + s2v, 0.0).astype(jnp.bfloat16)        # (P2, C2)
                # Global average pool as an MXU matmul, fused with the linear head.
                pooled = jnp.dot(poolv, y2, preferred_element_type=jnp.float32)
                logit = jnp.dot(pooled.astype(jnp.bfloat16), whv,
                                preferred_element_type=jnp.float32) + bhv    # (1, CLSP)
                rows.append(logit)
            # Single lane-dense (TN, 128) store of this tile's logits.
            o_ref[...] = jnp.concatenate(rows, axis=0).astype(o_ref.dtype)

        flops = 2 * n_pad * (P1 * K1P * C1 + 9 * P2 * P1 * C1
                             + 9 * P2 * C1 * C2 + P2 * C2 + C2 * CLSP)
        bytes_accessed = 2 * (patches.size + a2.size + self.w1_k.size + self.w2_k.size
                              + self.wh_k.size + pool_row.size) \
            + 4 * (self.s1_k.size + self.s2_k.size + self.bh_k.size + n_pad * CLSP)

        out = pl.pallas_call(
            fused_kernel,
            out_shape=jax.ShapeDtypeStruct((n_pad, CLSP), jnp.float32),
            grid=(n_pad // TN,),
            in_specs=[
                pl.BlockSpec((TN * P1, K1P), lambda i: (i, 0)),     # stem im2col patches
                pl.BlockSpec((K1P, C1), lambda i: (0, 0)),          # folded stem weight
                pl.BlockSpec((1, C1), lambda i: (0, 0)),            # stem shift
                pl.BlockSpec((9 * P2, P1), lambda i: (0, 0)),       # backbone gather matrix
                pl.BlockSpec((9, C1, C2), lambda i: (0, 0, 0)),     # folded backbone weight
                pl.BlockSpec((1, C2), lambda i: (0, 0)),            # backbone shift
                pl.BlockSpec((1, P2), lambda i: (0, 0)),            # 1/P2 pooling row
                pl.BlockSpec((C2, CLSP), lambda i: (0, 0)),         # head weight (padded)
                pl.BlockSpec((1, CLSP), lambda i: (0, 0)),          # head bias (padded)
            ],
            out_specs=pl.BlockSpec((TN, CLSP), lambda i: (i, 0)),
            compiler_params=pltpu.CompilerParams(
                dimension_semantics=("parallel",),                  # megacore on v7x
                vmem_limit_bytes=32 * 1024 * 1024,
            ),
            cost_estimate=pl.CostEstimate(flops=flops, transcendentals=0,
                                          bytes_accessed=bytes_accessed),
        )(patches, self.w1_k, self.s1_k, a2, self.w2_k, self.s2_k,
          pool_row, self.wh_k, self.bh_k)

        predictions = out[:N, :self.num_classes]
        return dict(outputs=predictions)


def _reference_forward(images_nchw, m):
    """Pure-JAX f32 reference of the same stem -> backbone.body -> clf head path."""
    x = jnp.transpose(images_nchw, (0, 2, 3, 1)).astype(jnp.float32)

    def conv_bn_relu(x, w, b, bn):
        y = jax.lax.conv_general_dilated(
            x, w, window_strides=(2, 2), padding=((1, 1), (1, 1)),
            dimension_numbers=('NHWC', 'HWIO', 'NHWC'))
        y = y + b
        y = (y - bn['mean']) / jnp.sqrt(bn['var'] + m.bn_eps) * bn['gamma'] + bn['beta']
        return jnp.maximum(y, 0.0)

    y = conv_bn_relu(x, m.stem_w, m.stem_b, m.stem_bn)
    y = conv_bn_relu(y, m.back_w, m.back_b, m.back_bn)
    pooled = jnp.mean(y, axis=(1, 2))
    return pooled @ m.head_w + m.head_b


if __name__ == "__main__":
    key = jax.random.PRNGKey(0)
    k_param, k_img = jax.random.split(key)

    model = MultiTaskNetworkPallas(k_param, in_ch=3, stem_ch=16, backbone_ch=32,
                                   num_classes=10)
    # NCHW images like PyTorch; CIFAR-like small shapes; batch 16 -> grid of 2 tiles.
    images = jax.random.normal(k_img, (16, 3, 32, 32), jnp.float32)

    out = model.forward(images, {"cifar10": "clf"})
    preds = jax.block_until_ready(out["outputs"])

    assert preds.shape == (16, 10)
    assert bool(jnp.all(jnp.isfinite(preds)))

    # correctness vs a pure-JAX f32 reference (bf16 MXU path -> loose tolerance)
    ref = _reference_forward(images, model)
    err = float(jnp.max(jnp.abs(preds - ref)))
    assert err < 0.2, f"max |pallas - reference| = {err}"
    print("KERNEL_OK")
</pallas_src>

<mosaic_0001>
module attributes {stable_mosaic.version = 11 : i64} {
  func.func @fused_kernel(%arg0: i32, %arg1: memref<2048x32xbf16, #tpu.memory_space<vmem>>, %arg2: memref<32x16xbf16, #tpu.memory_space<vmem>>, %arg3: memref<1x16xf32, #tpu.memory_space<vmem>>, %arg4: memref<576x256xbf16, #tpu.memory_space<vmem>>, %arg5: memref<9x16x32xbf16, #tpu.memory_space<vmem>>, %arg6: memref<1x32xf32, #tpu.memory_space<vmem>>, %arg7: memref<1x64xbf16, #tpu.memory_space<vmem>>, %arg8: memref<32x128xbf16, #tpu.memory_space<vmem>>, %arg9: memref<1x128xf32, #tpu.memory_space<vmem>>, %arg10: memref<8x128xf32, #tpu.memory_space<vmem>>) attributes {dimension_semantics = [#tpu.dimension_semantics<parallel>], iteration_bounds = array<i64: 2>, scalar_prefetch = 0 : i64, scratch_operands = 0 : i64, tpu.core_type = #tpu.core_type<tc>, window_params = [{transform_indices = @transform_0, window_bounds = array<i64: 2048, 32>}, {pipeline_mode = #tpu.pipeline_mode<synchronous>, transform_indices = @transform_1, window_bounds = array<i64: 32, 16>}, {pipeline_mode = #tpu.pipeline_mode<synchronous>, transform_indices = @transform_2, window_bounds = array<i64: 1, 16>}, {pipeline_mode = #tpu.pipeline_mode<synchronous>, transform_indices = @transform_3, window_bounds = array<i64: 576, 256>}, {pipeline_mode = #tpu.pipeline_mode<synchronous>, transform_indices = @transform_4, window_bounds = array<i64: 9, 16, 32>}, {pipeline_mode = #tpu.pipeline_mode<synchronous>, transform_indices = @transform_5, window_bounds = array<i64: 1, 32>}, {pipeline_mode = #tpu.pipeline_mode<synchronous>, transform_indices = @transform_6, window_bounds = array<i64: 1, 64>}, {pipeline_mode = #tpu.pipeline_mode<synchronous>, transform_indices = @transform_7, window_bounds = array<i64: 32, 128>}, {pipeline_mode = #tpu.pipeline_mode<synchronous>, transform_indices = @transform_8, window_bounds = array<i64: 1, 128>}, {transform_indices = @transform_9, window_bounds = array<i64: 8, 128>}]} {
    %c0 = arith.constant 0 : index
    %c0_0 = arith.constant 0 : index
    %0 = vector.load %arg1[%c0, %c0_0] : memref<2048x32xbf16, #tpu.memory_space<vmem>>, vector<2048x32xbf16>
    %c0_1 = arith.constant 0 : index
    %c0_2 = arith.constant 0 : index
    %1 = vector.load %arg2[%c0_1, %c0_2] : memref<32x16xbf16, #tpu.memory_space<vmem>>, vector<32x16xbf16>
    %cst = arith.constant dense<0.000000e+00> : vector<2048x16xf32>
    %2 = tpu.matmul %0, %1, %cst {dimension_numbers = #tpu.dot_dimension_numbers<[1], [0], [0], [1], [0, 0, 1, 1], [], []>} : vector<2048x32xbf16>, vector<32x16xbf16>, vector<2048x16xf32> -> vector<2048x16xf32>
    %c0_3 = arith.constant 0 : index
    %c0_4 = arith.constant 0 : index
    %3 = vector.load %arg3[%c0_3, %c0_4] : memref<1x16xf32, #tpu.memory_space<vmem>>, vector<1x16xf32>
    %4 = vector.broadcast %3 : vector<1x16xf32> to vector<2048x16xf32>
    %5 = arith.addf %2, %4 : vector<2048x16xf32>
    %cst_5 = arith.constant 0.000000e+00 : f32
    %6 = vector.broadcast %cst_5 : f32 to vector<2048x16xf32>
    %7 = arith.maximumf %5, %6 : vector<2048x16xf32>
    %8 = arith.truncf %7 : vector<2048x16xf32> to vector<2048x16xbf16>
    %c0_6 = arith.constant 0 : index
    %c0_7 = arith.constant 0 : index
    %9 = vector.load %arg4[%c0_6, %c0_7] : memref<576x256xbf16, #tpu.memory_space<vmem>>, vector<576x256xbf16>
    %c0_8 = arith.constant 0 : index
    %c0_9 = arith.constant 0 : index
    %c0_10 = arith.constant 0 : index
    %10 = vector.load %arg5[%c0_8, %c0_9, %c0_10] : memref<9x16x32xbf16, #tpu.memory_space<vmem>>, vector<9x16x32xbf16>
    %c0_11 = arith.constant 0 : index
    %c0_12 = arith.constant 0 : index
    %11 = vector.load %arg6[%c0_11, %c0_12] : memref<1x32xf32, #tpu.memory_space<vmem>>, vector<1x32xf32>
    %c0_13 = arith.constant 0 : index
    %c0_14 = arith.constant 0 : index
    %12 = vector.load %arg7[%c0_13, %c0_14] : memref<1x64xbf16, #tpu.memory_space<vmem>>, vector<1x64xbf16>
    %c0_15 = arith.constant 0 : index
    %c0_16 = arith.constant 0 : index
    %13 = vector.load %arg8[%c0_15, %c0_16] : memref<32x128xbf16, #tpu.memory_space<vmem>>, vector<32x128xbf16>
    %c0_17 = arith.constant 0 : index
    %c0_18 = arith.constant 0 : index
    %14 = vector.load %arg9[%c0_17, %c0_18] : memref<1x128xf32, #tpu.memory_space<vmem>>, vector<1x128xf32>
    %15 = vector.extract_strided_slice %8 {offsets = [0, 0], sizes = [256, 16], strides = [1, 1]} : vector<2048x16xbf16> to vector<256x16xbf16>
    %cst_19 = arith.constant dense<0.000000e+00> : vector<576x16xf32>
    %16 = tpu.matmul %9, %15, %cst_19 {dimension_numbers = #tpu.dot_dimension_numbers<[1], [0], [0], [1], [0, 0, 1, 1], [], []>} : vector<576x256xbf16>, vector<256x16xbf16>, vector<576x16xf32> -> vector<576x16xf32>
    %17 = arith.truncf %16 : vector<576x16xf32> to vector<576x16xbf16>
    %cst_20 = arith.constant 0.000000e+00 : f32
    %18 = vector.broadcast %cst_20 : f32 to vector<64x32xf32>
    %19 = vector.extract_strided_slice %17 {offsets = [0, 0], sizes = [64, 16], strides = [1, 1]} : vector<576x16xbf16> to vector<64x16xbf16>
    %20 = vector.extract_strided_slice %10 {offsets = [0, 0, 0], sizes = [1, 16, 32], strides = [1, 1, 1]} : vector<9x16x32xbf16> to vector<1x16x32xbf16>
    %21 = vector.shape_cast %20 : vector<1x16x32xbf16> to vector<16x32xbf16>
    %cst_21 = arith.constant dense<0.000000e+00> : vector<64x32xf32>
    %22 = tpu.matmul %19, %21, %cst_21 {dimension_numbers = #tpu.dot_dimension_numbers<[1], [0], [0], [1], [0, 0, 1, 1], [], []>} : vector<64x16xbf16>, vector<16x32xbf16>, vector<64x32xf32> -> vector<64x32xf32>
    %23 = arith.addf %18, %22 : vector<64x32xf32>
    %24 = vector.extract_strided_slice %17 {offsets = [64, 0], sizes = [64, 16], strides = [1, 1]} : vector<576x16xbf16> to vector<64x16xbf16>
    %25 = vector.extract_strided_slice %10 {offsets = [1, 0, 0], sizes = [1, 16, 32], strides = [1, 1, 1]} : vector<9x16x32xbf16> to vector<1x16x32xbf16>
    %26 = vector.shape_cast %25 : vector<1x16x32xbf16> to vector<16x32xbf16>
    %cst_22 = arith.constant dense<0.000000e+00> : vector<64x32xf32>
    %27 = tpu.matmul %24, %26, %cst_22 {dimension_numbers = #tpu.dot_dimension_numbers<[1], [0], [0], [1], [0, 0, 1, 1], [], []>} : vector<64x16xbf16>, vector<16x32xbf16>, vector<64x32xf32> -> vector<64x32xf32>
    %28 = arith.addf %23, %27 : vector<64x32xf32>
    %29 = vector.extract_strided_slice %17 {offsets = [128, 0], sizes = [64, 16], strides = [1, 1]} : vector<576x16xbf16> to vector<64x16xbf16>
    %30 = vector.extract_strided_slice %10 {offsets = [2, 0, 0], sizes = [1, 16, 32], strides = [1, 1, 1]} : vector<9x16x32xbf16> to vector<1x16x32xbf16>
    %31 = vector.shape_cast %30 : vector<1x16x32xbf16> to vector<16x32xbf16>
    %cst_23 = arith.constant dense<0.000000e+00> : vector<64x32xf32>
    %32 = tpu.matmul %29, %31, %cst_23 {dimension_numbers = #tpu.dot_dimension_numbers<[1], [0], [0], [1], [0, 0, 1, 1], [], []>} : vector<64x16xbf16>, vector<16x32xbf16>, vector<64x32xf32> -> vector<64x32xf32>
    %33 = arith.addf %28, %32 : vector<64x32xf32>
    %34 = vector.extract_strided_slice %17 {offsets = [192, 0], sizes = [64, 16], strides = [1, 1]} : vector<576x16xbf16> to vector<64x16xbf16>
    %35 = vector.extract_strided_slice %10 {offsets = [3, 0, 0], sizes = [1, 16, 32], strides = [1, 1, 1]} : vector<9x16x32xbf16> to vector<1x16x32xbf16>
    %36 = vector.shape_cast %35 : vector<1x16x32xbf16> to vector<16x32xbf16>
    %cst_24 = arith.constant dense<0.000000e+00> : vector<64x32xf32>
    %37 = tpu.matmul %34, %36, %cst_24 {dimension_numbers = #tpu.dot_dimension_numbers<[1], [0], [0], [1], [0, 0, 1, 1], [], []>} : vector<64x16xbf16>, vector<16x32xbf16>, vector<64x32xf32> -> vector<64x32xf32>
    %38 = arith.addf %33, %37 : vector<64x32xf32>
    %39 = vector.extract_strided_slice %17 {offsets = [256, 0], sizes = [64, 16], strides = [1, 1]} : vector<576x16xbf16> to vector<64x16xbf16>
    %40 = vector.extract_strided_slice %10 {offsets = [4, 0, 0], sizes = [1, 16, 32], strides = [1, 1, 1]} : vector<9x16x32xbf16> to vector<1x16x32xbf16>
    %41 = vector.shape_cast %40 : vector<1x16x32xbf16> to vector<16x32xbf16>
    %cst_25 = arith.constant dense<0.000000e+00> : vector<64x32xf32>
    %42 = tpu.matmul %39, %41, %cst_25 {dimension_numbers = #tpu.dot_dimension_numbers<[1], [0], [0], [1], [0, 0, 1, 1], [], []>} : vector<64x16xbf16>, vector<16x32xbf16>, vector<64x32xf32> -> vector<64x32xf32>
    %43 = arith.addf %38, %42 : vector<64x32xf32>
    %44 = vector.extract_strided_slice %17 {offsets = [320, 0], sizes = [64, 16], strides = [1, 1]} : vector<576x16xbf16> to vector<64x16xbf16>
    %45 = vector.extract_strided_slice %10 {offsets = [5, 0, 0], sizes = [1, 16, 32], strides = [1, 1, 1]} : vector<9x16x32xbf16> to vector<1x16x32xbf16>
    %46 = vector.shape_cast %45 : vector<1x16x32xbf16> to vector<16x32xbf16>
    %cst_26 = arith.constant dense<0.000000e+00> : vector<64x32xf32>
    %47 = tpu.matmul %44, %46, %cst_26 {dimension_numbers = #tpu.dot_dimension_numbers<[1], [0], [0], [1], [0, 0, 1, 1], [], []>} : vector<64x16xbf16>, vector<16x32xbf16>, vector<64x32xf32> -> vector<64x32xf32>
    %48 = arith.addf %43, %47 : vector<64x32xf32>
    %49 = vector.extract_strided_slice %17 {offsets = [384, 0], sizes = [64, 16], strides = [1, 1]} : vector<576x16xbf16> to vector<64x16xbf16>
    %50 = vector.extract_strided_slice %10 {offsets = [6, 0, 0], sizes = [1, 16, 32], strides = [1, 1, 1]} : vector<9x16x32xbf16> to vector<1x16x32xbf16>
    %51 = vector.shape_cast %50 : vector<1x16x32xbf16> to vector<16x32xbf16>
    %cst_27 = arith.constant dense<0.000000e+00> : vector<64x32xf32>
    %52 = tpu.matmul %49, %51, %cst_27 {dimension_numbers = #tpu.dot_dimension_numbers<[1], [0], [0], [1], [0, 0, 1, 1], [], []>} : vector<64x16xbf16>, vector<16x32xbf16>, vector<64x32xf32> -> vector<64x32xf32>
    %53 = arith.addf %48, %52 : vector<64x32xf32>
    %54 = vector.extract_strided_slice %17 {offsets = [448, 0], sizes = [64, 16], strides = [1, 1]} : vector<576x16xbf16> to vector<64x16xbf16>
    %55 = vector.extract_strided_slice %10 {offsets = [7, 0, 0], sizes = [1, 16, 32], strides = [1, 1, 1]} : vector<9x16x32xbf16> to vector<1x16x32xbf16>
    %56 = vector.shape_cast %55 : vector<1x16x32xbf16> to vector<16x32xbf16>
    %cst_28 = arith.constant dense<0.000000e+00> : vector<64x32xf32>
    %57 = tpu.matmul %54, %56, %cst_28 {dimension_numbers = #tpu.dot_dimension_numbers<[1], [0], [0], [1], [0, 0, 1, 1], [], []>} : vector<64x16xbf16>, vector<16x32xbf16>, vector<64x32xf32> -> vector<64x32xf32>
    %58 = arith.addf %53, %57 : vector<64x32xf32>
    %59 = vector.extract_strided_slice %17 {offsets = [512, 0], sizes = [64, 16], strides = [1, 1]} : vector<576x16xbf16> to vector<64x16xbf16>
    %60 = vector.extract_strided_slice %10 {offsets = [8, 0, 0], sizes = [1, 16, 32], strides = [1, 1, 1]} : vector<9x16x32xbf16> to vector<1x16x32xbf16>
    %61 = vector.shape_cast %60 : vector<1x16x32xbf16> to vector<16x32xbf16>
    %cst_29 = arith.constant dense<0.000000e+00> : vector<64x32xf32>
    %62 = tpu.matmul %59, %61, %cst_29 {dimension_numbers = #tpu.dot_dimension_numbers<[1], [0], [0], [1], [0, 0, 1, 1], [], []>} : vector<64x16xbf16>, vector<16x32xbf16>, vector<64x32xf32> -> vector<64x32xf32>
    %63 = arith.addf %58, %62 : vector<64x32xf32>
    %64 = vector.broadcast %11 : vector<1x32xf32> to vector<64x32xf32>
    %65 = arith.addf %63, %64 : vector<64x32xf32>
    %cst_30 = arith.constant 0.000000e+00 : f32
    %66 = vector.broadcast %cst_30 : f32 to vector<64x32xf32>
    %67 = arith.maximumf %65, %66 : vector<64x32xf32>
    %68 = arith.truncf %67 : vector<64x32xf32> to vector<64x32xbf16>
    %cst_31 = arith.constant dense<0.000000e+00> : vector<1x32xf32>
    %69 = tpu.matmul %12, %68, %cst_31 {dimension_numbers = #tpu.dot_dimension_numbers<[1], [0], [0], [1], [0, 0, 1, 1], [], []>} : vector<1x64xbf16>, vector<64x32xbf16>, vector<1x32xf32> -> vector<1x32xf32>
    %70 = arith.truncf %69 : vector<1x32xf32> to vector<1x32xbf16>
    %cst_32 = arith.constant dense<0.000000e+00> : vector<1x128xf32>
    %71 = tpu.matmul %70, %13, %cst_32 {dimension_numbers = #tpu.dot_dimension_numbers<[1], [0], [0], [1], [0, 0, 1, 1], [], []>} : vector<1x32xbf16>, vector<32x128xbf16>, vector<1x128xf32> -> vector<1x128xf32>
    %72 = arith.addf %71, %14 : vector<1x128xf32>
    %73 = vector.extract_strided_slice %8 {offsets = [256, 0], sizes = [256, 16], strides = [1, 1]} : vector<2048x16xbf16> to vector<256x16xbf16>
    %cst_33 = arith.constant dense<0.000000e+00> : vector<576x16xf32>
    %74 = tpu.matmul %9, %73, %cst_33 {dimension_numbers = #tpu.dot_dimension_numbers<[1], [0], [0], [1], [0, 0, 1, 1], [], []>} : vector<576x256xbf16>, vector<256x16xbf16>, vector<576x16xf32> -> vector<576x16xf32>
    %75 = arith.truncf %74 : vector<576x16xf32> to vector<576x16xbf16>
    %cst_34 = arith.constant 0.000000e+00 : f32
    %76 = vector.broadcast %cst_34 : f32 to vector<64x32xf32>
    %77 = vector.extract_strided_slice %75 {offsets = [0, 0], sizes = [64, 16], strides = [1, 1]} : vector<576x16xbf16> to vector<64x16xbf16>
    %78 = vector.extract_strided_slice %10 {offsets = [0, 0, 0], sizes = [1, 16, 32], strides = [1, 1, 1]} : vector<9x16x32xbf16> to vector<1x16x32xbf16>
    %79 = vector.shape_cast %78 : vector<1x16x32xbf16> to vector<16x32xbf16>
    %cst_35 = arith.constant dense<0.000000e+00> : vector<64x32xf32>
    %80 = tpu.matmul %77, %79, %cst_35 {dimension_numbers = #tpu.dot_dimension_numbers<[1], [0], [0], [1], [0, 0, 1, 1], [], []>} : vector<64x16xbf16>, vector<16x32xbf16>, vector<64x32xf32> -> vector<64x32xf32>
    %81 = arith.addf %76, %80 : vector<64x32xf32>
    %82 = vector.extract_strided_slice %75 {offsets = [64, 0], sizes = [64, 16], strides = [1, 1]} : vector<576x16xbf16> to vector<64x16xbf16>
    %83 = vector.extract_strided_slice %10 {offsets = [1, 0, 0], sizes = [1, 16, 32], strides = [1, 1, 1]} : vector<9x16x32xbf16> to vector<1x16x32xbf16>
    %84 = vector.shape_cast %83 : vector<1x16x32xbf16> to vector<16x32xbf16>
    %cst_36 = arith.constant dense<0.000000e+00> : vector<64x32xf32>
    %85 = tpu.matmul %82, %84, %cst_36 {dimension_numbers = #tpu.dot_dimension_numbers<[1], [0], [0], [1], [0, 0, 1, 1], [], []>} : vector<64x16xbf16>, vector<16x32xbf16>, vector<64x32xf32> -> vector<64x32xf32>
    %86 = arith.addf %81, %85 : vector<64x32xf32>
    %87 = vector.extract_strided_slice %75 {offsets = [128, 0], sizes = [64, 16], strides = [1, 1]} : vector<576x16xbf16> to vector<64x16xbf16>
    %88 = vector.extract_strided_slice %10 {offsets = [2, 0, 0], sizes = [1, 16, 32], strides = [1, 1, 1]} : vector<9x16x32xbf16> to vector<1x16x32xbf16>
    %89 = vector.shape_cast %88 : vector<1x16x32xbf16> to vector<16x32xbf16>
    %cst_37 = arith.constant dense<0.000000e+00> : vector<64x32xf32>
    %90 = tpu.matmul %87, %89, %cst_37 {dimension_numbers = #tpu.dot_dimension_numbers<[1], [0], [0], [1], [0, 0, 1, 1], [], []>} : vector<64x16xbf16>, vector<16x32xbf16>, vector<64x32xf32> -> vector<64x32xf32>
    %91 = arith.addf %86, %90 : vector<64x32xf32>
    %92 = vector.extract_strided_slice %75 {offsets = [192, 0], sizes = [64, 16], strides = [1, 1]} : vector<576x16xbf16> to vector<64x16xbf16>
    %93 = vector.extract_strided_slice %10 {offsets = [3, 0, 0], sizes = [1, 16, 32], strides = [1, 1, 1]} : vector<9x16x32xbf16> to vector<1x16x32xbf16>
    %94 = vector.shape_cast %93 : vector<1x16x32xbf16> to vector<16x32xbf16>
    %cst_38 = arith.constant dense<0.000000e+00> : vector<64x32xf32>
    %95 = tpu.matmul %92, %94, %cst_38 {dimension_numbers = #tpu.dot_dimension_numbers<[1], [0], [0], [1], [0, 0, 1, 1], [], []>} : vector<64x16xbf16>, vector<16x32xbf16>, vector<64x32xf32> -> vector<64x32xf32>
    %96 = arith.addf %91, %95 : vector<64x32xf32>
    %97 = vector.extract_strided_slice %75 {offsets = [256, 0], sizes = [64, 16], strides = [1, 1]} : vector<576x16xbf16> to vector<64x16xbf16>
    %98 = vector.extract_strided_slice %10 {offsets = [4, 0, 0], sizes = [1, 16, 32], strides = [1, 1, 1]} : vector<9x16x32xbf16> to vector<1x16x32xbf16>
    %99 = vector.shape_cast %98 : vector<1x16x32xbf16> to vector<16x32xbf16>
    %cst_39 = arith.constant dense<0.000000e+00> : vector<64x32xf32>
    %100 = tpu.matmul %97, %99, %cst_39 {dimension_numbers = #tpu.dot_dimension_numbers<[1], [0], [0], [1], [0, 0, 1, 1], [], []>} : vector<64x16xbf16>, vector<16x32xbf16>, vector<64x32xf32> -> vector<64x32xf32>
    %101 = arith.addf %96, %100 : vector<64x32xf32>
    %102 = vector.extract_strided_slice %75 {offsets = [320, 0], sizes = [64, 16], strides = [1, 1]} : vector<576x16xbf16> to vector<64x16xbf16>
    %103 = vector.extract_strided_slice %10 {offsets = [5, 0, 0], sizes = [1, 16, 32], strides = [1, 1, 1]} : vector<9x16x32xbf16> to vector<1x16x32xbf16>
    %104 = vector.shape_cast %103 : vector<1x16x32xbf16> to vector<16x32xbf16>
    %cst_40 = arith.constant dense<0.000000e+00> : vector<64x32xf32>
    %105 = tpu.matmul %102, %104, %cst_40 {dimension_numbers = #tpu.dot_dimension_numbers<[1], [0], [0], [1], [0, 0, 1, 1], [], []>} : vector<64x16xbf16>, vector<16x32xbf16>, vector<64x32xf32> -> vector<64x32xf32>
    %106 = arith.addf %101, %105 : vector<64x32xf32>
    %107 = vector.extract_strided_slice %75 {offsets = [384, 0], sizes = [64, 16], strides = [1, 1]} : vector<576x16xbf16> to vector<64x16xbf16>
    %108 = vector.extract_strided_slice %10 {offsets = [6, 0, 0], sizes = [1, 16, 32], strides = [1, 1, 1]} : vector<9x16x32xbf16> to vector<1x16x32xbf16>
    %109 = vector.shape_cast %108 : vector<1x16x32xbf16> to vector<16x32xbf16>
    %cst_41 = arith.constant dense<0.000000e+00> : vector<64x32xf32>
    %110 = tpu.matmul %107, %109, %cst_41 {dimension_numbers = #tpu.dot_dimension_numbers<[1], [0], [0], [1], [0, 0, 1, 1], [], []>} : vector<64x16xbf16>, vector<16x32xbf16>, vector<64x32xf32> -> vector<64x32xf32>
    %111 = arith.addf %106, %110 : vector<64x32xf32>
    %112 = vector.extract_strided_slice %75 {offsets = [448, 0], sizes = [64, 16], strides = [1, 1]} : vector<576x16xbf16> to vector<64x16xbf16>
    %113 = vector.extract_strided_slice %10 {offsets = [7, 0, 0], sizes = [1, 16, 32], strides = [1, 1, 1]} : vector<9x16x32xbf16> to vector<1x16x32xbf16>
    %114 = vector.shape_cast %113 : vector<1x16x32xbf16> to vector<16x32xbf16>
    %cst_42 = arith.constant dense<0.000000e+00> : vector<64x32xf32>
    %115 = tpu.matmul %112, %114, %cst_42 {dimension_numbers = #tpu.dot_dimension_numbers<[1], [0], [0], [1], [0, 0, 1, 1], [], []>} : vector<64x16xbf16>, vector<16x32xbf16>, vector<64x32xf32> -> vector<64x32xf32>
    %116 = arith.addf %111, %115 : vector<64x32xf32>
    %117 = vector.extract_strided_slice %75 {offsets = [512, 0], sizes = [64, 16], strides = [1, 1]} : vector<576x16xbf16> to vector<64x16xbf16>
    %118 = vector.extract_strided_slice %10 {offsets = [8, 0, 0], sizes = [1, 16, 32], strides = [1, 1, 1]} : vector<9x16x32xbf16> to vector<1x16x32xbf16>
    %119 = vector.shape_cast %118 : vector<1x16x32xbf16> to vector<16x32xbf16>
    %cst_43 = arith.constant dense<0.000000e+00> : vector<64x32xf32>
    %120 = tpu.matmul %117, %119, %cst_43 {dimension_numbers = #tpu.dot_dimension_numbers<[1], [0], [0], [1], [0, 0, 1, 1], [], []>} : vector<64x16xbf16>, vector<16x32xbf16>, vector<64x32xf32> -> vector<64x32xf32>
    %121 = arith.addf %116, %120 : vector<64x32xf32>
    %122 = vector.broadcast %11 : vector<1x32xf32> to vector<64x32xf32>
    %123 = arith.addf %121, %122 : vector<64x32xf32>
    %cst_44 = arith.constant 0.000000e+00 : f32
    %124 = vector.broadcast %cst_44 : f32 to vector<64x32xf32>
    %125 = arith.maximumf %123, %124 : vector<64x32xf32>
    %126 = arith.truncf %125 : vector<64x32xf32> to vector<64x32xbf16>
    %cst_45 = arith.constant dense<0.000000e+00> : vector<1x32xf32>
    %127 = tpu.matmul %12, %126, %cst_45 {dimension_numbers = #tpu.dot_dimension_numbers<[1], [0], [0], [1], [0, 0, 1, 1], [], []>} : vector<1x64xbf16>, vector<64x32xbf16>, vector<1x32xf32> -> vector<1x32xf32>
    %128 = arith.truncf %127 : vector<1x32xf32> to vector<1x32xbf16>
    %cst_46 = arith.constant dense<0.000000e+00> : vector<1x128xf32>
    %129 = tpu.matmul %128, %13, %cst_46 {dimension_numbers = #tpu.dot_dimension_numbers<[1], [0], [0], [1], [0, 0, 1, 1], [], []>} : vector<1x32xbf16>, vector<32x128xbf16>, vector<1x128xf32> -> vector<1x128xf32>
    %130 = arith.addf %129, %14 : vector<1x128xf32>
    %131 = vector.extract_strided_slice %8 {offsets = [512, 0], sizes = [256, 16], strides = [1, 1]} : vector<2048x16xbf16> to vector<256x16xbf16>
    %cst_47 = arith.constant dense<0.000000e+00> : vector<576x16xf32>
    %132 = tpu.matmul %9, %131, %cst_47 {dimension_numbers = #tpu.dot_dimension_numbers<[1], [0], [0], [1], [0, 0, 1, 1], [], []>} : vector<576x256xbf16>, vector<256x16xbf16>, vector<576x16xf32> -> vector<576x16xf32>
    %133 = arith.truncf %132 : vector<576x16xf32> to vector<576x16xbf16>
    %cst_48 = arith.constant 0.000000e+00 : f32
    %134 = vector.broadcast %cst_48 : f32 to vector<64x32xf32>
    %135 = vector.extract_strided_slice %133 {offsets = [0, 0], sizes = [64, 16], strides = [1, 1]} : vector<576x16xbf16> to vector<64x16xbf16>
    %136 = vector.extract_strided_slice %10 {offsets = [0, 0, 0], sizes = [1, 16, 32], strides = [1, 1, 1]} : vector<9x16x32xbf16> to vector<1x16x32xbf16>
    %137 = vector.shape_cast %136 : vector<1x16x32xbf16> to vector<16x32xbf16>
    %cst_49 = arith.constant dense<0.000000e+00> : vector<64x32xf32>
    %138 = tpu.matmul %135, %137, %cst_49 {dimension_numbers = #tpu.dot_dimension_numbers<[1], [0], [0], [1], [0, 0, 1, 1], [], []>} : vector<64x16xbf16>, vector<16x32xbf16>, vector<64x32xf32> -> vector<64x32xf32>
    %139 = arith.addf %134, %138 : vector<64x32xf32>
    %140 = vector.extract_strided_slice %133 {offsets = [64, 0], sizes = [64, 16], strides = [1, 1]} : vector<576x16xbf16> to vector<64x16xbf16>
    %141 = vector.extract_strided_slice %10 {offsets = [1, 0, 0], sizes = [1, 16, 32], strides = [1, 1, 1]} : vector<9x16x32xbf16> to vector<1x16x32xbf16>
    %142 = vector.shape_cast %141 : vector<1x16x32xbf16> to vector<16x32xbf16>
    %cst_50 = arith.constant dense<0.000000e+00> : vector<64x32xf32>
    %143 = tpu.matmul %140, %142, %cst_50 {dimension_numbers = #tpu.dot_dimension_numbers<[1], [0], [0], [1], [0, 0, 1, 1], [], []>} : vector<64x16xbf16>, vector<16x32xbf16>, vector<64x32xf32> -> vector<64x32xf32>
    %144 = arith.addf %139, %143 : vector<64x32xf32>
    %145 = vector.extract_strided_slice %133 {offsets = [128, 0], sizes = [64, 16], strides = [1, 1]} : vector<576x16xbf16> to vector<64x16xbf16>
    %146 = vector.extract_strided_slice %10 {offsets = [2, 0, 0], sizes = [1, 16, 32], strides = [1, 1, 1]} : vector<9x16x32xbf16> to vector<1x16x32xbf16>
    %147 = vector.shape_cast %146 : vector<1x16x32xbf16> to vector<16x32xbf16>
    %cst_51 = arith.constant dense<0.000000e+00> : vector<64x32xf32>
    %148 = tpu.matmul %145, %147, %cst_51 {dimension_numbers = #tpu.dot_dimension_numbers<[1], [0], [0], [1], [0, 0, 1, 1], [], []>} : vector<64x16xbf16>, vector<16x32xbf16>, vector<64x32xf32> -> vector<64x32xf32>
    %149 = arith.addf %144, %148 : vector<64x32xf32>
    %150 = vector.extract_strided_slice %133 {offsets = [192, 0], sizes = [64, 16], strides = [1, 1]} : vector<576x16xbf16> to vector<64x16xbf16>
    %151 = vector.extract_strided_slice %10 {offsets = [3, 0, 0], sizes = [1, 16, 32], strides = [1, 1, 1]} : vector<9x16x32xbf16> to vector<1x16x32xbf16>
    %152 = vector.shape_cast %151 : vector<1x16x32xbf16> to vector<16x32xbf16>
    %cst_52 = arith.constant dense<0.000000e+00> : vector<64x32xf32>
    %153 = tpu.matmul %150, %152, %cst_52 {dimension_numbers = #tpu.dot_dimension_numbers<[1], [0], [0], [1], [0, 0, 1, 1], [], []>} : vector<64x16xbf16>, vector<16x32xbf16>, vector<64x32xf32> -> vector<64x32xf32>
    %154 = arith.addf %149, %153 : vector<64x32xf32>
    %155 = vector.extract_strided_slice %133 {offsets = [256, 0], sizes = [64, 16], strides = [1, 1]} : vector<576x16xbf16> to vector<64x16xbf16>
    %156 = vector.extract_strided_slice %10 {offsets = [4, 0, 0], sizes = [1, 16, 32], strides = [1, 1, 1]} : vector<9x16x32xbf16> to vector<1x16x32xbf16>
    %157 = vector.shape_cast %156 : vector<1x16x32xbf16> to vector<16x32xbf16>
    %cst_53 = arith.constant dense<0.000000e+00> : vector<64x32xf32>
    %158 = tpu.matmul %155, %157, %cst_53 {dimension_numbers = #tpu.dot_dimension_numbers<[1], [0], [0], [1], [0, 0, 1, 1], [], []>} : vector<64x16xbf16>, vector<16x32xbf16>, vector<64x32xf32> -> vector<64x32xf32>
    %159 = arith.addf %154, %158 : vector<64x32xf32>
    %160 = vector.extract_strided_slice %133 {offsets = [320, 0], sizes = [64, 16], strides = [1, 1]} : vector<576x16xbf16> to vector<64x16xbf16>
    %161 = vector.extract_strided_slice %10 {offsets = [5, 0, 0], sizes = [1, 16, 32], strides = [1, 1, 1]} : vector<9x16x32xbf16> to vector<1x16x32xbf16>
    %162 = vector.shape_cast %161 : vector<1x16x32xbf16> to vector<16x32xbf16>
    %cst_54 = arith.constant dense<0.000000e+00> : vector<64x32xf32>
    %163 = tpu.matmul %160, %162, %cst_54 {dimension_numbers = #tpu.dot_dimension_numbers<[1], [0], [0], [1], [0, 0, 1, 1], [], []>} : vector<64x16xbf16>, vector<16x32xbf16>, vector<64x32xf32> -> vector<64x32xf32>
    %164 = arith.addf %159, %163 : vector<64x32xf32>
    %165 = vector.extract_strided_slice %133 {offsets = [384, 0], sizes = [64, 16], strides = [1, 1]} : vector<576x16xbf16> to vector<64x16xbf16>
    %166 = vector.extract_strided_slice %10 {offsets = [6, 0, 0], sizes = [1, 16, 32], strides = [1, 1, 1]} : vector<9x16x32xbf16> to vector<1x16x32xbf16>
    %167 = vector.shape_cast %166 : vector<1x16x32xbf16> to vector<16x32xbf16>
    %cst_55 = arith.constant dense<0.000000e+00> : vector<64x32xf32>
    %168 = tpu.matmul %165, %167, %cst_55 {dimension_numbers = #tpu.dot_dimension_numbers<[1], [0], [0], [1], [0, 0, 1, 1], [], []>} : vector<64x16xbf16>, vector<16x32xbf16>, vector<64x32xf32> -> vector<64x32xf32>
    %169 = arith.addf %164, %168 : vector<64x32xf32>
    %170 = vector.extract_strided_slice %133 {offsets = [448, 0], sizes = [64, 16], strides = [1, 1]} : vector<576x16xbf16> to vector<64x16xbf16>
    %171 = vector.extract_strided_slice %10 {offsets = [7, 0, 0], sizes = [1, 16, 32], strides = [1, 1, 1]} : vector<9x16x32xbf16> to vector<1x16x32xbf16>
    %172 = vector.shape_cast %171 : vector<1x16x32xbf16> to vector<16x32xbf16>
    %cst_56 = arith.constant dense<0.000000e+00> : vector<64x32xf32>
    %173 = tpu.matmul %170, %172, %cst_56 {dimension_numbers = #tpu.dot_dimension_numbers<[1], [0], [0], [1], [0, 0, 1, 1], [], []>} : vector<64x16xbf16>, vector<16x32xbf16>, vector<64x32xf32> -> vector<64x32xf32>
    %174 = arith.addf %169, %173 : vector<64x32xf32>
    %175 = vector.extract_strided_slice %133 {offsets = [512, 0], sizes = [64, 16], strides = [1, 1]} : vector<576x16xbf16> to vector<64x16xbf16>
    %176 = vector.extract_strided_slice %10 {offsets = [8, 0, 0], sizes = [1, 16, 32], strides = [1, 1, 1]} : vector<9x16x32xbf16> to vector<1x16x32xbf16>
    %177 = vector.shape_cast %176 : vector<1x16x32xbf16> to vector<16x32xbf16>
    %cst_57 = arith.constant dense<0.000000e+00> : vector<64x32xf32>
    %178 = tpu.matmul %175, %177, %cst_57 {dimension_numbers = #tpu.dot_dimension_numbers<[1], [0], [0], [1], [0, 0, 1, 1], [], []>} : vector<64x16xbf16>, vector<16x32xbf16>, vector<64x32xf32> -> vector<64x32xf32>
    %179 = arith.addf %174, %178 : vector<64x32xf32>
    %180 = vector.broadcast %11 : vector<1x32xf32> to vector<64x32xf32>
    %181 = arith.addf %179, %180 : vector<64x32xf32>
    %cst_58 = arith.constant 0.000000e+00 : f32
    %182 = vector.broadcast %cst_58 : f32 to vector<64x32xf32>
    %183 = arith.maximumf %181, %182 : vector<64x32xf32>
    %184 = arith.truncf %183 : vector<64x32xf32> to vector<64x32xbf16>
    %cst_59 = arith.constant dense<0.000000e+00> : vector<1x32xf32>
    %185 = tpu.matmul %12, %184, %cst_59 {dimension_numbers = #tpu.dot_dimension_numbers<[1], [0], [0], [1], [0, 0, 1, 1], [], []>} : vector<1x64xbf16>, vector<64x32xbf16>, vector<1x32xf32> -> vector<1x32xf32>
    %186 = arith.truncf %185 : vector<1x32xf32> to vector<1x32xbf16>
    %cst_60 = arith.constant dense<0.000000e+00> : vector<1x128xf32>
    %187 = tpu.matmul %186, %13, %cst_60 {dimension_numbers = #tpu.dot_dimension_numbers<[1], [0], [0], [1], [0, 0, 1, 1], [], []>} : vector<1x32xbf16>, vector<32x128xbf16>, vector<1x128xf32> -> vector<1x128xf32>
    %188 = arith.addf %187, %14 : vector<1x128xf32>
    %189 = vector.extract_strided_slice %8 {offsets = [768, 0], sizes = [256, 16], strides = [1, 1]} : vector<2048x16xbf16> to vector<256x16xbf16>
    %cst_61 = arith.constant dense<0.000000e+00> : vector<576x16xf32>
    %190 = tpu.matmul %9, %189, %cst_61 {dimension_numbers = #tpu.dot_dimension_numbers<[1], [0], [0], [1], [0, 0, 1, 1], [], []>} : vector<576x256xbf16>, vector<256x16xbf16>, vector<576x16xf32> -> vector<576x16xf32>
    %191 = arith.truncf %190 : vector<576x16xf32> to vector<576x16xbf16>
    %cst_62 = arith.constant 0.000000e+00 : f32
    %192 = vector.broadcast %cst_62 : f32 to vector<64x32xf32>
    %193 = vector.extract_strided_slice %191 {offsets = [0, 0], sizes = [64, 16], strides = [1, 1]} : vector<576x16xbf16> to vector<64x16xbf16>
    %194 = vector.extract_strided_slice %10 {offsets = [0, 0, 0], sizes = [1, 16, 32], strides = [1, 1, 1]} : vector<9x16x32xbf16> to vector<1x16x32xbf16>
    %195 = vector.shape_cast %194 : vector<1x16x32xbf16> to vector<16x32xbf16>
    %cst_63 = arith.constant dense<0.000000e+00> : vector<64x32xf32>
    %196 = tpu.matmul %193, %195, %cst_63 {dimension_numbers = #tpu.dot_dimension_numbers<[1], [0], [0], [1], [0, 0, 1, 1], [], []>} : vector<64x16xbf16>, vector<16x32xbf16>, vector<64x32xf32> -> vector<64x32xf32>
    %197 = arith.addf %192, %196 : vector<64x32xf32>
    %198 = vector.extract_strided_slice %191 {offsets = [64, 0], sizes = [64, 16], strides = [1, 1]} : vector<576x16xbf16> to vector<64x16xbf16>
    %199 = vector.extract_strided_slice %10 {offsets = [1, 0, 0], sizes = [1, 16, 32], strides = [1, 1, 1]} : vector<9x16x32xbf16> to vector<1x16x32xbf16>
    %200 = vector.shape_cast %199 : vector<1x16x32xbf16> to vector<16x32xbf16>
    %cst_64 = arith.constant dense<0.000000e+00> : vector<64x32xf32>
    %201 = tpu.matmul %198, %200, %cst_64 {dimension_numbers = #tpu.dot_dimension_numbers<[1], [0], [0], [1], [0, 0, 1, 1], [], []>} : vector<64x16xbf16>, vector<16x32xbf16>, vector<64x32xf32> -> vector<64x32xf32>
    %202 = arith.addf %197, %201 : vector<64x32xf32>
    %203 = vector.extract_strided_slice %191 {offsets = [128, 0], sizes = [64, 16], strides = [1, 1]} : vector<576x16xbf16> to vector<64x16xbf16>
    %204 = vector.extract_strided_slice %10 {offsets = [2, 0, 0], sizes = [1, 16, 32], strides = [1, 1, 1]} : vector<9x16x32xbf16> to vector<1x16x32xbf16>
    %205 = vector.shape_cast %204 : vector<1x16x32xbf16> to vector<16x32xbf16>
    %cst_65 = arith.constant dense<0.000000e+00> : vector<64x32xf32>
    %206 = tpu.matmul %203, %205, %cst_65 {dimension_numbers = #tpu.dot_dimension_numbers<[1], [0], [0], [1], [0, 0, 1, 1], [], []>} : vector<64x16xbf16>, vector<16x32xbf16>, vector<64x32xf32> -> vector<64x32xf32>
    %207 = arith.addf %202, %206 : vector<64x32xf32>
    %208 = vector.extract_strided_slice %191 {offsets = [192, 0], sizes = [64, 16], strides = [1, 1]} : vector<576x16xbf16> to vector<64x16xbf16>
    %209 = vector.extract_strided_slice %10 {offsets = [3, 0, 0], sizes = [1, 16, 32], strides = [1, 1, 1]} : vector<9x16x32xbf16> to vector<1x16x32xbf16>
    %210 = vector.shape_cast %209 : vector<1x16x32xbf16> to vector<16x32xbf16>
    %cst_66 = arith.constant dense<0.000000e+00> : vector<64x32xf32>
    %211 = tpu.matmul %208, %210, %cst_66 {dimension_numbers = #tpu.dot_dimension_numbers<[1], [0], [0], [1], [0, 0, 1, 1], [], []>} : vector<64x16xbf16>, vector<16x32xbf16>, vector<64x32xf32> -> vector<64x32xf32>
    %212 = arith.addf %207, %211 : vector<64x32xf32>
    %213 = vector.extract_strided_slice %191 {offsets = [256, 0], sizes = [64, 16], strides = [1, 1]} : vector<576x16xbf16> to vector<64x16xbf16>
    %214 = vector.extract_strided_slice %10 {offsets = [4, 0, 0], sizes = [1, 16, 32], strides = [1, 1, 1]} : vector<9x16x32xbf16> to vector<1x16x32xbf16>
    %215 = vector.shape_cast %214 : vector<1x16x32xbf16> to vector<16x32xbf16>
    %cst_67 = arith.constant dense<0.000000e+00> : vector<64x32xf32>
    %216 = tpu.matmul %213, %215, %cst_67 {dimension_numbers = #tpu.dot_dimension_numbers<[1], [0], [0], [1], [0, 0, 1, 1], [], []>} : vector<64x16xbf16>, vector<16x32xbf16>, vector<64x32xf32> -> vector<64x32xf32>
    %217 = arith.addf %212, %216 : vector<64x32xf32>
    %218 = vector.extract_strided_slice %191 {offsets = [320, 0], sizes = [64, 16], strides = [1, 1]} : vector<576x16xbf16> to vector<64x16xbf16>
    %219 = vector.extract_strided_slice %10 {offsets = [5, 0, 0], sizes = [1, 16, 32], strides = [1, 1, 1]} : vector<9x16x32xbf16> to vector<1x16x32xbf16>
    %220 = vector.shape_cast %219 : vector<1x16x32xbf16> to vector<16x32xbf16>
    %cst_68 = arith.constant dense<0.000000e+00> : vector<64x32xf32>
    %221 = tpu.matmul %218, %220, %cst_68 {dimension_numbers = #tpu.dot_dimension_numbers<[1], [0], [0], [1], [0, 0, 1, 1], [], []>} : vector<64x16xbf16>, vector<16x32xbf16>, vector<64x32xf32> -> vector<64x32xf32>
    %222 = arith.addf %217, %221 : vector<64x32xf32>
    %223 = vector.extract_strided_slice %191 {offsets = [384, 0], sizes = [64, 16], strides = [1, 1]} : vector<576x16xbf16> to vector<64x16xbf16>
    %224 = vector.extract_strided_slice %10 {offsets = [6, 0, 0], sizes = [1, 16, 32], strides = [1, 1, 1]} : vector<9x16x32xbf16> to vector<1x16x32xbf16>
    %225 = vector.shape_cast %224 : vector<1x16x32xbf16> to vector<16x32xbf16>
    %cst_69 = arith.constant dense<0.000000e+00> : vector<64x32xf32>
    %226 = tpu.matmul %223, %225, %cst_69 {dimension_numbers = #tpu.dot_dimension_numbers<[1], [0], [0], [1], [0, 0, 1, 1], [], []>} : vector<64x16xbf16>, vector<16x32xbf16>, vector<64x32xf32> -> vector<64x32xf32>
    %227 = arith.addf %222, %226 : vector<64x32xf32>
    %228 = vector.extract_strided_slice %191 {offsets = [448, 0], sizes = [64, 16], strides = [1, 1]} : vector<576x16xbf16> to vector<64x16xbf16>
    %229 = vector.extract_strided_slice %10 {offsets = [7, 0, 0], sizes = [1, 16, 32], strides = [1, 1, 1]} : vector<9x16x32xbf16> to vector<1x16x32xbf16>
    %230 = vector.shape_cast %229 : vector<1x16x32xbf16> to vector<16x32xbf16>
    %cst_70 = arith.constant dense<0.000000e+00> : vector<64x32xf32>
    %231 = tpu.matmul %228, %230, %cst_70 {dimension_numbers = #tpu.dot_dimension_numbers<[1], [0], [0], [1], [0, 0, 1, 1], [], []>} : vector<64x16xbf16>, vector<16x32xbf16>, vector<64x32xf32> -> vector<64x32xf32>
    %232 = arith.addf %227, %231 : vector<64x32xf32>
    %233 = vector.extract_strided_slice %191 {offsets = [512, 0], sizes = [64, 16], strides = [1, 1]} : vector<576x16xbf16> to vector<64x16xbf16>
    %234 = vector.extract_strided_slice %10 {offsets = [8, 0, 0], sizes = [1, 16, 32], strides = [1, 1, 1]} : vector<9x16x32xbf16> to vector<1x16x32xbf16>
    %235 = vector.shape_cast %234 : vector<1x16x32xbf16> to vector<16x32xbf16>
    %cst_71 = arith.constant dense<0.000000e+00> : vector<64x32xf32>
    %236 = tpu.matmul %233, %235, %cst_71 {dimension_numbers = #tpu.dot_dimension_numbers<[1], [0], [0], [1], [0, 0, 1, 1], [], []>} : vector<64x16xbf16>, vector<16x32xbf16>, vector<64x32xf32> -> vector<64x32xf32>
    %237 = arith.addf %232, %236 : vector<64x32xf32>
    %238 = vector.broadcast %11 : vector<1x32xf32> to vector<64x32xf32>
    %239 = arith.addf %237, %238 : vector<64x32xf32>
    %cst_72 = arith.constant 0.000000e+00 : f32
    %240 = vector.broadcast %cst_72 : f32 to vector<64x32xf32>
    %241 = arith.maximumf %239, %240 : vector<64x32xf32>
    %242 = arith.truncf %241 : vector<64x32xf32> to vector<64x32xbf16>
    %cst_73 = arith.constant dense<0.000000e+00> : vector<1x32xf32>
    %243 = tpu.matmul %12, %242, %cst_73 {dimension_numbers = #tpu.dot_dimension_numbers<[1], [0], [0], [1], [0, 0, 1, 1], [], []>} : vector<1x64xbf16>, vector<64x32xbf16>, vector<1x32xf32> -> vector<1x32xf32>
    %244 = arith.truncf %243 : vector<1x32xf32> to vector<1x32xbf16>
    %cst_74 = arith.constant dense<0.000000e+00> : vector<1x128xf32>
    %245 = tpu.matmul %244, %13, %cst_74 {dimension_numbers = #tpu.dot_dimension_numbers<[1], [0], [0], [1], [0, 0, 1, 1], [], []>} : vector<1x32xbf16>, vector<32x128xbf16>, vector<1x128xf32> -> vector<1x128xf32>
    %246 = arith.addf %245, %14 : vector<1x128xf32>
    %247 = vector.extract_strided_slice %8 {offsets = [1024, 0], sizes = [256, 16], strides = [1, 1]} : vector<2048x16xbf16> to vector<256x16xbf16>
    %cst_75 = arith.constant dense<0.000000e+00> : vector<576x16xf32>
    %248 = tpu.matmul %9, %247, %cst_75 {dimension_numbers = #tpu.dot_dimension_numbers<[1], [0], [0], [1], [0, 0, 1, 1], [], []>} : vector<576x256xbf16>, vector<256x16xbf16>, vector<576x16xf32> -> vector<576x16xf32>
    %249 = arith.truncf %248 : vector<576x16xf32> to vector<576x16xbf16>
    %cst_76 = arith.constant 0.000000e+00 : f32
    %250 = vector.broadcast %cst_76 : f32 to vector<64x32xf32>
    %251 = vector.extract_strided_slice %249 {offsets = [0, 0], sizes = [64, 16], strides = [1, 1]} : vector<576x16xbf16> to vector<64x16xbf16>
    %252 = vector.extract_strided_slice %10 {offsets = [0, 0, 0], sizes = [1, 16, 32], strides = [1, 1, 1]} : vector<9x16x32xbf16> to vector<1x16x32xbf16>
    %253 = vector.shape_cast %252 : vector<1x16x32xbf16> to vector<16x32xbf16>
    %cst_77 = arith.constant dense<0.000000e+00> : vector<64x32xf32>
    %254 = tpu.matmul %251, %253, %cst_77 {dimension_numbers = #tpu.dot_dimension_numbers<[1], [0], [0], [1], [0, 0, 1, 1], [], []>} : vector<64x16xbf16>, vector<16x32xbf16>, vector<64x32xf32> -> vector<64x32xf32>
    %255 = arith.addf %250, %254 : vector<64x32xf32>
    %256 = vector.extract_strided_slice %249 {offsets = [64, 0], sizes = [64, 16], strides = [1, 1]} : vector<576x16xbf16> to vector<64x16xbf16>
    %257 = vector.extract_strided_slice %10 {offsets = [1, 0, 0], sizes = [1, 16, 32], strides = [1, 1, 1]} : vector<9x16x32xbf16> to vector<1x16x32xbf16>
    %258 = vector.shape_cast %257 : vector<1x16x32xbf16> to vector<16x32xbf16>
    %cst_78 = arith.constant dense<0.000000e+00> : vector<64x32xf32>
    %259 = tpu.matmul %256, %258, %cst_78 {dimension_numbers = #tpu.dot_dimension_numbers<[1], [0], [0], [1], [0, 0, 1, 1], [], []>} : vector<64x16xbf16>, vector<16x32xbf16>, vector<64x32xf32> -> vector<64x32xf32>
    %260 = arith.addf %255, %259 : vector<64x32xf32>
    %261 = vector.extract_strided_slice %249 {offsets = [128, 0], sizes = [64, 16], strides = [1, 1]} : vector<576x16xbf16> to vector<64x16xbf16>
    %262 = vector.extract_strided_slice %10 {offsets = [2, 0, 0], sizes = [1, 16, 32], strides = [1, 1, 1]} : vector<9x16x32xbf16> to vector<1x16x32xbf16>
    %263 = vector.shape_cast %262 : vector<1x16x32xbf16> to vector<16x32xbf16>
    %cst_79 = arith.constant dense<0.000000e+00> : vector<64x32xf32>
    %264 = tpu.matmul %261, %263, %cst_79 {dimension_numbers = #tpu.dot_dimension_numbers<[1], [0], [0], [1], [0, 0, 1, 1], [], []>} : vector<64x16xbf16>, vector<16x32xbf16>, vector<64x32xf32> -> vector<64x32xf32>
    %265 = arith.addf %260, %264 : vector<64x32xf32>
    %266 = vector.extract_strided_slice %249 {offsets = [192, 0], sizes = [64, 16], strides = [1, 1]} : vector<576x16xbf16> to vector<64x16xbf16>
    %267 = vector.extract_strided_slice %10 {offsets = [3, 0, 0], sizes = [1, 16, 32], strides = [1, 1, 1]} : vector<9x16x32xbf16> to vector<1x16x32xbf16>
    %268 = vector.shape_cast %267 : vector<1x16x32xbf16> to vector<16x32xbf16>
    %cst_80 = arith.constant dense<0.000000e+00> : vector<64x32xf32>
    %269 = tpu.matmul %266, %268, %cst_80 {dimension_numbers = #tpu.dot_dimension_numbers<[1], [0], [0], [1], [0, 0, 1, 1], [], []>} : vector<64x16xbf16>, vector<16x32xbf16>, vector<64x32xf32> -> vector<64x32xf32>
    %270 = arith.addf %265, %269 : vector<64x32xf32>
    %271 = vector.extract_strided_slice %249 {offsets = [256, 0], sizes = [64, 16], strides = [1, 1]} : vector<576x16xbf16> to vector<64x16xbf16>
    %272 = vector.extract_strided_slice %10 {offsets = [4, 0, 0], sizes = [1, 16, 32], strides = [1, 1, 1]} : vector<9x16x32xbf16> to vector<1x16x32xbf16>
    %273 = vector.shape_cast %272 : vector<1x16x32xbf16> to vector<16x32xbf16>
    %cst_81 = arith.constant dense<0.000000e+00> : vector<64x32xf32>
    %274 = tpu.matmul %271, %273, %cst_81 {dimension_numbers = #tpu.dot_dimension_numbers<[1], [0], [0], [1], [0, 0, 1, 1], [], []>} : vector<64x16xbf16>, vector<16x32xbf16>, vector<64x32xf32> -> vector<64x32xf32>
    %275 = arith.addf %270, %274 : vector<64x32xf32>
    %276 = vector.extract_strided_slice %249 {offsets = [320, 0], sizes = [64, 16], strides = [1, 1]} : vector<576x16xbf16> to vector<64x16xbf16>
    %277 = vector.extract_strided_slice %10 {offsets = [5, 0, 0], sizes = [1, 16, 32], strides = [1, 1, 1]} : vector<9x16x32xbf16> to vector<1x16x32xbf16>
    %278 = vector.shape_cast %277 : vector<1x16x32xbf16> to vector<16x32xbf16>
    %cst_82 = arith.constant dense<0.000000e+00> : vector<64x32xf32>
    %279 = tpu.matmul %276, %278, %cst_82 {dimension_numbers = #tpu.dot_dimension_numbers<[1], [0], [0], [1], [0, 0, 1, 1], [], []>} : vector<64x16xbf16>, vector<16x32xbf16>, vector<64x32xf32> -> vector<64x32xf32>
    %280 = arith.addf %275, %279 : vector<64x32xf32>
    %281 = vector.extract_strided_slice %249 {offsets = [384, 0], sizes = [64, 16], strides = [1, 1]} : vector<576x16xbf16> to vector<64x16xbf16>
    %282 = vector.extract_strided_slice %10 {offsets = [6, 0, 0], sizes = [1, 16, 32], strides = [1, 1, 1]} : vector<9x16x32xbf16> to vector<1x16x32xbf16>
    %283 = vector.shape_cast %282 : vector<1x16x32xbf16> to vector<16x32xbf16>
    %cst_83 = arith.constant dense<0.000000e+00> : vector<64x32xf32>
    %284 = tpu.matmul %281, %283, %cst_83 {dimension_numbers = #tpu.dot_dimension_numbers<[1], [0], [0], [1], [0, 0, 1, 1], [], []>} : vector<64x16xbf16>, vector<16x32xbf16>, vector<64x32xf32> -> vector<64x32xf32>
    %285 = arith.addf %280, %284 : vector<64x32xf32>
    %286 = vector.extract_strided_slice %249 {offsets = [448, 0], sizes = [64, 16], strides = [1, 1]} : vector<576x16xbf16> to vector<64x16xbf16>
    %287 = vector.extract_strided_slice %10 {offsets = [7, 0, 0], sizes = [1, 16, 32], strides = [1, 1, 1]} : vector<9x16x32xbf16> to vector<1x16x32xbf16>
    %288 = vector.shape_cast %287 : vector<1x16x32xbf16> to vector<16x32xbf16>
    %cst_84 = arith.constant dense<0.000000e+00> : vector<64x32xf32>
    %289 = tpu.matmul %286, %288, %cst_84 {dimension_numbers = #tpu.dot_dimension_numbers<[1], [0], [0], [1], [0, 0, 1, 1], [], []>} : vector<64x16xbf16>, vector<16x32xbf16>, vector<64x32xf32> -> vector<64x32xf32>
    %290 = arith.addf %285, %289 : vector<64x32xf32>
    %291 = vector.extract_strided_slice %249 {offsets = [512, 0], sizes = [64, 16], strides = [1, 1]} : vector<576x16xbf16> to vector<64x16xbf16>
    %292 = vector.extract_strided_slice %10 {offsets = [8, 0, 0], sizes = [1, 16, 32], strides = [1, 1, 1]} : vector<9x16x32xbf16> to vector<1x16x32xbf16>
    %293 = vector.shape_cast %292 : vector<1x16x32xbf16> to vector<16x32xbf16>
    %cst_85 = arith.constant dense<0.000000e+00> : vector<64x32xf32>
    %294 = tpu.matmul %291, %293, %cst_85 {dimension_numbers = #tpu.dot_dimension_numbers<[1], [0], [0], [1], [0, 0, 1, 1], [], []>} : vector<64x16xbf16>, vector<16x32xbf16>, vector<64x32xf32> -> vector<64x32xf32>
    %295 = arith.addf %290, %294 : vector<64x32xf32>
    %296 = vector.broadcast %11 : vector<1x32xf32> to vector<64x32xf32>
    %297 = arith.addf %295, %296 : vector<64x32xf32>
    %cst_86 = arith.constant 0.000000e+00 : f32
    %298 = vector.broadcast %cst_86 : f32 to vector<64x32xf32>
    %299 = arith.maximumf %297, %298 : vector<64x32xf32>
    %300 = arith.truncf %299 : vector<64x32xf32> to vector<64x32xbf16>
    %cst_87 = arith.constant dense<0.000000e+00> : vector<1x32xf32>
    %301 = tpu.matmul %12, %300, %cst_87 {dimension_numbers = #tpu.dot_dimension_numbers<[1], [0], [0], [1], [0, 0, 1, 1], [], []>} : vector<1x64xbf16>, vector<64x32xbf16>, vector<1x32xf32> -> vector<1x32xf32>
    %302 = arith.truncf %301 : vector<1x32xf32> to vector<1x32xbf16>
    %cst_88 = arith.constant dense<0.000000e+00> : vector<1x128xf32>
    %303 = tpu.matmul %302, %13, %cst_88 {dimension_numbers = #tpu.dot_dimension_numbers<[1], [0], [0], [1], [0, 0, 1, 1], [], []>} : vector<1x32xbf16>, vector<32x128xbf16>, vector<1x128xf32> -> vector<1x128xf32>
    %304 = arith.addf %303, %14 : vector<1x128xf32>
    %305 = vector.extract_strided_slice %8 {offsets = [1280, 0], sizes = [256, 16], strides = [1, 1]} : vector<2048x16xbf16> to vector<256x16xbf16>
    %cst_89 = arith.constant dense<0.000000e+00> : vector<576x16xf32>
    %306 = tpu.matmul %9, %305, %cst_89 {dimension_numbers = #tpu.dot_dimension_numbers<[1], [0], [0], [1], [0, 0, 1, 1], [], []>} : vector<576x256xbf16>, vector<256x16xbf16>, vector<576x16xf32> -> vector<576x16xf32>
    %307 = arith.truncf %306 : vector<576x16xf32> to vector<576x16xbf16>
    %cst_90 = arith.constant 0.000000e+00 : f32
    %308 = vector.broadcast %cst_90 : f32 to vector<64x32xf32>
    %309 = vector.extract_strided_slice %307 {offsets = [0, 0], sizes = [64, 16], strides = [1, 1]} : vector<576x16xbf16> to vector<64x16xbf16>
    %310 = vector.extract_strided_slice %10 {offsets = [0, 0, 0], sizes = [1, 16, 32], strides = [1, 1, 1]} : vector<9x16x32xbf16> to vector<1x16x32xbf16>
    %311 = vector.shape_cast %310 : vector<1x16x32xbf16> to vector<16x32xbf16>
    %cst_91 = arith.constant dense<0.000000e+00> : vector<64x32xf32>
    %312 = tpu.matmul %309, %311, %cst_91 {dimension_numbers = #tpu.dot_dimension_numbers<[1], [0], [0], [1], [0, 0, 1, 1], [], []>} : vector<64x16xbf16>, vector<16x32xbf16>, vector<64x32xf32> -> vector<64x32xf32>
    %313 = arith.addf %308, %312 : vector<64x32xf32>
    %314 = vector.extract_strided_slice %307 {offsets = [64, 0], sizes = [64, 16], strides = [1, 1]} : vector<576x16xbf16> to vector<64x16xbf16>
    %315 = vector.extract_strided_slice %10 {offsets = [1, 0, 0], sizes = [1, 16, 32], strides = [1, 1, 1]} : vector<9x16x32xbf16> to vector<1x16x32xbf16>
    %316 = vector.shape_cast %315 : vector<1x16x32xbf16> to vector<16x32xbf16>
    %cst_92 = arith.constant dense<0.000000e+00> : vector<64x32xf32>
    %317 = tpu.matmul %314, %316, %cst_92 {dimension_numbers = #tpu.dot_dimension_numbers<[1], [0], [0], [1], [0, 0, 1, 1], [], []>} : vector<64x16xbf16>, vector<16x32xbf16>, vector<64x32xf32> -> vector<64x32xf32>
    %318 = arith.addf %313, %317 : vector<64x32xf32>
    %319 = vector.extract_strided_slice %307 {offsets = [128, 0], sizes = [64, 16], strides = [1, 1]} : vector<576x16xbf16> to vector<64x16xbf16>
    %320 = vector.extract_strided_slice %10 {offsets = [2, 0, 0], sizes = [1, 16, 32], strides = [1, 1, 1]} : vector<9x16x32xbf16> to vector<1x16x32xbf16>
    %321 = vector.shape_cast %320 : vector<1x16x32xbf16> to vector<16x32xbf16>
    %cst_93 = arith.constant dense<0.000000e+00> : vector<64x32xf32>
    %322 = tpu.matmul %319, %321, %cst_93 {dimension_numbers = #tpu.dot_dimension_numbers<[1], [0], [0], [1], [0, 0, 1, 1], [], []>} : vector<64x16xbf16>, vector<16x32xbf16>, vector<64x32xf32> -> vector<64x32xf32>
    %323 = arith.addf %318, %322 : vector<64x32xf32>
    %324 = vector.extract_strided_slice %307 {offsets = [192, 0], sizes = [64, 16], strides = [1, 1]} : vector<576x16xbf16> to vector<64x16xbf16>
    %325 = vector.extract_strided_slice %10 {offsets = [3, 0, 0], sizes = [1, 16, 32], strides = [1, 1, 1]} : vector<9x16x32xbf16> to vector<1x16x32xbf16>
    %326 = vector.shape_cast %325 : vector<1x16x32xbf16> to vector<16x32xbf16>
    %cst_94 = arith.constant dense<0.000000e+00> : vector<64x32xf32>
    %327 = tpu.matmul %324, %326, %cst_94 {dimension_numbers = #tpu.dot_dimension_numbers<[1], [0], [0], [1], [0, 0, 1, 1], [], []>} : vector<64x16xbf16>, vector<16x32xbf16>, vector<64x32xf32> -> vector<64x32xf32>
    %328 = arith.addf %323, %327 : vector<64x32xf32>
    %329 = vector.extract_strided_slice %307 {offsets = [256, 0], sizes = [64, 16], strides = [1, 1]} : vector<576x16xbf16> to vector<64x16xbf16>
    %330 = vector.extract_strided_slice %10 {offsets = [4, 0, 0], sizes = [1, 16, 32], strides = [1, 1, 1]} : vector<9x16x32xbf16> to vector<1x16x32xbf16>
    %331 = vector.shape_cast %330 : vector<1x16x32xbf16> to vector<16x32xbf16>
    %cst_95 = arith.constant dense<0.000000e+00> : vector<64x32xf32>
    %332 = tpu.matmul %329, %331, %cst_95 {dimension_numbers = #tpu.dot_dimension_numbers<[1], [0], [0], [1], [0, 0, 1, 1], [], []>} : vector<64x16xbf16>, vector<16x32xbf16>, vector<64x32xf32> -> vector<64x32xf32>
    %333 = arith.addf %328, %332 : vector<64x32xf32>
    %334 = vector.extract_strided_slice %307 {offsets = [320, 0], sizes = [64, 16], strides = [1, 1]} : vector<576x16xbf16> to vector<64x16xbf16>
    %335 = vector.extract_strided_slice %10 {offsets = [5, 0, 0], sizes = [1, 16, 32], strides = [1, 1, 1]} : vector<9x16x32xbf16> to vector<1x16x32xbf16>
    %336 = vector.shape_cast %335 : vector<1x16x32xbf16> to vector<16x32xbf16>
    %cst_96 = arith.constant dense<0.000000e+00> : vector<64x32xf32>
    %337 = tpu.matmul %334, %336, %cst_96 {dimension_numbers = #tpu.dot_dimension_numbers<[1], [0], [0], [1], [0, 0, 1, 1], [], []>} : vector<64x16xbf16>, vector<16x32xbf16>, vector<64x32xf32> -> vector<64x32xf32>
    %338 = arith.addf %333, %337 : vector<64x32xf32>
    %339 = vector.extract_strided_slice %307 {offsets = [384, 0], sizes = [64, 16], strides = [1, 1]} : vector<576x16xbf16> to vector<64x16xbf16>
    %340 = vector.extract_strided_slice %10 {offsets = [6, 0, 0], sizes = [1, 16, 32], strides = [1, 1, 1]} : vector<9x16x32xbf16> to vector<1x16x32xbf16>
    %341 = vector.shape_cast %340 : vector<1x16x32xbf16> to vector<16x32xbf16>
    %cst_97 = arith.constant dense<0.000000e+00> : vector<64x32xf32>
    %342 = tpu.matmul %339, %341, %cst_97 {dimension_numbers = #tpu.dot_dimension_numbers<[1], [0], [0], [1], [0, 0, 1, 1], [], []>} : vector<64x16xbf16>, vector<16x32xbf16>, vector<64x32xf32> -> vector<64x32xf32>
    %343 = arith.addf %338, %342 : vector<64x32xf32>
    %344 = vector.extract_strided_slice %307 {offsets = [448, 0], sizes = [64, 16], strides = [1, 1]} : vector<576x16xbf16> to vector<64x16xbf16>
    %345 = vector.extract_strided_slice %10 {offsets = [7, 0, 0], sizes = [1, 16, 32], strides = [1, 1, 1]} : vector<9x16x32xbf16> to vector<1x16x32xbf16>
    %346 = vector.shape_cast %345 : vector<1x16x32xbf16> to vector<16x32xbf16>
    %cst_98 = arith.constant dense<0.000000e+00> : vector<64x32xf32>
    %347 = tpu.matmul %344, %346, %cst_98 {dimension_numbers = #tpu.dot_dimension_numbers<[1], [0], [0], [1], [0, 0, 1, 1], [], []>} : vector<64x16xbf16>, vector<16x32xbf16>, vector<64x32xf32> -> vector<64x32xf32>
    %348 = arith.addf %343, %347 : vector<64x32xf32>
    %349 = vector.extract_strided_slice %307 {offsets = [512, 0], sizes = [64, 16], strides = [1, 1]} : vector<576x16xbf16> to vector<64x16xbf16>
    %350 = vector.extract_strided_slice %10 {offsets = [8, 0, 0], sizes = [1, 16, 32], strides = [1, 1, 1]} : vector<9x16x32xbf16> to vector<1x16x32xbf16>
    %351 = vector.shape_cast %350 : vector<1x16x32xbf16> to vector<16x32xbf16>
    %cst_99 = arith.constant dense<0.000000e+00> : vector<64x32xf32>
    %352 = tpu.matmul %349, %351, %cst_99 {dimension_numbers = #tpu.dot_dimension_numbers<[1], [0], [0], [1], [0, 0, 1, 1], [], []>} : vector<64x16xbf16>, vector<16x32xbf16>, vector<64x32xf32> -> vector<64x32xf32>
    %353 = arith.addf %348, %352 : vector<64x32xf32>
    %354 = vector.broadcast %11 : vector<1x32xf32> to vector<64x32xf32>
    %355 = arith.addf %353, %354 : vector<64x32xf32>
    %cst_100 = arith.constant 0.000000e+00 : f32
    %356 = vector.broadcast %cst_100 : f32 to vector<64x32xf32>
    %357 = arith.maximumf %355, %356 : vector<64x32xf32>
    %358 = arith.truncf %357 : vector<64x32xf32> to vector<64x32xbf16>
    %cst_101 = arith.constant dense<0.000000e+00> : vector<1x32xf32>
    %359 = tpu.matmul %12, %358, %cst_101 {dimension_numbers = #tpu.dot_dimension_numbers<[1], [0], [0], [1], [0, 0, 1, 1], [], []>} : vector<1x64xbf16>, vector<64x32xbf16>, vector<1x32xf32> -> vector<1x32xf32>
    %360 = arith.truncf %359 : vector<1x32xf32> to vector<1x32xbf16>
    %cst_102 = arith.constant dense<0.000000e+00> : vector<1x128xf32>
    %361 = tpu.matmul %360, %13, %cst_102 {dimension_numbers = #tpu.dot_dimension_numbers<[1], [0], [0], [1], [0, 0, 1, 1], [], []>} : vector<1x32xbf16>, vector<32x128xbf16>, vector<1x128xf32> -> vector<1x128xf32>
    %362 = arith.addf %361, %14 : vector<1x128xf32>
    %363 = vector.extract_strided_slice %8 {offsets = [1536, 0], sizes = [256, 16], strides = [1, 1]} : vector<2048x16xbf16> to vector<256x16xbf16>
    %cst_103 = arith.constant dense<0.000000e+00> : vector<576x16xf32>
    %364 = tpu.matmul %9, %363, %cst_103 {dimension_numbers = #tpu.dot_dimension_numbers<[1], [0], [0], [1], [0, 0, 1, 1], [], []>} : vector<576x256xbf16>, vector<256x16xbf16>, vector<576x16xf32> -> vector<576x16xf32>
    %365 = arith.truncf %364 : vector<576x16xf32> to vector<576x16xbf16>
    %cst_104 = arith.constant 0.000000e+00 : f32
    %366 = vector.broadcast %cst_104 : f32 to vector<64x32xf32>
    %367 = vector.extract_strided_slice %365 {offsets = [0, 0], sizes = [64, 16], strides = [1, 1]} : vector<576x16xbf16> to vector<64x16xbf16>
    %368 = vector.extract_strided_slice %10 {offsets = [0, 0, 0], sizes = [1, 16, 32], strides = [1, 1, 1]} : vector<9x16x32xbf16> to vector<1x16x32xbf16>
    %369 = vector.shape_cast %368 : vector<1x16x32xbf16> to vector<16x32xbf16>
    %cst_105 = arith.constant dense<0.000000e+00> : vector<64x32xf32>
    %370 = tpu.matmul %367, %369, %cst_105 {dimension_numbers = #tpu.dot_dimension_numbers<[1], [0], [0], [1], [0, 0, 1, 1], [], []>} : vector<64x16xbf16>, vector<16x32xbf16>, vector<64x32xf32> -> vector<64x32xf32>
    %371 = arith.addf %366, %370 : vector<64x32xf32>
    %372 = vector.extract_strided_slice %365 {offsets = [64, 0], sizes = [64, 16], strides = [1, 1]} : vector<576x16xbf16> to vector<64x16xbf16>
    %373 = vector.extract_strided_slice %10 {offsets = [1, 0, 0], sizes = [1, 16, 32], strides = [1, 1, 1]} : vector<9x16x32xbf16> to vector<1x16x32xbf16>
    %374 = vector.shape_cast %373 : vector<1x16x32xbf16> to vector<16x32xbf16>
    %cst_106 = arith.constant dense<0.000000e+00> : vector<64x32xf32>
    %375 = tpu.matmul %372, %374, %cst_106 {dimension_numbers = #tpu.dot_dimension_numbers<[1], [0], [0], [1], [0, 0, 1, 1], [], []>} : vector<64x16xbf16>, vector<16x32xbf16>, vector<64x32xf32> -> vector<64x32xf32>
    %376 = arith.addf %371, %375 : vector<64x32xf32>
    %377 = vector.extract_strided_slice %365 {offsets = [128, 0], sizes = [64, 16], strides = [1, 1]} : vector<576x16xbf16> to vector<64x16xbf16>
    %378 = vector.extract_strided_slice %10 {offsets = [2, 0, 0], sizes = [1, 16, 32], strides = [1, 1, 1]} : vector<9x16x32xbf16> to vector<1x16x32xbf16>
    %379 = vector.shape_cast %378 : vector<1x16x32xbf16> to vector<16x32xbf16>
    %cst_107 = arith.constant dense<0.000000e+00> : vector<64x32xf32>
    %380 = tpu.matmul %377, %379, %cst_107 {dimension_numbers = #tpu.dot_dimension_numbers<[1], [0], [0], [1], [0, 0, 1, 1], [], []>} : vector<64x16xbf16>, vector<16x32xbf16>, vector<64x32xf32> -> vector<64x32xf32>
    %381 = arith.addf %376, %380 : vector<64x32xf32>
    %382 = vector.extract_strided_slice %365 {offsets = [192, 0], sizes = [64, 16], strides = [1, 1]} : vector<576x16xbf16> to vector<64x16xbf16>
    %383 = vector.extract_strided_slice %10 {offsets = [3, 0, 0], sizes = [1, 16, 32], strides = [1, 1, 1]} : vector<9x16x32xbf16> to vector<1x16x32xbf16>
    %384 = vector.shape_cast %383 : vector<1x16x32xbf16> to vector<16x32xbf16>
    %cst_108 = arith.constant dense<0.000000e+00> : vector<64x32xf32>
    %385 = tpu.matmul %382, %384, %cst_108 {dimension_numbers = #tpu.dot_dimension_numbers<[1], [0], [0], [1], [0, 0, 1, 1], [], []>} : vector<64x16xbf16>, vector<16x32xbf16>, vector<64x32xf32> -> vector<64x32xf32>
    %386 = arith.addf %381, %385 : vector<64x32xf32>
    %387 = vector.extract_strided_slice %365 {offsets = [256, 0], sizes = [64, 16], strides = [1, 1]} : vector<576x16xbf16> to vector<64x16xbf16>
    %388 = vector.extract_strided_slice %10 {offsets = [4, 0, 0], sizes = [1, 16, 32], strides = [1, 1, 1]} : vector<9x16x32xbf16> to vector<1x16x32xbf16>
    %389 = vector.shape_cast %388 : vector<1x16x32xbf16> to vector<16x32xbf16>
    %cst_109 = arith.constant dense<0.000000e+00> : vector<64x32xf32>
    %390 = tpu.matmul %387, %389, %cst_109 {dimension_numbers = #tpu.dot_dimension_numbers<[1], [0], [0], [1], [0, 0, 1, 1], [], []>} : vector<64x16xbf16>, vector<16x32xbf16>, vector<64x32xf32> -> vector<64x32xf32>
    %391 = arith.addf %386, %390 : vector<64x32xf32>
    %392 = vector.extract_strided_slice %365 {offsets = [320, 0], sizes = [64, 16], strides = [1, 1]} : vector<576x16xbf16> to vector<64x16xbf16>
    %393 = vector.extract_strided_slice %10 {offsets = [5, 0, 0], sizes = [1, 16, 32], strides = [1, 1, 1]} : vector<9x16x32xbf16> to vector<1x16x32xbf16>
    %394 = vector.shape_cast %393 : vector<1x16x32xbf16> to vector<16x32xbf16>
    %cst_110 = arith.constant dense<0.000000e+00> : vector<64x32xf32>
    %395 = tpu.matmul %392, %394, %cst_110 {dimension_numbers = #tpu.dot_dimension_numbers<[1], [0], [0], [1], [0, 0, 1, 1], [], []>} : vector<64x16xbf16>, vector<16x32xbf16>, vector<64x32xf32> -> vector<64x32xf32>
    %396 = arith.addf %391, %395 : vector<64x32xf32>
    %397 = vector.extract_strided_slice %365 {offsets = [384, 0], sizes = [64, 16], strides = [1, 1]} : vector<576x16xbf16> to vector<64x16xbf16>
    %398 = vector.extract_strided_slice %10 {offsets = [6, 0, 0], sizes = [1, 16, 32], strides = [1, 1, 1]} : vector<9x16x32xbf16> to vector<1x16x32xbf16>
    %399 = vector.shape_cast %398 : vector<1x16x32xbf16> to vector<16x32xbf16>
    %cst_111 = arith.constant dense<0.000000e+00> : vector<64x32xf32>
    %400 = tpu.matmul %397, %399, %cst_111 {dimension_numbers = #tpu.dot_dimension_numbers<[1], [0], [0], [1], [0, 0, 1, 1], [], []>} : vector<64x16xbf16>, vector<16x32xbf16>, vector<64x32xf32> -> vector<64x32xf32>
    %401 = arith.addf %396, %400 : vector<64x32xf32>
    %402 = vector.extract_strided_slice %365 {offsets = [448, 0], sizes = [64, 16], strides = [1, 1]} : vector<576x16xbf16> to vector<64x16xbf16>
    %403 = vector.extract_strided_slice %10 {offsets = [7, 0, 0], sizes = [1, 16, 32], strides = [1, 1, 1]} : vector<9x16x32xbf16> to vector<1x16x32xbf16>
    %404 = vector.shape_cast %403 : vector<1x16x32xbf16> to vector<16x32xbf16>
    %cst_112 = arith.constant dense<0.000000e+00> : vector<64x32xf32>
    %405 = tpu.matmul %402, %404, %cst_112 {dimension_numbers = #tpu.dot_dimension_numbers<[1], [0], [0], [1], [0, 0, 1, 1], [], []>} : vector<64x16xbf16>, vector<16x32xbf16>, vector<64x32xf32> -> vector<64x32xf32>
    %406 = arith.addf %401, %405 : vector<64x32xf32>
    %407 = vector.extract_strided_slice %365 {offsets = [512, 0], sizes = [64, 16], strides = [1, 1]} : vector<576x16xbf16> to vector<64x16xbf16>
    %408 = vector.extract_strided_slice %10 {offsets = [8, 0, 0], sizes = [1, 16, 32], strides = [1, 1, 1]} : vector<9x16x32xbf16> to vector<1x16x32xbf16>
    %409 = vector.shape_cast %408 : vector<1x16x32xbf16> to vector<16x32xbf16>
    %cst_113 = arith.constant dense<0.000000e+00> : vector<64x32xf32>
    %410 = tpu.matmul %407, %409, %cst_113 {dimension_numbers = #tpu.dot_dimension_numbers<[1], [0], [0], [1], [0, 0, 1, 1], [], []>} : vector<64x16xbf16>, vector<16x32xbf16>, vector<64x32xf32> -> vector<64x32xf32>
    %411 = arith.addf %406, %410 : vector<64x32xf32>
    %412 = vector.broadcast %11 : vector<1x32xf32> to vector<64x32xf32>
    %413 = arith.addf %411, %412 : vector<64x32xf32>
    %cst_114 = arith.constant 0.000000e+00 : f32
    %414 = vector.broadcast %cst_114 : f32 to vector<64x32xf32>
    %415 = arith.maximumf %413, %414 : vector<64x32xf32>
    %416 = arith.truncf %415 : vector<64x32xf32> to vector<64x32xbf16>
    %cst_115 = arith.constant dense<0.000000e+00> : vector<1x32xf32>
    %417 = tpu.matmul %12, %416, %cst_115 {dimension_numbers = #tpu.dot_dimension_numbers<[1], [0], [0], [1], [0, 0, 1, 1], [], []>} : vector<1x64xbf16>, vector<64x32xbf16>, vector<1x32xf32> -> vector<1x32xf32>
    %418 = arith.truncf %417 : vector<1x32xf32> to vector<1x32xbf16>
    %cst_116 = arith.constant dense<0.000000e+00> : vector<1x128xf32>
    %419 = tpu.matmul %418, %13, %cst_116 {dimension_numbers = #tpu.dot_dimension_numbers<[1], [0], [0], [1], [0, 0, 1, 1], [], []>} : vector<1x32xbf16>, vector<32x128xbf16>, vector<1x128xf32> -> vector<1x128xf32>
    %420 = arith.addf %419, %14 : vector<1x128xf32>
    %421 = vector.extract_strided_slice %8 {offsets = [1792, 0], sizes = [256, 16], strides = [1, 1]} : vector<2048x16xbf16> to vector<256x16xbf16>
    %cst_117 = arith.constant dense<0.000000e+00> : vector<576x16xf32>
    %422 = tpu.matmul %9, %421, %cst_117 {dimension_numbers = #tpu.dot_dimension_numbers<[1], [0], [0], [1], [0, 0, 1, 1], [], []>} : vector<576x256xbf16>, vector<256x16xbf16>, vector<576x16xf32> -> vector<576x16xf32>
    %423 = arith.truncf %422 : vector<576x16xf32> to vector<576x16xbf16>
    %cst_118 = arith.constant 0.000000e+00 : f32
    %424 = vector.broadcast %cst_118 : f32 to vector<64x32xf32>
    %425 = vector.extract_strided_slice %423 {offsets = [0, 0], sizes = [64, 16], strides = [1, 1]} : vector<576x16xbf16> to vector<64x16xbf16>
    %426 = vector.extract_strided_slice %10 {offsets = [0, 0, 0], sizes = [1, 16, 32], strides = [1, 1, 1]} : vector<9x16x32xbf16> to vector<1x16x32xbf16>
    %427 = vector.shape_cast %426 : vector<1x16x32xbf16> to vector<16x32xbf16>
    %cst_119 = arith.constant dense<0.000000e+00> : vector<64x32xf32>
    %428 = tpu.matmul %425, %427, %cst_119 {dimension_numbers = #tpu.dot_dimension_numbers<[1], [0], [0], [1], [0, 0, 1, 1], [], []>} : vector<64x16xbf16>, vector<16x32xbf16>, vector<64x32xf32> -> vector<64x32xf32>
    %429 = arith.addf %424, %428 : vector<64x32xf32>
    %430 = vector.extract_strided_slice %423 {offsets = [64, 0], sizes = [64, 16], strides = [1, 1]} : vector<576x16xbf16> to vector<64x16xbf16>
    %431 = vector.extract_strided_slice %10 {offsets = [1, 0, 0], sizes = [1, 16, 32], strides = [1, 1, 1]} : vector<9x16x32xbf16> to vector<1x16x32xbf16>
    %432 = vector.shape_cast %431 : vector<1x16x32xbf16> to vector<16x32xbf16>
    %cst_120 = arith.constant dense<0.000000e+00> : vector<64x32xf32>
    %433 = tpu.matmul %430, %432, %cst_120 {dimension_numbers = #tpu.dot_dimension_numbers<[1], [0], [0], [1], [0, 0, 1, 1], [], []>} : vector<64x16xbf16>, vector<16x32xbf16>, vector<64x32xf32> -> vector<64x32xf32>
    %434 = arith.addf %429, %433 : vector<64x32xf32>
    %435 = vector.extract_strided_slice %423 {offsets = [128, 0], sizes = [64, 16], strides = [1, 1]} : vector<576x16xbf16> to vector<64x16xbf16>
    %436 = vector.extract_strided_slice %10 {offsets = [2, 0, 0], sizes = [1, 16, 32], strides = [1, 1, 1]} : vector<9x16x32xbf16> to vector<1x16x32xbf16>
    %437 = vector.shape_cast %436 : vector<1x16x32xbf16> to vector<16x32xbf16>
    %cst_121 = arith.constant dense<0.000000e+00> : vector<64x32xf32>
    %438 = tpu.matmul %435, %437, %cst_121 {dimension_numbers = #tpu.dot_dimension_numbers<[1], [0], [0], [1], [0, 0, 1, 1], [], []>} : vector<64x16xbf16>, vector<16x32xbf16>, vector<64x32xf32> -> vector<64x32xf32>
    %439 = arith.addf %434, %438 : vector<64x32xf32>
    %440 = vector.extract_strided_slice %423 {offsets = [192, 0], sizes = [64, 16], strides = [1, 1]} : vector<576x16xbf16> to vector<64x16xbf16>
    %441 = vector.extract_strided_slice %10 {offsets = [3, 0, 0], sizes = [1, 16, 32], strides = [1, 1, 1]} : vector<9x16x32xbf16> to vector<1x16x32xbf16>
    %442 = vector.shape_cast %441 : vector<1x16x32xbf16> to vector<16x32xbf16>
    %cst_122 = arith.constant dense<0.000000e+00> : vector<64x32xf32>
    %443 = tpu.matmul %440, %442, %cst_122 {dimension_numbers = #tpu.dot_dimension_numbers<[1], [0], [0], [1], [0, 0, 1, 1], [], []>} : vector<64x16xbf16>, vector<16x32xbf16>, vector<64x32xf32> -> vector<64x32xf32>
    %444 = arith.addf %439, %443 : vector<64x32xf32>
    %445 = vector.extract_strided_slice %423 {offsets = [256, 0], sizes = [64, 16], strides = [1, 1]} : vector<576x16xbf16> to vector<64x16xbf16>
    %446 = vector.extract_strided_slice %10 {offsets = [4, 0, 0], sizes = [1, 16, 32], strides = [1, 1, 1]} : vector<9x16x32xbf16> to vector<1x16x32xbf16>
    %447 = vector.shape_cast %446 : vector<1x16x32xbf16> to vector<16x32xbf16>
    %cst_123 = arith.constant dense<0.000000e+00> : vector<64x32xf32>
    %448 = tpu.matmul %445, %447, %cst_123 {dimension_numbers = #tpu.dot_dimension_numbers<[1], [0], [0], [1], [0, 0, 1, 1], [], []>} : vector<64x16xbf16>, vector<16x32xbf16>, vector<64x32xf32> -> vector<64x32xf32>
    %449 = arith.addf %444, %448 : vector<64x32xf32>
    %450 = vector.extract_strided_slice %423 {offsets = [320, 0], sizes = [64, 16], strides = [1, 1]} : vector<576x16xbf16> to vector<64x16xbf16>
    %451 = vector.extract_strided_slice %10 {offsets = [5, 0, 0], sizes = [1, 16, 32], strides = [1, 1, 1]} : vector<9x16x32xbf16> to vector<1x16x32xbf16>
    %452 = vector.shape_cast %451 : vector<1x16x32xbf16> to vector<16x32xbf16>
    %cst_124 = arith.constant dense<0.000000e+00> : vector<64x32xf32>
    %453 = tpu.matmul %450, %452, %cst_124 {dimension_numbers = #tpu.dot_dimension_numbers<[1], [0], [0], [1], [0, 0, 1, 1], [], []>} : vector<64x16xbf16>, vector<16x32xbf16>, vector<64x32xf32> -> vector<64x32xf32>
    %454 = arith.addf %449, %453 : vector<64x32xf32>
    %455 = vector.extract_strided_slice %423 {offsets = [384, 0], sizes = [64, 16], strides = [1, 1]} : vector<576x16xbf16> to vector<64x16xbf16>
    %456 = vector.extract_strided_slice %10 {offsets = [6, 0, 0], sizes = [1, 16, 32], strides = [1, 1, 1]} : vector<9x16x32xbf16> to vector<1x16x32xbf16>
    %457 = vector.shape_cast %456 : vector<1x16x32xbf16> to vector<16x32xbf16>
    %cst_125 = arith.constant dense<0.000000e+00> : vector<64x32xf32>
    %458 = tpu.matmul %455, %457, %cst_125 {dimension_numbers = #tpu.dot_dimension_numbers<[1], [0], [0], [1], [0, 0, 1, 1], [], []>} : vector<64x16xbf16>, vector<16x32xbf16>, vector<64x32xf32> -> vector<64x32xf32>
    %459 = arith.addf %454, %458 : vector<64x32xf32>
    %460 = vector.extract_strided_slice %423 {offsets = [448, 0], sizes = [64, 16], strides = [1, 1]} : vector<576x16xbf16> to vector<64x16xbf16>
    %461 = vector.extract_strided_slice %10 {offsets = [7, 0, 0], sizes = [1, 16, 32], strides = [1, 1, 1]} : vector<9x16x32xbf16> to vector<1x16x32xbf16>
    %462 = vector.shape_cast %461 : vector<1x16x32xbf16> to vector<16x32xbf16>
    %cst_126 = arith.constant dense<0.000000e+00> : vector<64x32xf32>
    %463 = tpu.matmul %460, %462, %cst_126 {dimension_numbers = #tpu.dot_dimension_numbers<[1], [0], [0], [1], [0, 0, 1, 1], [], []>} : vector<64x16xbf16>, vector<16x32xbf16>, vector<64x32xf32> -> vector<64x32xf32>
    %464 = arith.addf %459, %463 : vector<64x32xf32>
    %465 = vector.extract_strided_slice %423 {offsets = [512, 0], sizes = [64, 16], strides = [1, 1]} : vector<576x16xbf16> to vector<64x16xbf16>
    %466 = vector.extract_strided_slice %10 {offsets = [8, 0, 0], sizes = [1, 16, 32], strides = [1, 1, 1]} : vector<9x16x32xbf16> to vector<1x16x32xbf16>
    %467 = vector.shape_cast %466 : vector<1x16x32xbf16> to vector<16x32xbf16>
    %cst_127 = arith.constant dense<0.000000e+00> : vector<64x32xf32>
    %468 = tpu.matmul %465, %467, %cst_127 {dimension_numbers = #tpu.dot_dimension_numbers<[1], [0], [0], [1], [0, 0, 1, 1], [], []>} : vector<64x16xbf16>, vector<16x32xbf16>, vector<64x32xf32> -> vector<64x32xf32>
    %469 = arith.addf %464, %468 : vector<64x32xf32>
    %470 = vector.broadcast %11 : vector<1x32xf32> to vector<64x32xf32>
    %471 = arith.addf %469, %470 : vector<64x32xf32>
    %cst_128 = arith.constant 0.000000e+00 : f32
    %472 = vector.broadcast %cst_128 : f32 to vector<64x32xf32>
    %473 = arith.maximumf %471, %472 : vector<64x32xf32>
    %474 = arith.truncf %473 : vector<64x32xf32> to vector<64x32xbf16>
    %cst_129 = arith.constant dense<0.000000e+00> : vector<1x32xf32>
    %475 = tpu.matmul %12, %474, %cst_129 {dimension_numbers = #tpu.dot_dimension_numbers<[1], [0], [0], [1], [0, 0, 1, 1], [], []>} : vector<1x64xbf16>, vector<64x32xbf16>, vector<1x32xf32> -> vector<1x32xf32>
    %476 = arith.truncf %475 : vector<1x32xf32> to vector<1x32xbf16>
    %cst_130 = arith.constant dense<0.000000e+00> : vector<1x128xf32>
    %477 = tpu.matmul %476, %13, %cst_130 {dimension_numbers = #tpu.dot_dimension_numbers<[1], [0], [0], [1], [0, 0, 1, 1], [], []>} : vector<1x32xbf16>, vector<32x128xbf16>, vector<1x128xf32> -> vector<1x128xf32>
    %478 = arith.addf %477, %14 : vector<1x128xf32>
    %479 = tpu.concatenate %72, %130, %188, %246, %304, %362, %420, %478 in 0 : vector<1x128xf32>, vector<1x128xf32>, vector<1x128xf32>, vector<1x128xf32>, vector<1x128xf32>, vector<1x128xf32>, vector<1x128xf32>, vector<1x128xf32> -> vector<8x128xf32>
    %c0_131 = arith.constant 0 : index
    %c0_132 = arith.constant 0 : index
    %480 = vector.load %arg10[%c0_131, %c0_132] : memref<8x128xf32, #tpu.memory_space<vmem>>, vector<8x128xf32>
    tpu.vector_store %arg10[%c0_131, %c0_132], %479 {strides = array<i32>} : memref<8x128xf32, #tpu.memory_space<vmem>>, vector<8x128xf32>,
    return
  }
  func.func @transform_0(%arg0: i32) -> (i32, i32) {
    %c0_i32 = arith.constant 0 : i32
    %c0_i32_0 = arith.constant 0 : i32
    return %arg0, %c0_i32 : i32, i32
  }
  func.func @transform_1(%arg0: i32) -> (i32, i32) {
    %c0_i32 = arith.constant 0 : i32
    %c0_i32_0 = arith.constant 0 : i32
    %c0_i32_1 = arith.constant 0 : i32
    return %c0_i32, %c0_i32_0 : i32, i32
  }
  func.func @transform_2(%arg0: i32) -> (i32, i32) {
    %c0_i32 = arith.constant 0 : i32
    %c0_i32_0 = arith.constant 0 : i32
    %c0_i32_1 = arith.constant 0 : i32
    return %c0_i32, %c0_i32_0 : i32, i32
  }
  func.func @transform_3(%arg0: i32) -> (i32, i32) {
    %c0_i32 = arith.constant 0 : i32
    %c0_i32_0 = arith.constant 0 : i32
    %c0_i32_1 = arith.constant 0 : i32
    return %c0_i32, %c0_i32_0 : i32, i32
  }
  func.func @transform_4(%arg0: i32) -> (i32, i32, i32) {
    %c0_i32 = arith.constant 0 : i32
    %c0_i32_0 = arith.constant 0 : i32
    %c0_i32_1 = arith.constant 0 : i32
    %c0_i32_2 = arith.constant 0 : i32
    return %c0_i32, %c0_i32_0, %c0_i32_1 : i32, i32, i32
  }
  func.func @transform_5(%arg0: i32) -> (i32, i32) {
    %c0_i32 = arith.constant 0 : i32
    %c0_i32_0 = arith.constant 0 : i32
    %c0_i32_1 = arith.constant 0 : i32
    return %c0_i32, %c0_i32_0 : i32, i32
  }
  func.func @transform_6(%arg0: i32) -> (i32, i32) {
    %c0_i32 = arith.constant 0 : i32
    %c0_i32_0 = arith.constant 0 : i32
    %c0_i32_1 = arith.constant 0 : i32
    return %c0_i32, %c0_i32_0 : i32, i32
  }
  func.func @transform_7(%arg0: i32) -> (i32, i32) {
    %c0_i32 = arith.constant 0 : i32
    %c0_i32_0 = arith.constant 0 : i32
    %c0_i32_1 = arith.constant 0 : i32
    return %c0_i32, %c0_i32_0 : i32, i32
  }
  func.func @transform_8(%arg0: i32) -> (i32, i32) {
    %c0_i32 = arith.constant 0 : i32
    %c0_i32_0 = arith.constant 0 : i32
    %c0_i32_1 = arith.constant 0 : i32
    return %c0_i32, %c0_i32_0 : i32, i32
  }
  func.func @transform_9(%arg0: i32) -> (i32, i32) {
    %c0_i32 = arith.constant 0 : i32
    %c0_i32_0 = arith.constant 0 : i32
    return %arg0, %c0_i32 : i32, i32
  }
}

</mosaic_0001>

<bundles_post_ra>
// kernel: tpu_custom_call.1
= control target key start
LH: loop header
LB: loop body
LE: loop exit
PB: predicated region body
PF: predicated region fallthrough
CT: control target
= control target key end

     0   :  { %14 = vsyncpa [#allocation3], 0  ;;  %s22623_s0 = inlined_call_operand.vmem [shape: bf16[4096,32], index: 0, kind: input, shape index: {}]   ;;  %s22624_s1 = inlined_call_operand.vmem [shape: bf16[32,16], index: 1, kind: input, shape index: {}]   ;;  %s22625_s2 = inlined_call_operand.vmem [shape: f32[1,16], index: 2, kind: input, shape index: {}]   ;;  %s22626_s3 = inlined_call_operand.vmem [shape: bf16[576,256], index: 3, kind: input, shape index: {}]   ;;  %s22627_s4 = inlined_call_operand.vmem [shape: bf16[9,16,32], index: 4, kind: input, shape index: {}]   ;;  %s22628_s5 = inlined_call_operand.vmem [shape: f32[1,32], index: 5, kind: input, shape index: {}]   ;;  %s22629_s6 = inlined_call_operand.vmem [shape: bf16[1,64], index: 6, kind: input, shape index: {}]   ;;  %s22630_s7 = inlined_call_operand.vmem [shape: bf16[32,128], index: 7, kind: input, shape index: {}]   ;;  %s22631_s8 = inlined_call_operand.vmem [shape: f32[1,128], index: 8, kind: input, shape index: {}]   ;;  %s22632_s9 = inlined_call_operand.hbm [shape: f32[16,128], index: 9, kind: output, shape index: {}]  }
   0x1   :  { %16 = vsyncpa [#allocation3 + $0x1], 0  ;;  %s17020_s30 = smov 0   ;;  %s17022_s10 = smov 0  }
   0x2   :  { %s17024_s11 = smov 0   ;;  %s17026_s12 = smov 0  }
   0x3 LB: > { %s17041_s13 = sadd.s32 4294967295, %s16964_s12   ;;  %s13402_s14 = sadd.s32 4294967294, %s16964_s12   ;;  %s16964_s12 = sphi %s17026_s12, %s23596_s12   ;;  %s16960_s11 = sphi %s17024_s11, %s23595_s11   ;;  %s16956_s10 = sphi %s17022_s10, %s23594_s10   ;;  %s16952_s30 = sphi %s17020_s30, %s23593_s30  }
   0x4   : > { %s17045_s15 = sadd.s32 1, %s16964_s12   ;;  %s223_s16 = sadd.s32 1, %s16960_s11 }
   0x5   : > { %s220_s17 = ssub.s32 %s16964_s12, %s17045_s15  ;;  %p233_p0 = scmp.ne.s32.totalorder %s16960_s11, %s16956_s10 }
   0x6   : > { %p221_p1 = scmp.eq.s32.totalorder %s220_s17, 0  ;;  %p234_p2 = scmp.eq.s32.totalorder %s17041_s13, 1 }
   0x7   : > { %p239_p3 = scmp.ne.s32.totalorder %s16956_s10, %s16952_s30  ;;  %p240_p4 = scmp.eq.s32.totalorder %s13402_s14, 1 }
   0x8   : > { %s17056_s18 = scalar_select %p221_p1, %s16960_s11, %s223_s16  }
   0x9   : > { %p17058_p5 = por %p234_p2, %p233_p0  ;;  %p17062_p6 = por %p240_p4, %p239_p3 }
   0xa   : > { %p13405_p7 = scmp.ge.s32.totalorder %s16964_s12, 1  ;;  %p291_p8 = scmp.lt.s32.totalorder %s16964_s12, 3 }
   0xc   : > { %p292_p9 = pnand %p13405_p7, %p291_p8 }
   0xe   : > { %295 = sbr.rel (%p292_p9) target bundleno = 6965 (0x1b35), region = 56 }
  0x15   : > { %v16340_v0 = vld [vmem:[%s22624_s1] sm:$0xff]   ;;  %s13407_s23 = sshll.u32 %s17041_s13, 8  ;;  %v16341_v1 = vld [vmem:[%s22624_s1 + $0x8] sm:$0xff]   ;;  %vm1253_vm0 = vcmask 261120   ;;  %v22633_v28 = vmov 0   ;;  %vm3899_vm1 = vcmask 130048  }
  0x16   : > { %p328_p10 = scmp.lt.s32.totalorder %s13407_s23, 511  ;;  %14614 = vmatprep.subr.bf16.mxu0 %v16340_v0  ;;  %15754 = vmatprep.subr.bf16.mxu1 %v22633_v28  ;;  %v17194_v58 = vld [vmem:[%s22625_s2] ss:$0 sm:$0xff]  ;;  %vm16968_vm2 = vmmov 0   ;;  %vm4723_vm3 = vcmask 523264   ;;  %vm13314_vm4 = vcmask 1040384  }
  0x17   : > { %14615 = vmatpush3.bf16.msra.mxu0 %v16340_v0  ;;  %vm13316_vm5 = vcmask 1041408   ;;  %vm13318_vm6 = vcmask 1042432   ;;  %vm13320_vm7 = vcmask 1043456   ;;  %vm13322_vm8 = vcmask 1044480   ;;  %s324_s17 = sand.u32 1, %s16956_s10   ;;  %s14057_s22 = sshll.u32 %s17041_s13, 7 }
  0x18   : > { %s23598_s23 = smov (!%p328_p10, %s13407_s23), 511  ;;  %14616 = vmatprep.subr.bf16.mxu0 %v16341_v1  ;;  %vm13324_vm9 = vcmask 1045504   ;;  %s13406_s21 = sshll.u32 %s324_s17, 3  ;;  %vm13326_vm10 = vcmask 1046528  }
  0x19   : > { %s13408_s26 = sshll.u32 %s23598_s23, 2  ;;  %s326_s23 = scalar_lea.vmem [#allocation2], %s13406_s21 }
  0x1a   : > { %s17078_s29 = scalar_lea.vmem %s22623_s0, %s13408_s26  ;;  %s13343_s24 = sshll.u32 %s326_s23, 4  ;;  %s22582_s24 = int_to_ptr.vmem [resolvable:$true] %s13343_s24 }
  0x1b   : > { %14617 = vmatpush3.bf16.msra.mxu0 %v16341_v1  ;;  %v16342_v2 = vld [vmem:[%s17078_s29] sm:$0xff]   ;;  %v16343_v3 = vld [vmem:[%s17078_s29 + $0x8] sm:$0xff]   ;;  %v16344_v4 = vld [vmem:[%s17078_s29 + $0x10] sm:$0xff]   ;;  %s22580_s27 = scalar_lea.hbm %s22632_s9, %s14057_s22  ;;  %s13330_s13 = scalar_lea.sflag [#allocation3], %s324_s17 }
  0x1c   : > { %14618 = vmatprep.mubr.msk.bf16.mxu0 %vm1253_vm0, %v16342_v2  ;;  %v16345_v5 = vld [vmem:[%s17078_s29 + $0x18] sm:$0xff]   ;;  %v16346_v6 = vld [vmem:[%s17078_s29 + $0x20] sm:$0xff]   ;;  %v16347_v7 = vld [vmem:[%s17078_s29 + $0x28] sm:$0xff]   ;;  %3536 = vmatprep.subr.bf16.mxu0 %v22633_v28  ;;  %s16969_s28 = smov [#allocation2]  }
  0x1d   : > { %v16348_v8 = vld [vmem:[%s17078_s29 + $0x30] sm:$0xff]   ;;  %v16349_v9 = vld [vmem:[%s17078_s29 + $0x38] sm:$0xff]   ;;  %v16350_v10 = vld [vmem:[%s17078_s29 + $0x40] sm:$0xff]   ;;  %s16906_s14 = sshll.u32 %s16969_s28, 4  ;;  %s16907_s14 = int_to_ptr.vmem [resolvable:$false] %s16906_s14 }
  0x1e   : > { %14619 = vmatmul.mubr.msk.bf16.vlgmr.msra.gmra.mrb[0].mxu0 %vm1253_vm0, %v16343_v3  ;;  %v16351_v11 = vld [vmem:[%s17078_s29 + $0x48] sm:$0xff]   ;;  %v16352_v12 = vld [vmem:[%s17078_s29 + $0x50] sm:$0xff]   ;;  %v16353_v13 = vld [vmem:[%s17078_s29 + $0x58] sm:$0xff]   ;;  %s16908_s16 = scalar_lea.vmem %s16907_s14, 256  ;;  %p16909_p0 = scmp.lt.s32.totalorder %s22582_s24, %s16907_s14 }
  0x1f   : > { %14622 = vmatprep.mubr.msk.bf16.mxu0 %vm1253_vm0, %v16344_v4  ;;  %v16354_v14 = vld [vmem:[%s17078_s29 + $0x60] sm:$0xff]   ;;  %v16355_v15 = vld [vmem:[%s17078_s29 + $0x68] sm:$0xff]   ;;  %v16356_v16 = vld [vmem:[%s17078_s29 + $0x70] sm:$0xff]  }
  0x20   : > { %v16357_v17 = vld [vmem:[%s17078_s29 + $0x78] sm:$0xff]   ;;  %v16358_v18 = vld [vmem:[%s17078_s29 + $0x80] sm:$0xff]   ;;  %v16359_v19 = vld [vmem:[%s17078_s29 + $0x88] sm:$0xff]  }
  0x21   : > { %v16360_v20 = vld [vmem:[%s17078_s29 + $0x90] sm:$0xff]   ;;  %v16361_v21 = vld [vmem:[%s17078_s29 + $0x98] sm:$0xff]   ;;  %v16362_v22 = vld [vmem:[%s17078_s29 + $0xa0] sm:$0xff]  }
  0x22   : > { %v16363_v23 = vld [vmem:[%s17078_s29 + $0xa8] sm:$0xff]   ;;  %v16364_v24 = vld [vmem:[%s17078_s29 + $0xb0] sm:$0xff]   ;;  %v16365_v25 = vld [vmem:[%s17078_s29 + $0xb8] sm:$0xff]  }
  0x23   : > { %v16366_v26 = vld [vmem:[%s17078_s29 + $0xc0] sm:$0xff]   ;;  %v16367_v27 = vld [vmem:[%s17078_s29 + $0xc8] sm:$0xff]   ;;  %v16368_v29 = vld [vmem:[%s17078_s29 + $0xd0] sm:$0xff]  }
  0x24   : > { %v16369_v30 = vld [vmem:[%s17078_s29 + $0xd8] sm:$0xff]   ;;  %v16370_v31 = vld [vmem:[%s17078_s29 + $0xe0] sm:$0xff]   ;;  %v16371_v32 = vld [vmem:[%s17078_s29 + $0xe8] sm:$0xff]  }
  0x25   : > { %v16372_v33 = vld [vmem:[%s17078_s29 + $0xf0] sm:$0xff]   ;;  %v16373_v34 = vld [vmem:[%s17078_s29 + $0xf8] sm:$0xff]   ;;  %v16374_v35 = vld [vmem:[%s17078_s29 + $0x100] sm:$0xff]  }
  0x26   : > { %14623 = vmatmul.mubr.msk.bf16.gmra.mrb[4].mxu0 %vm1253_vm0, %v16345_v5  ;;  %v16375_v36 = vld [vmem:[%s17078_s29 + $0x108] sm:$0xff]   ;;  %v16376_v37 = vld [vmem:[%s17078_s29 + $0x110] sm:$0xff]   ;;  %v16377_v38 = vld [vmem:[%s17078_s29 + $0x118] sm:$0xff]  }
  0x27   : > { %14626 = vmatprep.mubr.msk.bf16.mxu0 %vm1253_vm0, %v16346_v6  ;;  %v16378_v39 = vld [vmem:[%s17078_s29 + $0x120] sm:$0xff]   ;;  %v16379_v40 = vld [vmem:[%s17078_s29 + $0x128] sm:$0xff]   ;;  %v16380_v41 = vld [vmem:[%s17078_s29 + $0x130] sm:$0xff]  }
  0x28   : > { %v16381_v42 = vld [vmem:[%s17078_s29 + $0x138] sm:$0xff]   ;;  %v16382_v43 = vld [vmem:[%s17078_s29 + $0x140] sm:$0xff]   ;;  %v16383_v44 = vld [vmem:[%s17078_s29 + $0x148] sm:$0xff]  }
  0x29   : > { %v16384_v45 = vld [vmem:[%s17078_s29 + $0x150] sm:$0xff]   ;;  %v16385_v46 = vld [vmem:[%s17078_s29 + $0x158] sm:$0xff]   ;;  %v16386_v47 = vld [vmem:[%s17078_s29 + $0x160] sm:$0xff]  }
  0x2a   : > { %v16387_v48 = vld [vmem:[%s17078_s29 + $0x168] sm:$0xff]   ;;  %v16388_v49 = vld [vmem:[%s17078_s29 + $0x170] sm:$0xff]   ;;  %v16389_v50 = vld [vmem:[%s17078_s29 + $0x178] sm:$0xff]  }
  0x2b   : > { %v16390_v51 = vld [vmem:[%s17078_s29 + $0x180] sm:$0xff]   ;;  %v16391_v52 = vld [vmem:[%s17078_s29 + $0x188] sm:$0xff]   ;;  %v16392_v53 = vld [vmem:[%s17078_s29 + $0x190] sm:$0xff]  }
  0x2c   : > { %v16393_v54 = vld [vmem:[%s17078_s29 + $0x198] sm:$0xff]   ;;  %v16394_v55 = vld [vmem:[%s17078_s29 + $0x1a0] sm:$0xff]   ;;  %v16395_v56 = vld [vmem:[%s17078_s29 + $0x1a8] sm:$0xff]  }
  0x2d   : > { %v16396_v57 = vld [vmem:[%s17078_s29 + $0x1b0] sm:$0xff]   ;;  %v16397_v62 = vld [vmem:[%s17078_s29 + $0x1b8] sm:$0xff]   ;;  %v16398_v1 = vld [vmem:[%s17078_s29 + $0x1c0] sm:$0xff]  }
  0x2e   : > { %14627 = vmatmul.mubr.msk.bf16.gmra.mrb[8].mxu0 %vm1253_vm0, %v16347_v7 }
  0x2f   : > { %14630 = vmatprep.mubr.msk.bf16.mxu0 %vm1253_vm0, %v16348_v8 }
  0x36   : > { %14631 = vmatmul.mubr.msk.bf16.gmra.mrb[12].mxu0 %vm1253_vm0, %v16349_v9 }
  0x37   : > { %14634 = vmatprep.mubr.msk.bf16.mxu0 %vm1253_vm0, %v16350_v10 }
  0x3e   : > { %14635 = vmatmul.mubr.msk.bf16.gmra.mrb[16].mxu0 %vm1253_vm0, %v16351_v11 }
  0x3f   : > { %14638 = vmatprep.mubr.msk.bf16.mxu0 %vm1253_vm0, %v16352_v12  ;;  %v16399_v12 = vld [vmem:[%s17078_s29 + $0x1c8] sm:$0xff]  }
  0x46   : > { %14639 = vmatmul.mubr.msk.bf16.gmra.mrb[20].mxu0 %vm1253_vm0, %v16353_v13 }
  0x47   : > { %14642 = vmatprep.mubr.msk.bf16.mxu0 %vm1253_vm0, %v16354_v14 }
  0x4e   : > { %14643 = vmatmul.mubr.msk.bf16.gmra.mrb[24].mxu0 %vm1253_vm0, %v16355_v15 }
  0x4f   : > { %14646 = vmatprep.mubr.msk.bf16.mxu0 %vm1253_vm0, %v16356_v16 }
  0x56   : > { %14647 = vmatmul.mubr.msk.bf16.gmra.mrb[28].mxu0 %vm1253_vm0, %v16357_v17  ;;  %v16400_v17 = vld [vmem:[%s17078_s29 + $0x1d0] sm:$0xff]  }
  0x57   : > { %14650 = vmatprep.mubr.msk.bf16.mxu0 %vm1253_vm0, %v16358_v18 }
  0x5e   : > { %14651 = vmatmul.mubr.msk.bf16.gmra.mrb[32].mxu0 %vm1253_vm0, %v16359_v19 }
  0x5f   : > { %14654 = vmatprep.mubr.msk.bf16.mxu0 %vm1253_vm0, %v16360_v20 }
  0x66   : > { %14655 = vmatmul.mubr.msk.bf16.gmra.mrb[36].mxu0 %vm1253_vm0, %v16361_v21 }
  0x67   : > { %14658 = vmatprep.mubr.msk.bf16.mxu0 %vm1253_vm0, %v16362_v22 }
  0x6e   : > { %14659 = vmatmul.mubr.msk.bf16.gmra.mrb[40].mxu0 %vm1253_vm0, %v16363_v23 }
  0x6f   : > { %14662 = vmatprep.mubr.msk.bf16.mxu0 %vm1253_vm0, %v16364_v24 }
  0x76   : > { %14663 = vmatmul.mubr.msk.bf16.gmra.mrb[44].mxu0 %vm1253_vm0, %v16365_v25 }
  0x77   : > { %14666 = vmatprep.mubr.msk.bf16.mxu0 %vm1253_vm0, %v16366_v26 }
  0x7e   : > { %14667 = vmatmul.mubr.msk.bf16.gmra.mrb[48].mxu0 %vm1253_vm0, %v16367_v27 }
  0x7f   : > { %14670 = vmatprep.mubr.msk.bf16.mxu0 %vm1253_vm0, %v16368_v29  ;;  %v16401_v29 = vld [vmem:[%s17078_s29 + $0x1d8] sm:$0xff]  }
  0x86   : > { %14671 = vmatmul.mubr.msk.bf16.gmra.mrb[52].mxu0 %vm1253_vm0, %v16369_v30 }
  0x87   : > { %14674 = vmatprep.mubr.msk.bf16.mxu0 %vm1253_vm0, %v16370_v31 }
  0x8e   : > { %14675 = vmatmul.mubr.msk.bf16.gmra.mrb[56].mxu0 %vm1253_vm0, %v16371_v32  ;;  %v16402_v32 = vld [vmem:[%s17078_s29 + $0x1e0] sm:$0xff]  }
  0x8f   : > { %14678 = vmatprep.mubr.msk.bf16.mxu0 %vm1253_vm0, %v16372_v33 }
  0x96   : > { %14679 = vmatmul.mubr.msk.bf16.gmra.mrb[60].mxu0 %vm1253_vm0, %v16373_v34 }
  0x97   : > { %14682 = vmatprep.mubr.msk.bf16.mxu0 %vm1253_vm0, %v16374_v35 }
  0x9e   : > { %14683 = vmatmul.mubr.msk.bf16.gmra.mrb[64].mxu0 %vm1253_vm0, %v16375_v36 }
  0x9f   : > { %14686 = vmatprep.mubr.msk.bf16.mxu0 %vm1253_vm0, %v16376_v37 }
  0xa6   : > { %14687 = vmatmul.mubr.msk.bf16.gmra.mrb[68].mxu0 %vm1253_vm0, %v16377_v38 }
  0xa7   : > { %14690 = vmatprep.mubr.msk.bf16.mxu0 %vm1253_vm0, %v16378_v39 }
  0xae   : > { %14691 = vmatmul.mubr.msk.bf16.gmra.mrb[72].mxu0 %vm1253_vm0, %v16379_v40 }
  0xaf   : > { %14694 = vmatprep.mubr.msk.bf16.mxu0 %vm1253_vm0, %v16380_v41 }
  0xb6   : > { %14695 = vmatmul.mubr.msk.bf16.gmra.mrb[76].mxu0 %vm1253_vm0, %v16381_v42 }
  0xb7   : > { %14698 = vmatprep.mubr.msk.bf16.mxu0 %vm1253_vm0, %v16382_v43 }
  0xbe   : > { %14699 = vmatmul.mubr.msk.bf16.gmra.mrb[80].mxu0 %vm1253_vm0, %v16383_v44 }
  0xbf   : > { %14702 = vmatprep.mubr.msk.bf16.mxu0 %vm1253_vm0, %v16384_v45  ;;  %v16403_v45 = vld [vmem:[%s17078_s29 + $0x1e8] sm:$0xff]  }
  0xc6   : > { %14703 = vmatmul.mubr.msk.bf16.gmra.mrb[84].mxu0 %vm1253_vm0, %v16385_v46 }
  0xc7   : > { %14706 = vmatprep.mubr.msk.bf16.mxu0 %vm1253_vm0, %v16386_v47 }
  0xce   : > { %14707 = vmatmul.mubr.msk.bf16.gmra.mrb[88].mxu0 %vm1253_vm0, %v16387_v48  ;;  %v16404_v48 = vld [vmem:[%s17078_s29 + $0x1f0] sm:$0xff]  }
  0xcf   : > { %14710 = vmatprep.mubr.msk.bf16.mxu0 %vm1253_vm0, %v16388_v49 }
  0xd6   : > { %14711 = vmatmul.mubr.msk.bf16.gmra.mrb[92].mxu0 %vm1253_vm0, %v16389_v50 }
  0xd7   : > { %14714 = vmatprep.mubr.msk.bf16.mxu0 %vm1253_vm0, %v16390_v51 }
  0xde   : > { %14715 = vmatmul.mubr.msk.bf16.gmra.mrb[96].mxu0 %vm1253_vm0, %v16391_v52 }
  0xdf   : > { %14718 = vmatprep.mubr.msk.bf16.mxu0 %vm1253_vm0, %v16392_v53 }
  0xe6   : > { %14719 = vmatmul.mubr.msk.bf16.gmra.mrb[100].mxu0 %vm1253_vm0, %v16393_v54 }
  0xe7   : > { %14722 = vmatprep.mubr.msk.bf16.mxu0 %vm1253_vm0, %v16394_v55 }
  0xee   : > { %14723 = vmatmul.mubr.msk.bf16.gmra.mrb[104].mxu0 %vm1253_vm0, %v16395_v56 }
  0xef   : > { %14726 = vmatprep.mubr.msk.bf16.mxu0 %vm1253_vm0, %v16396_v57 }
  0xf1   : > { %v14620_v59 = vpop.f32.mrb[0].mxu0 }
  0xf2   : > { %v1681_v60 = vadd.f32 %v14620_v59, %v17194_v58  ;;  %v1672_v61 = vpop.f32.mrb[1].mxu0 }
  0xf3   : > { %v1673_v63 = vadd.f32 %v17194_v58, %v1672_v61  ;;  %v14621_v0 = vpop.f32.mrb[2].mxu0 }
  0xf4   : > { %v1684_v2 = vadd.f32 %v14621_v0, %v17194_v58  ;;  %v1675_v3 = vpop.f32.mrb[3].mxu0  ;;  %v2697_v5 = vmax.f32 %v1681_v60, 0.0 }
  0xf5   : > { %v1676_v4 = vadd.f32 %v17194_v58, %v1675_v3  ;;  %v2695_v7 = vmax.f32 %v1673_v63, 0.0 }
  0xf6   : > { %v2698_v6 = vmax.f32 %v1684_v2, 0.0  ;;  %14727 = vmatmul.mubr.msk.bf16.gmra.mrb[108].mxu0 %vm1253_vm0, %v16397_v62  ;;  %v16405_v62 = vld [vmem:[%s17078_s29 + $0x1f8] sm:$0xff]  }
  0xf7   : > { %v2696_v8 = vmax.f32 %v1676_v4, 0.0  ;;  %14730 = vmatprep.mubr.msk.bf16.mxu0 %vm1253_vm0, %v16398_v1  ;;  %v16406_v1 = vld [vmem:[%s17078_s29 + $0x200] sm:$0xff]  }
  0xf8   : > { %v2952_v9 = vpack.c.bf16 %v2698_v6, %v2697_v5 }
  0xf9   : > { %v2951_v10 = vpack.c.bf16 %v2696_v8, %v2695_v7  ;;  %v14624_v11 = vpop.f32.mrb[4].mxu0 }
  0xfa   : > { %v1697_v13 = vadd.f32 %v14624_v11, %v17194_v58  ;;  %v1688_v14 = vpop.f32.mrb[5].mxu0 }
  0xfb   : > { %3537 = vmatpush1.bf16.msra.mxu0 %v2951_v10  ;;  %15770 = vmatpush1.bf16.msra.mxu1 %v2951_v10  ;;  %v1689_v15 = vadd.f32 %v17194_v58, %v1688_v14  ;;  %v14625_v16 = vpop.f32.mrb[6].mxu0  ;;  %v16407_v14 = vld [vmem:[%s17078_s29 + $0x208] sm:$0xff]  }
  0xfc   : > { %3538 = vmatprep.subr.bf16.mxu0 %v22633_v28  ;;  %15755 = vmatprep.subr.bf16.mxu1 %v22633_v28  ;;  %v1700_v18 = vadd.f32 %v14625_v16, %v17194_v58  ;;  %v1691_v19 = vpop.f32.mrb[7].mxu0  ;;  %v2701_v21 = vmax.f32 %v1697_v13, 0.0 }
  0xfd   : > { %v1692_v20 = vadd.f32 %v17194_v58, %v1691_v19  ;;  %v2699_v23 = vmax.f32 %v1689_v15, 0.0 }
  0xfe   : > { %14731 = vmatmul.mubr.msk.bf16.gmra.mrb[112].mxu0 %vm1253_vm0, %v16399_v12  ;;  %v2702_v22 = vmax.f32 %v1700_v18, 0.0 }
  0xff   : > { %3539 = vmatpush1.bf16.msra.mxu0 %v2952_v9  ;;  %15771 = vmatpush1.bf16.msra.mxu1 %v2952_v9  ;;  %v2700_v24 = vmax.f32 %v1692_v20, 0.0 }
 0x100   : > { %14734 = vmatprep.mubr.msk.bf16.mxu0 %vm1253_vm0, %v16400_v17  ;;  %v2954_v25 = vpack.c.bf16 %v2702_v22, %v2701_v21  ;;  %3540 = vmatprep.subr.bf16.mxu0 %v22633_v28  ;;  %v16408_v17 = vld [vmem:[%s17078_s29 + $0x210] sm:$0xff]  }
 0x101   : > { %v2953_v26 = vpack.c.bf16 %v2700_v24, %v2699_v23  ;;  %15756 = vmatprep.subr.bf16.mxu1 %v22633_v28  ;;  %v14628_v27 = vpop.f32.mrb[8].mxu0 }
 0x102   : > { %v1713_v30 = vadd.f32 %v14628_v27, %v17194_v58  ;;  %v1704_v31 = vpop.f32.mrb[9].mxu0 }
 0x103   : > { %3541 = vmatpush1.bf16.msra.mxu0 %v2953_v26  ;;  %15772 = vmatpush1.bf16.msra.mxu1 %v2953_v26  ;;  %v1705_v33 = vadd.f32 %v17194_v58, %v1704_v31  ;;  %v14629_v34 = vpop.f32.mrb[10].mxu0  ;;  %v16409_v31 = vld [vmem:[%s17078_s29 + $0x218] sm:$0xff]  }
 0x104   : > { %3542 = vmatprep.subr.bf16.mxu0 %v22633_v28  ;;  %15757 = vmatprep.subr.bf16.mxu1 %v22633_v28  ;;  %v1716_v35 = vadd.f32 %v14629_v34, %v17194_v58  ;;  %v1707_v36 = vpop.f32.mrb[11].mxu0  ;;  %v2705_v38 = vmax.f32 %v1713_v30, 0.0  ;;  %v16410_v34 = vld [vmem:[%s17078_s29 + $0x220] sm:$0xff]  }
 0x105   : > { %v1708_v37 = vadd.f32 %v17194_v58, %v1707_v36  ;;  %v2703_v40 = vmax.f32 %v1705_v33, 0.0 }
 0x106   : > { %14735 = vmatmul.mubr.msk.bf16.gmra.mrb[116].mxu0 %vm1253_vm0, %v16401_v29  ;;  %v2706_v39 = vmax.f32 %v1716_v35, 0.0 }
 0x107   : > { %14738 = vmatprep.mubr.msk.bf16.mxu0 %vm1253_vm0, %v16402_v32  ;;  %3543 = vmatpush1.bf16.msra.mxu0 %v2954_v25  ;;  %v2704_v41 = vmax.f32 %v1708_v37, 0.0 }
 0x108   : > { %15773 = vmatpush1.bf16.msra.mxu1 %v2954_v25  ;;  %v2956_v42 = vpack.c.bf16 %v2706_v39, %v2705_v38  ;;  %3544 = vmatprep.subr.bf16.mxu0 %v22633_v28 }
 0x109   : > { %v2955_v43 = vpack.c.bf16 %v2704_v41, %v2703_v40  ;;  %15758 = vmatprep.subr.bf16.mxu1 %v22633_v28  ;;  %v14632_v44 = vpop.f32.mrb[12].mxu0 }
 0x10a   : > { %v1729_v46 = vadd.f32 %v14632_v44, %v17194_v58  ;;  %v1720_v47 = vpop.f32.mrb[13].mxu0 }
 0x10b   : > { %3545 = vmatpush1.bf16.msra.mxu0 %v2955_v43  ;;  %v1721_v49 = vadd.f32 %v17194_v58, %v1720_v47  ;;  %v14633_v50 = vpop.f32.mrb[14].mxu0  ;;  %v16411_v47 = vld [vmem:[%s17078_s29 + $0x228] sm:$0xff]  }
 0x10c   : > { %15774 = vmatpush1.bf16.msra.mxu1 %v2955_v43  ;;  %3546 = vmatprep.subr.bf16.mxu0 %v22633_v28  ;;  %v1732_v51 = vadd.f32 %v14633_v50, %v17194_v58  ;;  %v1723_v52 = vpop.f32.mrb[15].mxu0  ;;  %v2709_v54 = vmax.f32 %v1729_v46, 0.0  ;;  %v16412_v50 = vld [vmem:[%s17078_s29 + $0x230] sm:$0xff]  }
 0x10d   : > { %15759 = vmatprep.subr.bf16.mxu1 %v22633_v28  ;;  %v1724_v53 = vadd.f32 %v17194_v58, %v1723_v52  ;;  %v2707_v56 = vmax.f32 %v1721_v49, 0.0 }
 0x10e   : > { %14739 = vmatmul.mubr.msk.bf16.gmra.mrb[120].mxu0 %vm1253_vm0, %v16403_v45  ;;  %v2710_v55 = vmax.f32 %v1732_v51, 0.0 }
 0x10f   : > { %14742 = vmatprep.mubr.msk.bf16.mxu0 %vm1253_vm0, %v16404_v48  ;;  %3547 = vmatpush1.bf16.msra.mxu0 %v2956_v42  ;;  %v2708_v57 = vmax.f32 %v1724_v53, 0.0 }
 0x110   : > { %15775 = vmatpush1.bf16.msra.mxu1 %v2956_v42  ;;  %v2958_v59 = vpack.c.bf16 %v2710_v55, %v2709_v54  ;;  %3548 = vmatprep.subr.bf16.mxu0 %v22633_v28 }
 0x111   : > { %v2957_v60 = vpack.c.bf16 %v2708_v57, %v2707_v56  ;;  %15760 = vmatprep.subr.bf16.mxu1 %v22633_v28  ;;  %v14636_v61 = vpop.f32.mrb[16].mxu0 }
 0x112   : > { %v1745_v63 = vadd.f32 %v14636_v61, %v17194_v58  ;;  %v1736_v0 = vpop.f32.mrb[17].mxu0 }
 0x113   : > { %3549 = vmatpush1.bf16.msra.mxu0 %v2957_v60  ;;  %v1737_v2 = vadd.f32 %v17194_v58, %v1736_v0  ;;  %v14637_v3 = vpop.f32.mrb[18].mxu0  ;;  %v16413_v0 = vld [vmem:[%s17078_s29 + $0x238] sm:$0xff]  }
 0x114   : > { %15776 = vmatpush1.bf16.msra.mxu1 %v2957_v60  ;;  %3550 = vmatprep.subr.bf16.mxu0 %v22633_v28  ;;  %v1748_v4 = vadd.f32 %v14637_v3, %v17194_v58  ;;  %v1739_v5 = vpop.f32.mrb[19].mxu0  ;;  %v2713_v7 = vmax.f32 %v1745_v63, 0.0  ;;  %v16414_v3 = vld [vmem:[%s17078_s29 + $0x240] sm:$0xff]  }
 0x115   : > { %15761 = vmatprep.subr.bf16.mxu1 %v22633_v28  ;;  %v1740_v6 = vadd.f32 %v17194_v58, %v1739_v5  ;;  %v2711_v9 = vmax.f32 %v1737_v2, 0.0 }
 0x116   : > { %14743 = vmatmul.mubr.msk.bf16.gmra.mrb[124].mxu0 %vm1253_vm0, %v16405_v62  ;;  %v2714_v8 = vmax.f32 %v1748_v4, 0.0 }
 0x117   : > { %14746 = vmatprep.mubr.msk.bf16.mxu0 %vm1253_vm0, %v16406_v1  ;;  %3551 = vmatpush1.bf16.msra.mxu0 %v2958_v59  ;;  %v2712_v10 = vmax.f32 %v1740_v6, 0.0 }
 0x118   : > { %15777 = vmatpush1.bf16.msra.mxu1 %v2958_v59  ;;  %v2960_v11 = vpack.c.bf16 %v2714_v8, %v2713_v7  ;;  %3552 = vmatprep.subr.bf16.mxu0 %v22633_v28 }
 0x119   : > { %v2959_v12 = vpack.c.bf16 %v2712_v10, %v2711_v9  ;;  %v14640_v13 = vpop.f32.mrb[20].mxu0  ;;  %15762 = vmatprep.subr.bf16.mxu1 %v22633_v28 }
 0x11a   : > { %v1761_v15 = vadd.f32 %v14640_v13, %v17194_v58  ;;  %v1752_v16 = vpop.f32.mrb[21].mxu0 }
 0x11b   : > { %v1753_v18 = vadd.f32 %v17194_v58, %v1752_v16  ;;  %v14641_v19 = vpop.f32.mrb[22].mxu0  ;;  %3553 = vmatpush1.bf16.msra.mxu0 %v2959_v12  ;;  %v16415_v16 = vld [vmem:[%s17078_s29 + $0x248] sm:$0xff]  }
 0x11c   : > { %v1764_v20 = vadd.f32 %v14641_v19, %v17194_v58  ;;  %15778 = vmatpush1.bf16.msra.mxu1 %v2959_v12  ;;  %v1755_v21 = vpop.f32.mrb[23].mxu0  ;;  %3554 = vmatprep.subr.bf16.mxu0 %v22633_v28  ;;  %v2717_v23 = vmax.f32 %v1761_v15, 0.0  ;;  %v16416_v19 = vld [vmem:[%s17078_s29 + $0x250] sm:$0xff]  }
 0x11d   : > { %v1756_v22 = vadd.f32 %v17194_v58, %v1755_v21  ;;  %15763 = vmatprep.subr.bf16.mxu1 %v22633_v28  ;;  %v2715_v25 = vmax.f32 %v1753_v18, 0.0 }
 0x11e   : > { %14747 = vmatmul.mubr.msk.bf16.gmra.mrb[128].mxu0 %vm1253_vm0, %v16407_v14  ;;  %v2718_v24 = vmax.f32 %v1764_v20, 0.0 }
 0x11f   : > { %14750 = vmatprep.mubr.msk.bf16.mxu0 %vm1253_vm0, %v16408_v17  ;;  %v2716_v26 = vmax.f32 %v1756_v22, 0.0  ;;  %3555 = vmatpush1.bf16.msra.mxu0 %v2960_v11 }
 0x120   : > { %v2962_v27 = vpack.c.bf16 %v2718_v24, %v2717_v23  ;;  %15779 = vmatpush1.bf16.msra.mxu1 %v2960_v11  ;;  %3556 = vmatprep.subr.bf16.mxu0 %v22633_v28 }
 0x121   : > { %v2961_v29 = vpack.c.bf16 %v2716_v26, %v2715_v25  ;;  %v14644_v30 = vpop.f32.mrb[24].mxu0  ;;  %15764 = vmatprep.subr.bf16.mxu1 %v22633_v28 }
 0x122   : > { %v1777_v32 = vadd.f32 %v14644_v30, %v17194_v58  ;;  %v1768_v33 = vpop.f32.mrb[25].mxu0 }
 0x123   : > { %v1769_v35 = vadd.f32 %v17194_v58, %v1768_v33  ;;  %v14645_v36 = vpop.f32.mrb[26].mxu0  ;;  %3557 = vmatpush1.bf16.msra.mxu0 %v2961_v29  ;;  %v16417_v33 = vld [vmem:[%s17078_s29 + $0x258] sm:$0xff]  }
 0x124   : > { %v1780_v37 = vadd.f32 %v14645_v36, %v17194_v58  ;;  %15780 = vmatpush1.bf16.msra.mxu1 %v2961_v29  ;;  %v1771_v38 = vpop.f32.mrb[27].mxu0  ;;  %3558 = vmatprep.subr.bf16.mxu0 %v22633_v28  ;;  %v2721_v40 = vmax.f32 %v1777_v32, 0.0  ;;  %v16418_v36 = vld [vmem:[%s17078_s29 + $0x260] sm:$0xff]  }
 0x125   : > { %v1772_v39 = vadd.f32 %v17194_v58, %v1771_v38  ;;  %15765 = vmatprep.subr.bf16.mxu1 %v22633_v28  ;;  %v2719_v42 = vmax.f32 %v1769_v35, 0.0 }
 0x126   : > { %14751 = vmatmul.mubr.msk.bf16.gmra.mrb[132].mxu0 %vm1253_vm0, %v16409_v31  ;;  %v2722_v41 = vmax.f32 %v1780_v37, 0.0 }
 0x127   : > { %14754 = vmatprep.mubr.msk.bf16.mxu0 %vm1253_vm0, %v16410_v34  ;;  %v2720_v43 = vmax.f32 %v1772_v39, 0.0  ;;  %3559 = vmatpush1.bf16.msra.mxu0 %v2962_v27 }
 0x128   : > { %v2964_v44 = vpack.c.bf16 %v2722_v41, %v2721_v40  ;;  %15781 = vmatpush1.bf16.msra.mxu1 %v2962_v27  ;;  %3560 = vmatprep.subr.bf16.mxu0 %v22633_v28 }
 0x129   : > { %v2963_v45 = vpack.c.bf16 %v2720_v43, %v2719_v42  ;;  %v14648_v46 = vpop.f32.mrb[28].mxu0  ;;  %15766 = vmatprep.subr.bf16.mxu1 %v22633_v28 }
 0x12a   : > { %v1793_v48 = vadd.f32 %v14648_v46, %v17194_v58  ;;  %v1784_v49 = vpop.f32.mrb[29].mxu0 }
 0x12b   : > { %v1785_v51 = vadd.f32 %v17194_v58, %v1784_v49  ;;  %v14649_v52 = vpop.f32.mrb[30].mxu0  ;;  %3561 = vmatpush1.bf16.msra.mxu0 %v2963_v45  ;;  %v16419_v49 = vld [vmem:[%s17078_s29 + $0x268] sm:$0xff]  }
 0x12c   : > { %v1796_v53 = vadd.f32 %v14649_v52, %v17194_v58  ;;  %15782 = vmatpush1.bf16.msra.mxu1 %v2963_v45  ;;  %v1787_v54 = vpop.f32.mrb[31].mxu0  ;;  %3562 = vmatprep.subr.bf16.mxu0 %v22633_v28  ;;  %v2725_v56 = vmax.f32 %v1793_v48, 0.0  ;;  %v16420_v52 = vld [vmem:[%s17078_s29 + $0x270] sm:$0xff]  }
 0x12d   : > { %v1788_v55 = vadd.f32 %v17194_v58, %v1787_v54  ;;  %15767 = vmatprep.subr.bf16.mxu1 %v22633_v28  ;;  %v2723_v59 = vmax.f32 %v1785_v51, 0.0 }
 0x12e   : > { %14755 = vmatmul.mubr.msk.bf16.gmra.mrb[136].mxu0 %vm1253_vm0, %v16411_v47  ;;  %v2726_v57 = vmax.f32 %v1796_v53, 0.0 }
 0x12f   : > { %14758 = vmatprep.mubr.msk.bf16.mxu0 %vm1253_vm0, %v16412_v50  ;;  %v2724_v60 = vmax.f32 %v1788_v55, 0.0  ;;  %3563 = vmatpush1.bf16.msra.mxu0 %v2964_v44 }
 0x130   : > { %v2966_v61 = vpack.c.bf16 %v2726_v57, %v2725_v56  ;;  %15783 = vmatpush1.bf16.msra.mxu1 %v2964_v44  ;;  %3564 = vmatprep.subr.bf16.mxu0 %v22633_v28 }
 0x131   : > { %v2965_v62 = vpack.c.bf16 %v2724_v60, %v2723_v59  ;;  %15768 = vmatprep.subr.bf16.mxu1 %v22633_v28  ;;  %v14652_v63 = vpop.f32.mrb[32].mxu0 }
 0x132   : > { %v1809_v1 = vadd.f32 %v14652_v63, %v17194_v58  ;;  %v1800_v2 = vpop.f32.mrb[33].mxu0 }
 0x133   : > { %3565 = vmatpush1.bf16.msra.mxu0 %v2965_v62  ;;  %v1801_v4 = vadd.f32 %v17194_v58, %v1800_v2  ;;  %v14653_v5 = vpop.f32.mrb[34].mxu0  ;;  %v16421_v2 = vld [vmem:[%s17078_s29 + $0x278] sm:$0xff]  }
 0x134   : > { %15784 = vmatpush1.bf16.msra.mxu1 %v2965_v62  ;;  %3566 = vmatprep.subr.bf16.mxu0 %v22633_v28  ;;  %v1812_v6 = vadd.f32 %v14653_v5, %v17194_v58  ;;  %v1803_v7 = vpop.f32.mrb[35].mxu0  ;;  %v2729_v9 = vmax.f32 %v1809_v1, 0.0  ;;  %v16422_v5 = vld [vmem:[%s17078_s29 + $0x280] sm:$0xff]  }
 0x135   : > { %15769 = vmatprep.subr.bf16.mxu1 %v22633_v28  ;;  %v1804_v8 = vadd.f32 %v17194_v58, %v1803_v7  ;;  %v2727_v11 = vmax.f32 %v1801_v4, 0.0 }
 0x136   : > { %14759 = vmatmul.mubr.msk.bf16.gmra.mrb[140].mxu0 %vm1253_vm0, %v16413_v0  ;;  %v2730_v10 = vmax.f32 %v1812_v6, 0.0 }
 0x137   : > { %14762 = vmatprep.mubr.msk.bf16.mxu0 %vm1253_vm0, %v16414_v3  ;;  %3567 = vmatpush1.bf16.msra.mxu0 %v2966_v61  ;;  %v2728_v12 = vmax.f32 %v1804_v8, 0.0 }
 0x138   : > { %v17299_v13 = vpack.c.bf16 %v2730_v10, %v2729_v9  ;;  %15785 = vmatpush1.bf16.msra.mxu1 %v2966_v61  ;;  %4823 = vmatprep.subr.bf16.mxu0 %v22633_v28  ;;  %v16462_v28 = vld [vmem:[%s17078_s29 + $0x3c0] sm:$0xff]  }
 0x139   : > { %v17302_v14 = vpack.c.bf16 %v2728_v12, %v2727_v11  ;;  %v14656_v15 = vpop.f32.mrb[36].mxu0 }
 0x13a   : > { %v1825_v17 = vadd.f32 %v14656_v15, %v17194_v58  ;;  %v1816_v18 = vpop.f32.mrb[37].mxu0 }
 0x13b   : > { %v1817_v20 = vadd.f32 %v17194_v58, %v1816_v18  ;;  %v14657_v21 = vpop.f32.mrb[38].mxu0 }
 0x13c   : > { %v1828_v22 = vadd.f32 %v14657_v21, %v17194_v58  ;;  %v1819_v23 = vpop.f32.mrb[39].mxu0  ;;  %v2733_v25 = vmax.f32 %v1825_v17, 0.0 }
 0x13d   : > { %v1820_v24 = vadd.f32 %v17194_v58, %v1819_v23  ;;  %v2731_v27 = vmax.f32 %v1817_v20, 0.0  ;;  %v16423_v20 = vld [vmem:[%s17078_s29 + $0x288] sm:$0xff]   ;;  %v16424_v23 = vld [vmem:[%s17078_s29 + $0x290] sm:$0xff]  }
 0x13e   : > { %14763 = vmatmul.mubr.msk.bf16.gmra.mrb[144].mxu0 %vm1253_vm0, %v16415_v16  ;;  %v2734_v26 = vmax.f32 %v1828_v22, 0.0 }
 0x13f   : > { %14766 = vmatprep.mubr.msk.bf16.mxu0 %vm1253_vm0, %v16416_v19  ;;  %v2732_v29 = vmax.f32 %v1820_v24, 0.0 }
 0x140   : > { %v17312_v30 = vpack.c.bf16 %v2734_v26, %v2733_v25 }
 0x141   : > { %v17314_v31 = vpack.c.bf16 %v2732_v29, %v2731_v27  ;;  %v14660_v32 = vpop.f32.mrb[40].mxu0 }
 0x142   : > { %v1841_v34 = vadd.f32 %v14660_v32, %v17194_v58  ;;  %v1832_v35 = vpop.f32.mrb[41].mxu0 }
 0x143   : > { %v1833_v37 = vadd.f32 %v17194_v58, %v1832_v35  ;;  %v14661_v38 = vpop.f32.mrb[42].mxu0 }
 0x144   : > { %v1844_v39 = vadd.f32 %v14661_v38, %v17194_v58  ;;  %v1835_v40 = vpop.f32.mrb[43].mxu0  ;;  %v2737_v42 = vmax.f32 %v1841_v34, 0.0 }
 0x145   : > { %v1836_v41 = vadd.f32 %v17194_v58, %v1835_v40  ;;  %v2735_v44 = vmax.f32 %v1833_v37, 0.0 }
 0x146   : > { %14767 = vmatmul.mubr.msk.bf16.gmra.mrb[148].mxu0 %vm1253_vm0, %v16417_v33  ;;  %v2738_v43 = vmax.f32 %v1844_v39, 0.0  ;;  %v16425_v39 = vld [vmem:[%s17078_s29 + $0x298] sm:$0xff]  }
 0x147   : > { %14770 = vmatprep.mubr.msk.bf16.mxu0 %vm1253_vm0, %v16418_v36  ;;  %v2736_v45 = vmax.f32 %v1836_v41, 0.0 }
 0x148   : > { %v17324_v46 = vpack.c.bf16 %v2738_v43, %v2737_v42  ;;  %v16426_v42 = vld [vmem:[%s17078_s29 + $0x2a0] sm:$0xff]  }
 0x149   : > { %v17326_v47 = vpack.c.bf16 %v2736_v45, %v2735_v44  ;;  %v14664_v48 = vpop.f32.mrb[44].mxu0 }
 0x14a   : > { %v1857_v50 = vadd.f32 %v14664_v48, %v17194_v58  ;;  %v1848_v51 = vpop.f32.mrb[45].mxu0 }
 0x14b   : > { %v1849_v53 = vadd.f32 %v17194_v58, %v1848_v51  ;;  %v14665_v54 = vpop.f32.mrb[46].mxu0 }
 0x14c   : > { %v1860_v55 = vadd.f32 %v14665_v54, %v17194_v58  ;;  %v1851_v56 = vpop.f32.mrb[47].mxu0  ;;  %v2741_v59 = vmax.f32 %v1857_v50, 0.0 }
 0x14d   : > { %v1852_v57 = vadd.f32 %v17194_v58, %v1851_v56  ;;  %v2739_v61 = vmax.f32 %v1849_v53, 0.0 }
 0x14e   : > { %14771 = vmatmul.mubr.msk.bf16.gmra.mrb[152].mxu0 %vm1253_vm0, %v16419_v49  ;;  %v2742_v60 = vmax.f32 %v1860_v55, 0.0 }
 0x14f   : > { %14774 = vmatprep.mubr.msk.bf16.mxu0 %vm1253_vm0, %v16420_v52  ;;  %v2740_v62 = vmax.f32 %v1852_v57, 0.0  ;;  %v16427_v57 = vld [vmem:[%s17078_s29 + $0x2a8] sm:$0xff]  }
 0x150   : > { %v17336_v63 = vpack.c.bf16 %v2742_v60, %v2741_v59 }
 0x151   : > { %v17338_v0 = vpack.c.bf16 %v2740_v62, %v2739_v61  ;;  %v14668_v1 = vpop.f32.mrb[48].mxu0  ;;  %v16428_v61 = vld [vmem:[%s17078_s29 + $0x2b0] sm:$0xff]  }
 0x152   : > { %v1873_v3 = vadd.f32 %v14668_v1, %v17194_v58  ;;  %v1864_v4 = vpop.f32.mrb[49].mxu0 }
 0x153   : > { %v1865_v6 = vadd.f32 %v17194_v58, %v1864_v4  ;;  %v14669_v7 = vpop.f32.mrb[50].mxu0 }
 0x154   : > { %v1876_v8 = vadd.f32 %v14669_v7, %v17194_v58  ;;  %v1867_v9 = vpop.f32.mrb[51].mxu0  ;;  %v2745_v11 = vmax.f32 %v1873_v3, 0.0 }
 0x155   : > { %v1868_v10 = vadd.f32 %v17194_v58, %v1867_v9  ;;  %v2743_v15 = vmax.f32 %v1865_v6, 0.0 }
 0x156   : > { %14775 = vmatmul.mubr.msk.bf16.gmra.mrb[156].mxu0 %vm1253_vm0, %v16421_v2  ;;  %v2746_v12 = vmax.f32 %v1876_v8, 0.0 }
 0x157   : > { %14778 = vmatprep.mubr.msk.bf16.mxu0 %vm1253_vm0, %v16422_v5  ;;  %v2744_v16 = vmax.f32 %v1868_v10, 0.0 }
 0x158   : > { %v17348_v17 = vpack.c.bf16 %v2746_v12, %v2745_v11  ;;  %v16429_v12 = vld [vmem:[%s17078_s29 + $0x2b8] sm:$0xff]  }
 0x159   : > { %v17350_v18 = vpack.c.bf16 %v2744_v16, %v2743_v15  ;;  %v14672_v19 = vpop.f32.mrb[52].mxu0 }
 0x15a   : > { %v1889_v21 = vadd.f32 %v14672_v19, %v17194_v58  ;;  %v1880_v22 = vpop.f32.mrb[53].mxu0  ;;  %v16430_v19 = vld [vmem:[%s17078_s29 + $0x2c0] sm:$0xff]  }
 0x15b   : > { %v1881_v24 = vadd.f32 %v17194_v58, %v1880_v22  ;;  %v14673_v25 = vpop.f32.mrb[54].mxu0 }
 0x15c   : > { %v1892_v26 = vadd.f32 %v14673_v25, %v17194_v58  ;;  %v1883_v27 = vpop.f32.mrb[55].mxu0  ;;  %v2749_v32 = vmax.f32 %v1889_v21, 0.0 }
 0x15d   : > { %v1884_v29 = vadd.f32 %v17194_v58, %v1883_v27  ;;  %v2747_v34 = vmax.f32 %v1881_v24, 0.0 }
 0x15e   : > { %14779 = vmatmul.mubr.msk.bf16.gmra.mrb[160].mxu0 %vm1253_vm0, %v16423_v20  ;;  %v2750_v33 = vmax.f32 %v1892_v26, 0.0 }
 0x15f   : > { %14782 = vmatprep.mubr.msk.bf16.mxu0 %vm1253_vm0, %v16424_v23  ;;  %v2748_v35 = vmax.f32 %v1884_v29, 0.0 }
 0x160   : > { %v17360_v36 = vpack.c.bf16 %v2750_v33, %v2749_v32 }
 0x161   : > { %v17362_v37 = vpack.c.bf16 %v2748_v35, %v2747_v34  ;;  %v14676_v38 = vpop.f32.mrb[56].mxu0  ;;  %v16431_v35 = vld [vmem:[%s17078_s29 + $0x2c8] sm:$0xff]  }
 0x162   : > { %v1905_v40 = vadd.f32 %v14676_v38, %v17194_v58  ;;  %v1896_v41 = vpop.f32.mrb[57].mxu0 }
 0x163   : > { %v1897_v43 = vadd.f32 %v17194_v58, %v1896_v41  ;;  %v14677_v44 = vpop.f32.mrb[58].mxu0 }
 0x164   : > { %v1908_v45 = vadd.f32 %v14677_v44, %v17194_v58  ;;  %v1899_v48 = vpop.f32.mrb[59].mxu0  ;;  %v2753_v50 = vmax.f32 %v1905_v40, 0.0  ;;  %v16432_v40 = vld [vmem:[%s17078_s29 + $0x2d0] sm:$0xff]  }
 0x165   : > { %v1900_v49 = vadd.f32 %v17194_v58, %v1899_v48  ;;  %v2751_v52 = vmax.f32 %v1897_v43, 0.0 }
 0x166   : > { %14783 = vmatmul.mubr.msk.bf16.gmra.mrb[164].mxu0 %vm1253_vm0, %v16425_v39  ;;  %v2754_v51 = vmax.f32 %v1908_v45, 0.0 }
 0x167   : > { %14786 = vmatprep.mubr.msk.bf16.mxu0 %vm1253_vm0, %v16426_v42  ;;  %v2752_v53 = vmax.f32 %v1900_v49, 0.0 }
 0x168   : > { %v17372_v54 = vpack.c.bf16 %v2754_v51, %v2753_v50 }
 0x169   : > { %v17374_v55 = vpack.c.bf16 %v2752_v53, %v2751_v52  ;;  %v14680_v56 = vpop.f32.mrb[60].mxu0 }
 0x16a   : > { %v1921_v59 = vadd.f32 %v14680_v56, %v17194_v58  ;;  %v1912_v60 = vpop.f32.mrb[61].mxu0 }
 0x16b   : > { %v1913_v62 = vadd.f32 %v17194_v58, %v1912_v60  ;;  %v14681_v1 = vpop.f32.mrb[62].mxu0 }
 0x16c   : > { %v1924_v2 = vadd.f32 %v14681_v1, %v17194_v58  ;;  %v1915_v3 = vpop.f32.mrb[63].mxu0  ;;  %v2757_v5 = vmax.f32 %v1921_v59, 0.0 }
 0x16d   : > { %v1916_v4 = vadd.f32 %v17194_v58, %v1915_v3  ;;  %v2755_v7 = vmax.f32 %v1913_v62, 0.0 }
 0x16e   : > { %14787 = vmatmul.mubr.msk.bf16.gmra.mrb[168].mxu0 %vm1253_vm0, %v16427_v57  ;;  %v2758_v6 = vmax.f32 %v1924_v2, 0.0  ;;  %v16433_v57 = vld [vmem:[%s17078_s29 + $0x2d8] sm:$0xff]  }
 0x16f   : > { %14790 = vmatprep.mubr.msk.bf16.mxu0 %vm1253_vm0, %v16428_v61  ;;  %v2756_v8 = vmax.f32 %v1916_v4, 0.0  ;;  %v16434_v61 = vld [vmem:[%s17078_s29 + $0x2e0] sm:$0xff]  }
 0x170   : > { %v17384_v9 = vpack.c.bf16 %v2758_v6, %v2757_v5 }
 0x171   : > { %v17386_v10 = vpack.c.bf16 %v2756_v8, %v2755_v7  ;;  %v14684_v11 = vpop.f32.mrb[64].mxu0 }
 0x172   : > { %v1937_v15 = vadd.f32 %v14684_v11, %v17194_v58  ;;  %v1928_v16 = vpop.f32.mrb[65].mxu0 }
 0x173   : > { %v1929_v20 = vadd.f32 %v17194_v58, %v1928_v16  ;;  %v14685_v21 = vpop.f32.mrb[66].mxu0  ;;  %v16435_v16 = vld [vmem:[%s17078_s29 + $0x2e8] sm:$0xff]  }
 0x174   : > { %v1940_v22 = vadd.f32 %v14685_v21, %v17194_v58  ;;  %v1931_v23 = vpop.f32.mrb[67].mxu0  ;;  %v2761_v25 = vmax.f32 %v1937_v15, 0.0  ;;  %v16436_v21 = vld [vmem:[%s17078_s29 + $0x2f0] sm:$0xff]  }
 0x175   : > { %v1932_v24 = vadd.f32 %v17194_v58, %v1931_v23  ;;  %v2759_v27 = vmax.f32 %v1929_v20, 0.0 }
 0x176   : > { %14791 = vmatmul.mubr.msk.bf16.gmra.mrb[172].mxu0 %vm1253_vm0, %v16429_v12  ;;  %v2762_v26 = vmax.f32 %v1940_v22, 0.0 }
 0x177   : > { %14794 = vmatprep.mubr.msk.bf16.mxu0 %vm1253_vm0, %v16430_v19  ;;  %v2760_v29 = vmax.f32 %v1932_v24, 0.0 }
 0x178   : > { %v17396_v32 = vpack.c.bf16 %v2762_v26, %v2761_v25 }
 0x179   : > { %v17398_v33 = vpack.c.bf16 %v2760_v29, %v2759_v27  ;;  %v14688_v34 = vpop.f32.mrb[68].mxu0 }
 0x17a   : > { %22843 = vst [vmem:[#allocation5_spill] sm:$0xff] %v17396_v32  ;;  %v1953_v38 = vadd.f32 %v14688_v34, %v17194_v58  ;;  %v1944_v39 = vpop.f32.mrb[69].mxu0  ;;  %v16469_v34 = vld [vmem:[%s22626_s3 + $0xb4] ss:$8 sps:$4 sm:$0xff]  }
 0x17b   : > { %22844 = vst [vmem:[#allocation6_spill] sm:$0xff] %v17398_v33  ;;  %v1945_v41 = vadd.f32 %v17194_v58, %v1944_v39  ;;  %v14689_v42 = vpop.f32.mrb[70].mxu0  ;;  %3656 = vmatprep.mubr.bf16.mxu1 %v16469_v34 }
 0x17c   : > { %v1956_v43 = vadd.f32 %v14689_v42, %v17194_v58  ;;  %v1947_v44 = vpop.f32.mrb[71].mxu0  ;;  %v2765_v48 = vmax.f32 %v1953_v38, 0.0  ;;  %v16437_v42 = vld [vmem:[%s17078_s29 + $0x2f8] sm:$0xff]  }
 0x17d   : > { %v1948_v45 = vadd.f32 %v17194_v58, %v1947_v44  ;;  %v2763_v50 = vmax.f32 %v1945_v41, 0.0 }
 0x17e   : > { %14795 = vmatmul.mubr.msk.bf16.gmra.mrb[176].mxu0 %vm1253_vm0, %v16431_v35  ;;  %v2766_v49 = vmax.f32 %v1956_v43, 0.0  ;;  %v16472_v43 = vld [vmem:[%s22626_s3 + $0xb0] ss:$8 sps:$4 sm:$0xff]  }
 0x17f   : > { %14798 = vmatprep.mubr.msk.bf16.mxu0 %vm1253_vm0, %v16432_v40  ;;  %v2764_v51 = vmax.f32 %v1948_v45, 0.0  ;;  %3657 = vmatmul.mubr.bf16.vlgmr.msra.gmra.mrb[0].mxu1 %v16472_v43 }
 0x180   : > { %v17408_v52 = vpack.c.bf16 %v2766_v49, %v2765_v48  ;;  %v16438_v48 = vld [vmem:[%s17078_s29 + $0x300] sm:$0xff]  }
 0x181   : > { %v17410_v53 = vpack.c.bf16 %v2764_v51, %v2763_v50  ;;  %v14692_v56 = vpop.f32.mrb[72].mxu0 }
 0x182   : > { %22845 = vst [vmem:[#allocation7_spill] sm:$0xff] %v17408_v52  ;;  %v1969_v59 = vadd.f32 %v14692_v56, %v17194_v58  ;;  %v1960_v60 = vpop.f32.mrb[73].mxu0 }
 0x183   : > { %22846 = vst [vmem:[#allocation8_spill] sm:$0xff] %v17410_v53  ;;  %v1961_v62 = vadd.f32 %v17194_v58, %v1960_v60  ;;  %v14693_v1 = vpop.f32.mrb[74].mxu0 }
 0x184   : > { %v1972_v2 = vadd.f32 %v14693_v1, %v17194_v58  ;;  %v1963_v3 = vpop.f32.mrb[75].mxu0  ;;  %v2769_v5 = vmax.f32 %v1969_v59, 0.0 }
 0x185   : > { %v1964_v4 = vadd.f32 %v17194_v58, %v1963_v3  ;;  %v2767_v7 = vmax.f32 %v1961_v62, 0.0 }
 0x186   : > { %14799 = vmatmul.mubr.msk.bf16.gmra.mrb[180].mxu0 %vm1253_vm0, %v16433_v57  ;;  %v2770_v6 = vmax.f32 %v1972_v2, 0.0 }
 0x187   : > { %14802 = vmatprep.mubr.msk.bf16.mxu0 %vm1253_vm0, %v16434_v61  ;;  %v2768_v8 = vmax.f32 %v1964_v4, 0.0  ;;  %v16476_v61 = vld [vmem:[%s22626_s3 + $0xc4] ss:$8 sps:$4 sm:$0xff]  }
 0x188   : > { %v17420_v11 = vpack.c.bf16 %v2770_v6, %v2769_v5  ;;  %3664 = vmatprep.mubr.bf16.mxu1 %v16476_v61  ;;  %v16439_v5 = vld [vmem:[%s17078_s29 + $0x308] sm:$0xff]  }
 0x189   : > { %v17422_v12 = vpack.c.bf16 %v2768_v8, %v2767_v7  ;;  %v14696_v15 = vpop.f32.mrb[76].mxu0  ;;  %v16478_v6 = vld [vmem:[%s22626_s3 + $0xc0] ss:$8 sps:$4 sm:$0xff]  }
 0x18a   : > { %22847 = vst [vmem:[#allocation9_spill] sm:$0xff] %v17420_v11  ;;  %v1985_v19 = vadd.f32 %v14696_v15, %v17194_v58  ;;  %v1976_v20 = vpop.f32.mrb[77].mxu0  ;;  %v16440_v15 = vld [vmem:[%s17078_s29 + $0x310] sm:$0xff]   ;;  %3665 = vmatmul.mubr.bf16.gmra.mrb[4].mxu1 %v16478_v6  ;;  %v16490_v6 = vld [vmem:[%s22626_s3 + $0xe0] ss:$8 sps:$4 sm:$0xff]  }
 0x18b   : > { %22848 = vst [vmem:[#allocation10_spill] sm:$0xff] %v17422_v12  ;;  %v1977_v22 = vadd.f32 %v17194_v58, %v1976_v20  ;;  %v14697_v23 = vpop.f32.mrb[78].mxu0 }
 0x18c   : > { %v1988_v24 = vadd.f32 %v14697_v23, %v17194_v58  ;;  %v1979_v25 = vpop.f32.mrb[79].mxu0  ;;  %v2773_v27 = vmax.f32 %v1985_v19, 0.0 }
 0x18d   : > { %v1980_v26 = vadd.f32 %v17194_v58, %v1979_v25  ;;  %v2771_v35 = vmax.f32 %v1977_v22, 0.0 }
 0x18e   : > { %14803 = vmatmul.mubr.msk.bf16.gmra.mrb[184].mxu0 %vm1253_vm0, %v16435_v16  ;;  %v2774_v29 = vmax.f32 %v1988_v24, 0.0 }
 0x18f   : > { %14806 = vmatprep.mubr.msk.bf16.mxu0 %vm1253_vm0, %v16436_v21  ;;  %v2772_v38 = vmax.f32 %v1980_v26, 0.0 }
 0x190   : > { %v17435_v39 = vpack.c.bf16 %v2774_v29, %v2773_v27  ;;  %v16481_v29 = vld [vmem:[%s22626_s3 + $0xd4] ss:$8 sps:$4 sm:$0xff]  }
 0x191   : > { %v17437_v40 = vpack.c.bf16 %v2772_v38, %v2771_v35  ;;  %v14700_v41 = vpop.f32.mrb[80].mxu0  ;;  %v16441_v38 = vld [vmem:[%s17078_s29 + $0x318] sm:$0xff]   ;;  %3672 = vmatprep.mubr.bf16.mxu1 %v16481_v29 }
 0x192   : > { %22849 = vst [vmem:[#allocation11_spill] sm:$0xff] %v17435_v39  ;;  %v2001_v44 = vadd.f32 %v14700_v41, %v17194_v58  ;;  %v1992_v45 = vpop.f32.mrb[81].mxu0  ;;  %v16484_v41 = vld [vmem:[%s22626_s3 + $0xd0] ss:$8 sps:$4 sm:$0xff]  }
 0x193   : > { %22850 = vst [vmem:[#allocation12_spill] sm:$0xff] %v17437_v40  ;;  %v1993_v49 = vadd.f32 %v17194_v58, %v1992_v45  ;;  %v14701_v50 = vpop.f32.mrb[82].mxu0  ;;  %3673 = vmatmul.mubr.bf16.gmra.mrb[8].mxu1 %v16484_v41 }
 0x194   : > { %v2004_v51 = vadd.f32 %v14701_v50, %v17194_v58  ;;  %v1995_v56 = vpop.f32.mrb[83].mxu0  ;;  %v2777_v59 = vmax.f32 %v2001_v44, 0.0  ;;  %v16442_v44 = vld [vmem:[%s17078_s29 + $0x320] sm:$0xff]  }
 0x195   : > { %v1996_v57 = vadd.f32 %v17194_v58, %v1995_v56  ;;  %v2775_v62 = vmax.f32 %v1993_v49, 0.0 }
 0x196   : > { %14807 = vmatmul.mubr.msk.bf16.gmra.mrb[188].mxu0 %vm1253_vm0, %v16437_v42  ;;  %v2778_v60 = vmax.f32 %v2004_v51, 0.0 }
 0x197   : > { %14810 = vmatprep.mubr.msk.bf16.mxu0 %vm1253_vm0, %v16438_v48  ;;  %v2776_v1 = vmax.f32 %v1996_v57, 0.0 }
 0x198   : > { %v17453_v2 = vpack.c.bf16 %v2778_v60, %v2777_v59 }
 0x199   : > { %v17455_v3 = vpack.c.bf16 %v2776_v1, %v2775_v62  ;;  %v14704_v4 = vpop.f32.mrb[84].mxu0  ;;  %v16487_v62 = vld [vmem:[%s22626_s3 + $0xe4] ss:$8 sps:$4 sm:$0xff]  }
 0x19a   : > { %22851 = vst [vmem:[#allocation13_spill] sm:$0xff] %v17453_v2  ;;  %v2017_v7 = vadd.f32 %v14704_v4, %v17194_v58  ;;  %v2008_v8 = vpop.f32.mrb[85].mxu0  ;;  %3680 = vmatprep.mubr.bf16.mxu1 %v16487_v62 }
 0x19b   : > { %22852 = vst [vmem:[#allocation14_spill] sm:$0xff] %v17455_v3  ;;  %v2009_v16 = vadd.f32 %v17194_v58, %v2008_v8  ;;  %v14705_v19 = vpop.f32.mrb[86].mxu0  ;;  %3681 = vmatmul.mubr.bf16.gmra.mrb[12].mxu1 %v16490_v6  ;;  %v16499_v6 = vld [vmem:[%s22626_s3 + $0x104] ss:$8 sps:$4 sm:$0xff]  }
 0x19c   : > { %v2020_v20 = vadd.f32 %v14705_v19, %v17194_v58  ;;  %v2011_v21 = vpop.f32.mrb[87].mxu0  ;;  %v2781_v23 = vmax.f32 %v2017_v7, 0.0 }
 0x19d   : > { %v2012_v22 = vadd.f32 %v17194_v58, %v2011_v21  ;;  %v2779_v25 = vmax.f32 %v2009_v16, 0.0 }
 0x19e   : > { %14811 = vmatmul.mubr.msk.bf16.gmra.mrb[192].mxu0 %vm1253_vm0, %v16439_v5  ;;  %v2782_v24 = vmax.f32 %v2020_v20, 0.0  ;;  %v16443_v5 = vld [vmem:[%s17078_s29 + $0x328] sm:$0xff]  }
 0x19f   : > { %14814 = vmatprep.mubr.msk.bf16.mxu0 %vm1253_vm0, %v16440_v15  ;;  %v2780_v26 = vmax.f32 %v2012_v22, 0.0  ;;  %v16444_v15 = vld [vmem:[%s17078_s29 + $0x330] sm:$0xff]  }
 0x1a0   : > { %v17468_v27 = vpack.c.bf16 %v2782_v24, %v2781_v23 }
 0x1a1   : > { %v17473_v34 = vpack.c.bf16 %v2780_v26, %v2779_v25  ;;  %v14708_v35 = vpop.f32.mrb[88].mxu0 }
 0x1a2   : > { %22853 = vst [vmem:[#allocation15_spill] sm:$0xff] %v17468_v27  ;;  %v2033_v42 = vadd.f32 %v14708_v35, %v17194_v58  ;;  %v2024_v43 = vpop.f32.mrb[89].mxu0  ;;  %v16493_v35 = vld [vmem:[%s22626_s3 + $0xf4] ss:$8 sps:$4 sm:$0xff]  }
 0x1a3   : > { %22854 = vst [vmem:[#allocation16_spill] sm:$0xff] %v17473_v34  ;;  %v2025_v45 = vadd.f32 %v17194_v58, %v2024_v43  ;;  %v14709_v48 = vpop.f32.mrb[90].mxu0  ;;  %v17518_v43 = vld [vmem:[%s22625_s2] ss:$0 sm:$0xff]  ;;  %3688 = vmatprep.mubr.bf16.mxu1 %v16493_v35 }
 0x1a4   : > { %v2036_v49 = vadd.f32 %v14709_v48, %v17194_v58  ;;  %v2027_v50 = vpop.f32.mrb[91].mxu0  ;;  %v2785_v56 = vmax.f32 %v2033_v42, 0.0  ;;  %v16445_v42 = vld [vmem:[%s17078_s29 + $0x338] sm:$0xff]   ;;  %v16446_v48 = vld [vmem:[%s17078_s29 + $0x340] sm:$0xff]  }
 0x1a5   : > { %v2028_v51 = vadd.f32 %v17194_v58, %v2027_v50  ;;  %v2783_v59 = vmax.f32 %v2025_v45, 0.0 }
 0x1a6   : > { %14815 = vmatmul.mubr.msk.bf16.gmra.mrb[196].mxu0 %vm1253_vm0, %v16441_v38  ;;  %v2786_v57 = vmax.f32 %v2036_v49, 0.0 }
 0x1a7   : > { %14818 = vmatprep.mubr.msk.bf16.mxu0 %vm1253_vm0, %v16442_v44  ;;  %v2784_v60 = vmax.f32 %v2028_v51, 0.0 }
 0x1a8   : > { %v17486_v61 = vpack.c.bf16 %v2786_v57, %v2785_v56 }
 0x1a9   : > { %v17491_v1 = vpack.c.bf16 %v2784_v60, %v2783_v59  ;;  %v14712_v4 = vpop.f32.mrb[92].mxu0 }
 0x1aa   : > { %22855 = vst [vmem:[#allocation17_spill] sm:$0xff] %v17486_v61  ;;  %v2049_v7 = vadd.f32 %v14712_v4, %v17194_v58  ;;  %v2040_v8 = vpop.f32.mrb[93].mxu0 }
 0x1ab   : > { %22856 = vst [vmem:[#allocation18_spill] sm:$0xff] %v17491_v1  ;;  %v2041_v16 = vadd.f32 %v17194_v58, %v2040_v8  ;;  %v14713_v19 = vpop.f32.mrb[94].mxu0 }
 0x1ac   : > { %v2052_v20 = vadd.f32 %v14713_v19, %v17194_v58  ;;  %v2043_v21 = vpop.f32.mrb[95].mxu0  ;;  %v2789_v23 = vmax.f32 %v2049_v7, 0.0 }
 0x1ad   : > { %v2044_v22 = vadd.f32 %v17194_v58, %v2043_v21  ;;  %v2787_v25 = vmax.f32 %v2041_v16, 0.0  ;;  %v16496_v58 = vld [vmem:[%s22626_s3 + $0xf0] ss:$8 sps:$4 sm:$0xff]   ;;  %v16502_v16 = vld [vmem:[%s22626_s3 + $0x100] ss:$8 sps:$4 sm:$0xff]  }
 0x1ae   : > { %14819 = vmatmul.mubr.msk.bf16.gmra.mrb[200].mxu0 %vm1253_vm0, %v16443_v5  ;;  %v2790_v24 = vmax.f32 %v2052_v20, 0.0  ;;  %3689 = vmatmul.mubr.bf16.gmra.mrb[16].mxu1 %v16496_v58  ;;  %v16448_v21 = vld [vmem:[%s17078_s29 + $0x350] sm:$0xff]  }
 0x1af   : > { %14822 = vmatprep.mubr.msk.bf16.mxu0 %vm1253_vm0, %v16444_v15  ;;  %v2788_v26 = vmax.f32 %v2044_v22, 0.0  ;;  %v16447_v15 = vld [vmem:[%s17078_s29 + $0x348] sm:$0xff]   ;;  %3696 = vmatprep.mubr.bf16.mxu1 %v16499_v6 }
 0x1b0   : > { %v17504_v29 = vpack.c.bf16 %v2790_v24, %v2789_v23 }
 0x1b1   : > { %v17509_v38 = vpack.c.bf16 %v2788_v26, %v2787_v25  ;;  %v14716_v41 = vpop.f32.mrb[96].mxu0 }
 0x1b2   : > { %22857 = vst [vmem:[#allocation19_spill] sm:$0xff] %v17504_v29  ;;  %v2065_v44 = vadd.f32 %v17518_v43, %v14716_v41  ;;  %v2056_v45 = vpop.f32.mrb[97].mxu0 }
 0x1b3   : > { %22858 = vst [vmem:[#allocation20_spill] sm:$0xff] %v17509_v38  ;;  %v2057_v49 = vadd.f32 %v17518_v43, %v2056_v45  ;;  %v14717_v50 = vpop.f32.mrb[98].mxu0  ;;  %v16505_v45 = vld [vmem:[%s22626_s3 + $0x114] ss:$8 sps:$4 sm:$0xff]  }
 0x1b4   : > { %v2068_v51 = vadd.f32 %v17518_v43, %v14717_v50  ;;  %v2059_v56 = vpop.f32.mrb[99].mxu0  ;;  %v2793_v59 = vmax.f32 %v2065_v44, 0.0  ;;  %v16449_v50 = vld [vmem:[%s17078_s29 + $0x358] sm:$0xff]  }
 0x1b5   : > { %v2060_v57 = vadd.f32 %v17518_v43, %v2059_v56  ;;  %v2791_v62 = vmax.f32 %v2057_v49, 0.0 }
 0x1b6   : > { %14823 = vmatmul.mubr.msk.bf16.gmra.mrb[204].mxu0 %vm1253_vm0, %v16445_v42  ;;  %v2794_v60 = vmax.f32 %v2068_v51, 0.0  ;;  %3697 = vmatmul.mubr.bf16.gmra.mrb[20].mxu1 %v16502_v16  ;;  %v16508_v51 = vld [vmem:[%s22626_s3 + $0x110] ss:$8 sps:$4 sm:$0xff]  }
 0x1b7   : > { %14826 = vmatprep.mubr.msk.bf16.mxu0 %vm1253_vm0, %v16446_v48  ;;  %v2792_v4 = vmax.f32 %v2060_v57, 0.0  ;;  %3704 = vmatprep.mubr.bf16.mxu1 %v16505_v45 }
 0x1b8   : > { %v17527_v5 = vpack.c.bf16 %v2794_v60, %v2793_v59  ;;  %v16450_v59 = vld [vmem:[%s17078_s29 + $0x360] sm:$0xff]  }
 0x1b9   : > { %v17532_v7 = vpack.c.bf16 %v2792_v4, %v2791_v62  ;;  %v14720_v8 = vpop.f32.mrb[100].mxu0 }
 0x1ba   : > { %22859 = vst [vmem:[#allocation21_spill] sm:$0xff] %v17527_v5  ;;  %v2081_v19 = vadd.f32 %v17518_v43, %v14720_v8  ;;  %v2072_v20 = vpop.f32.mrb[101].mxu0 }
 0x1bb   : > { %22860 = vst [vmem:[#allocation22_spill] sm:$0xff] %v17532_v7  ;;  %v2073_v22 = vadd.f32 %v17518_v43, %v2072_v20  ;;  %v14721_v23 = vpop.f32.mrb[102].mxu0 }
 0x1bc   : > { %v2084_v24 = vadd.f32 %v17518_v43, %v14721_v23  ;;  %v2075_v25 = vpop.f32.mrb[103].mxu0  ;;  %v2797_v35 = vmax.f32 %v2081_v19, 0.0 }
 0x1bd   : > { %v2076_v26 = vadd.f32 %v17518_v43, %v2075_v25  ;;  %v2795_v42 = vmax.f32 %v2073_v22, 0.0  ;;  %v16511_v22 = vld [vmem:[%s22626_s3 + $0x124] ss:$8 sps:$4 sm:$0xff]  }
 0x1be   : > { %14827 = vmatmul.mubr.msk.bf16.gmra.mrb[208].mxu0 %vm1253_vm0, %v16447_v15  ;;  %v2798_v41 = vmax.f32 %v2084_v24, 0.0  ;;  %3705 = vmatmul.mubr.bf16.gmra.mrb[24].mxu1 %v16508_v51  ;;  %v16451_v25 = vld [vmem:[%s17078_s29 + $0x368] sm:$0xff]  }
 0x1bf   : > { %14830 = vmatprep.mubr.msk.bf16.mxu0 %vm1253_vm0, %v16448_v21  ;;  %v2796_v58 = vmax.f32 %v2076_v26, 0.0  ;;  %v16514_v26 = vld [vmem:[%s22626_s3 + $0x120] ss:$8 sps:$4 sm:$0xff]   ;;  %3712 = vmatprep.mubr.bf16.mxu1 %v16511_v22 }
 0x1c0   : > { %v17545_v44 = vpack.c.bf16 %v2798_v41, %v2797_v35  ;;  %v16454_v22 = vld [vmem:[%s17078_s29 + $0x380] sm:$0xff]  }
 0x1c1   : > { %v17550_v48 = vpack.c.bf16 %v2796_v58, %v2795_v42  ;;  %v14724_v49 = vpop.f32.mrb[104].mxu0  ;;  %v16452_v42 = vld [vmem:[%s17078_s29 + $0x370] sm:$0xff]  }
 0x1c2   : > { %22861 = vst [vmem:[#allocation23_spill] sm:$0xff] %v17545_v44  ;;  %v2097_v56 = vadd.f32 %v17518_v43, %v14724_v49  ;;  %v2088_v57 = vpop.f32.mrb[105].mxu0 }
 0x1c3   : > { %22862 = vst [vmem:[#allocation24_spill] sm:$0xff] %v17550_v48  ;;  %v2089_v60 = vadd.f32 %v17518_v43, %v2088_v57  ;;  %v14725_v62 = vpop.f32.mrb[106].mxu0 }
 0x1c4   : > { %v2100_v4 = vadd.f32 %v17518_v43, %v14725_v62  ;;  %v2091_v6 = vpop.f32.mrb[107].mxu0  ;;  %v2801_v15 = vmax.f32 %v2097_v56, 0.0 }
 0x1c5   : > { %v2092_v8 = vadd.f32 %v17518_v43, %v2091_v6  ;;  %v2799_v19 = vmax.f32 %v2089_v60, 0.0 }
 0x1c6   : > { %14831 = vmatmul.mubr.msk.bf16.gmra.mrb[212].mxu0 %vm1253_vm0, %v16449_v50  ;;  %v2802_v16 = vmax.f32 %v2100_v4, 0.0  ;;  %3713 = vmatmul.mubr.bf16.gmra.mrb[28].mxu1 %v16514_v26  ;;  %v16517_v4 = vld [vmem:[%s22626_s3 + $0x134] ss:$8 sps:$4 sm:$0xff]  }
 0x1c7   : > { %14834 = vmatprep.mubr.msk.bf16.mxu0 %vm1253_vm0, %v16450_v59  ;;  %v2800_v20 = vmax.f32 %v2092_v8, 0.0  ;;  %3720 = vmatprep.mubr.bf16.mxu1 %v16517_v4 }
 0x1c8   : > { %v17563_v21 = vpack.c.bf16 %v2802_v16, %v2801_v15  ;;  %v16453_v15 = vld [vmem:[%s17078_s29 + $0x378] sm:$0xff]  }
 0x1c9   : > { %v17568_v23 = vpack.c.bf16 %v2800_v20, %v2799_v19  ;;  %v14728_v24 = vpop.f32.mrb[108].mxu0  ;;  %v16520_v16 = vld [vmem:[%s22626_s3 + $0x130] ss:$8 sps:$4 sm:$0xff]  }
 0x1ca   : > { %22863 = vst [vmem:[#allocation25_spill] sm:$0xff] %v17563_v21  ;;  %v2113_v35 = vadd.f32 %v17518_v43, %v14728_v24  ;;  %v2104_v41 = vpop.f32.mrb[109].mxu0 }
 0x1cb   : > { %22864 = vst [vmem:[#allocation26_spill] sm:$0xff] %v17568_v23  ;;  %v2105_v58 = vadd.f32 %v17518_v43, %v2104_v41  ;;  %v14729_v45 = vpop.f32.mrb[110].mxu0 }
 0x1cc   : > { %v2116_v49 = vadd.f32 %v17518_v43, %v14729_v45  ;;  %v2107_v50 = vpop.f32.mrb[111].mxu0  ;;  %v2805_v56 = vmax.f32 %v2113_v35, 0.0 }
 0x1cd   : > { %v2108_v51 = vadd.f32 %v17518_v43, %v2107_v50  ;;  %v2803_v59 = vmax.f32 %v2105_v58, 0.0 }
 0x1ce   : > { %14835 = vmatmul.mubr.msk.bf16.gmra.mrb[216].mxu0 %vm1253_vm0, %v16451_v25  ;;  %v2806_v57 = vmax.f32 %v2116_v49, 0.0  ;;  %3721 = vmatmul.mubr.bf16.gmra.mrb[32].mxu1 %v16520_v16 }
 0x1cf   : > { %14838 = vmatprep.mubr.msk.bf16.mxu0 %vm1253_vm0, %v16452_v42  ;;  %v2804_v60 = vmax.f32 %v2108_v51, 0.0  ;;  %v16521_v51 = vld [vmem:[%s22626_s3 + $0x144] ss:$8 sps:$4 sm:$0xff]  }
 0x1d0   : > { %v17581_v62 = vpack.c.bf16 %v2806_v57, %v2805_v56  ;;  %3728 = vmatprep.mubr.bf16.mxu1 %v16521_v51 }
 0x1d1   : > { %v17586_v6 = vpack.c.bf16 %v2804_v60, %v2803_v59  ;;  %v14732_v8 = vpop.f32.mrb[112].mxu0  ;;  %v16455_v59 = vld [vmem:[%s17078_s29 + $0x388] sm:$0xff]  }
 0x1d2   : > { %22865 = vst [vmem:[#allocation27_spill] sm:$0xff] %v17581_v62  ;;  %v2129_v19 = vadd.f32 %v17518_v43, %v14732_v8  ;;  %v2120_v20 = vpop.f32.mrb[113].mxu0  ;;  %v16523_v60 = vld [vmem:[%s22626_s3 + $0x140] ss:$8 sps:$4 sm:$0xff]   ;;  %v16456_v8 = vld [vmem:[%s17078_s29 + $0x390] sm:$0xff]  }
 0x1d3   : > { %22866 = vst [vmem:[#allocation28_spill] sm:$0xff] %v17586_v6  ;;  %v2121_v24 = vadd.f32 %v17518_v43, %v2120_v20  ;;  %v14733_v25 = vpop.f32.mrb[114].mxu0 }
 0x1d4   : > { %v2132_v26 = vadd.f32 %v17518_v43, %v14733_v25  ;;  %v2123_v35 = vpop.f32.mrb[115].mxu0  ;;  %v2809_v42 = vmax.f32 %v2129_v19, 0.0  ;;  %v16527_v25 = vld [vmem:[%s22626_s3 + $0x154] ss:$8 sps:$4 sm:$0xff]  }
 0x1d5   : > { %v2124_v41 = vadd.f32 %v17518_v43, %v2123_v35  ;;  %v2807_v45 = vmax.f32 %v2121_v24, 0.0 }
 0x1d6   : > { %14839 = vmatmul.mubr.msk.bf16.gmra.mrb[220].mxu0 %vm1253_vm0, %v16453_v15  ;;  %v2810_v58 = vmax.f32 %v2132_v26, 0.0  ;;  %3729 = vmatmul.mubr.bf16.gmra.mrb[36].mxu1 %v16523_v60  ;;  %v16458_v60 = vld [vmem:[%s17078_s29 + $0x3a0] sm:$0xff]  }
 0x1d7   : > { %14842 = vmatprep.mubr.msk.bf16.mxu0 %vm1253_vm0, %v16454_v22  ;;  %v2808_v49 = vmax.f32 %v2124_v41, 0.0  ;;  %3736 = vmatprep.mubr.bf16.mxu1 %v16527_v25 }
 0x1d8   : > { %v17599_v50 = vpack.c.bf16 %v2810_v58, %v2809_v42  ;;  %v16529_v58 = vld [vmem:[%s22626_s3 + $0x150] ss:$8 sps:$4 sm:$0xff]  }
 0x1d9   : > { %v17604_v56 = vpack.c.bf16 %v2808_v49, %v2807_v45  ;;  %v14736_v57 = vpop.f32.mrb[116].mxu0 }
 0x1da   : > { %22867 = vst [vmem:[#allocation29_spill] sm:$0xff] %v17599_v50  ;;  %v2136_v4 = vpop.f32.mrb[117].mxu0  ;;  %v2145_v15 = vadd.f32 %v17518_v43, %v14736_v57  ;;  %v16457_v57 = vld [vmem:[%s17078_s29 + $0x398] sm:$0xff]  }
 0x1db   : > { %22868 = vst [vmem:[#allocation30_spill] sm:$0xff] %v17604_v56  ;;  %v2137_v16 = vadd.f32 %v17518_v43, %v2136_v4  ;;  %v14737_v19 = vpop.f32.mrb[118].mxu0 }
 0x1dc   : > { %v2148_v20 = vadd.f32 %v17518_v43, %v14737_v19  ;;  %v2139_v22 = vpop.f32.mrb[119].mxu0  ;;  %v2813_v26 = vmax.f32 %v2145_v15, 0.0 }
 0x1dd   : > { %v2140_v24 = vadd.f32 %v17518_v43, %v2139_v22  ;;  %v2811_v35 = vmax.f32 %v2137_v16, 0.0  ;;  %v16533_v22 = vld [vmem:[%s22626_s3 + $0x164] ss:$8 sps:$4 sm:$0xff]  }
 0x1de   : > { %14843 = vmatmul.mubr.msk.bf16.gmra.mrb[224].mxu0 %vm1253_vm0, %v16455_v59  ;;  %v2814_v41 = vmax.f32 %v2148_v20, 0.0  ;;  %3737 = vmatmul.mubr.bf16.gmra.mrb[40].mxu1 %v16529_v58 }
 0x1df   : > { %14846 = vmatprep.mubr.msk.bf16.mxu0 %vm1253_vm0, %v16456_v8  ;;  %v2812_v42 = vmax.f32 %v2140_v24, 0.0  ;;  %3744 = vmatprep.mubr.bf16.mxu1 %v16533_v22  ;;  %v16539_v22 = vld [vmem:[%s22626_s3 + $0x174] ss:$8 sps:$4 sm:$0xff]  }
 0x1e0   : > { %v17623_v45 = vpack.c.bf16 %v2814_v41, %v2813_v26  ;;  %v16535_v41 = vld [vmem:[%s22626_s3 + $0x160] ss:$8 sps:$4 sm:$0xff]  }
 0x1e1   : > { %v17625_v49 = vpack.c.bf16 %v2812_v42, %v2811_v35  ;;  %v14740_v51 = vpop.f32.mrb[120].mxu0 }
 0x1e2   : > { %22869 = vst [vmem:[#allocation31_spill] sm:$0xff] %v17623_v45  ;;  %v2152_v59 = vpop.f32.mrb[121].mxu0  ;;  %v2161_v4 = vadd.f32 %v17518_v43, %v14740_v51 }
 0x1e3   : > { %22870 = vst [vmem:[#allocation32_spill] sm:$0xff] %v17625_v49  ;;  %v2153_v8 = vadd.f32 %v17518_v43, %v2152_v59  ;;  %v14741_v15 = vpop.f32.mrb[122].mxu0 }
 0x1e4   : > { %v2164_v16 = vadd.f32 %v17518_v43, %v14741_v15  ;;  %v2155_v19 = vpop.f32.mrb[123].mxu0  ;;  %v2817_v24 = vmax.f32 %v2161_v4, 0.0  ;;  %v16460_v15 = vld [vmem:[%s17078_s29 + $0x3b0] sm:$0xff]  }
 0x1e5   : > { %v2156_v20 = vadd.f32 %v17518_v43, %v2155_v19  ;;  %v2815_v25 = vmax.f32 %v2153_v8, 0.0 }
 0x1e6   : > { %14847 = vmatmul.mubr.msk.bf16.gmra.mrb[228].mxu0 %vm1253_vm0, %v16457_v57  ;;  %v2818_v26 = vmax.f32 %v2164_v16, 0.0  ;;  %v16459_v57 = vld [vmem:[%s17078_s29 + $0x3a8] sm:$0xff]   ;;  %3745 = vmatmul.mubr.bf16.gmra.mrb[44].mxu1 %v16535_v41 }
 0x1e7   : > { %14850 = vmatprep.mubr.msk.bf16.mxu0 %vm1253_vm0, %v16458_v60  ;;  %v2816_v35 = vmax.f32 %v2156_v20, 0.0  ;;  %3752 = vmatprep.mubr.bf16.mxu1 %v16539_v22 }
 0x1e8   : > { %v17641_v42 = vpack.c.bf16 %v2818_v26, %v2817_v24  ;;  %v16541_v24 = vld [vmem:[%s22626_s3 + $0x170] ss:$8 sps:$4 sm:$0xff]  }
 0x1e9   : > { %v17643_v58 = vpack.c.bf16 %v2816_v35, %v2815_v25  ;;  %v14744_v51 = vpop.f32.mrb[124].mxu0 }
 0x1ea   : > { %22871 = vst [vmem:[#allocation33_spill] sm:$0xff] %v17641_v42  ;;  %v2168_v59 = vpop.f32.mrb[125].mxu0  ;;  %v2177_v60 = vadd.f32 %v17518_v43, %v14744_v51  ;;  %v16542_v51 = vld [vmem:[%s22626_s3 + $0x184] ss:$8 sps:$4 sm:$0xff]  }
 0x1eb   : > { %22872 = vst [vmem:[#allocation34_spill] sm:$0xff] %v17643_v58  ;;  %v14745_v19 = vpop.f32.mrb[126].mxu0  ;;  %v2169_v4 = vadd.f32 %v17518_v43, %v2168_v59  ;;  %v16461_v59 = vld [vmem:[%s17078_s29 + $0x3b8] sm:$0xff]  }
 0x1ec   : > { %v2180_v8 = vadd.f32 %v17518_v43, %v14745_v19  ;;  %v2171_v16 = vpop.f32.mrb[127].mxu0  ;;  %v2821_v25 = vmax.f32 %v2177_v60, 0.0 }
 0x1ed   : > { %v2172_v20 = vadd.f32 %v17518_v43, %v2171_v16  ;;  %v2819_v26 = vmax.f32 %v2169_v4, 0.0 }
 0x1ee   : > { %14851 = vmatmul.mubr.msk.bf16.gmra.mrb[232].mxu0 %vm1253_vm0, %v16459_v57  ;;  %v2822_v35 = vmax.f32 %v2180_v8, 0.0  ;;  %3753 = vmatmul.mubr.bf16.gmra.mrb[48].mxu1 %v16541_v24  ;;  %v16544_v24 = vld [vmem:[%s22626_s3 + $0x180] ss:$8 sps:$4 sm:$0xff]  }
 0x1ef   : > { %14854 = vmatprep.mubr.msk.bf16.mxu0 %vm1253_vm0, %v16460_v15  ;;  %v2820_v41 = vmax.f32 %v2172_v20, 0.0  ;;  %3760 = vmatprep.mubr.bf16.mxu1 %v16542_v51  ;;  %v16545_v51 = vld [vmem:[%s22626_s3 + $0x194] ss:$8 sps:$4 sm:$0xff]  }
 0x1f0   : > { %v17663_v19 = vpack.c.bf16 %v2822_v35, %v2821_v25 }
 0x1f1   : > { %v14748_v57 = vpop.f32.mrb[128].mxu0  ;;  %v17665_v16 = vpack.c.bf16 %v2820_v41, %v2819_v26 }
 0x1f2   : > { %22873 = vst [vmem:[#allocation35_spill] sm:$0xff] %v17663_v19  ;;  %v2193_v15 = vadd.f32 %v17518_v43, %v14748_v57  ;;  %v2184_v22 = vpop.f32.mrb[129].mxu0  ;;  %v22885_v19 = vmov 0  }
 0x1f3   : > { %22874 = vst [vmem:[#allocation36_spill] sm:$0xff] %v17665_v16  ;;  %v2185_v42 = vadd.f32 %v17518_v43, %v2184_v22  ;;  %v14749_v60 = vpop.f32.mrb[130].mxu0 }
 0x1f4   : > { %v2196_v4 = vadd.f32 %v17518_v43, %v14749_v60  ;;  %v2187_v8 = vpop.f32.mrb[131].mxu0  ;;  %v2825_v25 = vmax.f32 %v2193_v15, 0.0 }
 0x1f5   : > { %v2188_v20 = vadd.f32 %v17518_v43, %v2187_v8  ;;  %v2823_v35 = vmax.f32 %v2185_v42, 0.0 }
 0x1f6   : > { %14855 = vmatmul.mubr.msk.bf16.gmra.mrb[236].mxu0 %vm1253_vm0, %v16461_v59  ;;  %v2826_v26 = vmax.f32 %v2196_v4, 0.0  ;;  %v16463_v59 = vld [vmem:[%s17078_s29 + $0x3c8] sm:$0xff]   ;;  %3761 = vmatmul.mubr.bf16.gmra.mrb[52].mxu1 %v16544_v24  ;;  %v16547_v24 = vld [vmem:[%s22626_s3 + $0x190] ss:$8 sps:$4 sm:$0xff]  }
 0x1f7   : > { %14858 = vmatprep.mubr.msk.bf16.mxu0 %vm1253_vm0, %v16462_v28  ;;  %v2824_v41 = vmax.f32 %v2188_v20, 0.0  ;;  %v16464_v28 = vld [vmem:[%s17078_s29 + $0x3d0] sm:$0xff]   ;;  %3768 = vmatprep.mubr.bf16.mxu1 %v16545_v51  ;;  %v16548_v51 = vld [vmem:[%s22626_s3 + $0x1a4] ss:$8 sps:$4 sm:$0xff]  }
 0x1f8   : > { %v17677_v57 = vpack.c.bf16 %v2826_v26, %v2825_v25 }
 0x1f9   : > { %v17682_v22 = vpack.c.bf16 %v2824_v41, %v2823_v35  ;;  %v14752_v60 = vpop.f32.mrb[132].mxu0 }
 0x1fa   : > { %22875 = vst [vmem:[#allocation37_spill] sm:$0xff] %v17677_v57  ;;  %v2209_v15 = vadd.f32 %v17518_v43, %v14752_v60  ;;  %v2200_v4 = vpop.f32.mrb[133].mxu0 }
 0x1fb   : > { %22876 = vst [vmem:[#allocation38_spill] sm:$0xff] %v17682_v22  ;;  %v2201_v42 = vadd.f32 %v17518_v43, %v2200_v4  ;;  %v14753_v8 = vpop.f32.mrb[134].mxu0 }
 0x1fc   : > { %v2212_v20 = vadd.f32 %v17518_v43, %v14753_v8  ;;  %v2203_v25 = vpop.f32.mrb[135].mxu0  ;;  %v2829_v35 = vmax.f32 %v2209_v15, 0.0 }
 0x1fd   : > { %v2204_v26 = vadd.f32 %v17518_v43, %v2203_v25  ;;  %v2827_v60 = vmax.f32 %v2201_v42, 0.0 }
 0x1fe   : > { %14859 = vmatmul.mubr.msk.bf16.gmra.mrb[240].mxu0 %vm1253_vm0, %v16463_v59  ;;  %v2830_v41 = vmax.f32 %v2212_v20, 0.0  ;;  %v16465_v59 = vld [vmem:[%s17078_s29 + $0x3d8] sm:$0xff]   ;;  %3769 = vmatmul.mubr.bf16.gmra.mrb[56].mxu1 %v16547_v24  ;;  %v16550_v24 = vld [vmem:[%s22626_s3 + $0x1a0] ss:$8 sps:$4 sm:$0xff]  }
 0x1ff   : > { %14862 = vmatprep.mubr.msk.bf16.mxu0 %vm1253_vm0, %v16464_v28  ;;  %v2828_v57 = vmax.f32 %v2204_v26, 0.0  ;;  %v16466_v28 = vld [vmem:[%s17078_s29 + $0x3e0] sm:$0xff]   ;;  %3776 = vmatprep.mubr.bf16.mxu1 %v16548_v51  ;;  %v16551_v51 = vld [vmem:[%s22626_s3 + $0x1b4] ss:$8 sps:$4 sm:$0xff]  }
 0x200   : > { %v17695_v4 = vpack.c.bf16 %v2830_v41, %v2829_v35 }
 0x201   : > { %v17700_v8 = vpack.c.bf16 %v2828_v57, %v2827_v60  ;;  %v14756_v25 = vpop.f32.mrb[136].mxu0 }
 0x202   : > { %22877 = vst [vmem:[#allocation39_spill] sm:$0xff] %v17695_v4  ;;  %v2225_v15 = vadd.f32 %v17518_v43, %v14756_v25  ;;  %v2216_v20 = vpop.f32.mrb[137].mxu0 }
 0x203   : > { %22878 = vst [vmem:[#allocation40_spill] sm:$0xff] %v17700_v8  ;;  %v2217_v42 = vadd.f32 %v17518_v43, %v2216_v20  ;;  %v14757_v26 = vpop.f32.mrb[138].mxu0 }
 0x204   : > { %v2228_v35 = vadd.f32 %v17518_v43, %v14757_v26  ;;  %v2219_v41 = vpop.f32.mrb[139].mxu0  ;;  %v2833_v57 = vmax.f32 %v2225_v15, 0.0 }
 0x205   : > { %v2220_v4 = vadd.f32 %v17518_v43, %v2219_v41  ;;  %v2831_v25 = vmax.f32 %v2217_v42, 0.0 }
 0x206   : > { %14863 = vmatmul.mubr.msk.bf16.gmra.mrb[244].mxu0 %vm1253_vm0, %v16465_v59  ;;  %v2834_v60 = vmax.f32 %v2228_v35, 0.0  ;;  %v16467_v59 = vld [vmem:[%s17078_s29 + $0x3e8] sm:$0xff]   ;;  %3777 = vmatmul.mubr.bf16.gmra.mrb[60].mxu1 %v16550_v24 }
 0x207   : > { %14866 = vmatprep.mubr.msk.bf16.mxu0 %vm1253_vm0, %v16466_v28  ;;  %v2832_v8 = vmax.f32 %v2220_v4, 0.0  ;;  %v16468_v28 = vld [vmem:[%s17078_s29 + $0x3f0] sm:$0xff]   ;;  %3784 = vmatprep.mubr.bf16.mxu1 %v16551_v51  ;;  %v16554_v51 = vld [vmem:[%s22626_s3 + $0x1c4] ss:$8 sps:$4 sm:$0xff]  }
 0x208   : > { %v17713_v20 = vpack.c.bf16 %v2834_v60, %v2833_v57 }
 0x209   : > { %v17718_v26 = vpack.c.bf16 %v2832_v8, %v2831_v25  ;;  %v14760_v41 = vpop.f32.mrb[140].mxu0 }
 0x20a   : > { %22879 = vst [vmem:[#allocation41_spill] sm:$0xff] %v17713_v20  ;;  %v2241_v15 = vadd.f32 %v17518_v43, %v14760_v41  ;;  %v2232_v35 = vpop.f32.mrb[141].mxu0 }
 0x20b   : > { %22880 = vst [vmem:[#allocation42_spill] sm:$0xff] %v17718_v26  ;;  %v2233_v4 = vadd.f32 %v17518_v43, %v2232_v35  ;;  %v14761_v42 = vpop.f32.mrb[142].mxu0  ;;  %v16553_v35 = vld [vmem:[%s22626_s3 + $0x1b0] ss:$8 sps:$4 sm:$0xff]  }
 0x20c   : > { %v2244_v57 = vadd.f32 %v17518_v43, %v14761_v42  ;;  %v2235_v60 = vpop.f32.mrb[143].mxu0  ;;  %v2837_v8 = vmax.f32 %v2241_v15, 0.0 }
 0x20d   : > { %v2236_v20 = vadd.f32 %v17518_v43, %v2235_v60  ;;  %v2835_v41 = vmax.f32 %v2233_v4, 0.0 }
 0x20e   : > { %14867 = vmatmul.mubr.msk.bf16.gmra.mrb[248].mxu0 %vm1253_vm0, %v16467_v59  ;;  %v2838_v25 = vmax.f32 %v2244_v57, 0.0  ;;  %v16471_v59 = vld [vmem:[%s17078_s29 + $0x3f8] sm:$0xff]   ;;  %3785 = vmatmul.mubr.bf16.gmra.mrb[64].mxu1 %v16553_v35  ;;  %s16902_s29 = scalar_lea.vmem %s22582_s24, 128 }
 0x20f   : > { %14870 = vmatprep.mubr.msk.bf16.mxu0 %vm1253_vm0, %v16468_v28  ;;  %v2836_v26 = vmax.f32 %v2236_v20, 0.0  ;;  %v17743_v20 = vld [vmem:[%s22626_s3 + $0x4] ss:$8 sps:$4 sm:$0xff]   ;;  %3792 = vmatprep.mubr.bf16.mxu1 %v16554_v51  ;;  %v16557_v51 = vld [vmem:[%s22626_s3 + $0x1d4] ss:$8 sps:$4 sm:$0xff]   ;;  %p16903_p11 = scmp.ne.s32.totalorder %s22582_s24, %s16902_s29  ;;  %p16910_p1 = scmp.lt.s32.totalorder %s16908_s16, %s16902_s29 }
 0x210   : > { %v17731_v24 = vpack.c.bf16 %v2838_v25, %v2837_v8 }
 0x211   : > { %v17733_v22 = vpack.c.bf16 %v2836_v26, %v2835_v41  ;;  %v14764_v42 = vpop.f32.mrb[144].mxu0  ;;  %p16904_p12 = pnand %p16903_p11, %p17058_p5  ;;  %p16911_p2 = por %p16910_p1, %p16909_p0 }
 0x212   : > { %22881 = vst [vmem:[#allocation43_spill] sm:$0xff] %v17731_v24  ;;  %v2257_v15 = vadd.f32 %v17518_v43, %v14764_v42  ;;  %v2248_v57 = vpop.f32.mrb[145].mxu0 }
 0x213   : > { %22882 = vst [vmem:[#allocation44_spill] sm:$0xff] %v17733_v22  ;;  %v2249_v28 = vadd.f32 %v17518_v43, %v2248_v57  ;;  %v14765_v4 = vpop.f32.mrb[146].mxu0  ;;  %v16556_v57 = vld [vmem:[%s22626_s3 + $0x1c0] ss:$8 sps:$4 sm:$0xff]   ;;  %p16905_p13 = pneg %p16904_p12 }
 0x214   : > { %v2260_v26 = vadd.f32 %v17518_v43, %v14765_v4  ;;  %v2251_v60 = vpop.f32.mrb[147].mxu0  ;;  %v2841_v25 = vmax.f32 %v2257_v15, 0.0 }
 0x215   : > { %v2252_v8 = vadd.f32 %v17518_v43, %v2251_v60  ;;  %v2839_v42 = vmax.f32 %v2249_v28, 0.0  ;;  %p16912_p3 = pnand %p16911_p2, %p16905_p13 }
 0x216   : > { %14871 = vmatmul.mubr.msk.bf16.gmra.mrb[252].mxu0 %vm1253_vm0, %v16471_v59  ;;  %v2842_v41 = vmax.f32 %v2260_v26, 0.0  ;;  %v17763_v59 = vld [vmem:[%s22626_s3] ss:$8 sps:$4 sm:$0xff]   ;;  %v17769_v26 = vld [vmem:[%s22626_s3 + $0x14] ss:$8 sps:$4 sm:$0xff]   ;;  %3793 = vmatmul.mubr.bf16.gmra.mrb[68].mxu1 %v16556_v57 }
 0x217   : > { %3568 = vmatprep.mubr.bf16.mxu0 %v17743_v20  ;;  %v2840_v24 = vmax.f32 %v2252_v8, 0.0  ;;  %3800 = vmatprep.mubr.bf16.mxu1 %v16557_v51  ;;  %v16559_v57 = vld [vmem:[%s22626_s3 + $0x1d0] ss:$8 sps:$4 sm:$0xff]  }
 0x218   : > { %v17753_v22 = vpack.c.bf16 %v2842_v41, %v2841_v25 }
 0x219   : > { %v17755_v35 = vpack.c.bf16 %v2840_v24, %v2839_v42  ;;  %v14768_v4 = vpop.f32.mrb[148].mxu0 }
 0x21a   : > { %22883 = vst [vmem:[#allocation45_spill] sm:$0xff] %v17753_v22  ;;  %v2273_v15 = vadd.f32 %v17518_v43, %v14768_v4  ;;  %v2264_v28 = vpop.f32.mrb[149].mxu0 }
 0x21b   : > { %22884 = vst [vmem:[#allocation46_spill] sm:$0xff] %v17755_v35  ;;  %v2265_v24 = vadd.f32 %v17518_v43, %v2264_v28  ;;  %v14769_v60 = vpop.f32.mrb[150].mxu0 }
 0x21c   : > { %v2276_v8 = vadd.f32 %v17518_v43, %v14769_v60  ;;  %v2267_v25 = vpop.f32.mrb[151].mxu0  ;;  %v2845_v42 = vmax.f32 %v2273_v15, 0.0  ;;  %v16560_v15 = vld [vmem:[%s22626_s3 + $0x1e4] ss:$8 sps:$4 sm:$0xff]  }
 0x21d   : > { %v2268_v41 = vadd.f32 %v17518_v43, %v2267_v25  ;;  %v2843_v22 = vmax.f32 %v2265_v24, 0.0 }
 0x21e   : > { %3569 = vmatmul.mubr.bf16.vlgmr.msra.gmra.mrb[0].mxu0 %v17763_v59  ;;  %v2846_v4 = vmax.f32 %v2276_v8, 0.0  ;;  %3801 = vmatmul.mubr.bf16.gmra.mrb[72].mxu1 %v16559_v57  ;;  %v16562_v57 = vld [vmem:[%s22626_s3 + $0x1e0] ss:$8 sps:$4 sm:$0xff]  }
 0x21f   : > { %4824 = vmatpush1.bf16.msra.mxu0 %v17302_v14  ;;  %3576 = vmatprep.mubr.bf16.mxu0 %v17769_v26  ;;  %v2844_v35 = vmax.f32 %v2268_v41, 0.0  ;;  %v17791_v14 = vld [vmem:[%s22626_s3 + $0x10] ss:$8 sps:$4 sm:$0xff]  }
 0x220   : > { %4825 = vmatprep.subr.bf16.mxu0 %v22885_v19  ;;  %v17778_v28 = vpack.c.bf16 %v2846_v4, %v2845_v42  ;;  %3808 = vmatprep.mubr.bf16.mxu1 %v16560_v15 }
 0x221   : > { %v17783_v60 = vpack.c.bf16 %v2844_v35, %v2843_v22  ;;  %v14772_v51 = vpop.f32.mrb[152].mxu0  ;;  %v17798_v22 = vld [vmem:[%s22626_s3 + $0x24] ss:$8 sps:$4 sm:$0xff]  }
 0x222   : > { %22886 = vst [vmem:[#allocation47_spill] sm:$0xff] %v17778_v28  ;;  %v2289_v24 = vadd.f32 %v17518_v43, %v14772_v51  ;;  %v2280_v8 = vpop.f32.mrb[153].mxu0 }
 0x223   : > { %22887 = vst [vmem:[#allocation48_spill] sm:$0xff] %v17783_v60  ;;  %4826 = vmatpush1.bf16.msra.mxu0 %v17299_v13  ;;  %v2281_v35 = vadd.f32 %v17518_v43, %v2280_v8  ;;  %v14773_v25 = vpop.f32.mrb[154].mxu0 }
 0x224   : > { %4827 = vmatprep.subr.bf16.mxu0 %v22885_v19  ;;  %v2292_v41 = vadd.f32 %v17518_v43, %v14773_v25  ;;  %v2283_v42 = vpop.f32.mrb[155].mxu0  ;;  %v2849_v13 = vmax.f32 %v2289_v24, 0.0  ;;  %v16563_v24 = vld [vmem:[%s22626_s3 + $0x1f4] ss:$8 sps:$4 sm:$0xff]  }
 0x225   : > { %v2284_v4 = vadd.f32 %v17518_v43, %v2283_v42  ;;  %v2847_v28 = vmax.f32 %v2281_v35, 0.0 }
 0x226   : > { %3577 = vmatmul.mubr.bf16.gmra.mrb[4].mxu0 %v17791_v14  ;;  %v2850_v51 = vmax.f32 %v2292_v41, 0.0  ;;  %3809 = vmatmul.mubr.bf16.gmra.mrb[76].mxu1 %v16562_v57  ;;  %v16565_v57 = vld [vmem:[%s22626_s3 + $0x1f0] ss:$8 sps:$4 sm:$0xff]  }
 0x227   : > { %4828 = vmatpush1.bf16.msra.mxu0 %v17314_v31  ;;  %3584 = vmatprep.mubr.bf16.mxu0 %v17798_v22  ;;  %v2848_v8 = vmax.f32 %v2284_v4, 0.0  ;;  %v17821_v31 = vld [vmem:[%s22626_s3 + $0x20] ss:$8 sps:$4 sm:$0xff]  }
 0x228   : > { %4829 = vmatprep.subr.bf16.mxu0 %v22885_v19  ;;  %v17808_v60 = vpack.c.bf16 %v2850_v51, %v2849_v13  ;;  %3816 = vmatprep.mubr.bf16.mxu1 %v16563_v24 }
 0x229   : > { %v17813_v25 = vpack.c.bf16 %v2848_v8, %v2847_v28  ;;  %v14776_v15 = vpop.f32.mrb[156].mxu0  ;;  %v17828_v28 = vld [vmem:[%s22626_s3 + $0x34] ss:$8 sps:$4 sm:$0xff]  }
 0x22a   : > { %22888 = vst [vmem:[#allocation49_spill] sm:$0xff] %v17808_v60  ;;  %v2305_v35 = vadd.f32 %v17518_v43, %v14776_v15  ;;  %v2296_v41 = vpop.f32.mrb[157].mxu0 }
 0x22b   : > { %22889 = vst [vmem:[#allocation50_spill] sm:$0xff] %v17813_v25  ;;  %4830 = vmatpush1.bf16.msra.mxu0 %v17312_v30  ;;  %v2297_v42 = vadd.f32 %v17518_v43, %v2296_v41  ;;  %v14777_v4 = vpop.f32.mrb[158].mxu0 }
 0x22c   : > { %4831 = vmatprep.subr.bf16.mxu0 %v22885_v19  ;;  %v2308_v13 = vadd.f32 %v17518_v43, %v14777_v4  ;;  %v2299_v51 = vpop.f32.mrb[159].mxu0  ;;  %v2853_v30 = vmax.f32 %v2305_v35, 0.0  ;;  %v16566_v35 = vld [vmem:[%s22626_s3 + $0x204] ss:$8 sps:$4 sm:$0xff]  }
 0x22d   : > { %v2300_v8 = vadd.f32 %v17518_v43, %v2299_v51  ;;  %v2851_v60 = vmax.f32 %v2297_v42, 0.0 }
 0x22e   : > { %3585 = vmatmul.mubr.bf16.gmra.mrb[8].mxu0 %v17821_v31  ;;  %v2854_v15 = vmax.f32 %v2308_v13, 0.0  ;;  %3817 = vmatmul.mubr.bf16.gmra.mrb[80].mxu1 %v16565_v57  ;;  %v16568_v57 = vld [vmem:[%s22626_s3 + $0x200] ss:$8 sps:$4 sm:$0xff]  }
 0x22f   : > { %4832 = vmatpush1.bf16.msra.mxu0 %v17326_v47  ;;  %3592 = vmatprep.mubr.bf16.mxu0 %v17828_v28  ;;  %v2852_v41 = vmax.f32 %v2300_v8, 0.0  ;;  %v17851_v47 = vld [vmem:[%s22626_s3 + $0x30] ss:$8 sps:$4 sm:$0xff]  }
 0x230   : > { %4833 = vmatprep.subr.bf16.mxu0 %v22885_v19  ;;  %v17838_v25 = vpack.c.bf16 %v2854_v15, %v2853_v30  ;;  %3824 = vmatprep.mubr.bf16.mxu1 %v16566_v35 }
 0x231   : > { %v17843_v4 = vpack.c.bf16 %v2852_v41, %v2851_v60  ;;  %v14780_v24 = vpop.f32.mrb[160].mxu0  ;;  %v17858_v60 = vld [vmem:[%s22626_s3 + $0x44] ss:$8 sps:$4 sm:$0xff]  }
 0x232   : > { %22890 = vst [vmem:[#allocation51_spill] sm:$0xff] %v17838_v25  ;;  %v2321_v42 = vadd.f32 %v17518_v43, %v14780_v24  ;;  %v2312_v13 = vpop.f32.mrb[161].mxu0 }
 0x233   : > { %22891 = vst [vmem:[#allocation52_spill] sm:$0xff] %v17843_v4  ;;  %4834 = vmatpush1.bf16.msra.mxu0 %v17324_v46  ;;  %v2313_v51 = vadd.f32 %v17518_v43, %v2312_v13  ;;  %v14781_v8 = vpop.f32.mrb[162].mxu0 }
 0x234   : > { %4835 = vmatprep.subr.bf16.mxu0 %v22885_v19  ;;  %v2324_v30 = vadd.f32 %v17518_v43, %v14781_v8  ;;  %v2315_v15 = vpop.f32.mrb[163].mxu0  ;;  %v2857_v46 = vmax.f32 %v2321_v42, 0.0  ;;  %v16569_v42 = vld [vmem:[%s22626_s3 + $0x214] ss:$8 sps:$4 sm:$0xff]  }
 0x235   : > { %v2316_v41 = vadd.f32 %v17518_v43, %v2315_v15  ;;  %v2855_v25 = vmax.f32 %v2313_v51, 0.0 }
 0x236   : > { %3593 = vmatmul.mubr.bf16.gmra.mrb[12].mxu0 %v17851_v47  ;;  %v2858_v24 = vmax.f32 %v2324_v30, 0.0  ;;  %3825 = vmatmul.mubr.bf16.gmra.mrb[84].mxu1 %v16568_v57  ;;  %v16571_v57 = vld [vmem:[%s22626_s3 + $0x210] ss:$8 sps:$4 sm:$0xff]  }
 0x237   : > { %4836 = vmatpush1.bf16.msra.mxu0 %v17338_v0  ;;  %3600 = vmatprep.mubr.bf16.mxu0 %v17858_v60  ;;  %v2856_v13 = vmax.f32 %v2316_v41, 0.0  ;;  %v17881_v0 = vld [vmem:[%s22626_s3 + $0x40] ss:$8 sps:$4 sm:$0xff]  }
 0x238   : > { %4837 = vmatprep.subr.bf16.mxu0 %v22885_v19  ;;  %v17868_v4 = vpack.c.bf16 %v2858_v24, %v2857_v46  ;;  %3832 = vmatprep.mubr.bf16.mxu1 %v16569_v42 }
 0x239   : > { %v17873_v8 = vpack.c.bf16 %v2856_v13, %v2855_v25  ;;  %v14784_v35 = vpop.f32.mrb[164].mxu0  ;;  %v17888_v25 = vld [vmem:[%s22626_s3 + $0x54] ss:$8 sps:$4 sm:$0xff]  }
 0x23a   : > { %22892 = vst [vmem:[#allocation53_spill] sm:$0xff] %v17868_v4  ;;  %v2337_v51 = vadd.f32 %v17518_v43, %v14784_v35  ;;  %v2328_v30 = vpop.f32.mrb[165].mxu0 }
 0x23b   : > { %22893 = vst [vmem:[#allocation54_spill] sm:$0xff] %v17873_v8  ;;  %4838 = vmatpush1.bf16.msra.mxu0 %v17336_v63  ;;  %v2329_v15 = vadd.f32 %v17518_v43, %v2328_v30  ;;  %v14785_v41 = vpop.f32.mrb[166].mxu0 }
 0x23c   : > { %4839 = vmatprep.subr.bf16.mxu0 %v22885_v19  ;;  %v2340_v46 = vadd.f32 %v17518_v43, %v14785_v41  ;;  %v2331_v24 = vpop.f32.mrb[167].mxu0  ;;  %v2861_v63 = vmax.f32 %v2337_v51, 0.0  ;;  %v16572_v51 = vld [vmem:[%s22626_s3 + $0x224] ss:$8 sps:$4 sm:$0xff]  }
 0x23d   : > { %v2332_v13 = vadd.f32 %v17518_v43, %v2331_v24  ;;  %v2859_v4 = vmax.f32 %v2329_v15, 0.0 }
 0x23e   : > { %3601 = vmatmul.mubr.bf16.gmra.mrb[16].mxu0 %v17881_v0  ;;  %v2862_v35 = vmax.f32 %v2340_v46, 0.0  ;;  %3833 = vmatmul.mubr.bf16.gmra.mrb[88].mxu1 %v16571_v57  ;;  %v16574_v57 = vld [vmem:[%s22626_s3 + $0x220] ss:$8 sps:$4 sm:$0xff]  }
 0x23f   : > { %4840 = vmatpush1.bf16.msra.mxu0 %v17350_v18  ;;  %3608 = vmatprep.mubr.bf16.mxu0 %v17888_v25  ;;  %v2860_v30 = vmax.f32 %v2332_v13, 0.0  ;;  %v17911_v18 = vld [vmem:[%s22626_s3 + $0x50] ss:$8 sps:$4 sm:$0xff]  }
 0x240   : > { %4841 = vmatprep.subr.bf16.mxu0 %v22885_v19  ;;  %v17898_v8 = vpack.c.bf16 %v2862_v35, %v2861_v63  ;;  %3840 = vmatprep.mubr.bf16.mxu1 %v16572_v51 }
 0x241   : > { %v17903_v41 = vpack.c.bf16 %v2860_v30, %v2859_v4  ;;  %v14788_v42 = vpop.f32.mrb[168].mxu0  ;;  %v17918_v4 = vld [vmem:[%s22626_s3 + $0x64] ss:$8 sps:$4 sm:$0xff]  }
 0x242   : > { %22894 = vst [vmem:[#allocation55_spill] sm:$0xff] %v17898_v8  ;;  %v2353_v15 = vadd.f32 %v17518_v43, %v14788_v42  ;;  %v2344_v46 = vpop.f32.mrb[169].mxu0 }
 0x243   : > { %22895 = vst [vmem:[#allocation56_spill] sm:$0xff] %v17903_v41  ;;  %4842 = vmatpush1.bf16.msra.mxu0 %v17348_v17  ;;  %v2345_v24 = vadd.f32 %v17518_v43, %v2344_v46  ;;  %v14789_v13 = vpop.f32.mrb[170].mxu0 }
 0x244   : > { %4843 = vmatprep.subr.bf16.mxu0 %v22885_v19  ;;  %v2356_v63 = vadd.f32 %v17518_v43, %v14789_v13  ;;  %v2347_v35 = vpop.f32.mrb[171].mxu0  ;;  %v2865_v17 = vmax.f32 %v2353_v15, 0.0  ;;  %v16575_v15 = vld [vmem:[%s22626_s3 + $0x234] ss:$8 sps:$4 sm:$0xff]  }
 0x245   : > { %v2348_v30 = vadd.f32 %v17518_v43, %v2347_v35  ;;  %v2863_v8 = vmax.f32 %v2345_v24, 0.0 }
 0x246   : > { %3609 = vmatmul.mubr.bf16.gmra.mrb[20].mxu0 %v17911_v18  ;;  %v2866_v42 = vmax.f32 %v2356_v63, 0.0  ;;  %3841 = vmatmul.mubr.bf16.gmra.mrb[92].mxu1 %v16574_v57  ;;  %v16577_v57 = vld [vmem:[%s22626_s3 + $0x230] ss:$8 sps:$4 sm:$0xff]  }
 0x247   : > { %4844 = vmatpush1.bf16.msra.mxu0 %v17362_v37  ;;  %3616 = vmatprep.mubr.bf16.mxu0 %v17918_v4  ;;  %v2864_v46 = vmax.f32 %v2348_v30, 0.0  ;;  %v17941_v37 = vld [vmem:[%s22626_s3 + $0x60] ss:$8 sps:$4 sm:$0xff]  }
 0x248   : > { %4845 = vmatprep.subr.bf16.mxu0 %v22885_v19  ;;  %v17928_v41 = vpack.c.bf16 %v2866_v42, %v2865_v17  ;;  %3848 = vmatprep.mubr.bf16.mxu1 %v16575_v15 }
 0x249   : > { %v17933_v13 = vpack.c.bf16 %v2864_v46, %v2863_v8  ;;  %v14792_v51 = vpop.f32.mrb[172].mxu0  ;;  %v17948_v8 = vld [vmem:[%s22626_s3 + $0x74] ss:$8 sps:$4 sm:$0xff]  }
 0x24a   : > { %22896 = vst [vmem:[#allocation57_spill] sm:$0xff] %v17928_v41  ;;  %v2369_v24 = vadd.f32 %v17518_v43, %v14792_v51  ;;  %v2360_v63 = vpop.f32.mrb[173].mxu0 }
 0x24b   : > { %22897 = vst [vmem:[#allocation58_spill] sm:$0xff] %v17933_v13  ;;  %4846 = vmatpush1.bf16.msra.mxu0 %v17360_v36  ;;  %v2361_v35 = vadd.f32 %v17518_v43, %v2360_v63  ;;  %v14793_v30 = vpop.f32.mrb[174].mxu0 }
 0x24c   : > { %4847 = vmatprep.subr.bf16.mxu0 %v22885_v19  ;;  %v2372_v17 = vadd.f32 %v17518_v43, %v14793_v30  ;;  %v2363_v42 = vpop.f32.mrb[175].mxu0  ;;  %v2869_v36 = vmax.f32 %v2369_v24, 0.0  ;;  %v17968_v24 = vld [vmem:[%s22626_s3 + $0x70] ss:$8 sps:$4 sm:$0xff]  }
 0x24d   : > { %v2364_v46 = vadd.f32 %v17518_v43, %v2363_v42  ;;  %v2867_v41 = vmax.f32 %v2361_v35, 0.0 }
 0x24e   : > { %3617 = vmatmul.mubr.bf16.gmra.mrb[24].mxu0 %v17941_v37  ;;  %v2870_v51 = vmax.f32 %v2372_v17, 0.0  ;;  %v17975_v17 = vld [vmem:[%s22626_s3 + $0x84] ss:$8 sps:$4 sm:$0xff]   ;;  %3849 = vmatmul.mubr.bf16.gmra.mrb[96].mxu1 %v16577_v57  ;;  %v17992_v57 = vld [vmem:[%s22626_s3 + $0x80] ss:$8 sps:$4 sm:$0xff]  }
 0x24f   : > { %4848 = vmatpush1.bf16.msra.mxu0 %v17374_v55  ;;  %3624 = vmatprep.mubr.bf16.mxu0 %v17948_v8  ;;  %v2868_v63 = vmax.f32 %v2364_v46, 0.0 }
 0x250   : > { %4849 = vmatprep.subr.bf16.mxu0 %v22885_v19  ;;  %v17958_v13 = vpack.c.bf16 %v2870_v51, %v2869_v36 }
 0x251   : > { %v17963_v30 = vpack.c.bf16 %v2868_v63, %v2867_v41  ;;  %v14796_v15 = vpop.f32.mrb[176].mxu0 }
 0x252   : > { %22898 = vst [vmem:[#allocation59_spill] sm:$0xff] %v17958_v13  ;;  %v2385_v55 = vadd.f32 %v17518_v43, %v14796_v15  ;;  %v2376_v35 = vpop.f32.mrb[177].mxu0  ;;  %v18033_v58 = vpop.f32.mrb[0].mxu1 }
 0x253   : > { %22899 = vst [vmem:[#allocation60_spill] sm:$0xff] %v17963_v30  ;;  %4850 = vmatpush1.bf16.msra.mxu0 %v17372_v54  ;;  %v2377_v42 = vadd.f32 %v17518_v43, %v2376_v35  ;;  %v14797_v41 = vpop.f32.mrb[178].mxu0  ;;  %v3660_v49 = vpop.f32.mrb[1].mxu1 }
 0x254   : > { %4851 = vmatprep.subr.bf16.mxu0 %v22885_v19  ;;  %v2388_v46 = vadd.f32 %v17518_v43, %v14797_v41  ;;  %v2379_v36 = vpop.f32.mrb[179].mxu0  ;;  %v2873_v63 = vmax.f32 %v2385_v55, 0.0 }
 0x255   : > { %v2380_v51 = vadd.f32 %v17518_v43, %v2379_v36  ;;  %v2871_v15 = vmax.f32 %v2377_v42, 0.0 }
 0x256   : > { %3625 = vmatmul.mubr.bf16.gmra.mrb[28].mxu0 %v17968_v24  ;;  %v2874_v54 = vmax.f32 %v2388_v46, 0.0 }
 0x257   : > { %4852 = vmatpush1.bf16.msra.mxu0 %v17386_v10  ;;  %3632 = vmatprep.mubr.bf16.mxu0 %v17975_v17  ;;  %v2872_v13 = vmax.f32 %v2380_v51, 0.0  ;;  %v17999_v10 = vld [vmem:[%s22626_s3 + $0x94] ss:$8 sps:$4 sm:$0xff]  }
 0x258   : > { %4853 = vmatprep.subr.bf16.mxu0 %v22885_v19  ;;  %v17985_v35 = vpack.c.bf16 %v2874_v54, %v2873_v63 }
 0x259   : > { %v17987_v30 = vpack.c.bf16 %v2872_v13, %v2871_v15  ;;  %v14800_v41 = vpop.f32.mrb[180].mxu0 }
 0x25a   : > { %22900 = vst [vmem:[#allocation61_spill] sm:$0xff] %v17985_v35  ;;  %v2401_v55 = vadd.f32 %v17518_v43, %v14800_v41  ;;  %v2392_v46 = vpop.f32.mrb[181].mxu0 }
 0x25b   : > { %22901 = vst [vmem:[#allocation62_spill] sm:$0xff] %v17987_v30  ;;  %4854 = vmatpush1.bf16.msra.mxu0 %v17384_v9  ;;  %v2393_v42 = vadd.f32 %v17518_v43, %v2392_v46  ;;  %v14801_v13 = vpop.f32.mrb[182].mxu0  ;;  %v18013_v46 = vld [vmem:[%s22626_s3 + $0x90] ss:$8 sps:$4 sm:$0xff]  }
 0x25c   : > { %v2404_v36 = vadd.f32 %v17518_v43, %v14801_v13  ;;  %v2395_v51 = vpop.f32.mrb[183].mxu0  ;;  %v2877_v54 = vmax.f32 %v2401_v55, 0.0  ;;  %v18019_v55 = vld [vmem:[%s22626_s3 + $0xa4] ss:$8 sps:$4 sm:$0xff]  }
 0x25d   : > { %v2396_v63 = vadd.f32 %v17518_v43, %v2395_v51  ;;  %v2875_v9 = vmax.f32 %v2393_v42, 0.0  ;;  %v18024_v42 = vld [vmem:[%s22625_s2] ss:$0 sm:$0xff] }
 0x25e   : > { %3633 = vmatmul.mubr.bf16.gmra.mrb[32].mxu0 %v17992_v57  ;;  %v2878_v15 = vmax.f32 %v2404_v36, 0.0 }
 0x25f   : > { %3640 = vmatprep.mubr.bf16.mxu0 %v17999_v10  ;;  %v2876_v41 = vmax.f32 %v2396_v63, 0.0 }
 0x260   : > { %v18006_v35 = vpack.c.bf16 %v2878_v15, %v2877_v54 }
 0x261   : > { %v18008_v30 = vpack.c.bf16 %v2876_v41, %v2875_v9  ;;  %v14804_v16 = vpop.f32.mrb[184].mxu0 }
 0x262   : > { %22902 = vst [vmem:[#allocation63_spill] sm:$0xff] %v18006_v35  ;;  %v2417_v13 = vadd.f32 %v17518_v43, %v14804_v16  ;;  %v2408_v51 = vpop.f32.mrb[185].mxu0 }
 0x263   : > { %22903 = vst [vmem:[#allocation64_spill] sm:$0xff] %v18008_v30  ;;  %v2409_v36 = vadd.f32 %v18024_v42, %v2408_v51  ;;  %v14805_v63 = vpop.f32.mrb[186].mxu0 }
 0x264   : > { %v2420_v54 = vadd.f32 %v18024_v42, %v14805_v63  ;;  %v2411_v15 = vpop.f32.mrb[187].mxu0  ;;  %v2881_v43 = vmax.f32 %v2417_v13, 0.0  ;;  %v18040_v63 = vld [vmem:[%s22626_s3 + $0xa0] ss:$8 sps:$4 sm:$0xff]   ;;  %v18042_v13 = vpop.f32.mrb[2].mxu1 }
 0x265   : > { %v2412_v9 = vadd.f32 %v18024_v42, %v2411_v15  ;;  %v2879_v41 = vmax.f32 %v2409_v36, 0.0 }
 0x266   : > { %3641 = vmatmul.mubr.bf16.gmra.mrb[36].mxu0 %v18013_v46  ;;  %v2882_v16 = vmax.f32 %v2420_v54, 0.0 }
 0x267   : > { %3648 = vmatprep.mubr.bf16.mxu0 %v18019_v55  ;;  %v2880_v35 = vmax.f32 %v2412_v9, 0.0  ;;  %v3663_v9 = vpop.f32.mrb[3].mxu1 }
 0x268   : > { %v18031_v30 = vpack.c.bf16 %v2882_v16, %v2881_v43  ;;  %v18052_v56 = vpop.f32.mrb[4].mxu1 }
 0x269   : > { %v18035_v45 = vpack.c.bf16 %v2880_v35, %v2879_v41  ;;  %v14808_v51 = vpop.f32.mrb[188].mxu0  ;;  %v3668_v62 = vpop.f32.mrb[5].mxu1 }
 0x26a   : > { %22904 = vst [vmem:[#allocation65_spill] sm:$0xff] %v18031_v30  ;;  %v2424_v15 = vpop.f32.mrb[189].mxu0  ;;  %v2433_v54 = vadd.f32 %v18024_v42, %v14808_v51 }
 0x26b   : > { %22905 = vst [vmem:[#allocation66_spill] sm:$0xff] %v18035_v45  ;;  %v14809_v36 = vpop.f32.mrb[190].mxu0  ;;  %v2425_v43 = vadd.f32 %v18024_v42, %v2424_v15 }
 0x26c   : > { %v2427_v16 = vpop.f32.mrb[191].mxu0  ;;  %v2436_v49 = vadd.f32 %v18024_v42, %v14809_v36  ;;  %v2885_v30 = vmax.f32 %v2433_v54, 0.0  ;;  %v18058_v36 = vpop.f32.mrb[6].mxu1 }
 0x26d   : > { %v2428_v41 = vadd.f32 %v18024_v42, %v2427_v16  ;;  %v2883_v50 = vmax.f32 %v2425_v43, 0.0  ;;  %v3671_v54 = vpop.f32.mrb[7].mxu1 }
 0x26e   : > { %3649 = vmatmul.mubr.bf16.gmra.mrb[40].mxu0 %v18040_v63  ;;  %v2886_v45 = vmax.f32 %v2436_v49, 0.0 }
 0x26f   : > { %4855 = vmatprep.mubr.bf16.mxu0 %v17743_v20  ;;  %v2884_v51 = vmax.f32 %v2428_v41, 0.0 }
 0x270   : > { %v18054_v9 = vpack.c.bf16 %v2886_v45, %v2885_v30 }
 0x271   : > { %v14812_v15 = vpop.f32.mrb[192].mxu0  ;;  %v18056_v6 = vpack.c.bf16 %v2884_v51, %v2883_v50 }
 0x272   : > { %22906 = vst [vmem:[#allocation67_spill] sm:$0xff] %v18054_v9  ;;  %v2440_v35 = vpop.f32.mrb[193].mxu0  ;;  %v2449_v16 = vadd.f32 %v18024_v42, %v14812_v15  ;;  %v18068_v15 = vpop.f32.mrb[8].mxu1 }
 0x273   : > { %22907 = vst [vmem:[#allocation68_spill] sm:$0xff] %v18056_v6  ;;  %v14813_v21 = vpop.f32.mrb[194].mxu0  ;;  %v2441_v49 = vadd.f32 %v18024_v42, %v2440_v35  ;;  %v3676_v9 = vpop.f32.mrb[9].mxu1 }
 0x274   : > { %v2443_v20 = vpop.f32.mrb[195].mxu0  ;;  %v2452_v45 = vadd.f32 %v18024_v42, %v14813_v21  ;;  %v2889_v62 = vmax.f32 %v2449_v16, 0.0 }
 0x275   : > { %v2444_v30 = vadd.f32 %v18024_v42, %v2443_v20  ;;  %v2887_v41 = vmax.f32 %v2441_v49, 0.0  ;;  %v18075_v20 = vpop.f32.mrb[10].mxu1 }
 0x276   : > { %4856 = vmatmul.mubr.bf16.vlgmr.msra.gmra.mrb[44].mxu0 %v17763_v59  ;;  %v2890_v50 = vmax.f32 %v2452_v45, 0.0  ;;  %v3679_v45 = vpop.f32.mrb[11].mxu1 }
 0x277   : > { %4863 = vmatprep.mubr.bf16.mxu0 %v17769_v26  ;;  %v2888_v51 = vmax.f32 %v2444_v30, 0.0 }
 0x278   : > { %v18070_v54 = vpack.c.bf16 %v2890_v50, %v2889_v62 }
 0x279   : > { %v14816_v35 = vpop.f32.mrb[196].mxu0  ;;  %v18072_v6 = vpack.c.bf16 %v2888_v51, %v2887_v41 }
 0x27a   : > { %22908 = vst [vmem:[#allocation69_spill] sm:$0xff] %v18070_v54  ;;  %v2465_v21 = vadd.f32 %v18024_v42, %v14816_v35  ;;  %v2456_v43 = vpop.f32.mrb[197].mxu0 }
 0x27b   : > { %22909 = vst [vmem:[#allocation70_spill] sm:$0xff] %v18072_v6  ;;  %v2457_v59 = vadd.f32 %v18024_v42, %v2456_v43  ;;  %v14817_v16 = vpop.f32.mrb[198].mxu0  ;;  %v18086_v43 = vpop.f32.mrb[12].mxu1 }
 0x27c   : > { %v2468_v26 = vadd.f32 %v18024_v42, %v14817_v16  ;;  %v2459_v49 = vpop.f32.mrb[199].mxu0  ;;  %v2893_v9 = vmax.f32 %v2465_v21, 0.0  ;;  %v3684_v54 = vpop.f32.mrb[13].mxu1 }
 0x27d   : > { %v2460_v62 = vadd.f32 %v18024_v42, %v2459_v49  ;;  %v2891_v41 = vmax.f32 %v2457_v59, 0.0  ;;  %v18091_v49 = vpop.f32.mrb[14].mxu1 }
 0x27e   : > { %v2894_v50 = vmax.f32 %v2468_v26, 0.0  ;;  %4864 = vmatmul.mubr.bf16.gmra.mrb[48].mxu0 %v17791_v14  ;;  %v3687_v59 = vpop.f32.mrb[15].mxu1 }
 0x27f   : > { %v2892_v51 = vmax.f32 %v2460_v62, 0.0  ;;  %4871 = vmatprep.mubr.bf16.mxu0 %v17798_v22 }
 0x280   : > { %v18084_v35 = vpack.c.bf16 %v2894_v50, %v2893_v9 }
 0x281   : > { %v18088_v45 = vpack.c.bf16 %v2892_v51, %v2891_v41  ;;  %v14820_v16 = vpop.f32.mrb[200].mxu0 }
 0x282   : > { %22910 = vst [vmem:[#allocation71_spill] sm:$0xff] %v18084_v35  ;;  %v2481_v30 = vadd.f32 %v18024_v42, %v14820_v16  ;;  %v2472_v6 = vpop.f32.mrb[201].mxu0 }
 0x283   : > { %22911 = vst [vmem:[#allocation72_spill] sm:$0xff] %v18088_v45  ;;  %v2473_v21 = vadd.f32 %v18024_v42, %v2472_v6  ;;  %v14821_v14 = vpop.f32.mrb[202].mxu0  ;;  %v18102_v6 = vpop.f32.mrb[16].mxu1 }
 0x284   : > { %v2484_v26 = vadd.f32 %v18024_v42, %v14821_v14  ;;  %v2475_v22 = vpop.f32.mrb[203].mxu0  ;;  %v2897_v50 = vmax.f32 %v2481_v30, 0.0  ;;  %v3692_v35 = vpop.f32.mrb[17].mxu1 }
 0x285   : > { %v2476_v9 = vadd.f32 %v18024_v42, %v2475_v22  ;;  %v2895_v54 = vmax.f32 %v2473_v21, 0.0  ;;  %v18106_v62 = vpop.f32.mrb[18].mxu1 }
 0x286   : > { %v2898_v41 = vmax.f32 %v2484_v26, 0.0  ;;  %4872 = vmatmul.mubr.bf16.gmra.mrb[52].mxu0 %v17821_v31  ;;  %v3695_v22 = vpop.f32.mrb[19].mxu1 }
 0x287   : > { %v2896_v51 = vmax.f32 %v2476_v9, 0.0  ;;  %4879 = vmatprep.mubr.bf16.mxu0 %v17828_v28 }
 0x288   : > { %v18100_v16 = vpack.c.bf16 %v2898_v41, %v2897_v50 }
 0x289   : > { %v18104_v59 = vpack.c.bf16 %v2896_v51, %v2895_v54  ;;  %v14824_v14 = vpop.f32.mrb[204].mxu0 }
 0x28a   : > { %22912 = vst [vmem:[#allocation73_spill] sm:$0xff] %v18100_v16  ;;  %v2488_v45 = vpop.f32.mrb[205].mxu0  ;;  %v2497_v30 = vadd.f32 %v18024_v42, %v14824_v14  ;;  %v18116_v14 = vpop.f32.mrb[20].mxu1 }
 0x28b   : > { %22913 = vst [vmem:[#allocation74_spill] sm:$0xff] %v18104_v59  ;;  %v14825_v26 = vpop.f32.mrb[206].mxu0  ;;  %v2489_v31 = vadd.f32 %v18024_v42, %v2488_v45  ;;  %v3700_v16 = vpop.f32.mrb[21].mxu1 }
 0x28c   : > { %v2491_v21 = vpop.f32.mrb[207].mxu0  ;;  %v2500_v9 = vadd.f32 %v18024_v42, %v14825_v26  ;;  %v2901_v35 = vmax.f32 %v2497_v30, 0.0  ;;  %v18122_v26 = vpop.f32.mrb[22].mxu1 }
 0x28d   : > { %v2492_v50 = vadd.f32 %v18024_v42, %v2491_v21  ;;  %v2899_v54 = vmax.f32 %v2489_v31, 0.0  ;;  %v3703_v30 = vpop.f32.mrb[23].mxu1 }
 0x28e   : > { %4880 = vmatmul.mubr.bf16.gmra.mrb[56].mxu0 %v17851_v47  ;;  %v2902_v41 = vmax.f32 %v2500_v9, 0.0 }
 0x28f   : > { %4887 = vmatprep.mubr.bf16.mxu0 %v17858_v60  ;;  %v2900_v51 = vmax.f32 %v2492_v50, 0.0 }
 0x290   : > { %v18118_v22 = vpack.c.bf16 %v2902_v41, %v2901_v35 }
 0x291   : > { %v14828_v45 = vpop.f32.mrb[208].mxu0  ;;  %v18120_v59 = vpack.c.bf16 %v2900_v51, %v2899_v54 }
 0x292   : > { %22914 = vst [vmem:[#allocation75_spill] sm:$0xff] %v18118_v22  ;;  %v2504_v28 = vpop.f32.mrb[209].mxu0  ;;  %v2513_v21 = vadd.f32 %v18024_v42, %v14828_v45  ;;  %v18132_v45 = vpop.f32.mrb[24].mxu1 }
 0x293   : > { %22915 = vst [vmem:[#allocation76_spill] sm:$0xff] %v18120_v59  ;;  %v14829_v47 = vpop.f32.mrb[210].mxu0  ;;  %v2505_v9 = vadd.f32 %v18024_v42, %v2504_v28  ;;  %v3708_v22 = vpop.f32.mrb[25].mxu1 }
 0x294   : > { %v2507_v60 = vpop.f32.mrb[211].mxu0  ;;  %v2516_v50 = vadd.f32 %v18024_v42, %v14829_v47  ;;  %v2905_v16 = vmax.f32 %v2513_v21, 0.0  ;;  %v18142_v21 = vpop.f32.mrb[26].mxu1 }
 0x295   : > { %v2508_v35 = vadd.f32 %v18024_v42, %v2507_v60  ;;  %v2903_v54 = vmax.f32 %v2505_v9, 0.0  ;;  %v3711_v60 = vpop.f32.mrb[27].mxu1 }
 0x296   : > { %4888 = vmatmul.mubr.bf16.gmra.mrb[60].mxu0 %v17881_v0  ;;  %v2906_v41 = vmax.f32 %v2516_v50, 0.0  ;;  %v16578_v0 = vld [vmem:[%s22627_s4 + $0x8] sm:$0xff]  }
 0x297   : > { %4895 = vmatprep.mubr.bf16.mxu0 %v17888_v25  ;;  %v2904_v51 = vmax.f32 %v2508_v35, 0.0  ;;  %14874 = vmatprep.subr.bf16.mxu1 %v16578_v0 }
 0x298   : > { %v18134_v30 = vpack.c.bf16 %v2906_v41, %v2905_v16  ;;  %15094 = vmatprep.subr.bf16.mxu0 %v16578_v0  ;;  %14875 = vmatpush3.bf16.msra.mxu1 %v16578_v0 }
 0x299   : > { %v14832_v28 = vpop.f32.mrb[212].mxu0  ;;  %v18136_v59 = vpack.c.bf16 %v2904_v51, %v2903_v54  ;;  %15095 = vmatpush3.bf16.msra.mxu0 %v16578_v0 }
 0x29a   : > { %22916 = vst [vmem:[#allocation77_spill] sm:$0xff] %v18134_v30  ;;  %v2529_v47 = vadd.f32 %v18024_v42, %v14832_v28  ;;  %v2520_v31 = vpop.f32.mrb[213].mxu0 }
 0x29b   : > { %22917 = vst [vmem:[#allocation78_spill] sm:$0xff] %v18136_v59  ;;  %v2521_v25 = vadd.f32 %v18024_v42, %v2520_v31  ;;  %v14833_v9 = vpop.f32.mrb[214].mxu0 }
 0x29c   : > { %v2532_v50 = vadd.f32 %v18024_v42, %v14833_v9  ;;  %v2523_v35 = vpop.f32.mrb[215].mxu0  ;;  %v2909_v41 = vmax.f32 %v2529_v47, 0.0  ;;  %v18153_v9 = vpop.f32.mrb[28].mxu1 }
 0x29d   : > { %v2524_v16 = vadd.f32 %v18024_v42, %v2523_v35  ;;  %v2907_v51 = vmax.f32 %v2521_v25, 0.0  ;;  %v3716_v30 = vpop.f32.mrb[29].mxu1 }
 0x29e   : > { %v2910_v54 = vmax.f32 %v2532_v50, 0.0  ;;  %4896 = vmatmul.mubr.bf16.gmra.mrb[64].mxu0 %v17911_v18  ;;  %v18158_v0 = vpop.f32.mrb[30].mxu1 }
 0x29f   : > { %v2908_v31 = vmax.f32 %v2524_v16, 0.0  ;;  %4903 = vmatprep.mubr.bf16.mxu0 %v17918_v4  ;;  %v3719_v25 = vpop.f32.mrb[31].mxu1 }
 0x2a0   : > { %v18151_v28 = vpack.c.bf16 %v2910_v54, %v2909_v41 }
 0x2a1   : > { %v18155_v60 = vpack.c.bf16 %v2908_v31, %v2907_v51  ;;  %v14836_v22 = vpop.f32.mrb[216].mxu0 }
 0x2a2   : > { %22918 = vst [vmem:[#allocation79_spill] sm:$0xff] %v18151_v28  ;;  %v2545_v35 = vadd.f32 %v18024_v42, %v14836_v22  ;;  %v2536_v59 = vpop.f32.mrb[217].mxu0 }
 0x2a3   : > { %22919 = vst [vmem:[#allocation80_spill] sm:$0xff] %v18155_v60  ;;  %v2537_v47 = vadd.f32 %v18024_v42, %v2536_v59  ;;  %v14837_v18 = vpop.f32.mrb[218].mxu0  ;;  %v18169_v59 = vpop.f32.mrb[32].mxu1 }
 0x2a4   : > { %v2548_v50 = vadd.f32 %v18024_v42, %v14837_v18  ;;  %v2539_v4 = vpop.f32.mrb[219].mxu0  ;;  %v2913_v54 = vmax.f32 %v2545_v35, 0.0  ;;  %v3724_v28 = vpop.f32.mrb[33].mxu1 }
 0x2a5   : > { %v2540_v41 = vadd.f32 %v18024_v42, %v2539_v4  ;;  %v2911_v30 = vmax.f32 %v2537_v47, 0.0  ;;  %v18174_v4 = vpop.f32.mrb[34].mxu1  ;;  %v18184_v28 = vld [vmem:[%s22627_s4] sm:$0xff]  }
 0x2a6   : > { %v2914_v51 = vmax.f32 %v2548_v50, 0.0  ;;  %4904 = vmatmul.mubr.bf16.gmra.mrb[68].mxu0 %v17941_v37  ;;  %v3727_v47 = vpop.f32.mrb[35].mxu1  ;;  %14884 = vmatprep.subr.bf16.mxu1 %v18184_v28 }
 0x2a7   : > { %v2912_v22 = vmax.f32 %v2540_v41, 0.0  ;;  %4911 = vmatprep.mubr.bf16.mxu0 %v17948_v8  ;;  %15104 = vmatprep.subr.bf16.mxu0 %v18184_v28 }
 0x2a8   : > { %v18167_v31 = vpack.c.bf16 %v2914_v51, %v2913_v54 }
 0x2a9   : > { %v18171_v25 = vpack.c.bf16 %v2912_v22, %v2911_v30  ;;  %v14840_v18 = vpop.f32.mrb[220].mxu0 }
 0x2aa   : > { %22920 = vst [vmem:[#allocation81_spill] sm:$0xff] %v18167_v31  ;;  %v2561_v16 = vadd.f32 %v18024_v42, %v14840_v18  ;;  %v2552_v60 = vpop.f32.mrb[221].mxu0 }
 0x2ab   : > { %22921 = vst [vmem:[#allocation82_spill] sm:$0xff] %v18171_v25  ;;  %v2553_v35 = vadd.f32 %v18024_v42, %v2552_v60  ;;  %v14841_v37 = vpop.f32.mrb[222].mxu0 }
 0x2ac   : > { %v2564_v50 = vadd.f32 %v18024_v42, %v14841_v37  ;;  %v2555_v8 = vpop.f32.mrb[223].mxu0  ;;  %v2917_v51 = vmax.f32 %v2561_v16, 0.0  ;;  %v18191_v37 = vpop.f32.mrb[36].mxu1 }
 0x2ad   : > { %v2556_v54 = vadd.f32 %v18024_v42, %v2555_v8  ;;  %v2915_v60 = vmax.f32 %v2553_v35, 0.0 }
 0x2ae   : > { %v2918_v30 = vmax.f32 %v2564_v50, 0.0  ;;  %4912 = vmatmul.mubr.bf16.gmra.mrb[72].mxu0 %v17968_v24  ;;  %v3732_v50 = vpop.f32.mrb[37].mxu1 }
 0x2af   : > { %v2916_v22 = vmax.f32 %v2556_v54, 0.0  ;;  %4919 = vmatprep.mubr.bf16.mxu0 %v17975_v17  ;;  %v18197_v24 = vpop.f32.mrb[38].mxu1 }
 0x2b0   : > { %v18188_v18 = vpack.c.bf16 %v2918_v30, %v2917_v51  ;;  %v3735_v54 = vpop.f32.mrb[39].mxu1 }
 0x2b1   : > { %v18194_v16 = vpack.c.bf16 %v2916_v22, %v2915_v60  ;;  %v14844_v47 = vpop.f32.mrb[224].mxu0 }
 0x2b2   : > { %22922 = vst [vmem:[#allocation83_spill] sm:$0xff] %v18188_v18  ;;  %v2577_v8 = vadd.f32 %v18024_v42, %v14844_v47  ;;  %v2568_v41 = vpop.f32.mrb[225].mxu0 }
 0x2b3   : > { %22923 = vst [vmem:[#allocation84_spill] sm:$0xff] %v18194_v16  ;;  %v2569_v35 = vadd.f32 %v18024_v42, %v2568_v41  ;;  %v14845_v17 = vpop.f32.mrb[226].mxu0  ;;  %v18208_v41 = vpop.f32.mrb[40].mxu1 }
 0x2b4   : > { %v2580_v51 = vadd.f32 %v18024_v42, %v14845_v17  ;;  %v2571_v30 = vpop.f32.mrb[227].mxu0  ;;  %v2921_v22 = vmax.f32 %v2577_v8, 0.0  ;;  %v3740_v25 = vpop.f32.mrb[41].mxu1 }
 0x2b5   : > { %v2572_v60 = vadd.f32 %v18024_v42, %v2571_v30  ;;  %v2919_v47 = vmax.f32 %v2569_v35, 0.0  ;;  %v18213_v30 = vpop.f32.mrb[42].mxu1 }
 0x2b6   : > { %v2922_v16 = vmax.f32 %v2580_v51, 0.0  ;;  %4920 = vmatmul.mubr.bf16.gmra.mrb[76].mxu0 %v17992_v57  ;;  %v3743_v35 = vpop.f32.mrb[43].mxu1 }
 0x2b7   : > { %v2920_v50 = vmax.f32 %v2572_v60, 0.0  ;;  %4927 = vmatprep.mubr.bf16.mxu0 %v17999_v10 }
 0x2b8   : > { %v18206_v31 = vpack.c.bf16 %v2922_v16, %v2921_v22 }
 0x2b9   : > { %v18210_v54 = vpack.c.bf16 %v2920_v50, %v2919_v47  ;;  %v14848_v17 = vpop.f32.mrb[228].mxu0 }
 0x2ba   : > { %22924 = vst [vmem:[#allocation85_spill] sm:$0xff] %v18206_v31  ;;  %v2593_v18 = vadd.f32 %v18024_v42, %v14848_v17  ;;  %v2584_v23 = vpop.f32.mrb[229].mxu0 }
 0x2bb   : > { %22925 = vst [vmem:[#allocation86_spill] sm:$0xff] %v18210_v54  ;;  %v2585_v8 = vadd.f32 %v18024_v42, %v2584_v23  ;;  %v14849_v57 = vpop.f32.mrb[230].mxu0  ;;  %v18224_v23 = vpop.f32.mrb[44].mxu1 }
 0x2bc   : > { %v2596_v51 = vadd.f32 %v18024_v42, %v14849_v57  ;;  %v2587_v10 = vpop.f32.mrb[231].mxu0  ;;  %v2925_v22 = vmax.f32 %v2593_v18, 0.0  ;;  %v3748_v31 = vpop.f32.mrb[45].mxu1 }
 0x2bd   : > { %v2588_v60 = vadd.f32 %v18024_v42, %v2587_v10  ;;  %v2923_v25 = vmax.f32 %v2585_v8, 0.0  ;;  %v18229_v10 = vpop.f32.mrb[46].mxu1 }
 0x2be   : > { %v2926_v47 = vmax.f32 %v2596_v51, 0.0  ;;  %4928 = vmatmul.mubr.bf16.gmra.mrb[80].mxu0 %v18013_v46  ;;  %v3751_v8 = vpop.f32.mrb[47].mxu1 }
 0x2bf   : > { %v2924_v50 = vmax.f32 %v2588_v60, 0.0  ;;  %4935 = vmatprep.mubr.bf16.mxu0 %v18019_v55 }
 0x2c0   : > { %v18222_v17 = vpack.c.bf16 %v2926_v47, %v2925_v22 }
 0x2c1   : > { %v18226_v35 = vpack.c.bf16 %v2924_v50, %v2923_v25  ;;  %v14852_v57 = vpop.f32.mrb[232].mxu0 }
 0x2c2   : > { %22926 = vst [vmem:[#allocation87_spill] sm:$0xff] %v18222_v17  ;;  %v2609_v16 = vadd.f32 %v18024_v42, %v14852_v57  ;;  %v2600_v54 = vpop.f32.mrb[233].mxu0 }
 0x2c3   : > { %22927 = vst [vmem:[#allocation88_spill] sm:$0xff] %v18226_v35  ;;  %v2601_v18 = vadd.f32 %v18024_v42, %v2600_v54  ;;  %v14853_v46 = vpop.f32.mrb[234].mxu0  ;;  %v16591_v54 = vld [vmem:[%s22626_s3 + $0xb4] ss:$8 sps:$4 sm:$0xff]  }
 0x2c4   : > { %v2612_v51 = vadd.f32 %v18024_v42, %v14853_v46  ;;  %v2603_v55 = vpop.f32.mrb[235].mxu0  ;;  %v2929_v47 = vmax.f32 %v2609_v16, 0.0  ;;  %v18242_v46 = vpop.f32.mrb[48].mxu1 }
 0x2c5   : > { %v2604_v22 = vadd.f32 %v18024_v42, %v2603_v55  ;;  %v2927_v31 = vmax.f32 %v2601_v18, 0.0  ;;  %v3756_v17 = vpop.f32.mrb[49].mxu1 }
 0x2c6   : > { %v2930_v25 = vmax.f32 %v2612_v51, 0.0  ;;  %4936 = vmatmul.mubr.bf16.gmra.mrb[84].mxu0 %v18040_v63  ;;  %v18247_v55 = vpop.f32.mrb[50].mxu1  ;;  %v16592_v17 = vld [vmem:[%s22626_s3 + $0xb0] ss:$8 sps:$4 sm:$0xff]  }
 0x2c7   : > { %v2928_v50 = vmax.f32 %v2604_v22, 0.0  ;;  %4943 = vmatprep.mubr.bf16.mxu0 %v16591_v54  ;;  %v3759_v22 = vpop.f32.mrb[51].mxu1 }
 0x2c8   : > { %v18240_v57 = vpack.c.bf16 %v2930_v25, %v2929_v47 }
 0x2c9   : > { %v18244_v8 = vpack.c.bf16 %v2928_v50, %v2927_v31  ;;  %v14856_v60 = vpop.f32.mrb[236].mxu0  ;;  %v18262_v22 = vpop.f32.mrb[52].mxu1 }
 0x2ca   : > { %22928 = vst [vmem:[#allocation89_spill] sm:$0xff] %v18240_v57  ;;  %v2625_v16 = vadd.f32 %v18024_v42, %v14856_v60  ;;  %v2616_v51 = vpop.f32.mrb[237].mxu0 }
 0x2cb   : > { %22929 = vst [vmem:[#allocation90_spill] sm:$0xff] %v18244_v8  ;;  %v2617_v63 = vadd.f32 %v18024_v42, %v2616_v51  ;;  %v14857_v18 = vpop.f32.mrb[238].mxu0  ;;  %v16593_v51 = vld [vmem:[%s22626_s3 + $0xc4] ss:$8 sps:$4 sm:$0xff]  }
 0x2cc   : > { %v2628_v35 = vadd.f32 %v18024_v42, %v14857_v18  ;;  %v2619_v54 = vpop.f32.mrb[239].mxu0  ;;  %v2933_v31 = vmax.f32 %v2625_v16, 0.0 }
 0x2cd   : > { %v2620_v25 = vadd.f32 %v18024_v42, %v2619_v54  ;;  %v2931_v60 = vmax.f32 %v2617_v63, 0.0 }
 0x2ce   : > { %v2934_v50 = vmax.f32 %v2628_v35, 0.0  ;;  %4944 = vmatmul.mubr.bf16.gmra.mrb[88].mxu0 %v16592_v17  ;;  %v3764_v35 = vpop.f32.mrb[53].mxu1 }
 0x2cf   : > { %v2932_v57 = vmax.f32 %v2620_v25, 0.0  ;;  %4951 = vmatprep.mubr.bf16.mxu0 %v16593_v51  ;;  %v18267_v44 = vpop.f32.mrb[54].mxu1 }
 0x2d0   : > { %v18260_v18 = vpack.c.bf16 %v2934_v50, %v2933_v31  ;;  %v3767_v17 = vpop.f32.mrb[55].mxu1 }
 0x2d1   : > { %v18264_v47 = vpack.c.bf16 %v2932_v57, %v2931_v60  ;;  %v14860_v16 = vpop.f32.mrb[240].mxu0  ;;  %v18282_v17 = vpop.f32.mrb[56].mxu1 }
 0x2d2   : > { %22930 = vst [vmem:[#allocation91_spill] sm:$0xff] %v18260_v18  ;;  %v2641_v54 = vadd.f32 %v18024_v42, %v14860_v16  ;;  %v2632_v8 = vpop.f32.mrb[241].mxu0  ;;  %v16594_v16 = vld [vmem:[%s22626_s3 + $0xc0] ss:$8 sps:$4 sm:$0xff]  }
 0x2d3   : > { %22931 = vst [vmem:[#allocation92_spill] sm:$0xff] %v18264_v47  ;;  %v2633_v63 = vadd.f32 %v18024_v42, %v2632_v8  ;;  %v14861_v25 = vpop.f32.mrb[242].mxu0  ;;  %v16595_v8 = vld [vmem:[%s22626_s3 + $0xd4] ss:$8 sps:$4 sm:$0xff]  }
 0x2d4   : > { %v2644_v48 = vadd.f32 %v18024_v42, %v14861_v25  ;;  %v2635_v51 = vpop.f32.mrb[243].mxu0  ;;  %v2937_v50 = vmax.f32 %v2641_v54, 0.0 }
 0x2d5   : > { %v2636_v57 = vadd.f32 %v18024_v42, %v2635_v51  ;;  %v2935_v35 = vmax.f32 %v2633_v63, 0.0 }
 0x2d6   : > { %v2938_v60 = vmax.f32 %v2644_v48, 0.0  ;;  %4952 = vmatmul.mubr.bf16.gmra.mrb[92].mxu0 %v16594_v16  ;;  %v3772_v48 = vpop.f32.mrb[57].mxu1 }
 0x2d7   : > { %v2936_v18 = vmax.f32 %v2636_v57, 0.0  ;;  %4959 = vmatprep.mubr.bf16.mxu0 %v16595_v8  ;;  %v18287_v5 = vpop.f32.mrb[58].mxu1 }
 0x2d8   : > { %v18280_v25 = vpack.c.bf16 %v2938_v60, %v2937_v50  ;;  %v3775_v16 = vpop.f32.mrb[59].mxu1 }
 0x2d9   : > { %v18284_v31 = vpack.c.bf16 %v2936_v18, %v2935_v35  ;;  %v14864_v54 = vpop.f32.mrb[244].mxu0  ;;  %v18302_v16 = vpop.f32.mrb[60].mxu1 }
 0x2da   : > { %22932 = vst [vmem:[#allocation93_spill] sm:$0xff] %v18280_v25  ;;  %v2657_v51 = vadd.f32 %v18024_v42, %v14864_v54  ;;  %v2648_v47 = vpop.f32.mrb[245].mxu0  ;;  %v16596_v54 = vld [vmem:[%s22626_s3 + $0xd0] ss:$8 sps:$4 sm:$0xff]  }
 0x2db   : > { %22933 = vst [vmem:[#allocation94_spill] sm:$0xff] %v18284_v31  ;;  %v2649_v63 = vadd.f32 %v18024_v42, %v2648_v47  ;;  %v14865_v57 = vpop.f32.mrb[246].mxu0  ;;  %v16597_v47 = vld [vmem:[%s22626_s3 + $0xe4] ss:$8 sps:$4 sm:$0xff]  }
 0x2dc   : > { %v2660_v7 = vadd.f32 %v18024_v42, %v14865_v57  ;;  %v2651_v8 = vpop.f32.mrb[247].mxu0  ;;  %v2941_v60 = vmax.f32 %v2657_v51, 0.0 }
 0x2dd   : > { %v2652_v18 = vadd.f32 %v18024_v42, %v2651_v8  ;;  %v2939_v48 = vmax.f32 %v2649_v63, 0.0 }
 0x2de   : > { %v2942_v35 = vmax.f32 %v2660_v7, 0.0  ;;  %4960 = vmatmul.mubr.bf16.gmra.mrb[96].mxu0 %v16596_v54  ;;  %v3780_v7 = vpop.f32.mrb[61].mxu1 }
 0x2df   : > { %v2940_v25 = vmax.f32 %v2652_v18, 0.0  ;;  %4967 = vmatprep.mubr.bf16.mxu0 %v16597_v47  ;;  %v18307_v29 = vpop.f32.mrb[62].mxu1 }
 0x2e0   : > { %v18300_v57 = vpack.c.bf16 %v2942_v35, %v2941_v60  ;;  %v3783_v54 = vpop.f32.mrb[63].mxu1 }
 0x2e1   : > { %v18304_v50 = vpack.c.bf16 %v2940_v25, %v2939_v48  ;;  %v14868_v51 = vpop.f32.mrb[248].mxu0  ;;  %v18322_v54 = vpop.f32.mrb[64].mxu1 }
 0x2e2   : > { %22934 = vst [vmem:[#allocation95_spill] sm:$0xff] %v18300_v57  ;;  %v2673_v8 = vadd.f32 %v18024_v42, %v14868_v51  ;;  %v2664_v31 = vpop.f32.mrb[249].mxu0  ;;  %v16598_v51 = vld [vmem:[%s22626_s3 + $0xe0] ss:$8 sps:$4 sm:$0xff]  }
 0x2e3   : > { %22935 = vst [vmem:[#allocation96_spill] sm:$0xff] %v18304_v50  ;;  %v2665_v63 = vadd.f32 %v18024_v42, %v2664_v31  ;;  %v14869_v18 = vpop.f32.mrb[250].mxu0  ;;  %v16599_v31 = vld [vmem:[%s22626_s3 + $0xf4] ss:$8 sps:$4 sm:$0xff]  }
 0x2e4   : > { %v2676_v38 = vadd.f32 %v18024_v42, %v14869_v18  ;;  %v2667_v47 = vpop.f32.mrb[251].mxu0  ;;  %v2945_v35 = vmax.f32 %v2673_v8, 0.0 }
 0x2e5   : > { %v2668_v25 = vadd.f32 %v18024_v42, %v2667_v47  ;;  %v2943_v7 = vmax.f32 %v2665_v63, 0.0 }
 0x2e6   : > { %v2946_v48 = vmax.f32 %v2676_v38, 0.0  ;;  %4968 = vmatmul.mubr.bf16.gmra.mrb[100].mxu0 %v16598_v51  ;;  %v3788_v38 = vpop.f32.mrb[65].mxu1 }
 0x2e7   : > { %v2944_v57 = vmax.f32 %v2668_v25, 0.0  ;;  %4975 = vmatprep.mubr.bf16.mxu0 %v16599_v31  ;;  %v18327_v61 = vpop.f32.mrb[66].mxu1 }
 0x2e8   : > { %v18320_v18 = vpack.c.bf16 %v2946_v48, %v2945_v35  ;;  %v3791_v51 = vpop.f32.mrb[67].mxu1 }
 0x2e9   : > { %v18324_v60 = vpack.c.bf16 %v2944_v57, %v2943_v7  ;;  %v14872_v8 = vpop.f32.mrb[252].mxu0  ;;  %v18342_v51 = vpop.f32.mrb[68].mxu1 }
 0x2ea   : > { %22936 = vst [vmem:[#allocation97_spill] sm:$0xff] %v18320_v18  ;;  %v2689_v47 = vadd.f32 %v18024_v42, %v14872_v8  ;;  %v2680_v50 = vpop.f32.mrb[253].mxu0  ;;  %v16600_v8 = vld [vmem:[%s22626_s3 + $0xf0] ss:$8 sps:$4 sm:$0xff]  }
 0x2eb   : > { %22937 = vst [vmem:[#allocation98_spill] sm:$0xff] %v18324_v60  ;;  %v2681_v63 = vadd.f32 %v18024_v42, %v2680_v50  ;;  %v14873_v25 = vpop.f32.mrb[254].mxu0  ;;  %v16601_v50 = vld [vmem:[%s22626_s3 + $0x104] ss:$8 sps:$4 sm:$0xff]  }
 0x2ec   : > { %v2692_v1 = vadd.f32 %v18024_v42, %v14873_v25  ;;  %v2683_v31 = vpop.f32.mrb[255].mxu0  ;;  %v2949_v48 = vmax.f32 %v2689_v47, 0.0 }
 0x2ed   : > { %v2684_v57 = vadd.f32 %v18024_v42, %v2683_v31  ;;  %v2947_v38 = vmax.f32 %v2681_v63, 0.0 }
 0x2ee   : > { %v2950_v7 = vmax.f32 %v2692_v1, 0.0  ;;  %4976 = vmatmul.mubr.bf16.gmra.mrb[104].mxu0 %v16600_v8  ;;  %v3796_v1 = vpop.f32.mrb[69].mxu1 }
 0x2ef   : > { %v2948_v18 = vmax.f32 %v2684_v57, 0.0  ;;  %4983 = vmatprep.mubr.bf16.mxu0 %v16601_v50  ;;  %v18348_v31 = vpop.f32.mrb[70].mxu1 }
 0x2f0   : > { %v18340_v25 = vpack.c.bf16 %v2950_v7, %v2949_v48  ;;  %v3799_v63 = vpop.f32.mrb[71].mxu1  ;;  %v16603_v7 = vld [vmem:[%s22626_s3 + $0x114] ss:$8 sps:$4 sm:$0xff]  }
 0x2f1   : > { %v18344_v35 = vpack.c.bf16 %v2948_v18, %v2947_v38  ;;  %v18346_v42 = vpop.f32.mrb[0].mxu0  ;;  %v16602_v18 = vld [vmem:[%s22626_s3 + $0x100] ss:$8 sps:$4 sm:$0xff]   ;;  %v18362_v38 = vpop.f32.mrb[72].mxu1 }
 0x2f2   : > { %22938 = vst [vmem:[#allocation99_spill] sm:$0xff] %v18340_v25  ;;  %v3572_v47 = vpop.f32.mrb[1].mxu0  ;;  %v3804_v1 = vpop.f32.mrb[73].mxu1 }
 0x2f3   : > { %22939 = vst [vmem:[#allocation100_spill] sm:$0xff] %v18344_v35  ;;  %v18350_v8 = vpop.f32.mrb[2].mxu0  ;;  %v16605_v1 = vld [vmem:[%s22626_s3 + $0x124] ss:$8 sps:$4 sm:$0xff]  }
 0x2f4   : > { %v3575_v60 = vpop.f32.mrb[3].mxu0 }
 0x2f5   : > { %v18366_v60 = vpop.f32.mrb[74].mxu1 }
 0x2f6   : > { %4984 = vmatmul.mubr.bf16.gmra.mrb[108].mxu0 %v16602_v18  ;;  %v3807_v48 = vpop.f32.mrb[75].mxu1 }
 0x2f7   : > { %4991 = vmatprep.mubr.bf16.mxu0 %v16603_v7  ;;  %v16604_v7 = vld [vmem:[%s22626_s3 + $0x110] ss:$8 sps:$4 sm:$0xff]  }
 0x2f9   : > { %v18364_v50 = vpop.f32.mrb[4].mxu0 }
 0x2fa   : > { %v3580_v47 = vpop.f32.mrb[5].mxu0 }
 0x2fb   : > { %v18368_v63 = vpop.f32.mrb[6].mxu0  ;;  %v18380_v47 = vpop.f32.mrb[76].mxu1 }
 0x2fc   : > { %v3583_v18 = vpop.f32.mrb[7].mxu0  ;;  %v3812_v35 = vpop.f32.mrb[77].mxu1 }
 0x2fd   : > { %v18384_v18 = vpop.f32.mrb[78].mxu1  ;;  %v16607_v35 = vld [vmem:[%s22626_s3 + $0x134] ss:$8 sps:$4 sm:$0xff]  }
 0x2fe   : > { %4992 = vmatmul.mubr.bf16.gmra.mrb[112].mxu0 %v16604_v7  ;;  %v3815_v25 = vpop.f32.mrb[79].mxu1 }
 0x2ff   : > { %4999 = vmatprep.mubr.bf16.mxu0 %v16605_v1  ;;  %v16606_v1 = vld [vmem:[%s22626_s3 + $0x120] ss:$8 sps:$4 sm:$0xff]  }
 0x301   : > { %v18382_v48 = vpop.f32.mrb[8].mxu0 }
 0x302   : > { %v3588_v57 = vpop.f32.mrb[9].mxu0 }
 0x303   : > { %v18386_v27 = vpop.f32.mrb[10].mxu0  ;;  %v18398_v57 = vpop.f32.mrb[80].mxu1 }
 0x304   : > { %v3591_v7 = vpop.f32.mrb[11].mxu0  ;;  %v3820_v3 = vpop.f32.mrb[81].mxu1 }
 0x305   : > { %v18402_v7 = vpop.f32.mrb[82].mxu1  ;;  %v16609_v3 = vld [vmem:[%s22626_s3 + $0x144] ss:$8 sps:$4 sm:$0xff]  }
 0x306   : > { %5000 = vmatmul.mubr.bf16.gmra.mrb[116].mxu0 %v16606_v1  ;;  %v3823_v2 = vpop.f32.mrb[83].mxu1 }
 0x307   : > { %5007 = vmatprep.mubr.bf16.mxu0 %v16607_v35  ;;  %v16608_v35 = vld [vmem:[%s22626_s3 + $0x130] ss:$8 sps:$4 sm:$0xff]  }
 0x309   : > { %v18400_v25 = vpop.f32.mrb[12].mxu0 }
 0x30a   : > { %v3596_v34 = vpop.f32.mrb[13].mxu0 }
 0x30b   : > { %v18404_v39 = vpop.f32.mrb[14].mxu0  ;;  %v18416_v34 = vpop.f32.mrb[84].mxu1 }
 0x30c   : > { %v3599_v1 = vpop.f32.mrb[15].mxu0  ;;  %22940 = vst [vmem:[#allocation101_spill] sm:$0xff] %v18416_v34  ;;  %v3828_v12 = vpop.f32.mrb[85].mxu1 }
 0x30d   : > { %v18418_v40 = vpop.f32.mrb[86].mxu1 }
 0x30e   : > { %5008 = vmatmul.mubr.bf16.gmra.mrb[120].mxu0 %v16608_v35  ;;  %v3831_v11 = vpop.f32.mrb[87].mxu1 }
 0x30f   : > { %5015 = vmatprep.mubr.bf16.mxu0 %v16609_v3  ;;  %v16610_v3 = vld [vmem:[%s22626_s3 + $0x140] ss:$8 sps:$4 sm:$0xff]  }
 0x311   : > { %v3602_v2 = vpop.f32.mrb[16].mxu0  ;;  %v18429_v12 = vpop.f32.mrb[88].mxu1 }
 0x312   : > { %v3604_v52 = vpop.f32.mrb[17].mxu0  ;;  %22941 = vst [vmem:[#allocation102_spill] sm:$0xff] %v18429_v12 }
 0x313   : > { %v3605_v1 = vpop.f32.mrb[18].mxu0  ;;  %v16611_v52 = vld [vmem:[%s22626_s3 + $0x154] ss:$8 sps:$4 sm:$0xff]  }
 0x314   : > { %v3861_v53 = vpack.c.bf16 %v3605_v1, %v3602_v2  ;;  %v3607_v32 = vpop.f32.mrb[19].mxu0  ;;  %v3836_v2 = vpop.f32.mrb[89].mxu1 }
 0x315   : > { %v18431_v1 = vpop.f32.mrb[90].mxu1 }
 0x316   : > { %14876 = vmatprep.mubr.msk.bf16.mxu1 %vm3899_vm1, %v3861_v53  ;;  %5016 = vmatmul.mubr.bf16.gmra.mrb[124].mxu0 %v16610_v3  ;;  %22942 = vst [vmem:[#allocation103_spill] sm:$0xff] %v18431_v1  ;;  %v3839_v33 = vpop.f32.mrb[91].mxu1  ;;  %v18436_v3 = vld [vmem:[%s22627_s4 + $0x10] sm:$0xff]  }
 0x317   : > { %5023 = vmatprep.mubr.bf16.mxu0 %v16611_v52  ;;  %v16612_v52 = vld [vmem:[%s22626_s3 + $0x150] ss:$8 sps:$4 sm:$0xff]  }
 0x319   : > { %v3610_v11 = vpop.f32.mrb[20].mxu0  ;;  %v18445_v33 = vpop.f32.mrb[92].mxu1 }
 0x31a   : > { %v3612_v32 = vpop.f32.mrb[21].mxu0  ;;  %22943 = vst [vmem:[#allocation104_spill] sm:$0xff] %v18445_v33 }
 0x31b   : > { %v3613_v35 = vpop.f32.mrb[22].mxu0 }
 0x31c   : > { %v3862_v53 = vpack.c.bf16 %v3613_v35, %v3610_v11  ;;  %v3615_v19 = vpop.f32.mrb[23].mxu0  ;;  %v3844_v35 = vpop.f32.mrb[93].mxu1 }
 0x31d   : > { %v16613_v19 = vld [vmem:[%s22626_s3 + $0x164] ss:$8 sps:$4 sm:$0xff]   ;;  %v18451_v32 = vpop.f32.mrb[94].mxu1  ;;  %v16615_v35 = vld [vmem:[%s22626_s3 + $0x174] ss:$8 sps:$4 sm:$0xff]  }
 0x31e   : > { %14877 = vmatmul.mubr.msk.bf16.vlgmr.msra.gmra.mrb[100].mxu1 %vm3899_vm1, %v3862_v53  ;;  %5024 = vmatmul.mubr.bf16.gmra.mrb[128].mxu0 %v16612_v52  ;;  %22944 = vst [vmem:[#allocation105_spill] sm:$0xff] %v18451_v32  ;;  %v3847_v34 = vpop.f32.mrb[95].mxu1 }
 0x31f   : > { %14885 = vmatpush3.bf16.msra.mxu1 %v18184_v28  ;;  %5031 = vmatprep.mubr.bf16.mxu0 %v16613_v19  ;;  %v16614_v19 = vld [vmem:[%s22626_s3 + $0x160] ss:$8 sps:$4 sm:$0xff]  }
 0x320   : > { %14894 = vmatprep.subr.bf16.mxu1 %v18436_v3 }
 0x321   : > { %v3618_v11 = vpop.f32.mrb[24].mxu0  ;;  %v18459_v1 = vpop.f32.mrb[96].mxu1 }
 0x322   : > { %v3620_v2 = vpop.f32.mrb[25].mxu0  ;;  %v3852_v34 = vpop.f32.mrb[97].mxu1 }
 0x323   : > { %v3621_v53 = vpop.f32.mrb[26].mxu0  ;;  %v18464_v2 = vpop.f32.mrb[98].mxu1  ;;  %v16617_v34 = vld [vmem:[%s22626_s3 + $0x184] ss:$8 sps:$4 sm:$0xff]  }
 0x324   : > { %v3863_v12 = vpack.c.bf16 %v3621_v53, %v3618_v11  ;;  %v3623_v52 = vpop.f32.mrb[27].mxu0 }
 0x325   : > { %v3855_v52 = vpop.f32.mrb[99].mxu1 }
 0x326   : > { %14880 = vmatprep.mubr.msk.bf16.mxu1 %vm3899_vm1, %v3863_v12  ;;  %5032 = vmatmul.mubr.bf16.gmra.mrb[132].mxu0 %v16614_v19  ;;  %v3892_v12 = vpack.c.bf16 %v18464_v2, %v18459_v1  ;;  %v16616_v19 = vld [vmem:[%s22626_s3 + $0x170] ss:$8 sps:$4 sm:$0xff]  }
 0x327   : > { %5039 = vmatprep.mubr.bf16.mxu0 %v16615_v35  ;;  %v22945_v35 = vpack.c.bf16 %v18350_v8, %v18346_v42  ;;  %v18482_v52 = vld [vmem:[%s22627_s4 + $0x18] sm:$0xff]   ;;  %v22946_v42 = vpack.c.bf16 %v18368_v63, %v18364_v50  ;;  %v16618_v8 = vld [vmem:[%s22626_s3 + $0x180] ss:$8 sps:$4 sm:$0xff]  }
 0x328   : > { %v16619_v50 = vld [vmem:[%s22626_s3 + $0x194] ss:$8 sps:$4 sm:$0xff]  }
 0x329   : > { %v3626_v11 = vpop.f32.mrb[28].mxu0 }
 0x32a   : > { %v3628_v53 = vpop.f32.mrb[29].mxu0 }
 0x32b   : > { %v3629_v28 = vpop.f32.mrb[30].mxu0 }
 0x32c   : > { %v3864_v33 = vpack.c.bf16 %v3629_v28, %v3626_v11  ;;  %v3631_v32 = vpop.f32.mrb[31].mxu0 }
 0x32e   : > { %14881 = vmatmul.mubr.msk.bf16.gmra.mrb[104].mxu1 %vm3899_vm1, %v3864_v33  ;;  %5040 = vmatmul.mubr.bf16.gmra.mrb[136].mxu0 %v16616_v19  ;;  %v22947_v19 = vpack.c.bf16 %v18386_v27, %v18382_v48  ;;  %v16620_v27 = vld [vmem:[%s22626_s3 + $0x190] ss:$8 sps:$4 sm:$0xff]   ;;  %v16621_v48 = vld [vmem:[%s22626_s3 + $0x1a4] ss:$8 sps:$4 sm:$0xff]  }
 0x32f   : > { %14886 = vmatprep.mubr.msk.bf16.mxu1 %vm3899_vm1, %v22945_v35  ;;  %5047 = vmatprep.mubr.bf16.mxu0 %v16617_v34 }
 0x331   : > { %v3634_v53 = vpop.f32.mrb[32].mxu0 }
 0x332   : > { %v3636_v28 = vpop.f32.mrb[33].mxu0 }
 0x333   : > { %v3637_v32 = vpop.f32.mrb[34].mxu0 }
 0x334   : > { %v3865_v11 = vpack.c.bf16 %v3637_v32, %v3634_v53  ;;  %v3639_v33 = vpop.f32.mrb[35].mxu0  ;;  %v22948_v32 = vpack.c.bf16 %v18404_v39, %v18400_v25  ;;  %v18514_v39 = vld [vmem:[%s22627_s4 + $0x20] sm:$0xff]  }
 0x336   : > { %14887 = vmatmul.mubr.msk.bf16.vlgmr.msra.gmra.mrb[100].mxu1 %vm3899_vm1, %v22946_v42  ;;  %5048 = vmatmul.mubr.bf16.gmra.mrb[140].mxu0 %v16618_v8 }
 0x337   : > { %14890 = vmatprep.mubr.msk.bf16.mxu1 %vm3899_vm1, %v22947_v19  ;;  %14895 = vmatpush3.bf16.msra.mxu1 %v18436_v3 }
 0x338   : > { %14904 = vmatprep.subr.bf16.mxu1 %v18482_v52  ;;  %5055 = vmatprep.mubr.bf16.mxu0 %v16619_v50  ;;  %v16623_v50 = vld [vmem:[%s22626_s3 + $0x1b4] ss:$8 sps:$4 sm:$0xff]  }
 0x339   : > { %v3642_v63 = vpop.f32.mrb[36].mxu0 }
 0x33a   : > { %v3644_v35 = vpop.f32.mrb[37].mxu0 }
 0x33b   : > { %v3645_v34 = vpop.f32.mrb[38].mxu0  ;;  %v16624_v35 = vld [vmem:[%s22626_s3 + $0x1b0] ss:$8 sps:$4 sm:$0xff]  }
 0x33c   : > { %v3866_v53 = vpack.c.bf16 %v3645_v34, %v3642_v63  ;;  %v3647_v28 = vpop.f32.mrb[39].mxu0  ;;  %v22949_v63 = vpack.c.bf16 %v18042_v13, %v18033_v58  ;;  %v22950_v34 = vpack.c.bf16 %v18058_v36, %v18052_v56  ;;  %v18543_v58 = vld [vmem:[%s22627_s4 + $0x28] sm:$0xff]   ;;  %v22951_v13 = vpack.c.bf16 %v18075_v20, %v18068_v15  ;;  %v16627_v15 = vld [vmem:[%s22626_s3 + $0x1d4] ss:$8 sps:$4 sm:$0xff]  }
 0x33d   : > { %v16626_v56 = vld [vmem:[%s22626_s3 + $0x1c0] ss:$8 sps:$4 sm:$0xff]   ;;  %v22952_v36 = vpack.c.bf16 %v18091_v49, %v18086_v43  ;;  %v22953_v20 = vpack.c.bf16 %v18106_v62, %v18102_v6  ;;  %v16628_v43 = vld [vmem:[%s22626_s3 + $0x1d0] ss:$8 sps:$4 sm:$0xff]   ;;  %v22954_v49 = vpack.c.bf16 %v18122_v26, %v18116_v14  ;;  %v16629_v28 = vld [vmem:[%s22626_s3 + $0x1e4] ss:$8 sps:$4 sm:$0xff]   ;;  %v22955_v6 = vpack.c.bf16 %v18142_v21, %v18132_v45 }
 0x33e   : > { %14891 = vmatmul.mubr.msk.bf16.gmra.mrb[104].mxu1 %vm3899_vm1, %v22948_v32  ;;  %5056 = vmatmul.mubr.bf16.gmra.mrb[144].mxu0 %v16620_v27  ;;  %v18578_v62 = vld [vmem:[%s22627_s4 + $0x30] sm:$0xff]   ;;  %v16630_v14 = vld [vmem:[%s22626_s3 + $0x1e0] ss:$8 sps:$4 sm:$0xff]   ;;  %v22956_v26 = vpack.c.bf16 %v18158_v0, %v18153_v9  ;;  %v22957_v21 = vpack.c.bf16 %v18174_v4, %v18169_v59  ;;  %v22958_v0 = vpack.c.bf16 %v18197_v24, %v18191_v37  ;;  %v16633_v32 = vld [vmem:[%s22626_s3 + $0x204] ss:$8 sps:$4 sm:$0xff]  }
 0x33f   : > { %14896 = vmatprep.mubr.msk.bf16.mxu1 %vm3899_vm1, %v3865_v11  ;;  %5063 = vmatprep.mubr.bf16.mxu0 %v16621_v48  ;;  %v16622_v11 = vld [vmem:[%s22626_s3 + $0x1a0] ss:$8 sps:$4 sm:$0xff]   ;;  %v16631_v45 = vld [vmem:[%s22626_s3 + $0x1f4] ss:$8 sps:$4 sm:$0xff]   ;;  %v16632_v9 = vld [vmem:[%s22626_s3 + $0x1f0] ss:$8 sps:$4 sm:$0xff]   ;;  %v22960_v4 = vpack.c.bf16 %v18213_v30, %v18208_v41  ;;  %v22961_v24 = vpack.c.bf16 %v18229_v10, %v18224_v23  ;;  %v22962_v30 = vpack.c.bf16 %v18247_v55, %v18242_v46 }
 0x340   : > { %v18613_v59 = vld [vmem:[%s22627_s4 + $0x38] sm:$0xff]   ;;  %v16634_v37 = vld [vmem:[%s22626_s3 + $0x200] ss:$8 sps:$4 sm:$0xff]   ;;  %v22963_v10 = vpack.c.bf16 %v18267_v44, %v18262_v22  ;;  %v16637_v27 = vld [vmem:[%s22626_s3 + $0x224] ss:$8 sps:$4 sm:$0xff]   ;;  %v22965_v55 = vpack.c.bf16 %v18287_v5, %v18282_v17  ;;  %v22966_v22 = vpack.c.bf16 %v18307_v29, %v18302_v16  ;;  %v22967_v17 = vpack.c.bf16 %v18327_v61, %v18322_v54 }
 0x341   : > { %v3650_v33 = vpop.f32.mrb[40].mxu0  ;;  %22959 = vst [vmem:[#allocation106_spill] sm:$0xff] %v18613_v59  ;;  %v16635_v41 = vld [vmem:[%s22626_s3 + $0x214] ss:$8 sps:$4 sm:$0xff]   ;;  %v16636_v23 = vld [vmem:[%s22626_s3 + $0x210] ss:$8 sps:$4 sm:$0xff]   ;;  %v22968_v16 = vpack.c.bf16 %v18348_v31, %v18342_v51  ;;  %v22969_v48 = vpack.c.bf16 %v18366_v60, %v18362_v38  ;;  %v22970_v61 = vpack.c.bf16 %v18384_v18, %v18380_v47  ;;  %v22971_v54 = vpack.c.bf16 %v18402_v7, %v18398_v57 }
 0x342   : > { %v3652_v42 = vpop.f32.mrb[41].mxu0  ;;  %v18648_v46 = vld [vmem:[%s22627_s4 + $0x40] sm:$0xff]   ;;  %v16639_v5 = vld [vmem:[%s22626_s3 + $0x234] ss:$8 sps:$4 sm:$0xff]   ;;  %v16640_v29 = vld [vmem:[%s22626_s3 + $0x230] ss:$8 sps:$4 sm:$0xff]  }
 0x343   : > { %v3653_v8 = vpop.f32.mrb[42].mxu0  ;;  %22964 = vst [vmem:[#allocation107_spill] sm:$0xff] %v18648_v46  ;;  %v16638_v44 = vld [vmem:[%s22626_s3 + $0x220] ss:$8 sps:$4 sm:$0xff]   ;;  %v22972_v51 = vld [vmem:[#allocation101_spill] sm:$0xff]  ;;  %v22975_v60 = vld [vmem:[#allocation102_spill] sm:$0xff] }
 0x344   : > { %v3867_v19 = vpack.c.bf16 %v3653_v8, %v3650_v33  ;;  %v3655_v25 = vpop.f32.mrb[43].mxu0  ;;  %v22973_v31 = vpack.c.bf16 %v18418_v40, %v22972_v51  ;;  %v22974_v38 = vld [vmem:[#allocation103_spill] sm:$0xff]  ;;  %v22977_v47 = vld [vmem:[#allocation105_spill] sm:$0xff]  ;;  %v22978_v18 = vld [vmem:[#allocation104_spill] sm:$0xff]  ;;  %v22641_v57 = vmov 0.0  }
 0x345   : > { %v22976_v33 = vpack.c.bf16 %v22974_v38, %v22975_v60  ;;  %v22979_v42 = vpack.c.bf16 %v22977_v47, %v22978_v18 }
 0x346   : > { %14897 = vmatmul.mubr.msk.bf16.vlgmr.msra.gmra.mrb[100].mxu1 %vm3899_vm1, %v3866_v53  ;;  %5064 = vmatmul.mubr.bf16.gmra.mrb[148].mxu0 %v16622_v11  ;;  %v16625_v53 = vld [vmem:[%s22626_s3 + $0x1c4] ss:$8 sps:$4 sm:$0xff]  }
 0x347   : > { %14900 = vmatprep.mubr.msk.bf16.mxu1 %vm3899_vm1, %v3867_v19  ;;  %14905 = vmatpush3.bf16.msra.mxu1 %v18482_v52 }
 0x348   : > { %14914 = vmatprep.subr.bf16.mxu1 %v18514_v39  ;;  %5071 = vmatprep.mubr.bf16.mxu0 %v16623_v50 }
 0x349   : > { %v18709_v40 = vpop.f32.mrb[44].mxu0 }
 0x34a   : > { %v4859_v7 = vpop.f32.mrb[45].mxu0 }
 0x34b   : > { %v18711_v8 = vpop.f32.mrb[46].mxu0 }
 0x34c   : > { %v4862_v25 = vpop.f32.mrb[47].mxu0 }
 0x34e   : > { %14901 = vmatmul.mubr.msk.bf16.gmra.mrb[104].mxu1 %vm3899_vm1, %v22949_v63  ;;  %5072 = vmatmul.mubr.bf16.gmra.mrb[152].mxu0 %v16624_v35 }
 0x34f   : > { %14906 = vmatprep.mubr.msk.bf16.mxu1 %vm3899_vm1, %v22950_v34  ;;  %5079 = vmatprep.mubr.bf16.mxu0 %v16625_v53 }
 0x351   : > { %v18715_v11 = vpop.f32.mrb[48].mxu0 }
 0x352   : > { %v4867_v1 = vpop.f32.mrb[49].mxu0 }
 0x353   : > { %v18717_v2 = vpop.f32.mrb[50].mxu0 }
 0x354   : > { %v4870_v50 = vpop.f32.mrb[51].mxu0 }
 0x356   : > { %14907 = vmatmul.mubr.msk.bf16.vlgmr.msra.gmra.mrb[100].mxu1 %vm3899_vm1, %v22951_v13  ;;  %5080 = vmatmul.mubr.bf16.gmra.mrb[156].mxu0 %v16626_v56 }
 0x357   : > { %14910 = vmatprep.mubr.msk.bf16.mxu1 %vm3899_vm1, %v22952_v36  ;;  %14915 = vmatpush3.bf16.msra.mxu1 %v18514_v39 }
 0x358   : > { %14924 = vmatprep.subr.bf16.mxu1 %v18543_v58  ;;  %5087 = vmatprep.mubr.bf16.mxu0 %v16627_v15 }
 0x359   : > { %v18721_v63 = vpop.f32.mrb[52].mxu0 }
 0x35a   : > { %v4875_v35 = vpop.f32.mrb[53].mxu0 }
 0x35b   : > { %v18723_v34 = vpop.f32.mrb[54].mxu0 }
 0x35c   : > { %v4878_v13 = vpop.f32.mrb[55].mxu0 }
 0x35e   : > { %14911 = vmatmul.mubr.msk.bf16.gmra.mrb[104].mxu1 %vm3899_vm1, %v22953_v20  ;;  %5088 = vmatmul.mubr.bf16.gmra.mrb[160].mxu0 %v16628_v43 }
 0x35f   : > { %14916 = vmatprep.mubr.msk.bf16.mxu1 %vm3899_vm1, %v22954_v49  ;;  %5095 = vmatprep.mubr.bf16.mxu0 %v16629_v28  ;;  %v18736_v49 = vld [vmem:[%s22628_s5] ss:$0 sm:$0xff] }
 0x360   : > { %22980 = vst [vmem:[#allocation101_spill] sm:$0xff] %v18736_v49 }
 0x361   : > { %v18727_v56 = vpop.f32.mrb[56].mxu0 }
 0x362   : > { %v4883_v36 = vpop.f32.mrb[57].mxu0 }
 0x363   : > { %v18729_v15 = vpop.f32.mrb[58].mxu0 }
 0x364   : > { %v4886_v20 = vpop.f32.mrb[59].mxu0 }
 0x366   : > { %14917 = vmatmul.mubr.msk.bf16.vlgmr.msra.gmra.mrb[100].mxu1 %vm3899_vm1, %v22955_v6  ;;  %5096 = vmatmul.mubr.bf16.gmra.mrb[164].mxu0 %v16630_v14 }
 0x367   : > { %14920 = vmatprep.mubr.msk.bf16.mxu1 %vm3899_vm1, %v22956_v26  ;;  %14925 = vmatpush3.bf16.msra.mxu1 %v18543_v58 }
 0x368   : > { %14934 = vmatprep.subr.bf16.mxu1 %v18578_v62  ;;  %5103 = vmatprep.mubr.bf16.mxu0 %v16631_v45 }
 0x369   : > { %v18739_v26 = vpop.f32.mrb[60].mxu0 }
 0x36e   : > { %14921 = vmatmul.mubr.msk.bf16.gmra.mrb[104].mxu1 %vm3899_vm1, %v22957_v21  ;;  %5104 = vmatmul.mubr.bf16.gmra.mrb[168].mxu0 %v16632_v9  ;;  %v4891_v9 = vpop.f32.mrb[61].mxu0 }
 0x36f   : > { %14926 = vmatprep.mubr.msk.bf16.mxu1 %vm3899_vm1, %v22958_v0  ;;  %5111 = vmatprep.mubr.bf16.mxu0 %v16633_v32 }
 0x376   : > { %14927 = vmatmul.mubr.msk.bf16.vlgmr.msra.gmra.mrb[100].mxu1 %vm3899_vm1, %v22960_v4  ;;  %5112 = vmatmul.mubr.bf16.gmra.mrb[172].mxu0 %v16634_v37  ;;  %v18743_v4 = vpop.f32.mrb[62].mxu0 }
 0x377   : > { %14930 = vmatprep.mubr.msk.bf16.mxu1 %vm3899_vm1, %v22961_v24  ;;  %14935 = vmatpush3.bf16.msra.mxu1 %v18578_v62  ;;  %v4894_v24 = vpop.f32.mrb[63].mxu0 }
 0x378   : > { %14944 = vmatprep.subr.bf16.mxu1 %v18613_v59  ;;  %5119 = vmatprep.mubr.bf16.mxu0 %v16635_v41 }
 0x37e   : > { %14931 = vmatmul.mubr.msk.bf16.gmra.mrb[104].mxu1 %vm3899_vm1, %v22962_v30  ;;  %5120 = vmatmul.mubr.bf16.gmra.mrb[176].mxu0 %v16636_v23 }
 0x37f   : > { %14936 = vmatprep.mubr.msk.bf16.mxu1 %vm3899_vm1, %v22963_v10  ;;  %5127 = vmatprep.mubr.bf16.mxu0 %v16637_v27 }
 0x386   : > { %14937 = vmatmul.mubr.msk.bf16.vlgmr.msra.gmra.mrb[100].mxu1 %vm3899_vm1, %v22965_v55  ;;  %5128 = vmatmul.mubr.bf16.gmra.mrb[180].mxu0 %v16638_v44 }
 0x387   : > { %14940 = vmatprep.mubr.msk.bf16.mxu1 %vm3899_vm1, %v22966_v22  ;;  %14945 = vmatpush3.bf16.msra.mxu1 %v18613_v59 }
 0x388   : > { %14954 = vmatprep.subr.bf16.mxu1 %v18648_v46  ;;  %5135 = vmatprep.mubr.bf16.mxu0 %v16639_v5 }
 0x38e   : > { %14941 = vmatmul.mubr.msk.bf16.gmra.mrb[104].mxu1 %vm3899_vm1, %v22967_v17  ;;  %5136 = vmatmul.mubr.bf16.gmra.mrb[184].mxu0 %v16640_v29  ;;  %v18749_v29 = vpop.f32.mrb[64].mxu0 }
 0x38f   : > { %14946 = vmatprep.mubr.msk.bf16.mxu1 %vm3899_vm1, %v22968_v16 }
 0x396   : > { %14947 = vmatmul.mubr.msk.bf16.vlgmr.msra.gmra.mrb[100].mxu1 %vm3899_vm1, %v22969_v48 }
 0x397   : > { %14950 = vmatprep.mubr.msk.bf16.mxu1 %vm3899_vm1, %v22970_v61  ;;  %14955 = vmatpush3.bf16.msra.mxu1 %v18648_v46  ;;  %v4899_v61 = vpop.f32.mrb[65].mxu0 }
 0x398   : > { %14964 = vmatprep.subr.bf16.mxu1 %v22641_v57 }
 0x39e   : > { %14951 = vmatmul.mubr.msk.bf16.gmra.mrb[104].mxu1 %vm3899_vm1, %v22971_v54 }
 0x39f   : > { %14956 = vmatprep.mubr.msk.bf16.mxu1 %vm3899_vm1, %v22973_v31  ;;  %v18754_v31 = vpop.f32.mrb[66].mxu0 }
 0x3a0   : > { %v4902_v60 = vpop.f32.mrb[67].mxu0 }
 0x3a1   : > { %v18760_v50 = vpop.f32.mrb[68].mxu0 }
 0x3a2   : > { %v4907_v35 = vpop.f32.mrb[69].mxu0 }
 0x3a3   : > { %v18763_v13 = vpop.f32.mrb[70].mxu0 }
 0x3a4   : > { %v4910_v36 = vpop.f32.mrb[71].mxu0 }
 0x3a6   : > { %14957 = vmatmul.mubr.msk.bf16.vlgmr.msra.gmra.mrb[100].mxu1 %vm3899_vm1, %v22976_v33 }
 0x3a7   : > { %14960 = vmatprep.mubr.msk.bf16.mxu1 %vm3899_vm1, %v22979_v42 }
 0x3ae   : > { %14961 = vmatmul.mubr.msk.bf16.gmra.mrb[104].mxu1 %vm3899_vm1, %v3892_v12 }
 0x3af   : > { %14972 = vmatprep.mubr.msk.bf16.mxu1 %vm16968_vm2, %v22641_v57 }
 0x479   : > { %v14958_v28 = vpop.f32.mrb[100].mxu1 }
 0x47a   : > { %v4705_v6 = vadd.f32 %v14958_v28, %v18736_v49  ;;  %v4658_v14 = vpop.f32.mrb[101].mxu1  ;;  %v18770_v28 = vld [vmem:[%s22629_s6] sm:$0x1] }
 0x47b   : > { %v4703_v45 = vadd.f32 %v18736_v49, %v4658_v14  ;;  %v14959_v21 = vpop.f32.mrb[102].mxu1  ;;  %22981 = vst [vmem:[#allocation103_spill] sm:$0xff] %v18770_v28  ;;  %v18780_v14 = vpop.f32.mrb[72].mxu0 }
 0x47c   : > { %v4706_v0 = vadd.f32 %v14959_v21, %v18736_v49  ;;  %v4661_v32 = vpop.f32.mrb[103].mxu1  ;;  %v4713_v41 = vmax.f32 %v4705_v6, 0.0  ;;  %v18775_v6 = vld [vmem:[%s22630_s7] sm:$0xff]  }
 0x47d   : > { %v4704_v37 = vadd.f32 %v18736_v49, %v4661_v32  ;;  %v4711_v10 = vmax.f32 %v4703_v45, 0.0  ;;  %22982 = vst [vmem:[#allocation102_spill] sm:$0xff] %v18775_v6  ;;  %v4915_v45 = vpop.f32.mrb[73].mxu0 }
 0x47e   : > { %v4714_v30 = vmax.f32 %v4706_v0, 0.0  ;;  %v18786_v21 = vpop.f32.mrb[74].mxu0 }
 0x47f   : > { %v4712_v27 = vmax.f32 %v4704_v37, 0.0  ;;  %v4918_v9 = vpop.f32.mrb[75].mxu0 }
 0x480   : > { %v4720_v55 = vpack.c.bf16 %v4714_v30, %v4713_v41  ;;  %v18790_v32 = vpop.f32.mrb[76].mxu0 }
 0x481   : > { %v4719_v44 = vpack.c.bf16 %v4712_v27, %v4711_v10  ;;  %v14962_v22 = vpop.f32.mrb[104].mxu1  ;;  %v4923_v37 = vpop.f32.mrb[77].mxu0 }
 0x482   : > { %v4709_v5 = vadd.f32 %v14962_v22, %v18736_v49  ;;  %v4674_v17 = vpop.f32.mrb[105].mxu1  ;;  %v18792_v24 = vpop.f32.mrb[78].mxu0 }
 0x483   : > { %v4707_v16 = vadd.f32 %v18736_v49, %v4674_v17  ;;  %v14963_v48 = vpop.f32.mrb[106].mxu1  ;;  %14965 = vmatpush3.bf16.msra.mxu1 %v4719_v44  ;;  %v4926_v41 = vpop.f32.mrb[79].mxu0 }
 0x484   : > { %v4710_v54 = vadd.f32 %v14963_v48, %v18736_v49  ;;  %v4677_v51 = vpop.f32.mrb[107].mxu1  ;;  %14966 = vmatprep.subr.bf16.mxu1 %v22641_v57  ;;  %v4717_v33 = vmax.f32 %v4709_v5, 0.0  ;;  %v18796_v10 = vpop.f32.mrb[80].mxu0 }
 0x485   : > { %v4708_v38 = vadd.f32 %v18736_v49, %v4677_v51  ;;  %v4715_v42 = vmax.f32 %v4707_v16, 0.0  ;;  %v4931_v27 = vpop.f32.mrb[81].mxu0 }
 0x486   : > { %v4718_v47 = vmax.f32 %v4710_v54, 0.0 }
 0x487   : > { %v4716_v7 = vmax.f32 %v4708_v38, 0.0  ;;  %14967 = vmatpush3.bf16.msra.mxu1 %v4720_v55  ;;  %v18798_v55 = vpop.f32.mrb[82].mxu0 }
 0x488   : > { %v4722_v25 = vpack.c.bf16 %v4718_v47, %v4717_v33  ;;  %14968 = vmatprep.subr.bf16.mxu1 %v22641_v57  ;;  %v4934_v44 = vpop.f32.mrb[83].mxu0 }
 0x489   : > { %v4721_v1 = vpack.c.bf16 %v4716_v7, %v4715_v42  ;;  %v18802_v5 = vpop.f32.mrb[84].mxu0 }
 0x48a   : > { %v4939_v17 = vpop.f32.mrb[85].mxu0 }
 0x48b   : > { %14969 = vmatpush3.bf16.msra.mxu1 %v4721_v1  ;;  %v18804_v16 = vpop.f32.mrb[86].mxu0 }
 0x48c   : > { %14970 = vmatprep.subr.bf16.mxu1 %v22641_v57  ;;  %v4942_v48 = vpop.f32.mrb[87].mxu0 }
 0x48d   : > { %v18808_v54 = vpop.f32.mrb[88].mxu0 }
 0x48e   : > { %v4947_v51 = vpop.f32.mrb[89].mxu0 }
 0x48f   : > { %14971 = vmatpush3.bf16.msra.mxu1 %v4722_v25  ;;  %v18810_v38 = vpop.f32.mrb[90].mxu0 }
 0x490   : > { %14976 = vmatprep.subr.bf16.mxu1 %v22641_v57  ;;  %v4950_v60 = vpop.f32.mrb[91].mxu0 }
 0x491   : > { %v18814_v47 = vpop.f32.mrb[92].mxu0 }
 0x492   : > { %14973 = vmatmul.mubr.msk.bf16.vlgmr.msra.gmra.mrb[108].mxu1 %vm4723_vm3, %v18770_v28  ;;  %v4955_v42 = vpop.f32.mrb[93].mxu0 }
 0x493   : > { %14977 = vmatpush3.bf16.msra.mxu1 %v18775_v6  ;;  %14980 = vmatprep.mubr.msk.bf16.mxu1 %vm16968_vm2, %v22641_v57  ;;  %v18816_v7 = vpop.f32.mrb[94].mxu0 }
 0x494   : > { %14978 = vmatprep.subr.bf16.mxu1 %v22641_v57  ;;  %v4958_v25 = vpop.f32.mrb[95].mxu0 }
 0x495   : > { %v18820_v35 = vpop.f32.mrb[96].mxu0 }
 0x496   : > { %v4963_v36 = vpop.f32.mrb[97].mxu0 }
 0x497   : > { %v18822_v45 = vpop.f32.mrb[98].mxu0 }
 0x498   : > { %v4966_v9 = vpop.f32.mrb[99].mxu0 }
 0x499   : > { %v18826_v41 = vpop.f32.mrb[100].mxu0 }
 0x49a   : > { %v4971_v27 = vpop.f32.mrb[101].mxu0 }
 0x49b   : > { %v18828_v44 = vpop.f32.mrb[102].mxu0 }
 0x49c   : > { %v4974_v17 = vpop.f32.mrb[103].mxu0 }
 0x49d   : > { %v18832_v51 = vpop.f32.mrb[104].mxu0 }
 0x49e   : > { %v4979_v60 = vpop.f32.mrb[105].mxu0 }
 0x49f   : > { %v18834_v42 = vpop.f32.mrb[106].mxu0  ;;  %v18851_v60 = vld [vmem:[%s22630_s7 + $0x8] sm:$0xff]  }
 0x4a0   : > { %v4982_v25 = vpop.f32.mrb[107].mxu0  ;;  %22983 = vst [vmem:[#allocation105_spill] sm:$0xff] %v18851_v60  ;;  %14979 = vmatpush3.bf16.msra.mxu1 %v18851_v60 }
 0x4a1   : > { %v18838_v9 = vpop.f32.mrb[108].mxu0 }
 0x4a2   : > { %v4987_v57 = vpop.f32.mrb[109].mxu0 }
 0x4a3   : > { %v18840_v37 = vpop.f32.mrb[110].mxu0 }
 0x4a4   : > { %v4990_v27 = vpop.f32.mrb[111].mxu0 }
 0x4a5   : > { %v18844_v1 = vpop.f32.mrb[112].mxu0  ;;  %v18859_v27 = vld [vmem:[%s22627_s4 + $0x8] sm:$0xff]  }
 0x4a6   : > { %v4995_v48 = vpop.f32.mrb[113].mxu0  ;;  %14984 = vmatprep.subr.bf16.mxu1 %v18859_v27 }
 0x4a7   : > { %v18846_v33 = vpop.f32.mrb[114].mxu0 }
 0x4a8   : > { %v4998_v25 = vpop.f32.mrb[115].mxu0 }
 0x4a9   : > { %v18862_v48 = vpop.f32.mrb[116].mxu0 }
 0x4aa   : > { %v5003_v17 = vpop.f32.mrb[117].mxu0 }
 0x4ab   : > { %v18864_v36 = vpop.f32.mrb[118].mxu0 }
 0x4ac   : > { %v5006_v61 = vpop.f32.mrb[119].mxu0 }
 0x4ad   : > { %v18868_v22 = vpop.f32.mrb[120].mxu0 }
 0x4ae   : > { %v5011_v57 = vpop.f32.mrb[121].mxu0 }
 0x4af   : > { %v18870_v30 = vpop.f32.mrb[122].mxu0 }
 0x4b0   : > { %v5014_v43 = vpop.f32.mrb[123].mxu0 }
 0x4b1   : > { %v18874_v12 = vpop.f32.mrb[124].mxu0 }
 0x4b2   : > { %v5019_v19 = vpop.f32.mrb[125].mxu0 }
 0x4b3   : > { %v18876_v0 = vpop.f32.mrb[126].mxu0 }
 0x4b4   : > { %v5022_v17 = vpop.f32.mrb[127].mxu0 }
 0x4b5   : > { %v18880_v20 = vpop.f32.mrb[128].mxu0 }
 0x4b6   : > { %v5027_v25 = vpop.f32.mrb[129].mxu0 }
 0x4b7   : > { %v18882_v18 = vpop.f32.mrb[130].mxu0 }
 0x4b8   : > { %v5030_v57 = vpop.f32.mrb[131].mxu0 }
 0x4b9   : > { %v18886_v23 = vpop.f32.mrb[132].mxu0 }
 0x4ba   : > { %22984 = vst [vmem:[#allocation104_spill] sm:$0xff] %v18886_v23  ;;  %v5035_v53 = vpop.f32.mrb[133].mxu0 }
 0x4bb   : > { %v18888_v60 = vpop.f32.mrb[134].mxu0 }
 0x4bc   : > { %22985 = vst [vmem:[#allocation108_spill] sm:$0xff] %v18888_v60  ;;  %v5038_v19 = vpop.f32.mrb[135].mxu0 }
 0x4bd   : > { %v18892_v6 = vpop.f32.mrb[136].mxu0 }
 0x4be   : > { %22986 = vst [vmem:[#allocation109_spill] sm:$0xff] %v18892_v6  ;;  %v5043_v61 = vpop.f32.mrb[137].mxu0 }
 0x4bf   : > { %v18894_v28 = vpop.f32.mrb[138].mxu0 }
 0x4c0   : > { %22987 = vst [vmem:[#allocation110_spill] sm:$0xff] %v18894_v28  ;;  %v5046_v25 = vpop.f32.mrb[139].mxu0 }
 0x4c1   : > { %v18898_v49 = vpop.f32.mrb[140].mxu0 }
 0x4c2   : > { %22988 = vst [vmem:[#allocation111_spill] sm:$0xff] %v18898_v49  ;;  %v5051_v43 = vpop.f32.mrb[141].mxu0 }
 0x4c3   : > { %v18900_v46 = vpop.f32.mrb[142].mxu0 }
 0x4c4   : > { %22989 = vst [vmem:[#allocation112_spill] sm:$0xff] %v18900_v46  ;;  %v5054_v53 = vpop.f32.mrb[143].mxu0 }
 0x4c5   : > { %v18904_v59 = vpop.f32.mrb[144].mxu0 }
 0x4c6   : > { %22990 = vst [vmem:[#allocation113_spill] sm:$0xff] %v18904_v59  ;;  %v5059_v17 = vpop.f32.mrb[145].mxu0 }
 0x4c7   : > { %v18906_v23 = vpop.f32.mrb[146].mxu0 }
 0x4c8   : > { %22991 = vst [vmem:[#allocation114_spill] sm:$0xff] %v18906_v23  ;;  %v5062_v61 = vpop.f32.mrb[147].mxu0 }
 0x4c9   : > { %v18910_v60 = vpop.f32.mrb[148].mxu0 }
 0x4ca   : > { %22992 = vst [vmem:[#allocation115_spill] sm:$0xff] %v18910_v60  ;;  %v5067_v57 = vpop.f32.mrb[149].mxu0 }
 0x4cb   : > { %v18912_v6 = vpop.f32.mrb[150].mxu0 }
 0x4cc   : > { %22993 = vst [vmem:[#allocation116_spill] sm:$0xff] %v18912_v6  ;;  %v5070_v43 = vpop.f32.mrb[151].mxu0 }
 0x4cd   : > { %v18916_v28 = vpop.f32.mrb[152].mxu0 }
 0x4ce   : > { %22994 = vst [vmem:[#allocation117_spill] sm:$0xff] %v18916_v28  ;;  %v5075_v19 = vpop.f32.mrb[153].mxu0 }
 0x4cf   : > { %v18918_v49 = vpop.f32.mrb[154].mxu0 }
 0x4d0   : > { %22995 = vst [vmem:[#allocation118_spill] sm:$0xff] %v18918_v49  ;;  %v5078_v17 = vpop.f32.mrb[155].mxu0 }
 0x4d1   : > { %v18922_v46 = vpop.f32.mrb[156].mxu0 }
 0x4d2   : > { %22996 = vst [vmem:[#allocation119_spill] sm:$0xff] %v18922_v46  ;;  %v5083_v25 = vpop.f32.mrb[157].mxu0 }
 0x4d3   : > { %v18924_v59 = vpop.f32.mrb[158].mxu0 }
 0x4d4   : > { %22997 = vst [vmem:[#allocation120_spill] sm:$0xff] %v18924_v59  ;;  %v5086_v57 = vpop.f32.mrb[159].mxu0 }
 0x4d5   : > { %v18928_v23 = vpop.f32.mrb[160].mxu0 }
 0x4d6   : > { %22998 = vst [vmem:[#allocation121_spill] sm:$0xff] %v18928_v23  ;;  %v5091_v53 = vpop.f32.mrb[161].mxu0 }
 0x4d7   : > { %v18930_v60 = vpop.f32.mrb[162].mxu0 }
 0x4d8   : > { %22999 = vst [vmem:[#allocation122_spill] sm:$0xff] %v18930_v60  ;;  %v5094_v19 = vpop.f32.mrb[163].mxu0 }
 0x4d9   : > { %v18934_v6 = vpop.f32.mrb[164].mxu0 }
 0x4da   : > { %23000 = vst [vmem:[#allocation123_spill] sm:$0xff] %v18934_v6  ;;  %v5099_v61 = vpop.f32.mrb[165].mxu0 }
 0x4db   : > { %v18936_v28 = vpop.f32.mrb[166].mxu0 }
 0x4dc   : > { %23001 = vst [vmem:[#allocation124_spill] sm:$0xff] %v18936_v28  ;;  %v5102_v25 = vpop.f32.mrb[167].mxu0 }
 0x4dd   : > { %v18940_v49 = vpop.f32.mrb[168].mxu0 }
 0x4de   : > { %23002 = vst [vmem:[#allocation125_spill] sm:$0xff] %v18940_v49  ;;  %v5107_v43 = vpop.f32.mrb[169].mxu0 }
 0x4df   : > { %v18942_v46 = vpop.f32.mrb[170].mxu0 }
 0x4e0   : > { %23003 = vst [vmem:[#allocation126_spill] sm:$0xff] %v18942_v46  ;;  %v5110_v53 = vpop.f32.mrb[171].mxu0 }
 0x4e1   : > { %v18946_v59 = vpop.f32.mrb[172].mxu0 }
 0x4e2   : > { %v5115_v17 = vpop.f32.mrb[173].mxu0 }
 0x4e3   : > { %v18948_v23 = vpop.f32.mrb[174].mxu0 }
 0x4e4   : > { %v5118_v61 = vpop.f32.mrb[175].mxu0 }
 0x4e5   : > { %v18952_v60 = vpop.f32.mrb[176].mxu0 }
 0x4e6   : > { %v5123_v57 = vpop.f32.mrb[177].mxu0 }
 0x4e7   : > { %v18954_v6 = vpop.f32.mrb[178].mxu0  ;;  %v23004_v57 = vpack.c.bf16 %v18743_v4, %v18739_v26  ;;  %v23006_v4 = vpack.c.bf16 %v18763_v13, %v18760_v50  ;;  %v23010_v50 = vpack.c.bf16 %v18723_v34, %v18721_v63  ;;  %v23011_v13 = vpack.c.bf16 %v18729_v15, %v18727_v56 }
 0x4e8   : > { %v5126_v28 = vpop.f32.mrb[179].mxu0  ;;  %v5177_v19 = vpack.c.bf16 %v18954_v6, %v18952_v60  ;;  %v23017_v63 = vpack.c.bf16 %v18822_v45, %v18820_v35  ;;  %v23019_v34 = vpack.c.bf16 %v18834_v42, %v18832_v51  ;;  %v23020_v56 = vpack.c.bf16 %v18840_v37, %v18838_v9  ;;  %v23046_v45 = vld [vmem:[#allocation120_spill] sm:$0xff]  ;;  %v23047_v37 = vld [vmem:[#allocation119_spill] sm:$0xff]  ;;  %v23050_v51 = vld [vmem:[#allocation121_spill] sm:$0xff] }
 0x4e9   : > { %v18959_v17 = vpop.f32.mrb[180].mxu0  ;;  %v18969_v28 = vld [vmem:[%s22627_s4] sm:$0xff]   ;;  %v23021_v15 = vpack.c.bf16 %v18846_v33, %v18844_v1  ;;  %v23044_v1 = vld [vmem:[#allocation117_spill] sm:$0xff] }
 0x4ea   : > { %v5131_v25 = vpop.f32.mrb[181].mxu0  ;;  %v23040_v33 = vld [vmem:[#allocation115_spill] sm:$0xff] }
 0x4eb   : > { %v23053_v9 = vld [vmem:[#allocation123_spill] sm:$0xff] }
 0x565   : > { %v4761_v43 = vpop.f32.mrb[108].mxu1 }
 0x566   : > { %v4767_v53 = vpack.c.bf16 %v4761_v43, %v4761_v43  ;;  %v14974_v49 = vpop.f32.mrb[109].mxu1 }
 0x567   : > { %v4764_v46 = vpop.f32.mrb[110].mxu1 }
 0x568   : > { %14981 = vmatmul.mubr.msk.bf16.vlgmr.msra.gmra.mrb[112].mxu1 %vm1253_vm0, %v4767_v53  ;;  %v14975_v61 = vpop.f32.mrb[111].mxu1  ;;  %v5132_v46 = vpop.f32.mrb[182].mxu0  ;;  %v23005_v53 = vpack.c.bf16 %v18754_v31, %v18749_v29  ;;  %v23008_v29 = vpack.c.bf16 %v18711_v8, %v18709_v40  ;;  %v23009_v31 = vpack.c.bf16 %v18717_v2, %v18715_v11  ;;  %v23012_v40 = vpack.c.bf16 %v18792_v24, %v18790_v32  ;;  %v23026_v24 = vld [vmem:[#allocation108_spill] sm:$0xff] }
 0x569   : > { %14985 = vmatpush3.bf16.msra.mxu1 %v18859_v27  ;;  %14986 = vmatprep.mubr.msk.bf16.mxu1 %vm3899_vm1, %v23004_v57  ;;  %v5134_v49 = vpop.f32.mrb[183].mxu0  ;;  %v5178_v43 = vpack.c.bf16 %v5132_v46, %v18959_v17  ;;  %v23007_v17 = vpack.c.bf16 %v18786_v21, %v18780_v14  ;;  %v23013_v8 = vpack.c.bf16 %v18798_v55, %v18796_v10  ;;  %v23027_v10 = vld [vmem:[#allocation104_spill] sm:$0xff]  ;;  %v23030_v55 = vld [vmem:[#allocation110_spill] sm:$0xff]  ;;  %v23055_v46 = vmov 0.0  }
 0x56a   : > { %14994 = vmatprep.subr.bf16.mxu1 %v18969_v28  ;;  %v5137_v26 = vpop.f32.mrb[184].mxu0  ;;  %v23015_v11 = vpack.c.bf16 %v18810_v38, %v18808_v54  ;;  %v23016_v2 = vpack.c.bf16 %v18816_v7, %v18814_v47  ;;  %v23023_v14 = vpack.c.bf16 %v18870_v30, %v18868_v22  ;;  %v23024_v21 = vpack.c.bf16 %v18876_v0, %v18874_v12  ;;  %v23029_v30 = vld [vmem:[#allocation106_spill] sm:$0xff]  ;;  %v23031_v22 = vld [vmem:[#allocation109_spill] sm:$0xff]  ;;  %v23033_v12 = vld [vmem:[#allocation112_spill] sm:$0xff] }
 0x56b   : > { %v5139_v25 = vpop.f32.mrb[185].mxu0  ;;  %v23025_v32 = vpack.c.bf16 %v18882_v18, %v18880_v20  ;;  %v23034_v0 = vld [vmem:[#allocation111_spill] sm:$0xff]  ;;  %v23036_v18 = vld [vmem:[#allocation114_spill] sm:$0xff]  ;;  %v23037_v20 = vld [vmem:[#allocation113_spill] sm:$0xff] }
 0x56c   : > { %v5140_v61 = vpop.f32.mrb[186].mxu0  ;;  %v23038_v54 = vpack.c.bf16 %v23036_v18, %v23037_v20  ;;  %v23039_v38 = vld [vmem:[#allocation116_spill] sm:$0xff]  ;;  %v23042_v47 = vld [vmem:[#allocation107_spill] sm:$0xff]  ;;  %v23043_v7 = vld [vmem:[#allocation118_spill] sm:$0xff]  ;;  %v23059_v25 = vpack.c.bf16 %v18948_v23, %v18946_v59 }
 0x56d   : > { %v5179_v57 = vpack.c.bf16 %v5140_v61, %v5137_v26  ;;  %v5142_v49 = vpop.f32.mrb[187].mxu0  ;;  %v23045_v35 = vpack.c.bf16 %v23043_v7, %v23044_v1  ;;  %v23057_v26 = vld [vmem:[#allocation125_spill] sm:$0xff]  ;;  %v23067_v7 = vld [vmem:[#allocation8_spill] sm:$0xff]  ;;  %v23068_v1 = vld [vmem:[#allocation7_spill] sm:$0xff] }
 0x56e   : > { %v23060_v23 = vld [vmem:[#allocation101_spill] sm:$0xff] }
 0x570   : > { %14987 = vmatmul.mubr.msk.bf16.vlgmr.msra.gmra.mrb[116].mxu1 %vm3899_vm1, %v23005_v53  ;;  %v23056_v53 = vld [vmem:[#allocation126_spill] sm:$0xff] }
 0x571   : > { %14990 = vmatprep.mubr.msk.bf16.mxu1 %vm3899_vm1, %v23006_v4  ;;  %14995 = vmatpush3.bf16.msra.mxu1 %v18969_v28  ;;  %v23058_v4 = vpack.c.bf16 %v23056_v53, %v23057_v26  ;;  %v23079_v53 = vld [vmem:[#allocation20_spill] sm:$0xff]  ;;  %v23080_v26 = vld [vmem:[#allocation19_spill] sm:$0xff] }
 0x572   : > { %15004 = vmatprep.subr.bf16.mxu1 %v18436_v3 }
 0x578   : > { %14991 = vmatmul.mubr.msk.bf16.gmra.mrb[120].mxu1 %vm3899_vm1, %v23007_v17 }
 0x579   : > { %14996 = vmatprep.mubr.msk.bf16.mxu1 %vm3899_vm1, %v23008_v29 }
 0x580   : > { %14997 = vmatmul.mubr.msk.bf16.vlgmr.msra.gmra.mrb[116].mxu1 %vm3899_vm1, %v23009_v31 }
 0x581   : > { %15000 = vmatprep.mubr.msk.bf16.mxu1 %vm3899_vm1, %v23010_v50  ;;  %15005 = vmatpush3.bf16.msra.mxu1 %v18436_v3  ;;  %v23014_v3 = vpack.c.bf16 %v18804_v16, %v18802_v5  ;;  %v23032_v5 = vpack.c.bf16 %v23030_v55, %v23031_v22  ;;  %v23035_v16 = vpack.c.bf16 %v23033_v12, %v23034_v0  ;;  %v23061_v22 = vld [vmem:[#allocation103_spill] sm:$0xff]  ;;  %v23063_v12 = vld [vmem:[#allocation105_spill] sm:$0xff]  ;;  %v23064_v0 = vmov 0  }
 0x582   : > { %15014 = vmatprep.subr.bf16.mxu1 %v18482_v52 }
 0x588   : > { %15001 = vmatmul.mubr.msk.bf16.gmra.mrb[120].mxu1 %vm3899_vm1, %v23011_v13 }
 0x589   : > { %15006 = vmatprep.mubr.msk.bf16.mxu1 %vm3899_vm1, %v23012_v40 }
 0x590   : > { %15007 = vmatmul.mubr.msk.bf16.vlgmr.msra.gmra.mrb[116].mxu1 %vm3899_vm1, %v23013_v8 }
 0x591   : > { %15010 = vmatprep.mubr.msk.bf16.mxu1 %vm3899_vm1, %v23014_v3  ;;  %15015 = vmatpush3.bf16.msra.mxu1 %v18482_v52  ;;  %v23018_v52 = vpack.c.bf16 %v18828_v44, %v18826_v41  ;;  %v23048_v41 = vpack.c.bf16 %v23046_v45, %v23047_v37  ;;  %v23049_v44 = vld [vmem:[#allocation122_spill] sm:$0xff]  ;;  %v23070_v45 = vld [vmem:[#allocation9_spill] sm:$0xff]  ;;  %v23071_v37 = vld [vmem:[#allocation12_spill] sm:$0xff] }
 0x592   : > { %15024 = vmatprep.subr.bf16.mxu1 %v18514_v39  ;;  %v23051_v42 = vpack.c.bf16 %v23049_v44, %v23050_v51  ;;  %v23073_v44 = vld [vmem:[#allocation14_spill] sm:$0xff]  ;;  %v23074_v51 = vld [vmem:[#allocation13_spill] sm:$0xff] }
 0x598   : > { %15011 = vmatmul.mubr.msk.bf16.gmra.mrb[120].mxu1 %vm3899_vm1, %v23015_v11 }
 0x599   : > { %15016 = vmatprep.mubr.msk.bf16.mxu1 %vm3899_vm1, %v23016_v2 }
 0x5a0   : > { %15017 = vmatmul.mubr.msk.bf16.vlgmr.msra.gmra.mrb[116].mxu1 %vm3899_vm1, %v23017_v63 }
 0x5a1   : > { %15020 = vmatprep.mubr.msk.bf16.mxu1 %vm3899_vm1, %v23018_v52  ;;  %15025 = vmatpush3.bf16.msra.mxu1 %v18514_v39  ;;  %v23022_v39 = vpack.c.bf16 %v18864_v36, %v18862_v48  ;;  %v23052_v36 = vld [vmem:[#allocation124_spill] sm:$0xff] }
 0x5a2   : > { %15034 = vmatprep.subr.bf16.mxu1 %v18543_v58  ;;  %v23054_v48 = vpack.c.bf16 %v23052_v36, %v23053_v9  ;;  %v23076_v36 = vld [vmem:[#allocation15_spill] sm:$0xff]  ;;  %v23077_v9 = vld [vmem:[#allocation18_spill] sm:$0xff] }
 0x5a8   : > { %15021 = vmatmul.mubr.msk.bf16.gmra.mrb[120].mxu1 %vm3899_vm1, %v23019_v34 }
 0x5a9   : > { %15026 = vmatprep.mubr.msk.bf16.mxu1 %vm3899_vm1, %v23020_v56 }
 0x5b0   : > { %15027 = vmatmul.mubr.msk.bf16.vlgmr.msra.gmra.mrb[116].mxu1 %vm3899_vm1, %v23021_v15 }
 0x5b1   : > { %15030 = vmatprep.mubr.msk.bf16.mxu1 %vm3899_vm1, %v23022_v39  ;;  %15035 = vmatpush3.bf16.msra.mxu1 %v18543_v58  ;;  %v23028_v58 = vpack.c.bf16 %v23026_v24, %v23027_v10 }
 0x5b2   : > { %15044 = vmatprep.subr.bf16.mxu1 %v18578_v62 }
 0x5b8   : > { %15031 = vmatmul.mubr.msk.bf16.gmra.mrb[120].mxu1 %vm3899_vm1, %v23023_v14 }
 0x5b9   : > { %15036 = vmatprep.mubr.msk.bf16.mxu1 %vm3899_vm1, %v23024_v21 }
 0x5c0   : > { %15037 = vmatmul.mubr.msk.bf16.vlgmr.msra.gmra.mrb[116].mxu1 %vm3899_vm1, %v23025_v32 }
 0x5c1   : > { %15040 = vmatprep.mubr.msk.bf16.mxu1 %vm3899_vm1, %v23028_v58  ;;  %15045 = vmatpush3.bf16.msra.mxu1 %v18578_v62  ;;  %v23041_v62 = vpack.c.bf16 %v23039_v38, %v23040_v33  ;;  %v23065_v33 = vld [vmem:[#allocation6_spill] sm:$0xff] }
 0x5c2   : > { %15054 = vmatprep.subr.bf16.mxu1 %v23029_v30 }
 0x5c8   : > { %15041 = vmatmul.mubr.msk.bf16.gmra.mrb[120].mxu1 %vm3899_vm1, %v23032_v5  ;;  %v23062_v5 = vld [vmem:[#allocation102_spill] sm:$0xff] }
 0x5c9   : > { %15046 = vmatprep.mubr.msk.bf16.mxu1 %vm3899_vm1, %v23035_v16 }
 0x5d0   : > { %15047 = vmatmul.mubr.msk.bf16.vlgmr.msra.gmra.mrb[116].mxu1 %vm3899_vm1, %v23038_v54 }
 0x5d1   : > { %15050 = vmatprep.mubr.msk.bf16.mxu1 %vm3899_vm1, %v23041_v62  ;;  %15055 = vmatpush3.bf16.msra.mxu1 %v23029_v30  ;;  %v19152_v62 = vld [vmem:[%s22626_s3 + $0x4] ss:$8 sps:$4 sm:$0xff]  }
 0x5d2   : > { %15064 = vmatprep.subr.bf16.mxu1 %v23042_v47 }
 0x5d8   : > { %15051 = vmatmul.mubr.msk.bf16.gmra.mrb[120].mxu1 %vm3899_vm1, %v23045_v35  ;;  %v23069_v35 = vld [vmem:[#allocation10_spill] sm:$0xff] }
 0x5d9   : > { %15056 = vmatprep.mubr.msk.bf16.mxu1 %vm3899_vm1, %v23048_v41  ;;  %v23072_v41 = vld [vmem:[#allocation11_spill] sm:$0xff] }
 0x5e0   : > { %15057 = vmatmul.mubr.msk.bf16.vlgmr.msra.gmra.mrb[116].mxu1 %vm3899_vm1, %v23051_v42  ;;  %v23075_v42 = vld [vmem:[#allocation16_spill] sm:$0xff] }
 0x5e1   : > { %15060 = vmatprep.mubr.msk.bf16.mxu1 %vm3899_vm1, %v23054_v48  ;;  %15065 = vmatpush3.bf16.msra.mxu1 %v23042_v47  ;;  %v23066_v47 = vld [vmem:[#allocation5_spill] sm:$0xff] }
 0x5e2   : > { %15074 = vmatprep.subr.bf16.mxu1 %v23055_v46  ;;  %v23078_v48 = vld [vmem:[#allocation17_spill] sm:$0xff] }
 0x5e8   : > { %15061 = vmatmul.mubr.msk.bf16.gmra.mrb[120].mxu1 %vm3899_vm1, %v23058_v4  ;;  %v19189_v4 = vld [vmem:[%s22626_s3] ss:$8 sps:$4 sm:$0xff]  }
 0x5e9   : > { %15066 = vmatprep.mubr.msk.bf16.mxu1 %vm3899_vm1, %v23059_v25  ;;  %v23081_v25 = vld [vmem:[#allocation22_spill] sm:$0xff] }
 0x5f0   : > { %15067 = vmatmul.mubr.msk.bf16.vlgmr.msra.gmra.mrb[116].mxu1 %vm3899_vm1, %v5177_v19 }
 0x5f1   : > { %15070 = vmatprep.mubr.msk.bf16.mxu1 %vm3899_vm1, %v5178_v43 }
 0x5f8   : > { %15071 = vmatmul.mubr.msk.bf16.gmra.mrb[120].mxu1 %vm3899_vm1, %v5179_v57 }
 0x5f9   : > { %15082 = vmatprep.mubr.msk.bf16.mxu1 %vm16968_vm2, %v23055_v46 }
 0x63b   : > { %v19125_v61 = vpop.f32.mrb[112].mxu1 }
 0x63c   : > { %v14982_v49 = vpop.f32.mrb[113].mxu1 }
 0x63d   : > { %v4820_v17 = vpop.f32.mrb[114].mxu1  ;;  %v19196_v49 = vld [vmem:[%s22626_s3 + $0x14] ss:$8 sps:$4 sm:$0xff]  }
 0x63e   : > { %v14983_v29 = vpop.f32.mrb[115].mxu1  ;;  %v23082_v17 = vld [vmem:[#allocation21_spill] sm:$0xff] }
 0x63f   : > { %v19205_v29 = vld [vmem:[%s22626_s3 + $0x10] ss:$8 sps:$4 sm:$0xff]  }
 0x6c3   : > { %v15068_v59 = vpop.f32.mrb[116].mxu1 }
 0x6c4   : > { %v5931_v31 = vadd.f32 %v15068_v59, %v23060_v23  ;;  %v5890_v50 = vpop.f32.mrb[117].mxu1  ;;  %v23083_v59 = vld [vmem:[#allocation24_spill] sm:$0xff] }
 0x6c5   : > { %v5929_v6 = vadd.f32 %v23060_v23, %v5890_v50  ;;  %v15069_v60 = vpop.f32.mrb[118].mxu1  ;;  %v19221_v50 = vld [vmem:[%s22626_s3 + $0x20] ss:$8 sps:$4 sm:$0xff]  }
 0x6c6   : > { %v5932_v19 = vadd.f32 %v15069_v60, %v23060_v23  ;;  %v5893_v43 = vpop.f32.mrb[119].mxu1  ;;  %v5939_v13 = vmax.f32 %v5931_v31, 0.0  ;;  %v23084_v31 = vld [vmem:[#allocation23_spill] sm:$0xff]  ;;  %v19228_v60 = vld [vmem:[%s22626_s3 + $0x34] ss:$8 sps:$4 sm:$0xff]  }
 0x6c7   : > { %v5930_v57 = vadd.f32 %v23060_v23, %v5893_v43  ;;  %v5937_v8 = vmax.f32 %v5929_v6, 0.0  ;;  %v23085_v6 = vld [vmem:[#allocation26_spill] sm:$0xff] }
 0x6c8   : > { %v5940_v40 = vmax.f32 %v5932_v19, 0.0  ;;  %v23086_v19 = vld [vmem:[#allocation25_spill] sm:$0xff] }
 0x6c9   : > { %v5938_v3 = vmax.f32 %v5930_v57, 0.0  ;;  %v19237_v43 = vld [vmem:[%s22626_s3 + $0x30] ss:$8 sps:$4 sm:$0xff]   ;;  %v23087_v57 = vld [vmem:[#allocation28_spill] sm:$0xff] }
 0x6ca   : > { %v5946_v11 = vpack.c.bf16 %v5940_v40, %v5939_v13  ;;  %v19244_v13 = vld [vmem:[%s22626_s3 + $0x44] ss:$8 sps:$4 sm:$0xff]  }
 0x6cb   : > { %v5945_v2 = vpack.c.bf16 %v5938_v3, %v5937_v8  ;;  %v15072_v63 = vpop.f32.mrb[120].mxu1  ;;  %v23088_v40 = vld [vmem:[#allocation27_spill] sm:$0xff]  ;;  %v23089_v3 = vld [vmem:[#allocation30_spill] sm:$0xff] }
 0x6cc   : > { %v5935_v52 = vadd.f32 %v15072_v63, %v23060_v23  ;;  %v5906_v34 = vpop.f32.mrb[121].mxu1  ;;  %v19253_v8 = vld [vmem:[%s22626_s3 + $0x40] ss:$8 sps:$4 sm:$0xff]   ;;  %v19269_v63 = vld [vmem:[%s22626_s3 + $0x50] ss:$8 sps:$4 sm:$0xff]  }
 0x6cd   : > { %v5933_v56 = vadd.f32 %v23060_v23, %v5906_v34  ;;  %v15073_v15 = vpop.f32.mrb[122].mxu1  ;;  %15075 = vmatpush3.bf16.msra.mxu1 %v5945_v2  ;;  %v23090_v2 = vld [vmem:[#allocation29_spill] sm:$0xff]  ;;  %v19276_v34 = vld [vmem:[%s22626_s3 + $0x64] ss:$8 sps:$4 sm:$0xff]  }
 0x6ce   : > { %v5936_v39 = vadd.f32 %v15073_v15, %v23060_v23  ;;  %v5909_v14 = vpop.f32.mrb[123].mxu1  ;;  %15076 = vmatprep.subr.bf16.mxu1 %v23055_v46  ;;  %v5943_v32 = vmax.f32 %v5935_v52, 0.0  ;;  %v23091_v52 = vld [vmem:[#allocation32_spill] sm:$0xff] }
 0x6cf   : > { %v5934_v21 = vadd.f32 %v23060_v23, %v5909_v14  ;;  %v5941_v10 = vmax.f32 %v5933_v56, 0.0  ;;  %v19212_v23 = vld [vmem:[%s22626_s3 + $0x24] ss:$8 sps:$4 sm:$0xff]   ;;  %v19285_v15 = vld [vmem:[%s22626_s3 + $0x60] ss:$8 sps:$4 sm:$0xff]  }
 0x6d0   : > { %v5944_v24 = vmax.f32 %v5936_v39, 0.0  ;;  %v23092_v56 = vld [vmem:[#allocation31_spill] sm:$0xff]  ;;  %v23093_v39 = vld [vmem:[#allocation34_spill] sm:$0xff] }
 0x6d1   : > { %v5942_v58 = vmax.f32 %v5934_v21, 0.0  ;;  %15077 = vmatpush3.bf16.msra.mxu1 %v5946_v11  ;;  %v19260_v11 = vld [vmem:[%s22626_s3 + $0x54] ss:$8 sps:$4 sm:$0xff]  }
 0x6d2   : > { %v5948_v30 = vpack.c.bf16 %v5944_v24, %v5943_v32  ;;  %15078 = vmatprep.subr.bf16.mxu1 %v23055_v46  ;;  %v19292_v14 = vld [vmem:[%s22626_s3 + $0x74] ss:$8 sps:$4 sm:$0xff]   ;;  %v19301_v32 = vld [vmem:[%s22626_s3 + $0x70] ss:$8 sps:$4 sm:$0xff]   ;;  %v23095_v24 = vld [vmem:[#allocation36_spill] sm:$0xff] }
 0x6d3   : > { %v5947_v55 = vpack.c.bf16 %v5942_v58, %v5941_v10  ;;  %v23094_v21 = vld [vmem:[#allocation33_spill] sm:$0xff]  ;;  %v19308_v10 = vld [vmem:[%s22626_s3 + $0x84] ss:$8 sps:$4 sm:$0xff]  }
 0x6d4   : > { %v23096_v58 = vld [vmem:[#allocation35_spill] sm:$0xff] }
 0x6d5   : > { %15079 = vmatpush3.bf16.msra.mxu1 %v5947_v55  ;;  %v19323_v55 = vld [vmem:[%s22626_s3 + $0x94] ss:$8 sps:$4 sm:$0xff]  }
 0x6d6   : > { %15080 = vmatprep.subr.bf16.mxu1 %v23055_v46 }
 0x6d9   : > { %15081 = vmatpush3.bf16.msra.mxu1 %v5948_v30  ;;  %v19317_v30 = vld [vmem:[%s22626_s3 + $0x80] ss:$8 sps:$4 sm:$0xff]  }
 0x6da   : > { %15086 = vmatprep.subr.bf16.mxu1 %v23055_v46 }
 0x6dc   : > { %15083 = vmatmul.mubr.msk.bf16.vlgmr.msra.gmra.mrb[124].mxu1 %vm4723_vm3, %v23061_v22  ;;  %v19329_v22 = vld [vmem:[%s22626_s3 + $0x90] ss:$8 sps:$4 sm:$0xff]  }
 0x6dd   : > { %15087 = vmatpush3.bf16.msra.mxu1 %v23062_v5  ;;  %15090 = vmatprep.mubr.msk.bf16.mxu1 %vm16968_vm2, %v23055_v46  ;;  %v19335_v5 = vld [vmem:[%s22626_s3 + $0xa4] ss:$8 sps:$4 sm:$0xff]  }
 0x6de   : > { %15088 = vmatprep.subr.bf16.mxu1 %v23055_v46 }
 0x6e1   : > { %15089 = vmatpush3.bf16.msra.mxu1 %v23063_v12  ;;  %v19341_v12 = vld [vmem:[%s22626_s3 + $0xa0] ss:$8 sps:$4 sm:$0xff]  }
 0x6e2   : > { %6033 = vmatprep.subr.bf16.mxu1 %v23064_v0 }
 0x7af   : > { %v5983_v16 = vpop.f32.mrb[124].mxu1 }
 0x7b0   : > { %v5989_v18 = vpack.c.bf16 %v5983_v16, %v5983_v16  ;;  %v15084_v20 = vpop.f32.mrb[125].mxu1  ;;  %v19347_v16 = vld [vmem:[%s22626_s3 + $0xb4] ss:$8 sps:$4 sm:$0xff]  }
 0x7b1   : > { %v5986_v54 = vpop.f32.mrb[126].mxu1  ;;  %v19359_v20 = vld [vmem:[%s22626_s3 + $0xc4] ss:$8 sps:$4 sm:$0xff]  }
 0x7b2   : > { %15091 = vmatmul.mubr.msk.bf16.vlgmr.msra.gmra.mrb[128].mxu1 %vm1253_vm0, %v5989_v18  ;;  %v15085_v38 = vpop.f32.mrb[127].mxu1  ;;  %v19353_v18 = vld [vmem:[%s22626_s3 + $0xb0] ss:$8 sps:$4 sm:$0xff]   ;;  %v19365_v54 = vld [vmem:[%s22626_s3 + $0xc0] ss:$8 sps:$4 sm:$0xff]  }
 0x7b3   : > { %6034 = vmatpush1.bf16.msra.mxu1 %v23065_v33  ;;  %6065 = vmatprep.mubr.bf16.mxu1 %v19152_v62  ;;  %v19371_v38 = vld [vmem:[%s22626_s3 + $0xd4] ss:$8 sps:$4 sm:$0xff]   ;;  %v19377_v33 = vld [vmem:[%s22626_s3 + $0xd0] ss:$8 sps:$4 sm:$0xff]  }
 0x7b4   : > { %6035 = vmatprep.subr.bf16.mxu1 %v23064_v0 }
 0x7b7   : > { %6036 = vmatpush1.bf16.msra.mxu1 %v23066_v47  ;;  %v19383_v47 = vld [vmem:[%s22626_s3 + $0xe4] ss:$8 sps:$4 sm:$0xff]  }
 0x7b8   : > { %6037 = vmatprep.subr.bf16.mxu1 %v23064_v0 }
 0x7bb   : > { %6038 = vmatpush1.bf16.msra.mxu1 %v23067_v7  ;;  %v19389_v7 = vld [vmem:[%s22626_s3 + $0xe0] ss:$8 sps:$4 sm:$0xff]  }
 0x7bc   : > { %6039 = vmatprep.subr.bf16.mxu1 %v23064_v0 }
 0x7bf   : > { %6040 = vmatpush1.bf16.msra.mxu1 %v23068_v1  ;;  %v19395_v1 = vld [vmem:[%s22626_s3 + $0xf4] ss:$8 sps:$4 sm:$0xff]  }
 0x7c0   : > { %6041 = vmatprep.subr.bf16.mxu1 %v23064_v0 }
 0x7c3   : > { %6042 = vmatpush1.bf16.msra.mxu1 %v23069_v35  ;;  %v19401_v35 = vld [vmem:[%s22626_s3 + $0xf0] ss:$8 sps:$4 sm:$0xff]  }
 0x7c4   : > { %6043 = vmatprep.subr.bf16.mxu1 %v23064_v0 }
 0x7c7   : > { %6044 = vmatpush1.bf16.msra.mxu1 %v23070_v45  ;;  %v19407_v45 = vld [vmem:[%s22626_s3 + $0x104] ss:$8 sps:$4 sm:$0xff]  }
 0x7c8   : > { %6045 = vmatprep.subr.bf16.mxu1 %v23064_v0 }
 0x7cb   : > { %6046 = vmatpush1.bf16.msra.mxu1 %v23071_v37  ;;  %v19413_v37 = vld [vmem:[%s22626_s3 + $0x100] ss:$8 sps:$4 sm:$0xff]  }
 0x7cc   : > { %6047 = vmatprep.subr.bf16.mxu1 %v23064_v0 }
 0x7cf   : > { %6048 = vmatpush1.bf16.msra.mxu1 %v23072_v41  ;;  %v19419_v41 = vld [vmem:[%s22626_s3 + $0x114] ss:$8 sps:$4 sm:$0xff]  }
 0x7d0   : > { %6049 = vmatprep.subr.bf16.mxu1 %v23064_v0 }
 0x7d3   : > { %6050 = vmatpush1.bf16.msra.mxu1 %v23073_v44  ;;  %v19425_v44 = vld [vmem:[%s22626_s3 + $0x110] ss:$8 sps:$4 sm:$0xff]  }
 0x7d4   : > { %6051 = vmatprep.subr.bf16.mxu1 %v23064_v0 }
 0x7d7   : > { %6052 = vmatpush1.bf16.msra.mxu1 %v23074_v51  ;;  %v19431_v51 = vld [vmem:[%s22626_s3 + $0x124] ss:$8 sps:$4 sm:$0xff]  }
 0x7d8   : > { %6053 = vmatprep.subr.bf16.mxu1 %v23064_v0 }
 0x7db   : > { %6054 = vmatpush1.bf16.msra.mxu1 %v23075_v42  ;;  %v19437_v42 = vld [vmem:[%s22626_s3 + $0x120] ss:$8 sps:$4 sm:$0xff]  }
 0x7dc   : > { %6055 = vmatprep.subr.bf16.mxu1 %v23064_v0 }
 0x7df   : > { %6056 = vmatpush1.bf16.msra.mxu1 %v23076_v36  ;;  %v19443_v36 = vld [vmem:[%s22626_s3 + $0x134] ss:$8 sps:$4 sm:$0xff]  }
 0x7e0   : > { %6057 = vmatprep.subr.bf16.mxu1 %v23064_v0 }
 0x7e3   : > { %6058 = vmatpush1.bf16.msra.mxu1 %v23077_v9  ;;  %v3175_v9 = vld [vmem:[%s22631_s8] sm:$0x1] }
 0x7e4   : > { %6059 = vmatprep.subr.bf16.mxu1 %v23064_v0 }
 0x7e7   : > { %6060 = vmatpush1.bf16.msra.mxu1 %v23078_v48 }
 0x7e8   : > { %6061 = vmatprep.subr.bf16.mxu1 %v23064_v0 }
 0x7eb   : > { %6062 = vmatpush1.bf16.msra.mxu1 %v23079_v53 }
 0x7ec   : > { %6063 = vmatprep.subr.bf16.mxu1 %v23064_v0 }
 0x7ef   : > { %6064 = vmatpush1.bf16.msra.mxu1 %v23080_v26 }
 0x7f0   : > { %7243 = vmatprep.subr.bf16.mxu1 %v23064_v0 }
 0x7f2   : > { %6066 = vmatmul.mubr.bf16.vlgmr.msra.gmra.mrb[132].mxu1 %v19189_v4 }
 0x7f3   : > { %7244 = vmatpush1.bf16.msra.mxu1 %v23081_v25  ;;  %6073 = vmatprep.mubr.bf16.mxu1 %v19196_v49 }
 0x7f4   : > { %7245 = vmatprep.subr.bf16.mxu1 %v23064_v0 }
 0x7f7   : > { %7246 = vmatpush1.bf16.msra.mxu1 %v23082_v17  ;;  %v4818_v17 = vadd.f32 %v19125_v61, %v3175_v9  ;;  %v19467_v61 = vld [vmem:[%s22626_s3 + $0x140] ss:$8 sps:$4 sm:$0xff]  }
 0x7f8   : > { %7247 = vmatprep.subr.bf16.mxu1 %v23064_v0 }
 0x7fa   : > { %6074 = vmatmul.mubr.bf16.gmra.mrb[136].mxu1 %v19205_v29 }
 0x7fb   : > { %7248 = vmatpush1.bf16.msra.mxu1 %v23083_v59  ;;  %6081 = vmatprep.mubr.bf16.mxu1 %v19212_v23 }
 0x7fc   : > { %7249 = vmatprep.subr.bf16.mxu1 %v23064_v0 }
 0x7ff   : > { %7250 = vmatpush1.bf16.msra.mxu1 %v23084_v31 }
 0x800   : > { %7251 = vmatprep.subr.bf16.mxu1 %v23064_v0 }
 0x802   : > { %6082 = vmatmul.mubr.bf16.gmra.mrb[140].mxu1 %v19221_v50 }
 0x803   : > { %7252 = vmatpush1.bf16.msra.mxu1 %v23085_v6  ;;  %6089 = vmatprep.mubr.bf16.mxu1 %v19228_v60 }
 0x804   : > { %7253 = vmatprep.subr.bf16.mxu1 %v23064_v0 }
 0x807   : > { %7254 = vmatpush1.bf16.msra.mxu1 %v23086_v19  ;;  %v19455_v19 = vld [vmem:[%s22626_s3 + $0x130] ss:$8 sps:$4 sm:$0xff]  }
 0x808   : > { %7255 = vmatprep.subr.bf16.mxu1 %v23064_v0 }
 0x80a   : > { %6090 = vmatmul.mubr.bf16.gmra.mrb[144].mxu1 %v19237_v43 }
 0x80b   : > { %7256 = vmatpush1.bf16.msra.mxu1 %v23087_v57  ;;  %6097 = vmatprep.mubr.bf16.mxu1 %v19244_v13  ;;  %v19461_v57 = vld [vmem:[%s22626_s3 + $0x144] ss:$8 sps:$4 sm:$0xff]  }
 0x80c   : > { %7257 = vmatprep.subr.bf16.mxu1 %v23064_v0 }
 0x80f   : > { %7258 = vmatpush1.bf16.msra.mxu1 %v23088_v40  ;;  %v19473_v40 = vld [vmem:[%s22626_s3 + $0x154] ss:$8 sps:$4 sm:$0xff]  }
 0x810   : > { %7259 = vmatprep.subr.bf16.mxu1 %v23064_v0 }
 0x812   : > { %6098 = vmatmul.mubr.bf16.gmra.mrb[148].mxu1 %v19253_v8 }
 0x813   : > { %7260 = vmatpush1.bf16.msra.mxu1 %v23089_v3  ;;  %6105 = vmatprep.mubr.bf16.mxu1 %v19260_v11  ;;  %v19479_v3 = vld [vmem:[%s22626_s3 + $0x150] ss:$8 sps:$4 sm:$0xff]  }
 0x814   : > { %7261 = vmatprep.subr.bf16.mxu1 %v23064_v0  ;;  %23098 = vst [vmem:[#allocation104_spill] sm:$0xff] %v19479_v3 }
 0x817   : > { %7262 = vmatpush1.bf16.msra.mxu1 %v23090_v2  ;;  %v19485_v2 = vld [vmem:[%s22626_s3 + $0x164] ss:$8 sps:$4 sm:$0xff]  }
 0x818   : > { %7263 = vmatprep.subr.bf16.mxu1 %v23064_v0  ;;  %23099 = vst [vmem:[#allocation106_spill] sm:$0xff] %v19485_v2 }
 0x81a   : > { %6106 = vmatmul.mubr.bf16.gmra.mrb[152].mxu1 %v19269_v63 }
 0x81b   : > { %7264 = vmatpush1.bf16.msra.mxu1 %v23091_v52  ;;  %6113 = vmatprep.mubr.bf16.mxu1 %v19276_v34  ;;  %v19491_v52 = vld [vmem:[%s22626_s3 + $0x160] ss:$8 sps:$4 sm:$0xff]  }
 0x81c   : > { %7265 = vmatprep.subr.bf16.mxu1 %v23064_v0  ;;  %23100 = vst [vmem:[#allocation110_spill] sm:$0xff] %v19491_v52 }
 0x81f   : > { %7266 = vmatpush1.bf16.msra.mxu1 %v23092_v56  ;;  %v19497_v56 = vld [vmem:[%s22626_s3 + $0x174] ss:$8 sps:$4 sm:$0xff]  }
 0x820   : > { %7267 = vmatprep.subr.bf16.mxu1 %v23064_v0  ;;  %23101 = vst [vmem:[#allocation109_spill] sm:$0xff] %v19497_v56 }
 0x822   : > { %6114 = vmatmul.mubr.bf16.gmra.mrb[156].mxu1 %v19285_v15 }
 0x823   : > { %7268 = vmatpush1.bf16.msra.mxu1 %v23093_v39  ;;  %6121 = vmatprep.mubr.bf16.mxu1 %v19292_v14  ;;  %v19503_v39 = vld [vmem:[%s22626_s3 + $0x170] ss:$8 sps:$4 sm:$0xff]  }
 0x824   : > { %7269 = vmatprep.subr.bf16.mxu1 %v23064_v0  ;;  %23102 = vst [vmem:[#allocation112_spill] sm:$0xff] %v19503_v39 }
 0x827   : > { %7270 = vmatpush1.bf16.msra.mxu1 %v23094_v21  ;;  %v19509_v21 = vld [vmem:[%s22626_s3 + $0x184] ss:$8 sps:$4 sm:$0xff]  }
 0x828   : > { %7271 = vmatprep.subr.bf16.mxu1 %v23064_v0  ;;  %23103 = vst [vmem:[#allocation111_spill] sm:$0xff] %v19509_v21 }
 0x82a   : > { %6122 = vmatmul.mubr.bf16.gmra.mrb[160].mxu1 %v19301_v32 }
 0x82b   : > { %7272 = vmatpush1.bf16.msra.mxu1 %v23095_v24  ;;  %6129 = vmatprep.mubr.bf16.mxu1 %v19308_v10  ;;  %v19515_v24 = vld [vmem:[%s22626_s3 + $0x180] ss:$8 sps:$4 sm:$0xff]  }
 0x82c   : > { %7273 = vmatprep.subr.bf16.mxu1 %v23064_v0  ;;  %23104 = vst [vmem:[#allocation114_spill] sm:$0xff] %v19515_v24 }
 0x82f   : > { %7274 = vmatpush1.bf16.msra.mxu1 %v23096_v58  ;;  %v19521_v58 = vld [vmem:[%s22626_s3 + $0x194] ss:$8 sps:$4 sm:$0xff]  }
 0x830   : > { %15314 = vmatprep.subr.bf16.mxu1 %v18859_v27  ;;  %23105 = vst [vmem:[#allocation113_spill] sm:$0xff] %v19521_v58 }
 0x832   : > { %6130 = vmatmul.mubr.bf16.gmra.mrb[164].mxu1 %v19317_v30 }
 0x833   : > { %6137 = vmatprep.mubr.bf16.mxu1 %v19323_v55 }
 0x83a   : > { %6138 = vmatmul.mubr.bf16.gmra.mrb[168].mxu1 %v19329_v22 }
 0x83b   : > { %6145 = vmatprep.mubr.bf16.mxu1 %v19335_v5 }
 0x842   : > { %6146 = vmatmul.mubr.bf16.gmra.mrb[172].mxu1 %v19341_v12 }
 0x843   : > { %6153 = vmatprep.mubr.bf16.mxu1 %v19347_v16 }
 0x84a   : > { %6154 = vmatmul.mubr.bf16.gmra.mrb[176].mxu1 %v19353_v18 }
 0x84b   : > { %6161 = vmatprep.mubr.bf16.mxu1 %v19359_v20 }
 0x852   : > { %6162 = vmatmul.mubr.bf16.gmra.mrb[180].mxu1 %v19365_v54 }
 0x853   : > { %6169 = vmatprep.mubr.bf16.mxu1 %v19371_v38 }
 0x85a   : > { %6170 = vmatmul.mubr.bf16.gmra.mrb[184].mxu1 %v19377_v33 }
 0x85b   : > { %6177 = vmatprep.mubr.bf16.mxu1 %v19383_v47 }
 0x862   : > { %6178 = vmatmul.mubr.bf16.gmra.mrb[188].mxu1 %v19389_v7 }
 0x863   : > { %6185 = vmatprep.mubr.bf16.mxu1 %v19395_v1 }
 0x86a   : > { %6186 = vmatmul.mubr.bf16.gmra.mrb[192].mxu1 %v19401_v35 }
 0x86b   : > { %6193 = vmatprep.mubr.bf16.mxu1 %v19407_v45 }
 0x872   : > { %6194 = vmatmul.mubr.bf16.gmra.mrb[196].mxu1 %v19413_v37 }
 0x873   : > { %6201 = vmatprep.mubr.bf16.mxu1 %v19419_v41 }
 0x87a   : > { %6202 = vmatmul.mubr.bf16.gmra.mrb[200].mxu1 %v19425_v44 }
 0x87b   : > { %6209 = vmatprep.mubr.bf16.mxu1 %v19431_v51 }
 0x882   : > { %6210 = vmatmul.mubr.bf16.gmra.mrb[204].mxu1 %v19437_v42 }
 0x883   : > { %6217 = vmatprep.mubr.bf16.mxu1 %v19443_v36 }
 0x885   : > { %v6027_v48 = vpop.f32.mrb[128].mxu1 }
 0x886   : > { %v6028_v53 = vadd.f32 %v6027_v48, %v3175_v9  ;;  %v15092_v26 = vpop.f32.mrb[129].mxu1  ;;  %v19527_v9 = vld [vmem:[%s22626_s3 + $0x190] ss:$8 sps:$4 sm:$0xff]   ;;  %v19533_v48 = vld [vmem:[%s22626_s3 + $0x1a4] ss:$8 sps:$4 sm:$0xff]  }
 0x887   : > { %v6030_v25 = vpop.f32.mrb[130].mxu1  ;;  %23106 = vst [vmem:[#allocation116_spill] sm:$0xff] %v19527_v9  ;;  %23107 = vst [vmem:[#allocation115_spill] sm:$0xff] %v19533_v48  ;;  %v19545_v26 = vld [vmem:[%s22626_s3 + $0x1b4] ss:$8 sps:$4 sm:$0xff]  }
 0x888   : > { %v13294_v59 = vrot.slane %v6028_v53, 7  ;;  %v15093_v31 = vpop.f32.mrb[131].mxu1  ;;  %v19539_v53 = vld [vmem:[%s22626_s3 + $0x1a0] ss:$8 sps:$4 sm:$0xff]   ;;  %23109 = vst [vmem:[#allocation118_spill] sm:$0xff] %v19545_v26 }
 0x889   : > { %23108 = vst [vmem:[#allocation107_spill] sm:$0xff] %v19539_v53 }
 0x88a   : > { %v19450_v6 = vsel %vm13314_vm4, %v4818_v17, %v13294_v59  ;;  %6218 = vmatmul.mubr.bf16.gmra.mrb[208].mxu1 %v19455_v19 }
 0x88b   : > { %23097 = vst [vmem:[#allocation108_spill] sm:$0xff] %v19450_v6  ;;  %6225 = vmatprep.mubr.bf16.mxu1 %v19461_v57  ;;  %v19557_v6 = vld [vmem:[%s22626_s3 + $0x1b0] ss:$8 sps:$4 sm:$0xff]  }
 0x88c   : > { %23110 = vst [vmem:[#allocation117_spill] sm:$0xff] %v19557_v6 }
 0x892   : > { %6226 = vmatmul.mubr.bf16.gmra.mrb[212].mxu1 %v19467_v61 }
 0x893   : > { %6233 = vmatprep.mubr.bf16.mxu1 %v19473_v40 }
 0x89a   : > { %6234 = vmatmul.mubr.bf16.gmra.mrb[216].mxu1 %v19479_v3  ;;  %v19669_v3 = vld [vmem:[%s22626_s3 + $0x220] ss:$8 sps:$4 sm:$0xff]  }
 0x89b   : > { %6241 = vmatprep.mubr.bf16.mxu1 %v19485_v2  ;;  %v19636_v2 = vld [vmem:[%s22626_s3 + $0x200] ss:$8 sps:$4 sm:$0xff]  }
 0x89c   : > { %23120 = vst [vmem:[#allocation103_spill] sm:$0xff] %v19636_v2 }
 0x8a2   : > { %6242 = vmatmul.mubr.bf16.gmra.mrb[220].mxu1 %v19491_v52 }
 0x8a3   : > { %6249 = vmatprep.mubr.bf16.mxu1 %v19497_v56 }
 0x8aa   : > { %6250 = vmatmul.mubr.bf16.gmra.mrb[224].mxu1 %v19503_v39 }
 0x8ab   : > { %6257 = vmatprep.mubr.bf16.mxu1 %v19509_v21 }
 0x8b2   : > { %6258 = vmatmul.mubr.bf16.gmra.mrb[228].mxu1 %v19515_v24 }
 0x8b3   : > { %6265 = vmatprep.mubr.bf16.mxu1 %v19521_v58 }
 0x8ba   : > { %6266 = vmatmul.mubr.bf16.gmra.mrb[232].mxu1 %v19527_v9 }
 0x8bb   : > { %6273 = vmatprep.mubr.bf16.mxu1 %v19533_v48 }
 0x8c2   : > { %6274 = vmatmul.mubr.bf16.gmra.mrb[236].mxu1 %v19539_v53 }
 0x8c3   : > { %6281 = vmatprep.mubr.bf16.mxu1 %v19545_v26  ;;  %v19563_v26 = vld [vmem:[%s22626_s3 + $0x1c4] ss:$8 sps:$4 sm:$0xff]  }
 0x8c4   : > { %23111 = vst [vmem:[#allocation120_spill] sm:$0xff] %v19563_v26 }
 0x8c5   : > { %v19548_v25 = vpop.f32.mrb[132].mxu1 }
 0x8c6   : > { %v6069_v17 = vpop.f32.mrb[133].mxu1 }
 0x8c7   : > { %v19550_v59 = vpop.f32.mrb[134].mxu1 }
 0x8c8   : > { %v6072_v0 = vpop.f32.mrb[135].mxu1 }
 0x8ca   : > { %6282 = vmatmul.mubr.bf16.gmra.mrb[240].mxu1 %v19557_v6  ;;  %v19575_v6 = vld [vmem:[%s22626_s3 + $0x1c0] ss:$8 sps:$4 sm:$0xff]  }
 0x8cb   : > { %6289 = vmatprep.mubr.bf16.mxu1 %v19563_v26  ;;  %23112 = vst [vmem:[#allocation119_spill] sm:$0xff] %v19575_v6  ;;  %v19581_v26 = vld [vmem:[%s22626_s3 + $0x1d4] ss:$8 sps:$4 sm:$0xff]  }
 0x8cc   : > { %23113 = vst [vmem:[#allocation122_spill] sm:$0xff] %v19581_v26 }
 0x8cd   : > { %v19566_v17 = vpop.f32.mrb[136].mxu1 }
 0x8ce   : > { %v6077_v53 = vpop.f32.mrb[137].mxu1 }
 0x8cf   : > { %v19568_v48 = vpop.f32.mrb[138].mxu1 }
 0x8d0   : > { %v6080_v31 = vpop.f32.mrb[139].mxu1 }
 0x8d2   : > { %6290 = vmatmul.mubr.bf16.gmra.mrb[244].mxu1 %v19575_v6  ;;  %v19593_v6 = vld [vmem:[%s22626_s3 + $0x1d0] ss:$8 sps:$4 sm:$0xff]  }
 0x8d3   : > { %6297 = vmatprep.mubr.bf16.mxu1 %v19581_v26  ;;  %23114 = vst [vmem:[#allocation121_spill] sm:$0xff] %v19593_v6  ;;  %v19599_v26 = vld [vmem:[%s22626_s3 + $0x1e4] ss:$8 sps:$4 sm:$0xff]  }
 0x8d4   : > { %23115 = vst [vmem:[#allocation124_spill] sm:$0xff] %v19599_v26 }
 0x8d5   : > { %v19584_v53 = vpop.f32.mrb[140].mxu1 }
 0x8d6   : > { %v6085_v9 = vpop.f32.mrb[141].mxu1 }
 0x8d7   : > { %v19586_v58 = vpop.f32.mrb[142].mxu1 }
 0x8d8   : > { %v6088_v0 = vpop.f32.mrb[143].mxu1 }
 0x8da   : > { %6298 = vmatmul.mubr.bf16.gmra.mrb[248].mxu1 %v19593_v6  ;;  %v19611_v6 = vld [vmem:[%s22626_s3 + $0x1e0] ss:$8 sps:$4 sm:$0xff]  }
 0x8db   : > { %6305 = vmatprep.mubr.bf16.mxu1 %v19599_v26  ;;  %23116 = vst [vmem:[#allocation123_spill] sm:$0xff] %v19611_v6  ;;  %v19617_v26 = vld [vmem:[%s22626_s3 + $0x1f4] ss:$8 sps:$4 sm:$0xff]  }
 0x8dc   : > { %23117 = vst [vmem:[#allocation126_spill] sm:$0xff] %v19617_v26 }
 0x8dd   : > { %v19602_v9 = vpop.f32.mrb[144].mxu1 }
 0x8de   : > { %v6093_v24 = vpop.f32.mrb[145].mxu1 }
 0x8df   : > { %v19604_v21 = vpop.f32.mrb[146].mxu1 }
 0x8e0   : > { %v6096_v31 = vpop.f32.mrb[147].mxu1 }
 0x8e1   : > { %v19623_v31 = vld [vmem:[%s22626_s3 + $0x1f0] ss:$8 sps:$4 sm:$0xff]  }
 0x8e2   : > { %6306 = vmatmul.mubr.bf16.gmra.mrb[252].mxu1 %v19611_v6  ;;  %23118 = vst [vmem:[#allocation125_spill] sm:$0xff] %v19623_v31  ;;  %v19630_v6 = vld [vmem:[%s22626_s3 + $0x204] ss:$8 sps:$4 sm:$0xff]  }
 0x8e3   : > { %6313 = vmatprep.mubr.bf16.mxu1 %v19617_v26  ;;  %23119 = vst [vmem:[#allocation101_spill] sm:$0xff] %v19630_v6 }
 0x8e5   : > { %v6099_v24 = vpop.f32.mrb[148].mxu1 }
 0x8e6   : > { %v6101_v39 = vpop.f32.mrb[149].mxu1 }
 0x8e7   : > { %v6102_v56 = vpop.f32.mrb[150].mxu1 }
 0x8e8   : > { %v6358_v52 = vpack.c.bf16 %v6102_v56, %v6099_v24  ;;  %v6104_v0 = vpop.f32.mrb[151].mxu1 }
 0x8ea   : > { %6314 = vmatmul.mubr.bf16.gmra.mrb[0].mxu1 %v19623_v31  ;;  %15096 = vmatprep.mubr.msk.bf16.mxu0 %vm3899_vm1, %v6358_v52  ;;  %v19643_v52 = vld [vmem:[%s22626_s3 + $0x214] ss:$8 sps:$4 sm:$0xff]  }
 0x8eb   : > { %6321 = vmatprep.mubr.bf16.mxu1 %v19630_v6  ;;  %23121 = vst [vmem:[#allocation102_spill] sm:$0xff] %v19643_v52  ;;  %v19656_v6 = vld [vmem:[%s22626_s3 + $0x210] ss:$8 sps:$4 sm:$0xff]  }
 0x8ec   : > { %23122 = vst [vmem:[#allocation105_spill] sm:$0xff] %v19656_v6 }
 0x8ed   : > { %v6107_v39 = vpop.f32.mrb[152].mxu1 }
 0x8ee   : > { %v6109_v26 = vpop.f32.mrb[153].mxu1 }
 0x8ef   : > { %v6110_v56 = vpop.f32.mrb[154].mxu1  ;;  %v19650_v26 = vld [vmem:[%s22627_s4 + $0x10] sm:$0xff]  }
 0x8f0   : > { %v6359_v0 = vpack.c.bf16 %v6110_v56, %v6107_v39  ;;  %v6112_v24 = vpop.f32.mrb[155].mxu1 }
 0x8f2   : > { %6322 = vmatmul.mubr.bf16.gmra.mrb[4].mxu1 %v19636_v2  ;;  %15097 = vmatmul.mubr.msk.bf16.vlgmr.msra.gmra.mrb[188].mxu0 %vm3899_vm1, %v6359_v0 }
 0x8f3   : > { %6329 = vmatprep.mubr.bf16.mxu1 %v19643_v52  ;;  %15105 = vmatpush3.bf16.msra.mxu0 %v18969_v28  ;;  %v19663_v52 = vld [vmem:[%s22626_s3 + $0x224] ss:$8 sps:$4 sm:$0xff]  }
 0x8f4   : > { %15114 = vmatprep.subr.bf16.mxu0 %v19650_v26  ;;  %23123 = vst [vmem:[#allocation6_spill] sm:$0xff] %v19663_v52 }
 0x8f5   : > { %v6115_v39 = vpop.f32.mrb[156].mxu1 }
 0x8f6   : > { %v6117_v56 = vpop.f32.mrb[157].mxu1 }
 0x8f7   : > { %v6118_v24 = vpop.f32.mrb[158].mxu1 }
 0x8f8   : > { %v6360_v0 = vpack.c.bf16 %v6118_v24, %v6115_v39  ;;  %v6120_v2 = vpop.f32.mrb[159].mxu1 }
 0x8fa   : > { %6330 = vmatmul.mubr.bf16.gmra.mrb[8].mxu1 %v19656_v6  ;;  %15100 = vmatprep.mubr.msk.bf16.mxu0 %vm3899_vm1, %v6360_v0  ;;  %v19676_v0 = vld [vmem:[%s22626_s3 + $0x234] ss:$8 sps:$4 sm:$0xff]  }
 0x8fb   : > { %6337 = vmatprep.mubr.bf16.mxu1 %v19663_v52  ;;  %23124 = vst [vmem:[#allocation5_spill] sm:$0xff] %v19676_v0 }
 0x8fd   : > { %v6123_v56 = vpop.f32.mrb[160].mxu1 }
 0x8fe   : > { %v6125_v31 = vpop.f32.mrb[161].mxu1 }
 0x8ff   : > { %v6126_v39 = vpop.f32.mrb[162].mxu1  ;;  %v23125_v31 = vpack.c.bf16 %v19550_v59, %v19548_v25  ;;  %v23127_v25 = vpack.c.bf16 %v19586_v58, %v19584_v53  ;;  %v19701_v59 = vld [vmem:[%s22627_s4 + $0x18] sm:$0xff]   ;;  %v23128_v58 = vpack.c.bf16 %v19604_v21, %v19602_v9 }
 0x900   : > { %v6361_v2 = vpack.c.bf16 %v6126_v39, %v6123_v56  ;;  %v6128_v24 = vpop.f32.mrb[163].mxu1 }
 0x902   : > { %6338 = vmatmul.mubr.bf16.gmra.mrb[12].mxu1 %v19669_v3  ;;  %15101 = vmatmul.mubr.msk.bf16.gmra.mrb[192].mxu0 %vm3899_vm1, %v6361_v2  ;;  %v19686_v2 = vld [vmem:[%s22626_s3 + $0x230] ss:$8 sps:$4 sm:$0xff]  }
 0x903   : > { %6345 = vmatprep.mubr.bf16.mxu1 %v19676_v0  ;;  %15106 = vmatprep.mubr.msk.bf16.mxu0 %vm3899_vm1, %v23125_v31  ;;  %v23126_v0 = vpack.c.bf16 %v19568_v48, %v19566_v17 }
 0x905   : > { %v6131_v56 = vpop.f32.mrb[164].mxu1 }
 0x906   : > { %v6133_v39 = vpop.f32.mrb[165].mxu1 }
 0x907   : > { %v6134_v24 = vpop.f32.mrb[166].mxu1 }
 0x908   : > { %v6136_v52 = vpop.f32.mrb[167].mxu1  ;;  %v6362_v6 = vpack.c.bf16 %v6134_v24, %v6131_v56 }
 0x90a   : > { %6346 = vmatmul.mubr.bf16.gmra.mrb[16].mxu1 %v19686_v2  ;;  %15107 = vmatmul.mubr.msk.bf16.vlgmr.msra.gmra.mrb[188].mxu0 %vm3899_vm1, %v23126_v0 }
 0x90b   : > { %15110 = vmatprep.mubr.msk.bf16.mxu0 %vm3899_vm1, %v23127_v25  ;;  %15115 = vmatpush3.bf16.msra.mxu0 %v19650_v26 }
 0x90c   : > { %15124 = vmatprep.subr.bf16.mxu0 %v19701_v59  ;;  %7275 = vmatprep.mubr.bf16.mxu1 %v19152_v62 }
 0x90d   : > { %v6139_v52 = vpop.f32.mrb[168].mxu1 }
 0x90e   : > { %v6141_v48 = vpop.f32.mrb[169].mxu1 }
 0x90f   : > { %v6142_v17 = vpop.f32.mrb[170].mxu1 }
 0x910   : > { %v6363_v0 = vpack.c.bf16 %v6142_v17, %v6139_v52  ;;  %v6144_v31 = vpop.f32.mrb[171].mxu1 }
 0x912   : > { %15111 = vmatmul.mubr.msk.bf16.gmra.mrb[192].mxu0 %vm3899_vm1, %v23128_v58  ;;  %7276 = vmatmul.mubr.bf16.vlgmr.msra.gmra.mrb[20].mxu1 %v19189_v4  ;;  %v19721_v4 = vld [vmem:[%s22627_s4 + $0x20] sm:$0xff]  }
 0x913   : > { %15116 = vmatprep.mubr.msk.bf16.mxu0 %vm3899_vm1, %v6362_v6  ;;  %7283 = vmatprep.mubr.bf16.mxu1 %v19196_v49 }
 0x914   : > { %15315 = vmatpush3.bf16.msra.mxu1 %v18859_v27 }
 0x915   : > { %v6147_v53 = vpop.f32.mrb[172].mxu1  ;;  %15324 = vmatprep.subr.bf16.mxu1 %v18969_v28 }
 0x916   : > { %v6149_v62 = vpop.f32.mrb[173].mxu1 }
 0x917   : > { %v6150_v56 = vpop.f32.mrb[174].mxu1 }
 0x918   : > { %v6364_v39 = vpack.c.bf16 %v6150_v56, %v6147_v53  ;;  %v6152_v24 = vpop.f32.mrb[175].mxu1 }
 0x91a   : > { %15117 = vmatmul.mubr.msk.bf16.vlgmr.msra.gmra.mrb[188].mxu0 %vm3899_vm1, %v6363_v0  ;;  %7284 = vmatmul.mubr.bf16.gmra.mrb[24].mxu1 %v19205_v29 }
 0x91b   : > { %15120 = vmatprep.mubr.msk.bf16.mxu0 %vm3899_vm1, %v6364_v39  ;;  %15125 = vmatpush3.bf16.msra.mxu0 %v19701_v59 }
 0x91c   : > { %15134 = vmatprep.subr.bf16.mxu0 %v19721_v4  ;;  %7291 = vmatprep.mubr.bf16.mxu1 %v19212_v23 }
 0x91d   : > { %v6155_v27 = vpop.f32.mrb[176].mxu1 }
 0x91e   : > { %v6157_v28 = vpop.f32.mrb[177].mxu1 }
 0x91f   : > { %v6158_v49 = vpop.f32.mrb[178].mxu1 }
 0x920   : > { %v6365_v6 = vpack.c.bf16 %v6158_v49, %v6155_v27  ;;  %v6160_v21 = vpop.f32.mrb[179].mxu1 }
 0x922   : > { %15121 = vmatmul.mubr.msk.bf16.gmra.mrb[192].mxu0 %vm3899_vm1, %v6365_v6  ;;  %7292 = vmatmul.mubr.bf16.gmra.mrb[28].mxu1 %v19221_v50  ;;  %v19738_v50 = vld [vmem:[%s22627_s4 + $0x28] sm:$0xff]  }
 0x923   : > { %7299 = vmatprep.mubr.bf16.mxu1 %v19228_v60 }
 0x925   : > { %v6163_v29 = vpop.f32.mrb[180].mxu1 }
 0x926   : > { %v6165_v9 = vpop.f32.mrb[181].mxu1 }
 0x927   : > { %v6166_v25 = vpop.f32.mrb[182].mxu1 }
 0x928   : > { %v6168_v52 = vpop.f32.mrb[183].mxu1  ;;  %v6366_v48 = vpack.c.bf16 %v6166_v25, %v6163_v29 }
 0x92a   : > { %15126 = vmatprep.mubr.msk.bf16.mxu0 %vm3899_vm1, %v6366_v48  ;;  %7300 = vmatmul.mubr.bf16.gmra.mrb[32].mxu1 %v19237_v43 }
 0x92b   : > { %7307 = vmatprep.mubr.bf16.mxu1 %v19244_v13 }
 0x92d   : > { %v6171_v23 = vpop.f32.mrb[184].mxu1 }
 0x92e   : > { %v6173_v17 = vpop.f32.mrb[185].mxu1 }
 0x92f   : > { %v6174_v0 = vpop.f32.mrb[186].mxu1 }
 0x930   : > { %v6367_v31 = vpack.c.bf16 %v6174_v0, %v6171_v23  ;;  %v6176_v58 = vpop.f32.mrb[187].mxu1 }
 0x932   : > { %15127 = vmatmul.mubr.msk.bf16.vlgmr.msra.gmra.mrb[188].mxu0 %vm3899_vm1, %v6367_v31  ;;  %7308 = vmatmul.mubr.bf16.gmra.mrb[36].mxu1 %v19253_v8 }
 0x933   : > { %15135 = vmatpush3.bf16.msra.mxu0 %v19721_v4  ;;  %7315 = vmatprep.mubr.bf16.mxu1 %v19260_v11 }
 0x934   : > { %15144 = vmatprep.subr.bf16.mxu0 %v19738_v50 }
 0x935   : > { %v6179_v60 = vpop.f32.mrb[188].mxu1 }
 0x936   : > { %v6181_v43 = vpop.f32.mrb[189].mxu1 }
 0x937   : > { %v6182_v13 = vpop.f32.mrb[190].mxu1 }
 0x938   : > { %v6368_v53 = vpack.c.bf16 %v6182_v13, %v6179_v60  ;;  %v6184_v62 = vpop.f32.mrb[191].mxu1 }
 0x93a   : > { %15130 = vmatprep.mubr.msk.bf16.mxu0 %vm3899_vm1, %v6368_v53  ;;  %7316 = vmatmul.mubr.bf16.gmra.mrb[40].mxu1 %v19269_v63 }
 0x93b   : > { %7323 = vmatprep.mubr.bf16.mxu1 %v19276_v34 }
 0x93d   : > { %v6187_v8 = vpop.f32.mrb[192].mxu1 }
 0x93e   : > { %v6189_v11 = vpop.f32.mrb[193].mxu1 }
 0x93f   : > { %v6190_v56 = vpop.f32.mrb[194].mxu1 }
 0x940   : > { %v6369_v39 = vpack.c.bf16 %v6190_v56, %v6187_v8  ;;  %v6192_v24 = vpop.f32.mrb[195].mxu1 }
 0x942   : > { %15131 = vmatmul.mubr.msk.bf16.gmra.mrb[192].mxu0 %vm3899_vm1, %v6369_v39  ;;  %7324 = vmatmul.mubr.bf16.gmra.mrb[44].mxu1 %v19285_v15  ;;  %v19757_v15 = vld [vmem:[%s22627_s4 + $0x30] sm:$0xff]  }
 0x943   : > { %7331 = vmatprep.mubr.bf16.mxu1 %v19292_v14 }
 0x945   : > { %v6195_v27 = vpop.f32.mrb[196].mxu1 }
 0x946   : > { %v6197_v28 = vpop.f32.mrb[197].mxu1 }
 0x947   : > { %v6198_v49 = vpop.f32.mrb[198].mxu1 }
 0x948   : > { %v6370_v6 = vpack.c.bf16 %v6198_v49, %v6195_v27  ;;  %v6200_v21 = vpop.f32.mrb[199].mxu1 }
 0x94a   : > { %15136 = vmatprep.mubr.msk.bf16.mxu0 %vm3899_vm1, %v6370_v6  ;;  %7332 = vmatmul.mubr.bf16.gmra.mrb[48].mxu1 %v19301_v32 }
 0x94b   : > { %7339 = vmatprep.mubr.bf16.mxu1 %v19308_v10 }
 0x94d   : > { %v6203_v63 = vpop.f32.mrb[200].mxu1 }
 0x94e   : > { %v6205_v34 = vpop.f32.mrb[201].mxu1 }
 0x94f   : > { %v6206_v29 = vpop.f32.mrb[202].mxu1 }
 0x950   : > { %v6371_v9 = vpack.c.bf16 %v6206_v29, %v6203_v63  ;;  %v6208_v25 = vpop.f32.mrb[203].mxu1 }
 0x952   : > { %15137 = vmatmul.mubr.msk.bf16.vlgmr.msra.gmra.mrb[188].mxu0 %vm3899_vm1, %v6371_v9  ;;  %7340 = vmatmul.mubr.bf16.gmra.mrb[52].mxu1 %v19317_v30 }
 0x953   : > { %15145 = vmatpush3.bf16.msra.mxu0 %v19738_v50  ;;  %7347 = vmatprep.mubr.bf16.mxu1 %v19323_v55 }
 0x954   : > { %15154 = vmatprep.subr.bf16.mxu0 %v19757_v15 }
 0x955   : > { %v6211_v14 = vpop.f32.mrb[204].mxu1 }
 0x956   : > { %v6213_v32 = vpop.f32.mrb[205].mxu1 }
 0x957   : > { %v6214_v10 = vpop.f32.mrb[206].mxu1 }
 0x958   : > { %v6372_v52 = vpack.c.bf16 %v6214_v10, %v6211_v14  ;;  %v6216_v48 = vpop.f32.mrb[207].mxu1 }
 0x95a   : > { %15140 = vmatprep.mubr.msk.bf16.mxu0 %vm3899_vm1, %v6372_v52  ;;  %7348 = vmatmul.mubr.bf16.gmra.mrb[56].mxu1 %v19329_v22 }
 0x95b   : > { %7355 = vmatprep.mubr.bf16.mxu1 %v19335_v5 }
 0x95d   : > { %v6219_v30 = vpop.f32.mrb[208].mxu1 }
 0x95e   : > { %v6221_v55 = vpop.f32.mrb[209].mxu1 }
 0x95f   : > { %v6222_v23 = vpop.f32.mrb[210].mxu1 }
 0x960   : > { %v6373_v17 = vpack.c.bf16 %v6222_v23, %v6219_v30  ;;  %v6224_v0 = vpop.f32.mrb[211].mxu1 }
 0x962   : > { %15141 = vmatmul.mubr.msk.bf16.gmra.mrb[192].mxu0 %vm3899_vm1, %v6373_v17  ;;  %7356 = vmatmul.mubr.bf16.gmra.mrb[60].mxu1 %v19341_v12  ;;  %v19776_v12 = vld [vmem:[%s22627_s4 + $0x38] sm:$0xff]  }
 0x963   : > { %7363 = vmatprep.mubr.bf16.mxu1 %v19347_v16  ;;  %23129 = vst [vmem:[#allocation8_spill] sm:$0xff] %v19776_v12 }
 0x965   : > { %v6227_v31 = vpop.f32.mrb[212].mxu1 }
 0x966   : > { %v6229_v58 = vpop.f32.mrb[213].mxu1 }
 0x967   : > { %v6230_v60 = vpop.f32.mrb[214].mxu1 }
 0x968   : > { %v6374_v43 = vpack.c.bf16 %v6230_v60, %v6227_v31  ;;  %v6232_v13 = vpop.f32.mrb[215].mxu1 }
 0x969   : > { %v23132_v13 = vld [vmem:[#allocation106_spill] sm:$0xff] }
 0x96a   : > { %15146 = vmatprep.mubr.msk.bf16.mxu0 %vm3899_vm1, %v6374_v43  ;;  %7364 = vmatmul.mubr.bf16.gmra.mrb[64].mxu1 %v19353_v18  ;;  %v23131_v43 = vld [vmem:[#allocation104_spill] sm:$0xff] }
 0x96b   : > { %7371 = vmatprep.mubr.bf16.mxu1 %v19359_v20 }
 0x96d   : > { %v6235_v22 = vpop.f32.mrb[216].mxu1 }
 0x96e   : > { %v6237_v5 = vpop.f32.mrb[217].mxu1 }
 0x96f   : > { %v6238_v53 = vpop.f32.mrb[218].mxu1 }
 0x970   : > { %v6375_v62 = vpack.c.bf16 %v6238_v53, %v6235_v22  ;;  %v6240_v8 = vpop.f32.mrb[219].mxu1 }
 0x971   : > { %v23134_v8 = vld [vmem:[#allocation109_spill] sm:$0xff] }
 0x972   : > { %15147 = vmatmul.mubr.msk.bf16.vlgmr.msra.gmra.mrb[188].mxu0 %vm3899_vm1, %v6375_v62  ;;  %7372 = vmatmul.mubr.bf16.gmra.mrb[68].mxu1 %v19365_v54 }
 0x973   : > { %15155 = vmatpush3.bf16.msra.mxu0 %v19757_v15  ;;  %7379 = vmatprep.mubr.bf16.mxu1 %v19371_v38 }
 0x974   : > { %15164 = vmatprep.subr.bf16.mxu0 %v19776_v12 }
 0x975   : > { %v6243_v16 = vpop.f32.mrb[220].mxu1 }
 0x976   : > { %v6245_v18 = vpop.f32.mrb[221].mxu1 }
 0x977   : > { %v6246_v20 = vpop.f32.mrb[222].mxu1 }
 0x978   : > { %v6376_v11 = vpack.c.bf16 %v6246_v20, %v6243_v16  ;;  %v6248_v56 = vpop.f32.mrb[223].mxu1 }
 0x97a   : > { %15150 = vmatprep.mubr.msk.bf16.mxu0 %vm3899_vm1, %v6376_v11  ;;  %7380 = vmatmul.mubr.bf16.gmra.mrb[72].mxu1 %v19377_v33 }
 0x97b   : > { %7387 = vmatprep.mubr.bf16.mxu1 %v19383_v47 }
 0x97d   : > { %v6251_v54 = vpop.f32.mrb[224].mxu1 }
 0x97e   : > { %v6253_v38 = vpop.f32.mrb[225].mxu1 }
 0x97f   : > { %v6254_v39 = vpop.f32.mrb[226].mxu1  ;;  %v23136_v38 = vld [vmem:[#allocation111_spill] sm:$0xff] }
 0x980   : > { %v6377_v24 = vpack.c.bf16 %v6254_v39, %v6251_v54  ;;  %v6256_v27 = vpop.f32.mrb[227].mxu1  ;;  %v23135_v54 = vld [vmem:[#allocation112_spill] sm:$0xff] }
 0x982   : > { %15151 = vmatmul.mubr.msk.bf16.gmra.mrb[192].mxu0 %vm3899_vm1, %v6377_v24  ;;  %7388 = vmatmul.mubr.bf16.gmra.mrb[76].mxu1 %v19389_v7  ;;  %v19795_v7 = vld [vmem:[%s22627_s4 + $0x40] sm:$0xff]  }
 0x983   : > { %7395 = vmatprep.mubr.bf16.mxu1 %v19395_v1  ;;  %23130 = vst [vmem:[#allocation7_spill] sm:$0xff] %v19795_v7 }
 0x985   : > { %v6259_v28 = vpop.f32.mrb[228].mxu1 }
 0x986   : > { %v6261_v49 = vpop.f32.mrb[229].mxu1 }
 0x987   : > { %v6262_v6 = vpop.f32.mrb[230].mxu1 }
 0x988   : > { %v6378_v21 = vpack.c.bf16 %v6262_v6, %v6259_v28  ;;  %v6264_v63 = vpop.f32.mrb[231].mxu1  ;;  %v23137_v6 = vld [vmem:[#allocation114_spill] sm:$0xff] }
 0x98a   : > { %15156 = vmatprep.mubr.msk.bf16.mxu0 %vm3899_vm1, %v6378_v21  ;;  %7396 = vmatmul.mubr.bf16.gmra.mrb[80].mxu1 %v19401_v35  ;;  %v23138_v21 = vld [vmem:[#allocation113_spill] sm:$0xff] }
 0x98b   : > { %7403 = vmatprep.mubr.bf16.mxu1 %v19407_v45 }
 0x98d   : > { %v6267_v33 = vpop.f32.mrb[232].mxu1 }
 0x98e   : > { %v6269_v47 = vpop.f32.mrb[233].mxu1 }
 0x98f   : > { %v6270_v34 = vpop.f32.mrb[234].mxu1 }
 0x990   : > { %v6379_v29 = vpack.c.bf16 %v6270_v34, %v6267_v33  ;;  %v6272_v9 = vpop.f32.mrb[235].mxu1 }
 0x991   : > { %v23139_v9 = vld [vmem:[#allocation116_spill] sm:$0xff] }
 0x992   : > { %15157 = vmatmul.mubr.msk.bf16.vlgmr.msra.gmra.mrb[188].mxu0 %vm3899_vm1, %v6379_v29  ;;  %7404 = vmatmul.mubr.bf16.gmra.mrb[84].mxu1 %v19413_v37 }
 0x993   : > { %15165 = vmatpush3.bf16.msra.mxu0 %v19776_v12  ;;  %7411 = vmatprep.mubr.bf16.mxu1 %v19419_v41 }
 0x994   : > { %15174 = vmatprep.subr.bf16.mxu0 %v19795_v7 }
 0x995   : > { %v6275_v1 = vpop.f32.mrb[236].mxu1 }
 0x996   : > { %v6277_v35 = vpop.f32.mrb[237].mxu1 }
 0x997   : > { %v6278_v45 = vpop.f32.mrb[238].mxu1 }
 0x998   : > { %v6380_v25 = vpack.c.bf16 %v6278_v45, %v6275_v1  ;;  %v6280_v14 = vpop.f32.mrb[239].mxu1  ;;  %v23140_v1 = vld [vmem:[#allocation115_spill] sm:$0xff] }
 0x99a   : > { %15160 = vmatprep.mubr.msk.bf16.mxu0 %vm3899_vm1, %v6380_v25  ;;  %7412 = vmatmul.mubr.bf16.gmra.mrb[88].mxu1 %v19425_v44 }
 0x99b   : > { %7419 = vmatprep.mubr.bf16.mxu1 %v19431_v51 }
 0x99d   : > { %v6283_v37 = vpop.f32.mrb[240].mxu1 }
 0x99e   : > { %v6285_v41 = vpop.f32.mrb[241].mxu1 }
 0x99f   : > { %v6286_v32 = vpop.f32.mrb[242].mxu1  ;;  %v23141_v41 = vld [vmem:[#allocation107_spill] sm:$0xff] }
 0x9a0   : > { %v6381_v10 = vpack.c.bf16 %v6286_v32, %v6283_v37  ;;  %v6288_v52 = vpop.f32.mrb[243].mxu1  ;;  %v23142_v32 = vld [vmem:[#allocation118_spill] sm:$0xff] }
 0x9a1   : > { %v23144_v52 = vld [vmem:[#allocation120_spill] sm:$0xff] }
 0x9a2   : > { %15161 = vmatmul.mubr.msk.bf16.gmra.mrb[192].mxu0 %vm3899_vm1, %v6381_v10  ;;  %7420 = vmatmul.mubr.bf16.gmra.mrb[92].mxu1 %v19437_v42  ;;  %v23143_v10 = vld [vmem:[#allocation117_spill] sm:$0xff] }
 0x9a3   : > { %7427 = vmatprep.mubr.bf16.mxu1 %v19443_v36 }
 0x9a5   : > { %v6291_v48 = vpop.f32.mrb[244].mxu1 }
 0x9a6   : > { %v6293_v30 = vpop.f32.mrb[245].mxu1 }
 0x9a7   : > { %v6294_v55 = vpop.f32.mrb[246].mxu1  ;;  %v23146_v30 = vld [vmem:[#allocation122_spill] sm:$0xff] }
 0x9a8   : > { %v6382_v23 = vpack.c.bf16 %v6294_v55, %v6291_v48  ;;  %v6296_v17 = vpop.f32.mrb[247].mxu1  ;;  %v23145_v48 = vld [vmem:[#allocation119_spill] sm:$0xff]  ;;  %v23147_v55 = vld [vmem:[#allocation121_spill] sm:$0xff] }
 0x9a9   : > { %v23149_v17 = vld [vmem:[#allocation123_spill] sm:$0xff] }
 0x9aa   : > { %15166 = vmatprep.mubr.msk.bf16.mxu0 %vm3899_vm1, %v6382_v23  ;;  %7428 = vmatmul.mubr.bf16.gmra.mrb[96].mxu1 %v19455_v19  ;;  %v23148_v23 = vld [vmem:[#allocation124_spill] sm:$0xff] }
 0x9ab   : > { %7435 = vmatprep.mubr.bf16.mxu1 %v19461_v57 }
 0x9ad   : > { %v6299_v44 = vpop.f32.mrb[248].mxu1 }
 0x9ae   : > { %v6301_v51 = vpop.f32.mrb[249].mxu1 }
 0x9af   : > { %v6302_v0 = vpop.f32.mrb[250].mxu1  ;;  %v23151_v51 = vld [vmem:[#allocation125_spill] sm:$0xff] }
 0x9b0   : > { %v6383_v31 = vpack.c.bf16 %v6302_v0, %v6299_v44  ;;  %v6304_v58 = vpop.f32.mrb[251].mxu1  ;;  %v23150_v44 = vld [vmem:[#allocation126_spill] sm:$0xff]  ;;  %v23152_v0 = vld [vmem:[#allocation101_spill] sm:$0xff] }
 0x9b1   : > { %v23154_v58 = vld [vmem:[#allocation102_spill] sm:$0xff] }
 0x9b2   : > { %15167 = vmatmul.mubr.msk.bf16.vlgmr.msra.gmra.mrb[188].mxu0 %vm3899_vm1, %v6383_v31  ;;  %7436 = vmatmul.mubr.bf16.gmra.mrb[100].mxu1 %v19467_v61  ;;  %v23153_v31 = vld [vmem:[#allocation103_spill] sm:$0xff] }
 0x9b3   : > { %15175 = vmatpush3.bf16.msra.mxu0 %v19795_v7  ;;  %7443 = vmatprep.mubr.bf16.mxu1 %v19473_v40  ;;  %v23133_v40 = vld [vmem:[#allocation110_spill] sm:$0xff] }
 0x9b4   : > { %15184 = vmatprep.subr.bf16.mxu0 %v23055_v46 }
 0x9b5   : > { %v6307_v42 = vpop.f32.mrb[252].mxu1 }
 0x9b6   : > { %v6309_v36 = vpop.f32.mrb[253].mxu1 }
 0x9b7   : > { %v6310_v19 = vpop.f32.mrb[254].mxu1  ;;  %v23156_v36 = vld [vmem:[#allocation6_spill] sm:$0xff] }
 0x9b8   : > { %v6384_v60 = vpack.c.bf16 %v6310_v19, %v6307_v42  ;;  %v6312_v57 = vpop.f32.mrb[255].mxu1  ;;  %v23155_v42 = vld [vmem:[#allocation105_spill] sm:$0xff] }
 0x9b9   : > { %v23157_v19 = vld [vmem:[#allocation5_spill] sm:$0xff] }
 0x9ba   : > { %15170 = vmatprep.mubr.msk.bf16.mxu0 %vm3899_vm1, %v6384_v60  ;;  %7444 = vmatmul.mubr.bf16.gmra.mrb[104].mxu1 %v23131_v43 }
 0x9bb   : > { %7451 = vmatprep.mubr.bf16.mxu1 %v23132_v13 }
 0x9bd   : > { %v6315_v22 = vpop.f32.mrb[0].mxu1 }
 0x9be   : > { %v6317_v5 = vpop.f32.mrb[1].mxu1 }
 0x9bf   : > { %v6318_v61 = vpop.f32.mrb[2].mxu1 }
 0x9c0   : > { %v6385_v53 = vpack.c.bf16 %v6318_v61, %v6315_v22  ;;  %v6320_v62 = vpop.f32.mrb[3].mxu1 }
 0x9c2   : > { %15171 = vmatmul.mubr.msk.bf16.gmra.mrb[192].mxu0 %vm3899_vm1, %v6385_v53  ;;  %7452 = vmatmul.mubr.bf16.gmra.mrb[108].mxu1 %v23133_v40 }
 0x9c3   : > { %7459 = vmatprep.mubr.bf16.mxu1 %v23134_v8 }
 0x9c5   : > { %v6323_v16 = vpop.f32.mrb[4].mxu1 }
 0x9c6   : > { %v6325_v18 = vpop.f32.mrb[5].mxu1 }
 0x9c7   : > { %v6326_v20 = vpop.f32.mrb[6].mxu1 }
 0x9c8   : > { %v6386_v11 = vpack.c.bf16 %v6326_v20, %v6323_v16  ;;  %v6328_v56 = vpop.f32.mrb[7].mxu1 }
 0x9ca   : > { %15176 = vmatprep.mubr.msk.bf16.mxu0 %vm3899_vm1, %v6386_v11  ;;  %7460 = vmatmul.mubr.bf16.gmra.mrb[112].mxu1 %v23135_v54  ;;  %v19872_v54 = vld [vmem:[%s22628_s5] ss:$0 sm:$0xff] }
 0x9cb   : > { %7467 = vmatprep.mubr.bf16.mxu1 %v23136_v38  ;;  %23158 = vst [vmem:[#allocation10_spill] sm:$0xff] %v19872_v54 }
 0x9cd   : > { %v6331_v39 = vpop.f32.mrb[8].mxu1 }
 0x9ce   : > { %v6333_v24 = vpop.f32.mrb[9].mxu1 }
 0x9cf   : > { %v6334_v27 = vpop.f32.mrb[10].mxu1 }
 0x9d0   : > { %v6387_v28 = vpack.c.bf16 %v6334_v27, %v6331_v39  ;;  %v6336_v49 = vpop.f32.mrb[11].mxu1 }
 0x9d2   : > { %15177 = vmatmul.mubr.msk.bf16.vlgmr.msra.gmra.mrb[188].mxu0 %vm3899_vm1, %v6387_v28  ;;  %7468 = vmatmul.mubr.bf16.gmra.mrb[116].mxu1 %v23137_v6 }
 0x9d3   : > { %7475 = vmatprep.mubr.bf16.mxu1 %v23138_v21 }
 0x9d5   : > { %v6339_v63 = vpop.f32.mrb[12].mxu1 }
 0x9d6   : > { %v6341_v33 = vpop.f32.mrb[13].mxu1 }
 0x9d7   : > { %v6342_v47 = vpop.f32.mrb[14].mxu1 }
 0x9d8   : > { %v6388_v34 = vpack.c.bf16 %v6342_v47, %v6339_v63  ;;  %v6344_v29 = vpop.f32.mrb[15].mxu1 }
 0x9da   : > { %15180 = vmatprep.mubr.msk.bf16.mxu0 %vm3899_vm1, %v6388_v34  ;;  %7476 = vmatmul.mubr.bf16.gmra.mrb[120].mxu1 %v23139_v9 }
 0x9db   : > { %7483 = vmatprep.mubr.bf16.mxu1 %v23140_v1 }
 0x9dd   : > { %v6347_v35 = vpop.f32.mrb[16].mxu1 }
 0x9de   : > { %v6349_v45 = vpop.f32.mrb[17].mxu1 }
 0x9df   : > { %v6350_v25 = vpop.f32.mrb[18].mxu1 }
 0x9e0   : > { %v6389_v14 = vpack.c.bf16 %v6350_v25, %v6347_v35  ;;  %v6352_v37 = vpop.f32.mrb[19].mxu1 }
 0x9e2   : > { %15181 = vmatmul.mubr.msk.bf16.gmra.mrb[192].mxu0 %vm3899_vm1, %v6389_v14  ;;  %7484 = vmatmul.mubr.bf16.gmra.mrb[124].mxu1 %v23141_v41 }
 0x9e3   : > { %15192 = vmatprep.mubr.msk.bf16.mxu0 %vm16968_vm2, %v23055_v46  ;;  %7491 = vmatprep.mubr.bf16.mxu1 %v23142_v32 }
 0x9e5   : > { %v19849_v60 = vpop.f32.mrb[20].mxu1 }
 0x9e6   : > { %v7279_v57 = vpop.f32.mrb[21].mxu1 }
 0x9e7   : > { %v19851_v43 = vpop.f32.mrb[22].mxu1 }
 0x9e8   : > { %v7282_v22 = vpop.f32.mrb[23].mxu1 }
 0x9ea   : > { %7492 = vmatmul.mubr.bf16.gmra.mrb[128].mxu1 %v23143_v10 }
 0x9eb   : > { %7499 = vmatprep.mubr.bf16.mxu1 %v23144_v52 }
 0x9ed   : > { %v19855_v5 = vpop.f32.mrb[24].mxu1 }
 0x9ee   : > { %v7287_v61 = vpop.f32.mrb[25].mxu1 }
 0x9ef   : > { %v19857_v53 = vpop.f32.mrb[26].mxu1 }
 0x9f0   : > { %v7290_v62 = vpop.f32.mrb[27].mxu1 }
 0x9f2   : > { %7500 = vmatmul.mubr.bf16.gmra.mrb[132].mxu1 %v23145_v48 }
 0x9f3   : > { %7507 = vmatprep.mubr.bf16.mxu1 %v23146_v30 }
 0x9f5   : > { %v19861_v40 = vpop.f32.mrb[28].mxu1 }
 0x9fa   : > { %7508 = vmatmul.mubr.bf16.gmra.mrb[136].mxu1 %v23147_v55 }
 0x9fb   : > { %7515 = vmatprep.mubr.bf16.mxu1 %v23148_v23 }
 0xa02   : > { %7516 = vmatmul.mubr.bf16.gmra.mrb[140].mxu1 %v23149_v17 }
 0xa03   : > { %7523 = vmatprep.mubr.bf16.mxu1 %v23150_v44 }
 0xa0a   : > { %7524 = vmatmul.mubr.bf16.gmra.mrb[144].mxu1 %v23151_v51 }
 0xa0b   : > { %7531 = vmatprep.mubr.bf16.mxu1 %v23152_v0 }
 0xa12   : > { %7532 = vmatmul.mubr.bf16.gmra.mrb[148].mxu1 %v23153_v31 }
 0xa13   : > { %7539 = vmatprep.mubr.bf16.mxu1 %v23154_v58 }
 0xa1a   : > { %7540 = vmatmul.mubr.bf16.gmra.mrb[152].mxu1 %v23155_v42 }
 0xa1b   : > { %7547 = vmatprep.mubr.bf16.mxu1 %v23156_v36 }
 0xa22   : > { %7548 = vmatmul.mubr.bf16.gmra.mrb[156].mxu1 %v19669_v3 }
 0xa23   : > { %7555 = vmatprep.mubr.bf16.mxu1 %v23157_v19 }
 0xa2a   : > { %7556 = vmatmul.mubr.bf16.gmra.mrb[160].mxu1 %v19686_v2  ;;  %v7295_v2 = vpop.f32.mrb[29].mxu1 }
 0xa2b   : > { %v19863_v8 = vpop.f32.mrb[30].mxu1 }
 0xa2c   : > { %v7298_v18 = vpop.f32.mrb[31].mxu1 }
 0xa2d   : > { %v19867_v20 = vpop.f32.mrb[32].mxu1 }
 0xa2e   : > { %v7303_v11 = vpop.f32.mrb[33].mxu1 }
 0xa2f   : > { %v19876_v28 = vpop.f32.mrb[34].mxu1 }
 0xa30   : > { %v7306_v21 = vpop.f32.mrb[35].mxu1 }
 0xa31   : > { %v19882_v45 = vpop.f32.mrb[36].mxu1 }
 0xa32   : > { %v7311_v25 = vpop.f32.mrb[37].mxu1 }
 0xa33   : > { %v19884_v14 = vpop.f32.mrb[38].mxu1 }
 0xa34   : > { %v7314_v37 = vpop.f32.mrb[39].mxu1 }
 0xa35   : > { %v19890_v10 = vpop.f32.mrb[40].mxu1 }
 0xa36   : > { %v7319_v30 = vpop.f32.mrb[41].mxu1 }
 0xa37   : > { %v19894_v17 = vpop.f32.mrb[42].mxu1 }
 0xa38   : > { %v7322_v0 = vpop.f32.mrb[43].mxu1 }
 0xa39   : > { %v19900_v62 = vpop.f32.mrb[44].mxu1 }
 0xa3a   : > { %v7327_v2 = vpop.f32.mrb[45].mxu1 }
 0xa3b   : > { %v19902_v18 = vpop.f32.mrb[46].mxu1 }
 0xa3c   : > { %v7330_v11 = vpop.f32.mrb[47].mxu1 }
 0xaa5   : > { %v15178_v56 = vpop.f32.mrb[188].mxu0 }
 0xaa6   : > { %v7141_v38 = vadd.f32 %v19872_v54, %v15178_v56  ;;  %v7100_v39 = vpop.f32.mrb[189].mxu0 }
 0xaa7   : > { %v7139_v24 = vadd.f32 %v19872_v54, %v7100_v39  ;;  %v15179_v27 = vpop.f32.mrb[190].mxu0  ;;  %v19913_v39 = vld [vmem:[%s22629_s6] sm:$0x1] }
 0xaa8   : > { %v7142_v49 = vadd.f32 %v19872_v54, %v15179_v27  ;;  %v7103_v6 = vpop.f32.mrb[191].mxu0  ;;  %v7149_v47 = vmax.f32 %v7141_v38, 0.0  ;;  %v19908_v38 = vpop.f32.mrb[48].mxu1  ;;  %23159 = vst [vmem:[#allocation9_spill] sm:$0xff] %v19913_v39  ;;  %v19920_v27 = vld [vmem:[%s22630_s7] sm:$0xff]  }
 0xaa9   : > { %v7140_v63 = vadd.f32 %v19872_v54, %v7103_v6  ;;  %v7147_v29 = vmax.f32 %v7139_v24, 0.0  ;;  %v7335_v24 = vpop.f32.mrb[49].mxu1  ;;  %23160 = vst [vmem:[#allocation12_spill] sm:$0xff] %v19920_v27 }
 0xaaa   : > { %v7150_v34 = vmax.f32 %v7142_v49, 0.0  ;;  %v19925_v49 = vpop.f32.mrb[50].mxu1 }
 0xaab   : > { %v7148_v9 = vmax.f32 %v7140_v63, 0.0  ;;  %v7338_v6 = vpop.f32.mrb[51].mxu1  ;;  %v19933_v63 = vld [vmem:[%s22630_s7 + $0x8] sm:$0xff]  }
 0xaac   : > { %v7156_v1 = vpack.c.bf16 %v7150_v34, %v7149_v47  ;;  %23161 = vst [vmem:[#allocation11_spill] sm:$0xff] %v19933_v63  ;;  %v19939_v47 = vld [vmem:[%s22627_s4 + $0x8] sm:$0xff]   ;;  %v19942_v34 = vpop.f32.mrb[52].mxu1 }
 0xaad   : > { %v7155_v35 = vpack.c.bf16 %v7148_v9, %v7147_v29  ;;  %v7343_v29 = vpop.f32.mrb[53].mxu1 }
 0xaae   : > { %v19944_v9 = vpop.f32.mrb[54].mxu1 }
 0xaaf   : > { %15185 = vmatpush3.bf16.msra.mxu0 %v7155_v35 }
 0xab0   : > { %15186 = vmatprep.subr.bf16.mxu0 %v23055_v46 }
 0xab3   : > { %15187 = vmatpush3.bf16.msra.mxu0 %v7156_v1  ;;  %v7346_v1 = vpop.f32.mrb[55].mxu1 }
 0xab4   : > { %15188 = vmatprep.subr.bf16.mxu0 %v23055_v46  ;;  %v19948_v25 = vpop.f32.mrb[56].mxu1 }
 0xab5   : > { %v15182_v32 = vpop.f32.mrb[192].mxu0  ;;  %v7351_v37 = vpop.f32.mrb[57].mxu1 }
 0xab6   : > { %v7145_v52 = vadd.f32 %v19872_v54, %v15182_v32  ;;  %v7116_v48 = vpop.f32.mrb[193].mxu0  ;;  %v19950_v32 = vpop.f32.mrb[58].mxu1 }
 0xab7   : > { %v7143_v55 = vadd.f32 %v19872_v54, %v7116_v48  ;;  %v15183_v23 = vpop.f32.mrb[194].mxu0 }
 0xab8   : > { %v7146_v44 = vadd.f32 %v19872_v54, %v15183_v23  ;;  %v7119_v51 = vpop.f32.mrb[195].mxu0  ;;  %v7153_v42 = vmax.f32 %v7145_v52, 0.0  ;;  %v7354_v52 = vpop.f32.mrb[59].mxu1 }
 0xab9   : > { %v7144_v31 = vadd.f32 %v19872_v54, %v7119_v51  ;;  %v7151_v19 = vmax.f32 %v7143_v55, 0.0  ;;  %v19954_v30 = vpop.f32.mrb[60].mxu1 }
 0xaba   : > { %v7154_v36 = vmax.f32 %v7146_v44, 0.0  ;;  %v7359_v55 = vpop.f32.mrb[61].mxu1 }
 0xabb   : > { %v7152_v57 = vmax.f32 %v7144_v31, 0.0  ;;  %v19956_v23 = vpop.f32.mrb[62].mxu1 }
 0xabc   : > { %v7158_v22 = vpack.c.bf16 %v7154_v36, %v7153_v42  ;;  %v7362_v44 = vpop.f32.mrb[63].mxu1 }
 0xabd   : > { %v7157_v61 = vpack.c.bf16 %v7152_v57, %v7151_v19  ;;  %v19960_v0 = vpop.f32.mrb[64].mxu1 }
 0xabe   : > { %v7367_v31 = vpop.f32.mrb[65].mxu1 }
 0xabf   : > { %15189 = vmatpush3.bf16.msra.mxu0 %v7157_v61  ;;  %v19962_v42 = vpop.f32.mrb[66].mxu1 }
 0xac0   : > { %15190 = vmatprep.subr.bf16.mxu0 %v23055_v46  ;;  %v7370_v36 = vpop.f32.mrb[67].mxu1 }
 0xac1   : > { %v19966_v57 = vpop.f32.mrb[68].mxu1 }
 0xac3   : > { %15191 = vmatpush3.bf16.msra.mxu0 %v7158_v22  ;;  %v7375_v22 = vpop.f32.mrb[69].mxu1 }
 0xac4   : > { %15196 = vmatprep.subr.bf16.mxu0 %v23055_v46  ;;  %v19968_v61 = vpop.f32.mrb[70].mxu1 }
 0xac5   : > { %v7378_v2 = vpop.f32.mrb[71].mxu1 }
 0xac6   : > { %15193 = vmatmul.mubr.msk.bf16.vlgmr.msra.gmra.mrb[196].mxu0 %vm4723_vm3, %v19913_v39  ;;  %v19972_v24 = vpop.f32.mrb[72].mxu1 }
 0xac7   : > { %15197 = vmatpush3.bf16.msra.mxu0 %v19920_v27  ;;  %15200 = vmatprep.mubr.msk.bf16.mxu0 %vm16968_vm2, %v23055_v46  ;;  %v7383_v6 = vpop.f32.mrb[73].mxu1 }
 0xac8   : > { %15198 = vmatprep.subr.bf16.mxu0 %v23055_v46  ;;  %v19974_v29 = vpop.f32.mrb[74].mxu1 }
 0xac9   : > { %v7386_v1 = vpop.f32.mrb[75].mxu1 }
 0xaca   : > { %v19978_v52 = vpop.f32.mrb[76].mxu1 }
 0xacb   : > { %15199 = vmatpush3.bf16.msra.mxu0 %v19933_v63  ;;  %v7391_v55 = vpop.f32.mrb[77].mxu1 }
 0xacc   : > { %15204 = vmatprep.subr.bf16.mxu0 %v19939_v47  ;;  %v19980_v44 = vpop.f32.mrb[78].mxu1 }
 0xacd   : > { %v7394_v31 = vpop.f32.mrb[79].mxu1 }
 0xace   : > { %v19984_v22 = vpop.f32.mrb[80].mxu1 }
 0xacf   : > { %v7399_v2 = vpop.f32.mrb[81].mxu1 }
 0xad0   : > { %v19986_v11 = vpop.f32.mrb[82].mxu1 }
 0xad1   : > { %v7402_v6 = vpop.f32.mrb[83].mxu1 }
 0xad2   : > { %v19990_v19 = vpop.f32.mrb[84].mxu1 }
 0xad3   : > { %v7407_v37 = vpop.f32.mrb[85].mxu1 }
 0xad4   : > { %v19992_v51 = vpop.f32.mrb[86].mxu1 }
 0xad5   : > { %v7410_v55 = vpop.f32.mrb[87].mxu1 }
 0xad6   : > { %v19996_v48 = vpop.f32.mrb[88].mxu1 }
 0xad7   : > { %v7415_v36 = vpop.f32.mrb[89].mxu1 }
 0xad8   : > { %v19998_v35 = vpop.f32.mrb[90].mxu1 }
 0xad9   : > { %v7418_v2 = vpop.f32.mrb[91].mxu1 }
 0xada   : > { %v20002_v33 = vpop.f32.mrb[92].mxu1 }
 0xadb   : > { %v7423_v1 = vpop.f32.mrb[93].mxu1 }
 0xadc   : > { %v20004_v16 = vpop.f32.mrb[94].mxu1 }
 0xadd   : > { %v7426_v37 = vpop.f32.mrb[95].mxu1 }
 0xade   : > { %v20008_v3 = vpop.f32.mrb[96].mxu1 }
 0xadf   : > { %v7431_v31 = vpop.f32.mrb[97].mxu1 }
 0xae0   : > { %v20010_v13 = vpop.f32.mrb[98].mxu1 }
 0xae1   : > { %v7434_v36 = vpop.f32.mrb[99].mxu1 }
 0xae2   : > { %v20014_v21 = vpop.f32.mrb[100].mxu1 }
 0xae3   : > { %v7439_v6 = vpop.f32.mrb[101].mxu1 }
 0xae4   : > { %v20016_v56 = vpop.f32.mrb[102].mxu1 }
 0xae5   : > { %v7442_v1 = vpop.f32.mrb[103].mxu1 }
 0xae6   : > { %v20020_v58 = vpop.f32.mrb[104].mxu1 }
 0xae7   : > { %v7447_v55 = vpop.f32.mrb[105].mxu1 }
 0xae8   : > { %v20022_v41 = vpop.f32.mrb[106].mxu1 }
 0xae9   : > { %v7450_v31 = vpop.f32.mrb[107].mxu1 }
 0xaea   : > { %v20026_v63 = vpop.f32.mrb[108].mxu1 }
 0xaeb   : > { %23162 = vst [vmem:[#allocation14_spill] sm:$0xff] %v20026_v63  ;;  %v7455_v2 = vpop.f32.mrb[109].mxu1 }
 0xaec   : > { %v20028_v27 = vpop.f32.mrb[110].mxu1 }
 0xaed   : > { %23163 = vst [vmem:[#allocation13_spill] sm:$0xff] %v20028_v27  ;;  %v7458_v6 = vpop.f32.mrb[111].mxu1 }
 0xaee   : > { %v20032_v39 = vpop.f32.mrb[112].mxu1 }
 0xaef   : > { %23164 = vst [vmem:[#allocation16_spill] sm:$0xff] %v20032_v39  ;;  %v7463_v37 = vpop.f32.mrb[113].mxu1 }
 0xaf0   : > { %v20034_v54 = vpop.f32.mrb[114].mxu1 }
 0xaf1   : > { %23165 = vst [vmem:[#allocation15_spill] sm:$0xff] %v20034_v54  ;;  %v7466_v55 = vpop.f32.mrb[115].mxu1 }
 0xaf2   : > { %v20038_v46 = vpop.f32.mrb[116].mxu1 }
 0xaf3   : > { %23166 = vst [vmem:[#allocation18_spill] sm:$0xff] %v20038_v46  ;;  %v7471_v36 = vpop.f32.mrb[117].mxu1 }
 0xaf4   : > { %v20040_v7 = vpop.f32.mrb[118].mxu1 }
 0xaf5   : > { %23167 = vst [vmem:[#allocation17_spill] sm:$0xff] %v20040_v7  ;;  %v7474_v2 = vpop.f32.mrb[119].mxu1 }
 0xaf6   : > { %v20044_v12 = vpop.f32.mrb[120].mxu1 }
 0xaf7   : > { %23168 = vst [vmem:[#allocation20_spill] sm:$0xff] %v20044_v12  ;;  %v7479_v1 = vpop.f32.mrb[121].mxu1 }
 0xaf8   : > { %v20046_v63 = vpop.f32.mrb[122].mxu1 }
 0xaf9   : > { %23169 = vst [vmem:[#allocation19_spill] sm:$0xff] %v20046_v63  ;;  %v7482_v37 = vpop.f32.mrb[123].mxu1 }
 0xafa   : > { %v20050_v27 = vpop.f32.mrb[124].mxu1 }
 0xafb   : > { %23170 = vst [vmem:[#allocation22_spill] sm:$0xff] %v20050_v27  ;;  %v7487_v31 = vpop.f32.mrb[125].mxu1 }
 0xafc   : > { %v20052_v39 = vpop.f32.mrb[126].mxu1 }
 0xafd   : > { %23171 = vst [vmem:[#allocation21_spill] sm:$0xff] %v20052_v39  ;;  %v7490_v36 = vpop.f32.mrb[127].mxu1 }
 0xafe   : > { %v20056_v54 = vpop.f32.mrb[128].mxu1 }
 0xaff   : > { %23172 = vst [vmem:[#allocation24_spill] sm:$0xff] %v20056_v54  ;;  %v7495_v6 = vpop.f32.mrb[129].mxu1 }
 0xb00   : > { %v20058_v46 = vpop.f32.mrb[130].mxu1 }
 0xb01   : > { %23173 = vst [vmem:[#allocation23_spill] sm:$0xff] %v20058_v46  ;;  %v7498_v1 = vpop.f32.mrb[131].mxu1 }
 0xb02   : > { %v20062_v7 = vpop.f32.mrb[132].mxu1 }
 0xb03   : > { %23174 = vst [vmem:[#allocation26_spill] sm:$0xff] %v20062_v7  ;;  %v7503_v55 = vpop.f32.mrb[133].mxu1 }
 0xb04   : > { %v20064_v12 = vpop.f32.mrb[134].mxu1 }
 0xb05   : > { %23175 = vst [vmem:[#allocation25_spill] sm:$0xff] %v20064_v12  ;;  %v7506_v31 = vpop.f32.mrb[135].mxu1 }
 0xb06   : > { %v20068_v63 = vpop.f32.mrb[136].mxu1 }
 0xb07   : > { %23176 = vst [vmem:[#allocation28_spill] sm:$0xff] %v20068_v63  ;;  %v7511_v2 = vpop.f32.mrb[137].mxu1 }
 0xb08   : > { %v20070_v27 = vpop.f32.mrb[138].mxu1 }
 0xb09   : > { %23177 = vst [vmem:[#allocation27_spill] sm:$0xff] %v20070_v27  ;;  %v7514_v6 = vpop.f32.mrb[139].mxu1 }
 0xb0a   : > { %v20074_v39 = vpop.f32.mrb[140].mxu1 }
 0xb0b   : > { %23178 = vst [vmem:[#allocation30_spill] sm:$0xff] %v20074_v39  ;;  %v7519_v37 = vpop.f32.mrb[141].mxu1 }
 0xb0c   : > { %v20076_v54 = vpop.f32.mrb[142].mxu1 }
 0xb0d   : > { %23179 = vst [vmem:[#allocation29_spill] sm:$0xff] %v20076_v54  ;;  %v7522_v55 = vpop.f32.mrb[143].mxu1 }
 0xb0e   : > { %v20080_v46 = vpop.f32.mrb[144].mxu1 }
 0xb0f   : > { %23180 = vst [vmem:[#allocation32_spill] sm:$0xff] %v20080_v46  ;;  %v7527_v36 = vpop.f32.mrb[145].mxu1 }
 0xb10   : > { %v20082_v7 = vpop.f32.mrb[146].mxu1 }
 0xb11   : > { %23181 = vst [vmem:[#allocation31_spill] sm:$0xff] %v20082_v7  ;;  %v7530_v2 = vpop.f32.mrb[147].mxu1 }
 0xb12   : > { %v20086_v12 = vpop.f32.mrb[148].mxu1  ;;  %v20109_v2 = vld [vmem:[%s22627_s4] sm:$0xff]  }
 0xb13   : > { %v7535_v1 = vpop.f32.mrb[149].mxu1 }
 0xb14   : > { %v20088_v63 = vpop.f32.mrb[150].mxu1 }
 0xb15   : > { %v7538_v37 = vpop.f32.mrb[151].mxu1  ;;  %v7596_v55 = vpack.c.bf16 %v20088_v63, %v20086_v12 }
 0xb16   : > { %v20092_v27 = vpop.f32.mrb[152].mxu1 }
 0xb17   : > { %v7543_v31 = vpop.f32.mrb[153].mxu1 }
 0xb18   : > { %v20094_v39 = vpop.f32.mrb[154].mxu1  ;;  %v23182_v31 = vpack.c.bf16 %v19884_v14, %v19882_v45  ;;  %v23184_v14 = vpack.c.bf16 %v19902_v18, %v19900_v62  ;;  %v20142_v62 = vld [vmem:[%s22627_s4 + $0x10] sm:$0xff]   ;;  %v23198_v18 = vpack.c.bf16 %v19992_v51, %v19990_v19  ;;  %v23220_v51 = vld [vmem:[#allocation7_spill] sm:$0xff] }
 0xb19   : > { %v7546_v36 = vpop.f32.mrb[155].mxu1 }
 0xb1a   : > { %v20099_v1 = vpop.f32.mrb[156].mxu1 }
 0xb1b   : > { %v7551_v36 = vpop.f32.mrb[157].mxu1 }
 0xb99   : > { %v7193_v54 = vpop.f32.mrb[196].mxu0 }
 0xb9a   : > { %v7199_v6 = vpack.c.bf16 %v7193_v54, %v7193_v54  ;;  %v15194_v46 = vpop.f32.mrb[197].mxu0 }
 0xb9b   : > { %v7196_v7 = vpop.f32.mrb[198].mxu0  ;;  %v7552_v46 = vpop.f32.mrb[158].mxu1 }
 0xb9c   : > { %15201 = vmatmul.mubr.msk.bf16.vlgmr.msra.gmra.mrb[200].mxu0 %vm1253_vm0, %v7199_v6  ;;  %v15195_v37 = vpop.f32.mrb[199].mxu0  ;;  %v7554_v7 = vpop.f32.mrb[159].mxu1  ;;  %v7598_v54 = vpack.c.bf16 %v7552_v46, %v20099_v1  ;;  %v23183_v6 = vpack.c.bf16 %v19894_v17, %v19890_v10  ;;  %v23185_v1 = vpack.c.bf16 %v19925_v49, %v19908_v38  ;;  %v23186_v10 = vpack.c.bf16 %v19851_v43, %v19849_v60 }
 0xb9d   : > { %15205 = vmatpush3.bf16.msra.mxu0 %v19939_v47  ;;  %15206 = vmatprep.mubr.msk.bf16.mxu0 %vm3899_vm1, %v23182_v31  ;;  %v7557_v45 = vpop.f32.mrb[160].mxu1  ;;  %v23187_v17 = vpack.c.bf16 %v19857_v53, %v19855_v5  ;;  %v23189_v60 = vpack.c.bf16 %v19876_v28, %v19867_v20  ;;  %v23190_v43 = vpack.c.bf16 %v19944_v9, %v19942_v34 }
 0xb9e   : > { %15214 = vmatprep.subr.bf16.mxu0 %v20109_v2  ;;  %v7559_v37 = vpop.f32.mrb[161].mxu1  ;;  %v23191_v5 = vpack.c.bf16 %v19950_v32, %v19948_v25  ;;  %v23192_v53 = vpack.c.bf16 %v19956_v23, %v19954_v30  ;;  %v23195_v20 = vpack.c.bf16 %v19974_v29, %v19972_v24  ;;  %v23197_v28 = vpack.c.bf16 %v19986_v11, %v19984_v22  ;;  %v23217_v30 = vld [vmem:[#allocation21_spill] sm:$0xff]  ;;  %v23218_v23 = vld [vmem:[#allocation22_spill] sm:$0xff]  ;;  %v23227_v24 = vld [vmem:[#allocation27_spill] sm:$0xff] }
 0xb9f   : > { %v7560_v31 = vpop.f32.mrb[162].mxu1  ;;  %v23199_v38 = vpack.c.bf16 %v19998_v35, %v19996_v48  ;;  %v23201_v49 = vpack.c.bf16 %v20010_v13, %v20008_v3  ;;  %v23202_v34 = vpack.c.bf16 %v20016_v56, %v20014_v21  ;;  %v23203_v9 = vpack.c.bf16 %v20022_v41, %v20020_v58  ;;  %v23207_v13 = vld [vmem:[#allocation8_spill] sm:$0xff]  ;;  %v23208_v3 = vld [vmem:[#allocation15_spill] sm:$0xff]  ;;  %v23211_v56 = vld [vmem:[#allocation17_spill] sm:$0xff] }
 0xba0   : > { %v7599_v36 = vpack.c.bf16 %v7560_v31, %v7557_v45  ;;  %v7562_v7 = vpop.f32.mrb[163].mxu1  ;;  %v23209_v35 = vld [vmem:[#allocation16_spill] sm:$0xff]  ;;  %v23212_v21 = vld [vmem:[#allocation18_spill] sm:$0xff]  ;;  %v23214_v41 = vld [vmem:[#allocation19_spill] sm:$0xff]  ;;  %v23237_v31 = vpack.c.bf16 %v20094_v39, %v20092_v27 }
 0xba1   : > { %v23210_v25 = vpack.c.bf16 %v23208_v3, %v23209_v35  ;;  %v23213_v32 = vpack.c.bf16 %v23211_v56, %v23212_v21  ;;  %v23215_v58 = vld [vmem:[#allocation20_spill] sm:$0xff]  ;;  %v23231_v22 = vld [vmem:[#allocation30_spill] sm:$0xff]  ;;  %v23234_v45 = vld [vmem:[#allocation31_spill] sm:$0xff] }
 0xba2   : > { %v23216_v48 = vpack.c.bf16 %v23214_v41, %v23215_v58  ;;  %v23228_v29 = vld [vmem:[#allocation28_spill] sm:$0xff]  ;;  %v23240_v58 = vld [vmem:[#allocation9_spill] sm:$0xff] }
 0xba4   : > { %15207 = vmatmul.mubr.msk.bf16.vlgmr.msra.gmra.mrb[204].mxu0 %vm3899_vm1, %v23183_v6  ;;  %v23233_v6 = vmov 0.0  }
 0xba5   : > { %15210 = vmatprep.mubr.msk.bf16.mxu0 %vm3899_vm1, %v23184_v14  ;;  %15215 = vmatpush3.bf16.msra.mxu0 %v20109_v2  ;;  %v23235_v14 = vld [vmem:[#allocation32_spill] sm:$0xff] }
 0xba6   : > { %15224 = vmatprep.subr.bf16.mxu0 %v19650_v26  ;;  %v23188_v26 = vpack.c.bf16 %v19863_v8, %v19861_v40  ;;  %v23193_v40 = vpack.c.bf16 %v19962_v42, %v19960_v0  ;;  %v23194_v8 = vpack.c.bf16 %v19968_v61, %v19966_v57  ;;  %v23221_v0 = vld [vmem:[#allocation23_spill] sm:$0xff]  ;;  %v23222_v42 = vld [vmem:[#allocation24_spill] sm:$0xff]  ;;  %v23224_v57 = vld [vmem:[#allocation25_spill] sm:$0xff]  ;;  %v23236_v37 = vpack.c.bf16 %v23234_v45, %v23235_v14 }
 0xba7   : > { %v23223_v19 = vpack.c.bf16 %v23221_v0, %v23222_v42  ;;  %v23225_v61 = vld [vmem:[#allocation26_spill] sm:$0xff]  ;;  %v23253_v14 = vld [vmem:[#allocation45_spill] sm:$0xff] }
 0xba8   : > { %v23226_v11 = vpack.c.bf16 %v23224_v57, %v23225_v61  ;;  %v23244_v57 = vld [vmem:[#allocation38_spill] sm:$0xff]  ;;  %v20304_v61 = vld [vmem:[%s22626_s3 + $0x4] ss:$8 sps:$4 sm:$0xff]  }
 0xba9   : > { %v23252_v45 = vld [vmem:[#allocation46_spill] sm:$0xff] }
 0xbac   : > { %15211 = vmatmul.mubr.msk.bf16.gmra.mrb[208].mxu0 %vm3899_vm1, %v23185_v1  ;;  %v20273_v1 = vld [vmem:[%s22631_s8] sm:$0x1] }
 0xbad   : > { %15216 = vmatprep.mubr.msk.bf16.mxu0 %vm3899_vm1, %v23186_v10  ;;  %v23238_v10 = vld [vmem:[#allocation108_spill] sm:$0xff] }
 0xbb4   : > { %15217 = vmatmul.mubr.msk.bf16.vlgmr.msra.gmra.mrb[204].mxu0 %vm3899_vm1, %v23187_v17  ;;  %v23239_v17 = vld [vmem:[#allocation10_spill] sm:$0xff] }
 0xbb5   : > { %15220 = vmatprep.mubr.msk.bf16.mxu0 %vm3899_vm1, %v23188_v26  ;;  %15225 = vmatpush3.bf16.msra.mxu0 %v20142_v62 }
 0xbb6   : > { %15234 = vmatprep.subr.bf16.mxu0 %v19701_v59 }
 0xbbc   : > { %15221 = vmatmul.mubr.msk.bf16.gmra.mrb[208].mxu0 %vm3899_vm1, %v23189_v60 }
 0xbbd   : > { %15226 = vmatprep.mubr.msk.bf16.mxu0 %vm3899_vm1, %v23190_v43 }
 0xbc4   : > { %15227 = vmatmul.mubr.msk.bf16.vlgmr.msra.gmra.mrb[204].mxu0 %vm3899_vm1, %v23191_v5 }
 0xbc5   : > { %15230 = vmatprep.mubr.msk.bf16.mxu0 %vm3899_vm1, %v23192_v53  ;;  %15235 = vmatpush3.bf16.msra.mxu0 %v19701_v59  ;;  %v23196_v59 = vpack.c.bf16 %v19980_v44, %v19978_v52  ;;  %v23229_v52 = vpack.c.bf16 %v23227_v24, %v23228_v29  ;;  %v23230_v44 = vld [vmem:[#allocation29_spill] sm:$0xff]  ;;  %v23246_v24 = vld [vmem:[#allocation40_spill] sm:$0xff]  ;;  %v23247_v29 = vld [vmem:[#allocation39_spill] sm:$0xff] }
 0xbc6   : > { %15244 = vmatprep.subr.bf16.mxu0 %v19721_v4  ;;  %v23232_v46 = vpack.c.bf16 %v23230_v44, %v23231_v22  ;;  %v23249_v44 = vld [vmem:[#allocation41_spill] sm:$0xff]  ;;  %v23250_v22 = vld [vmem:[#allocation44_spill] sm:$0xff] }
 0xbcc   : > { %15231 = vmatmul.mubr.msk.bf16.gmra.mrb[208].mxu0 %vm3899_vm1, %v23193_v40 }
 0xbcd   : > { %15236 = vmatprep.mubr.msk.bf16.mxu0 %vm3899_vm1, %v23194_v8 }
 0xbd4   : > { %15237 = vmatmul.mubr.msk.bf16.vlgmr.msra.gmra.mrb[204].mxu0 %vm3899_vm1, %v23195_v20 }
 0xbd5   : > { %15240 = vmatprep.mubr.msk.bf16.mxu0 %vm3899_vm1, %v23196_v59  ;;  %15245 = vmatpush3.bf16.msra.mxu0 %v19721_v4  ;;  %v23200_v4 = vpack.c.bf16 %v20004_v16, %v20002_v33  ;;  %v23204_v16 = vld [vmem:[#allocation13_spill] sm:$0xff]  ;;  %v23205_v33 = vld [vmem:[#allocation14_spill] sm:$0xff] }
 0xbd6   : > { %15254 = vmatprep.subr.bf16.mxu0 %v19738_v50 }
 0xbdc   : > { %15241 = vmatmul.mubr.msk.bf16.gmra.mrb[208].mxu0 %vm3899_vm1, %v23197_v28 }
 0xbdd   : > { %15246 = vmatprep.mubr.msk.bf16.mxu0 %vm3899_vm1, %v23198_v18 }
 0xbe4   : > { %15247 = vmatmul.mubr.msk.bf16.vlgmr.msra.gmra.mrb[204].mxu0 %vm3899_vm1, %v23199_v38 }
 0xbe5   : > { %15250 = vmatprep.mubr.msk.bf16.mxu0 %vm3899_vm1, %v23200_v4  ;;  %15255 = vmatpush3.bf16.msra.mxu0 %v19738_v50  ;;  %v23206_v50 = vpack.c.bf16 %v23204_v16, %v23205_v33 }
 0xbe6   : > { %15264 = vmatprep.subr.bf16.mxu0 %v19757_v15 }
 0xbec   : > { %15251 = vmatmul.mubr.msk.bf16.gmra.mrb[208].mxu0 %vm3899_vm1, %v23201_v49 }
 0xbed   : > { %15256 = vmatprep.mubr.msk.bf16.mxu0 %vm3899_vm1, %v23202_v34 }
 0xbf4   : > { %15257 = vmatmul.mubr.msk.bf16.vlgmr.msra.gmra.mrb[204].mxu0 %vm3899_vm1, %v23203_v9 }
 0xbf5   : > { %15260 = vmatprep.mubr.msk.bf16.mxu0 %vm3899_vm1, %v23206_v50  ;;  %15265 = vmatpush3.bf16.msra.mxu0 %v19757_v15  ;;  %v23219_v15 = vpack.c.bf16 %v23217_v30, %v23218_v23  ;;  %v23242_v30 = vld [vmem:[#allocation11_spill] sm:$0xff]  ;;  %v23243_v23 = vmov 0  }
 0xbf6   : > { %15274 = vmatprep.subr.bf16.mxu0 %v23207_v13 }
 0xbfc   : > { %15261 = vmatmul.mubr.msk.bf16.gmra.mrb[208].mxu0 %vm3899_vm1, %v23210_v25 }
 0xbfd   : > { %15266 = vmatprep.mubr.msk.bf16.mxu0 %vm3899_vm1, %v23213_v32 }
 0xc04   : > { %15267 = vmatmul.mubr.msk.bf16.vlgmr.msra.gmra.mrb[204].mxu0 %vm3899_vm1, %v23216_v48  ;;  %v23241_v48 = vld [vmem:[#allocation12_spill] sm:$0xff] }
 0xc05   : > { %15270 = vmatprep.mubr.msk.bf16.mxu0 %vm3899_vm1, %v23219_v15  ;;  %15275 = vmatpush3.bf16.msra.mxu0 %v23207_v13 }
 0xc06   : > { %15284 = vmatprep.subr.bf16.mxu0 %v23220_v51 }
 0xc0c   : > { %15271 = vmatmul.mubr.msk.bf16.gmra.mrb[208].mxu0 %vm3899_vm1, %v23223_v19 }
 0xc0d   : > { %15276 = vmatprep.mubr.msk.bf16.mxu0 %vm3899_vm1, %v23226_v11  ;;  %v23245_v11 = vld [vmem:[#allocation37_spill] sm:$0xff] }
 0xc14   : > { %15277 = vmatmul.mubr.msk.bf16.vlgmr.msra.gmra.mrb[204].mxu0 %vm3899_vm1, %v23229_v52  ;;  %v23248_v52 = vld [vmem:[#allocation42_spill] sm:$0xff] }
 0xc15   : > { %15280 = vmatprep.mubr.msk.bf16.mxu0 %vm3899_vm1, %v23232_v46  ;;  %15285 = vmatpush3.bf16.msra.mxu0 %v23220_v51  ;;  %v23251_v46 = vld [vmem:[#allocation43_spill] sm:$0xff] }
 0xc16   : > { %15294 = vmatprep.subr.bf16.mxu0 %v23233_v6 }
 0xc1c   : > { %15281 = vmatmul.mubr.msk.bf16.gmra.mrb[208].mxu0 %vm3899_vm1, %v23236_v37  ;;  %v23254_v37 = vld [vmem:[#allocation48_spill] sm:$0xff] }
 0xc1d   : > { %15286 = vmatprep.mubr.msk.bf16.mxu0 %vm3899_vm1, %v7596_v55 }
 0xc24   : > { %15287 = vmatmul.mubr.msk.bf16.vlgmr.msra.gmra.mrb[204].mxu0 %vm3899_vm1, %v23237_v31  ;;  %v23255_v31 = vld [vmem:[#allocation47_spill] sm:$0xff] }
 0xc25   : > { %15290 = vmatprep.mubr.msk.bf16.mxu0 %vm3899_vm1, %v7598_v54 }
 0xc2c   : > { %15291 = vmatmul.mubr.msk.bf16.gmra.mrb[208].mxu0 %vm3899_vm1, %v7599_v36 }
 0xc2d   : > { %15302 = vmatprep.mubr.msk.bf16.mxu0 %vm16968_vm2, %v23233_v6 }
 0xc6f   : > { %v7237_v7 = vpop.f32.mrb[200].mxu0 }
 0xc70   : > { %v7238_v12 = vadd.f32 %v20273_v1, %v7237_v7  ;;  %v15202_v63 = vpop.f32.mrb[201].mxu0  ;;  %v23256_v7 = vld [vmem:[#allocation50_spill] sm:$0xff] }
 0xc71   : > { %v7240_v39 = vpop.f32.mrb[202].mxu0  ;;  %v23258_v63 = vld [vmem:[#allocation52_spill] sm:$0xff] }
 0xc72   : > { %v13297_v27 = vrot.slane %v7238_v12, 6  ;;  %v15203_v55 = vpop.f32.mrb[203].mxu0  ;;  %v23257_v12 = vld [vmem:[#allocation49_spill] sm:$0xff]  ;;  %v23259_v39 = vld [vmem:[#allocation51_spill] sm:$0xff] }
 0xc73   : > { %v23260_v55 = vld [vmem:[#allocation54_spill] sm:$0xff] }
 0xc74   : > { %v20277_v54 = vsel %vm13316_vm5, %v23238_v10, %v13297_v27  ;;  %v20341_v27 = vld [vmem:[%s22626_s3] ss:$8 sps:$4 sm:$0xff]   ;;  %v20348_v10 = vld [vmem:[%s22626_s3 + $0x14] ss:$8 sps:$4 sm:$0xff]  }
 0xcf7   : > { %v15288_v36 = vpop.f32.mrb[204].mxu0 }
 0xcf8   : > { %v8351_v26 = vadd.f32 %v23239_v17, %v15288_v36  ;;  %v8310_v60 = vpop.f32.mrb[205].mxu0  ;;  %v23261_v36 = vld [vmem:[#allocation53_spill] sm:$0xff] }
 0xcf9   : > { %v8349_v43 = vadd.f32 %v23239_v17, %v8310_v60  ;;  %v15289_v5 = vpop.f32.mrb[206].mxu0  ;;  %v20364_v60 = vld [vmem:[%s22626_s3 + $0x24] ss:$8 sps:$4 sm:$0xff]  }
 0xcfa   : > { %v8352_v53 = vadd.f32 %v23239_v17, %v15289_v5  ;;  %v8313_v40 = vpop.f32.mrb[207].mxu0  ;;  %v8359_v20 = vmax.f32 %v8351_v26, 0.0  ;;  %v23262_v26 = vld [vmem:[#allocation56_spill] sm:$0xff] }
 0xcfb   : > { %v8350_v8 = vadd.f32 %v23239_v17, %v8313_v40  ;;  %v8357_v28 = vmax.f32 %v8349_v43, 0.0  ;;  %v23263_v43 = vld [vmem:[#allocation55_spill] sm:$0xff]  ;;  %v20380_v40 = vld [vmem:[%s22626_s3 + $0x34] ss:$8 sps:$4 sm:$0xff]  }
 0xcfc   : > { %v8360_v59 = vmax.f32 %v8352_v53, 0.0  ;;  %v20373_v5 = vld [vmem:[%s22626_s3 + $0x20] ss:$8 sps:$4 sm:$0xff]   ;;  %v23264_v53 = vld [vmem:[#allocation58_spill] sm:$0xff] }
 0xcfd   : > { %v8358_v18 = vmax.f32 %v8350_v8, 0.0  ;;  %v23265_v8 = vld [vmem:[#allocation57_spill] sm:$0xff] }
 0xcfe   : > { %v8366_v38 = vpack.c.bf16 %v8360_v59, %v8359_v20  ;;  %v20389_v20 = vld [vmem:[%s22626_s3 + $0x30] ss:$8 sps:$4 sm:$0xff]   ;;  %v23266_v59 = vld [vmem:[#allocation60_spill] sm:$0xff] }
 0xcff   : > { %v8365_v4 = vpack.c.bf16 %v8358_v18, %v8357_v28  ;;  %v15292_v49 = vpop.f32.mrb[208].mxu0  ;;  %v20396_v28 = vld [vmem:[%s22626_s3 + $0x44] ss:$8 sps:$4 sm:$0xff]  }
 0xd00   : > { %v8355_v34 = vadd.f32 %v23239_v17, %v15292_v49  ;;  %v8326_v9 = vpop.f32.mrb[209].mxu0  ;;  %v23267_v18 = vld [vmem:[#allocation59_spill] sm:$0xff]  ;;  %v20412_v49 = vld [vmem:[%s22626_s3 + $0x54] ss:$8 sps:$4 sm:$0xff]  }
 0xd01   : > { %v8353_v16 = vadd.f32 %v23239_v17, %v8326_v9  ;;  %v15293_v33 = vpop.f32.mrb[210].mxu0  ;;  %15295 = vmatpush3.bf16.msra.mxu0 %v8365_v4  ;;  %v23268_v4 = vld [vmem:[#allocation62_spill] sm:$0xff] }
 0xd02   : > { %v8356_v50 = vadd.f32 %v23239_v17, %v15293_v33  ;;  %v8329_v13 = vpop.f32.mrb[211].mxu0  ;;  %15296 = vmatprep.subr.bf16.mxu0 %v23233_v6  ;;  %v8363_v35 = vmax.f32 %v8355_v34, 0.0  ;;  %v23269_v34 = vld [vmem:[#allocation61_spill] sm:$0xff]  ;;  %v20428_v33 = vld [vmem:[%s22626_s3 + $0x64] ss:$8 sps:$4 sm:$0xff]  }
 0xd03   : > { %v8354_v3 = vadd.f32 %v23239_v17, %v8329_v13  ;;  %v8361_v56 = vmax.f32 %v8353_v16, 0.0  ;;  %v20357_v17 = vld [vmem:[%s22626_s3 + $0x10] ss:$8 sps:$4 sm:$0xff]   ;;  %v23270_v16 = vld [vmem:[#allocation64_spill] sm:$0xff] }
 0xd04   : > { %v8364_v25 = vmax.f32 %v8356_v50, 0.0  ;;  %v20421_v9 = vld [vmem:[%s22626_s3 + $0x50] ss:$8 sps:$4 sm:$0xff]   ;;  %v23271_v50 = vld [vmem:[#allocation63_spill] sm:$0xff] }
 0xd05   : > { %v8362_v21 = vmax.f32 %v8354_v3, 0.0  ;;  %15297 = vmatpush3.bf16.msra.mxu0 %v8366_v38  ;;  %v20405_v38 = vld [vmem:[%s22626_s3 + $0x40] ss:$8 sps:$4 sm:$0xff]   ;;  %v23272_v3 = vld [vmem:[#allocation66_spill] sm:$0xff] }
 0xd06   : > { %v8368_v32 = vpack.c.bf16 %v8364_v25, %v8363_v35  ;;  %15298 = vmatprep.subr.bf16.mxu0 %v23233_v6  ;;  %v20437_v13 = vld [vmem:[%s22626_s3 + $0x60] ss:$8 sps:$4 sm:$0xff]   ;;  %v20444_v35 = vld [vmem:[%s22626_s3 + $0x74] ss:$8 sps:$4 sm:$0xff]  }
 0xd07   : > { %v8367_v41 = vpack.c.bf16 %v8362_v21, %v8361_v56  ;;  %v23273_v25 = vld [vmem:[#allocation65_spill] sm:$0xff]  ;;  %v23274_v21 = vld [vmem:[#allocation68_spill] sm:$0xff] }
 0xd08   : > { %v20453_v56 = vld [vmem:[%s22626_s3 + $0x70] ss:$8 sps:$4 sm:$0xff]  }
 0xd09   : > { %15299 = vmatpush3.bf16.msra.mxu0 %v8367_v41  ;;  %v23275_v41 = vld [vmem:[#allocation67_spill] sm:$0xff] }
 0xd0a   : > { %15300 = vmatprep.subr.bf16.mxu0 %v23233_v6 }
 0xd0d   : > { %15301 = vmatpush3.bf16.msra.mxu0 %v8368_v32  ;;  %v20460_v32 = vld [vmem:[%s22626_s3 + $0x84] ss:$8 sps:$4 sm:$0xff]  }
 0xd0e   : > { %15306 = vmatprep.subr.bf16.mxu0 %v23233_v6 }
 0xd10   : > { %15303 = vmatmul.mubr.msk.bf16.vlgmr.msra.gmra.mrb[212].mxu0 %vm4723_vm3, %v23240_v58  ;;  %v20469_v58 = vld [vmem:[%s22626_s3 + $0x80] ss:$8 sps:$4 sm:$0xff]  }
 0xd11   : > { %15307 = vmatpush3.bf16.msra.mxu0 %v23241_v48  ;;  %15310 = vmatprep.mubr.msk.bf16.mxu0 %vm16968_vm2, %v23233_v6  ;;  %v20475_v48 = vld [vmem:[%s22626_s3 + $0x94] ss:$8 sps:$4 sm:$0xff]  }
 0xd12   : > { %15308 = vmatprep.subr.bf16.mxu0 %v23233_v6 }
 0xd15   : > { %15309 = vmatpush3.bf16.msra.mxu0 %v23242_v30  ;;  %v20481_v30 = vld [vmem:[%s22626_s3 + $0x90] ss:$8 sps:$4 sm:$0xff]  }
 0xd16   : > { %8453 = vmatprep.subr.bf16.mxu0 %v23243_v23 }
 0xde3   : > { %v8403_v15 = vpop.f32.mrb[212].mxu0 }
 0xde4   : > { %v8409_v51 = vpack.c.bf16 %v8403_v15, %v8403_v15  ;;  %v15304_v0 = vpop.f32.mrb[213].mxu0  ;;  %v20487_v15 = vld [vmem:[%s22626_s3 + $0xa4] ss:$8 sps:$4 sm:$0xff]  }
 0xde5   : > { %v8406_v42 = vpop.f32.mrb[214].mxu0  ;;  %v20499_v0 = vld [vmem:[%s22626_s3 + $0xb4] ss:$8 sps:$4 sm:$0xff]  }
 0xde6   : > { %15311 = vmatmul.mubr.msk.bf16.vlgmr.msra.gmra.mrb[216].mxu0 %vm1253_vm0, %v8409_v51  ;;  %v15305_v19 = vpop.f32.mrb[215].mxu0  ;;  %v20493_v51 = vld [vmem:[%s22626_s3 + $0xa0] ss:$8 sps:$4 sm:$0xff]   ;;  %v20505_v42 = vld [vmem:[%s22626_s3 + $0xb0] ss:$8 sps:$4 sm:$0xff]  }
 0xde7   : > { %8454 = vmatpush1.bf16.msra.mxu0 %v23244_v57  ;;  %8485 = vmatprep.mubr.bf16.mxu0 %v20304_v61  ;;  %v20511_v19 = vld [vmem:[%s22626_s3 + $0xc4] ss:$8 sps:$4 sm:$0xff]   ;;  %v20517_v57 = vld [vmem:[%s22626_s3 + $0xc0] ss:$8 sps:$4 sm:$0xff]  }
 0xde8   : > { %8455 = vmatprep.subr.bf16.mxu0 %v23243_v23 }
 0xdeb   : > { %8456 = vmatpush1.bf16.msra.mxu0 %v23245_v11  ;;  %v20523_v11 = vld [vmem:[%s22626_s3 + $0xd4] ss:$8 sps:$4 sm:$0xff]  }
 0xdec   : > { %8457 = vmatprep.subr.bf16.mxu0 %v23243_v23 }
 0xdef   : > { %8458 = vmatpush1.bf16.msra.mxu0 %v23246_v24  ;;  %v20529_v24 = vld [vmem:[%s22626_s3 + $0xd0] ss:$8 sps:$4 sm:$0xff]  }
 0xdf0   : > { %8459 = vmatprep.subr.bf16.mxu0 %v23243_v23 }
 0xdf3   : > { %8460 = vmatpush1.bf16.msra.mxu0 %v23247_v29  ;;  %v20535_v29 = vld [vmem:[%s22626_s3 + $0xe4] ss:$8 sps:$4 sm:$0xff]  }
 0xdf4   : > { %8461 = vmatprep.subr.bf16.mxu0 %v23243_v23 }
 0xdf7   : > { %8462 = vmatpush1.bf16.msra.mxu0 %v23248_v52  ;;  %v20541_v52 = vld [vmem:[%s22626_s3 + $0xe0] ss:$8 sps:$4 sm:$0xff]  }
 0xdf8   : > { %8463 = vmatprep.subr.bf16.mxu0 %v23243_v23 }
 0xdfb   : > { %8464 = vmatpush1.bf16.msra.mxu0 %v23249_v44  ;;  %v20547_v44 = vld [vmem:[%s22626_s3 + $0xf4] ss:$8 sps:$4 sm:$0xff]  }
 0xdfc   : > { %8465 = vmatprep.subr.bf16.mxu0 %v23243_v23 }
 0xdff   : > { %8466 = vmatpush1.bf16.msra.mxu0 %v23250_v22  ;;  %v20553_v22 = vld [vmem:[%s22626_s3 + $0xf0] ss:$8 sps:$4 sm:$0xff]  }
 0xe00   : > { %8467 = vmatprep.subr.bf16.mxu0 %v23243_v23 }
 0xe03   : > { %8468 = vmatpush1.bf16.msra.mxu0 %v23251_v46  ;;  %v20559_v46 = vld [vmem:[%s22626_s3 + $0x104] ss:$8 sps:$4 sm:$0xff]  }
 0xe04   : > { %8469 = vmatprep.subr.bf16.mxu0 %v23243_v23 }
 0xe07   : > { %8470 = vmatpush1.bf16.msra.mxu0 %v23252_v45  ;;  %v20565_v45 = vld [vmem:[%s22626_s3 + $0x100] ss:$8 sps:$4 sm:$0xff]  }
 0xe08   : > { %8471 = vmatprep.subr.bf16.mxu0 %v23243_v23 }
 0xe0b   : > { %8472 = vmatpush1.bf16.msra.mxu0 %v23253_v14  ;;  %v20571_v14 = vld [vmem:[%s22626_s3 + $0x114] ss:$8 sps:$4 sm:$0xff]  }
 0xe0c   : > { %8473 = vmatprep.subr.bf16.mxu0 %v23243_v23 }
 0xe0f   : > { %8474 = vmatpush1.bf16.msra.mxu0 %v23254_v37  ;;  %v20577_v37 = vld [vmem:[%s22626_s3 + $0x110] ss:$8 sps:$4 sm:$0xff]  }
 0xe10   : > { %8475 = vmatprep.subr.bf16.mxu0 %v23243_v23 }
 0xe13   : > { %8476 = vmatpush1.bf16.msra.mxu0 %v23255_v31  ;;  %v20583_v31 = vld [vmem:[%s22626_s3 + $0x124] ss:$8 sps:$4 sm:$0xff]  }
 0xe14   : > { %8477 = vmatprep.subr.bf16.mxu0 %v23243_v23 }
 0xe17   : > { %8478 = vmatpush1.bf16.msra.mxu0 %v23256_v7  ;;  %v20589_v7 = vld [vmem:[%s22626_s3 + $0x120] ss:$8 sps:$4 sm:$0xff]  }
 0xe18   : > { %8479 = vmatprep.subr.bf16.mxu0 %v23243_v23 }
 0xe1b   : > { %8480 = vmatpush1.bf16.msra.mxu0 %v23257_v12  ;;  %v20595_v12 = vld [vmem:[%s22626_s3 + $0x134] ss:$8 sps:$4 sm:$0xff]  }
 0xe1c   : > { %8481 = vmatprep.subr.bf16.mxu0 %v23243_v23 }
 0xe1f   : > { %8482 = vmatpush1.bf16.msra.mxu0 %v23258_v63 }
 0xe20   : > { %8483 = vmatprep.subr.bf16.mxu0 %v23243_v23 }
 0xe23   : > { %8484 = vmatpush1.bf16.msra.mxu0 %v23259_v39 }
 0xe24   : > { %9663 = vmatprep.subr.bf16.mxu0 %v23243_v23 }
 0xe26   : > { %8486 = vmatmul.mubr.bf16.vlgmr.msra.gmra.mrb[220].mxu0 %v20341_v27 }
 0xe27   : > { %9664 = vmatpush1.bf16.msra.mxu0 %v23260_v55  ;;  %8493 = vmatprep.mubr.bf16.mxu0 %v20348_v10 }
 0xe28   : > { %9665 = vmatprep.subr.bf16.mxu0 %v23243_v23 }
 0xe2b   : > { %9666 = vmatpush1.bf16.msra.mxu0 %v23261_v36 }
 0xe2c   : > { %9667 = vmatprep.subr.bf16.mxu0 %v23243_v23 }
 0xe2e   : > { %8494 = vmatmul.mubr.bf16.gmra.mrb[224].mxu0 %v20357_v17 }
 0xe2f   : > { %9668 = vmatpush1.bf16.msra.mxu0 %v23262_v26  ;;  %8501 = vmatprep.mubr.bf16.mxu0 %v20364_v60 }
 0xe30   : > { %9669 = vmatprep.subr.bf16.mxu0 %v23243_v23 }
 0xe33   : > { %9670 = vmatpush1.bf16.msra.mxu0 %v23263_v43 }
 0xe34   : > { %9671 = vmatprep.subr.bf16.mxu0 %v23243_v23 }
 0xe36   : > { %8502 = vmatmul.mubr.bf16.gmra.mrb[228].mxu0 %v20373_v5 }
 0xe37   : > { %9672 = vmatpush1.bf16.msra.mxu0 %v23264_v53  ;;  %8509 = vmatprep.mubr.bf16.mxu0 %v20380_v40 }
 0xe38   : > { %9673 = vmatprep.subr.bf16.mxu0 %v23243_v23 }
 0xe3b   : > { %9674 = vmatpush1.bf16.msra.mxu0 %v23265_v8  ;;  %v20605_v8 = vld [vmem:[%s22626_s3 + $0x130] ss:$8 sps:$4 sm:$0xff]  }
 0xe3c   : > { %9675 = vmatprep.subr.bf16.mxu0 %v23243_v23 }
 0xe3e   : > { %8510 = vmatmul.mubr.bf16.gmra.mrb[232].mxu0 %v20389_v20 }
 0xe3f   : > { %9676 = vmatpush1.bf16.msra.mxu0 %v23266_v59  ;;  %8517 = vmatprep.mubr.bf16.mxu0 %v20396_v28  ;;  %v20611_v59 = vld [vmem:[%s22626_s3 + $0x144] ss:$8 sps:$4 sm:$0xff]  }
 0xe40   : > { %9677 = vmatprep.subr.bf16.mxu0 %v23243_v23 }
 0xe43   : > { %9678 = vmatpush1.bf16.msra.mxu0 %v23267_v18  ;;  %v20629_v18 = vld [vmem:[%s22626_s3 + $0x150] ss:$8 sps:$4 sm:$0xff]  }
 0xe44   : > { %9679 = vmatprep.subr.bf16.mxu0 %v23243_v23  ;;  %23277 = vst [vmem:[#allocation33_spill] sm:$0xff] %v20629_v18 }
 0xe46   : > { %8518 = vmatmul.mubr.bf16.gmra.mrb[236].mxu0 %v20405_v38 }
 0xe47   : > { %9680 = vmatpush1.bf16.msra.mxu0 %v23268_v4  ;;  %8525 = vmatprep.mubr.bf16.mxu0 %v20412_v49  ;;  %v20635_v4 = vld [vmem:[%s22626_s3 + $0x164] ss:$8 sps:$4 sm:$0xff]  }
 0xe48   : > { %9681 = vmatprep.subr.bf16.mxu0 %v23243_v23  ;;  %23278 = vst [vmem:[#allocation36_spill] sm:$0xff] %v20635_v4 }
 0xe4b   : > { %9682 = vmatpush1.bf16.msra.mxu0 %v23269_v34  ;;  %v20641_v34 = vld [vmem:[%s22626_s3 + $0x160] ss:$8 sps:$4 sm:$0xff]  }
 0xe4c   : > { %9683 = vmatprep.subr.bf16.mxu0 %v23243_v23  ;;  %23279 = vst [vmem:[#allocation35_spill] sm:$0xff] %v20641_v34 }
 0xe4e   : > { %8526 = vmatmul.mubr.bf16.gmra.mrb[240].mxu0 %v20421_v9 }
 0xe4f   : > { %9684 = vmatpush1.bf16.msra.mxu0 %v23270_v16  ;;  %8533 = vmatprep.mubr.bf16.mxu0 %v20428_v33  ;;  %v20647_v16 = vld [vmem:[%s22626_s3 + $0x174] ss:$8 sps:$4 sm:$0xff]  }
 0xe50   : > { %9685 = vmatprep.subr.bf16.mxu0 %v23243_v23  ;;  %23280 = vst [vmem:[#allocation104_spill] sm:$0xff] %v20647_v16 }
 0xe53   : > { %9686 = vmatpush1.bf16.msra.mxu0 %v23271_v50  ;;  %v20653_v50 = vld [vmem:[%s22626_s3 + $0x170] ss:$8 sps:$4 sm:$0xff]  }
 0xe54   : > { %9687 = vmatprep.subr.bf16.mxu0 %v23243_v23  ;;  %23281 = vst [vmem:[#allocation106_spill] sm:$0xff] %v20653_v50 }
 0xe56   : > { %8534 = vmatmul.mubr.bf16.gmra.mrb[244].mxu0 %v20437_v13 }
 0xe57   : > { %9688 = vmatpush1.bf16.msra.mxu0 %v23272_v3  ;;  %8541 = vmatprep.mubr.bf16.mxu0 %v20444_v35  ;;  %v20659_v3 = vld [vmem:[%s22626_s3 + $0x184] ss:$8 sps:$4 sm:$0xff]  }
 0xe58   : > { %9689 = vmatprep.subr.bf16.mxu0 %v23243_v23  ;;  %23282 = vst [vmem:[#allocation110_spill] sm:$0xff] %v20659_v3 }
 0xe5b   : > { %9690 = vmatpush1.bf16.msra.mxu0 %v23273_v25  ;;  %v20665_v25 = vld [vmem:[%s22626_s3 + $0x180] ss:$8 sps:$4 sm:$0xff]  }
 0xe5c   : > { %9691 = vmatprep.subr.bf16.mxu0 %v23243_v23  ;;  %23283 = vst [vmem:[#allocation109_spill] sm:$0xff] %v20665_v25 }
 0xe5e   : > { %8542 = vmatmul.mubr.bf16.gmra.mrb[248].mxu0 %v20453_v56 }
 0xe5f   : > { %9692 = vmatpush1.bf16.msra.mxu0 %v23274_v21  ;;  %8549 = vmatprep.mubr.bf16.mxu0 %v20460_v32  ;;  %v20671_v21 = vld [vmem:[%s22626_s3 + $0x194] ss:$8 sps:$4 sm:$0xff]  }
 0xe60   : > { %9693 = vmatprep.subr.bf16.mxu0 %v23243_v23  ;;  %23284 = vst [vmem:[#allocation112_spill] sm:$0xff] %v20671_v21 }
 0xe63   : > { %9694 = vmatpush1.bf16.msra.mxu0 %v23275_v41  ;;  %v20677_v41 = vld [vmem:[%s22626_s3 + $0x190] ss:$8 sps:$4 sm:$0xff]  }
 0xe64   : > { %15534 = vmatprep.subr.bf16.mxu0 %v19939_v47  ;;  %23285 = vst [vmem:[#allocation111_spill] sm:$0xff] %v20677_v41 }
 0xe66   : > { %8550 = vmatmul.mubr.bf16.gmra.mrb[252].mxu0 %v20469_v58 }
 0xe67   : > { %8557 = vmatprep.mubr.bf16.mxu0 %v20475_v48 }
 0xe6e   : > { %8558 = vmatmul.mubr.bf16.gmra.mrb[0].mxu0 %v20481_v30 }
 0xe6f   : > { %8565 = vmatprep.mubr.bf16.mxu0 %v20487_v15 }
 0xe76   : > { %8566 = vmatmul.mubr.bf16.gmra.mrb[4].mxu0 %v20493_v51 }
 0xe77   : > { %8573 = vmatprep.mubr.bf16.mxu0 %v20499_v0 }
 0xe7e   : > { %8574 = vmatmul.mubr.bf16.gmra.mrb[8].mxu0 %v20505_v42 }
 0xe7f   : > { %8581 = vmatprep.mubr.bf16.mxu0 %v20511_v19 }
 0xe86   : > { %8582 = vmatmul.mubr.bf16.gmra.mrb[12].mxu0 %v20517_v57 }
 0xe87   : > { %8589 = vmatprep.mubr.bf16.mxu0 %v20523_v11 }
 0xe8e   : > { %8590 = vmatmul.mubr.bf16.gmra.mrb[16].mxu0 %v20529_v24 }
 0xe8f   : > { %8597 = vmatprep.mubr.bf16.mxu0 %v20535_v29 }
 0xe96   : > { %8598 = vmatmul.mubr.bf16.gmra.mrb[20].mxu0 %v20541_v52 }
 0xe97   : > { %8605 = vmatprep.mubr.bf16.mxu0 %v20547_v44 }
 0xe9e   : > { %8606 = vmatmul.mubr.bf16.gmra.mrb[24].mxu0 %v20553_v22 }
 0xe9f   : > { %8613 = vmatprep.mubr.bf16.mxu0 %v20559_v46 }
 0xea6   : > { %8614 = vmatmul.mubr.bf16.gmra.mrb[28].mxu0 %v20565_v45 }
 0xea7   : > { %8621 = vmatprep.mubr.bf16.mxu0 %v20571_v14 }
 0xeae   : > { %8622 = vmatmul.mubr.bf16.gmra.mrb[32].mxu0 %v20577_v37 }
 0xeaf   : > { %8629 = vmatprep.mubr.bf16.mxu0 %v20583_v31 }
 0xeb6   : > { %8630 = vmatmul.mubr.bf16.gmra.mrb[36].mxu0 %v20589_v7 }
 0xeb7   : > { %8637 = vmatprep.mubr.bf16.mxu0 %v20595_v12 }
 0xeb9   : > { %v8447_v63 = vpop.f32.mrb[216].mxu0 }
 0xeba   : > { %v8448_v39 = vadd.f32 %v20273_v1, %v8447_v63  ;;  %v15312_v55 = vpop.f32.mrb[217].mxu0  ;;  %v20617_v1 = vld [vmem:[%s22626_s3 + $0x140] ss:$8 sps:$4 sm:$0xff]   ;;  %v20683_v63 = vld [vmem:[%s22626_s3 + $0x1a4] ss:$8 sps:$4 sm:$0xff]  }
 0xebb   : > { %v8450_v36 = vpop.f32.mrb[218].mxu0  ;;  %23286 = vst [vmem:[#allocation114_spill] sm:$0xff] %v20683_v63  ;;  %v20695_v55 = vld [vmem:[%s22626_s3 + $0x1b4] ss:$8 sps:$4 sm:$0xff]  }
 0xebc   : > { %v13300_v26 = vrot.slane %v8448_v39, 5  ;;  %v15313_v43 = vpop.f32.mrb[219].mxu0  ;;  %v20689_v39 = vld [vmem:[%s22626_s3 + $0x1a0] ss:$8 sps:$4 sm:$0xff]   ;;  %23288 = vst [vmem:[#allocation116_spill] sm:$0xff] %v20695_v55 }
 0xebd   : > { %23287 = vst [vmem:[#allocation113_spill] sm:$0xff] %v20689_v39 }
 0xebe   : > { %v20600_v53 = vsel %vm13318_vm6, %v20277_v54, %v13300_v26  ;;  %8638 = vmatmul.mubr.bf16.gmra.mrb[40].mxu0 %v20605_v8  ;;  %v20623_v54 = vld [vmem:[%s22626_s3 + $0x154] ss:$8 sps:$4 sm:$0xff]  }
 0xebf   : > { %23276 = vst [vmem:[#allocation34_spill] sm:$0xff] %v20600_v53  ;;  %8645 = vmatprep.mubr.bf16.mxu0 %v20611_v59 }
 0xec6   : > { %8646 = vmatmul.mubr.bf16.gmra.mrb[44].mxu0 %v20617_v1 }
 0xec7   : > { %8653 = vmatprep.mubr.bf16.mxu0 %v20623_v54 }
 0xece   : > { %8654 = vmatmul.mubr.bf16.gmra.mrb[48].mxu0 %v20629_v18  ;;  %v20786_v18 = vld [vmem:[%s22626_s3 + $0x200] ss:$8 sps:$4 sm:$0xff]  }
 0xecf   : > { %8661 = vmatprep.mubr.bf16.mxu0 %v20635_v4  ;;  %23299 = vst [vmem:[#allocation126_spill] sm:$0xff] %v20786_v18 }
 0xed6   : > { %8662 = vmatmul.mubr.bf16.gmra.mrb[52].mxu0 %v20641_v34 }
 0xed7   : > { %8669 = vmatprep.mubr.bf16.mxu0 %v20647_v16 }
 0xede   : > { %8670 = vmatmul.mubr.bf16.gmra.mrb[56].mxu0 %v20653_v50 }
 0xedf   : > { %8677 = vmatprep.mubr.bf16.mxu0 %v20659_v3 }
 0xee6   : > { %8678 = vmatmul.mubr.bf16.gmra.mrb[60].mxu0 %v20665_v25 }
 0xee7   : > { %8685 = vmatprep.mubr.bf16.mxu0 %v20671_v21 }
 0xeee   : > { %8686 = vmatmul.mubr.bf16.gmra.mrb[64].mxu0 %v20677_v41 }
 0xeef   : > { %8693 = vmatprep.mubr.bf16.mxu0 %v20683_v63 }
 0xef6   : > { %8694 = vmatmul.mubr.bf16.gmra.mrb[68].mxu0 %v20689_v39  ;;  %v20707_v39 = vld [vmem:[%s22626_s3 + $0x1b0] ss:$8 sps:$4 sm:$0xff]  }
 0xef7   : > { %8701 = vmatprep.mubr.bf16.mxu0 %v20695_v55  ;;  %23289 = vst [vmem:[#allocation115_spill] sm:$0xff] %v20707_v39  ;;  %v20713_v55 = vld [vmem:[%s22626_s3 + $0x1c4] ss:$8 sps:$4 sm:$0xff]  }
 0xef8   : > { %23290 = vst [vmem:[#allocation107_spill] sm:$0xff] %v20713_v55 }
 0xef9   : > { %v20698_v36 = vpop.f32.mrb[220].mxu0 }
 0xefa   : > { %v8489_v26 = vpop.f32.mrb[221].mxu0 }
 0xefb   : > { %v20700_v43 = vpop.f32.mrb[222].mxu0 }
 0xefc   : > { %v8492_v53 = vpop.f32.mrb[223].mxu0 }
 0xefe   : > { %8702 = vmatmul.mubr.bf16.gmra.mrb[72].mxu0 %v20707_v39  ;;  %v20725_v39 = vld [vmem:[%s22626_s3 + $0x1c0] ss:$8 sps:$4 sm:$0xff]  }
 0xeff   : > { %8709 = vmatprep.mubr.bf16.mxu0 %v20713_v55  ;;  %23291 = vst [vmem:[#allocation118_spill] sm:$0xff] %v20725_v39  ;;  %v20731_v55 = vld [vmem:[%s22626_s3 + $0x1d4] ss:$8 sps:$4 sm:$0xff]  }
 0xf00   : > { %23292 = vst [vmem:[#allocation117_spill] sm:$0xff] %v20731_v55 }
 0xf01   : > { %v20716_v26 = vpop.f32.mrb[224].mxu0 }
 0xf02   : > { %v8497_v63 = vpop.f32.mrb[225].mxu0 }
 0xf03   : > { %v20718_v41 = vpop.f32.mrb[226].mxu0 }
 0xf04   : > { %v8500_v23 = vpop.f32.mrb[227].mxu0 }
 0xf06   : > { %8710 = vmatmul.mubr.bf16.gmra.mrb[76].mxu0 %v20725_v39  ;;  %v20743_v39 = vld [vmem:[%s22626_s3 + $0x1d0] ss:$8 sps:$4 sm:$0xff]  }
 0xf07   : > { %8717 = vmatprep.mubr.bf16.mxu0 %v20731_v55  ;;  %23293 = vst [vmem:[#allocation120_spill] sm:$0xff] %v20743_v39  ;;  %v20749_v55 = vld [vmem:[%s22626_s3 + $0x1e4] ss:$8 sps:$4 sm:$0xff]  }
 0xf08   : > { %23294 = vst [vmem:[#allocation119_spill] sm:$0xff] %v20749_v55 }
 0xf09   : > { %v20734_v63 = vpop.f32.mrb[228].mxu0 }
 0xf0a   : > { %v8505_v21 = vpop.f32.mrb[229].mxu0 }
 0xf0b   : > { %v20736_v25 = vpop.f32.mrb[230].mxu0 }
 0xf0c   : > { %v8508_v53 = vpop.f32.mrb[231].mxu0 }
 0xf0e   : > { %8718 = vmatmul.mubr.bf16.gmra.mrb[80].mxu0 %v20743_v39  ;;  %v20761_v39 = vld [vmem:[%s22626_s3 + $0x1e0] ss:$8 sps:$4 sm:$0xff]  }
 0xf0f   : > { %8725 = vmatprep.mubr.bf16.mxu0 %v20749_v55  ;;  %23295 = vst [vmem:[#allocation122_spill] sm:$0xff] %v20761_v39  ;;  %v20767_v55 = vld [vmem:[%s22626_s3 + $0x1f4] ss:$8 sps:$4 sm:$0xff]  }
 0xf10   : > { %23296 = vst [vmem:[#allocation121_spill] sm:$0xff] %v20767_v55 }
 0xf11   : > { %v20752_v21 = vpop.f32.mrb[232].mxu0 }
 0xf12   : > { %v8513_v3 = vpop.f32.mrb[233].mxu0 }
 0xf13   : > { %v20754_v50 = vpop.f32.mrb[234].mxu0 }
 0xf14   : > { %v8516_v23 = vpop.f32.mrb[235].mxu0 }
 0xf15   : > { %v20773_v23 = vld [vmem:[%s22626_s3 + $0x1f0] ss:$8 sps:$4 sm:$0xff]  }
 0xf16   : > { %8726 = vmatmul.mubr.bf16.gmra.mrb[84].mxu0 %v20761_v39  ;;  %23297 = vst [vmem:[#allocation124_spill] sm:$0xff] %v20773_v23  ;;  %v20780_v39 = vld [vmem:[%s22626_s3 + $0x204] ss:$8 sps:$4 sm:$0xff]  }
 0xf17   : > { %8733 = vmatprep.mubr.bf16.mxu0 %v20767_v55  ;;  %23298 = vst [vmem:[#allocation123_spill] sm:$0xff] %v20780_v39 }
 0xf19   : > { %v8519_v3 = vpop.f32.mrb[236].mxu0 }
 0xf1a   : > { %v8521_v16 = vpop.f32.mrb[237].mxu0 }
 0xf1b   : > { %v8522_v34 = vpop.f32.mrb[238].mxu0 }
 0xf1c   : > { %v8778_v4 = vpack.c.bf16 %v8522_v34, %v8519_v3  ;;  %v8524_v53 = vpop.f32.mrb[239].mxu0 }
 0xf1e   : > { %8734 = vmatmul.mubr.bf16.gmra.mrb[88].mxu0 %v20773_v23  ;;  %15316 = vmatprep.mubr.msk.bf16.mxu1 %vm3899_vm1, %v8778_v4  ;;  %v20793_v4 = vld [vmem:[%s22626_s3 + $0x214] ss:$8 sps:$4 sm:$0xff]   ;;  %v20814_v23 = vld [vmem:[%s22626_s3 + $0x220] ss:$8 sps:$4 sm:$0xff]  }
 0xf1f   : > { %8741 = vmatprep.mubr.bf16.mxu0 %v20780_v39  ;;  %23300 = vst [vmem:[#allocation125_spill] sm:$0xff] %v20793_v4 }
 0xf21   : > { %v8527_v16 = vpop.f32.mrb[240].mxu0 }
 0xf22   : > { %v8529_v55 = vpop.f32.mrb[241].mxu0 }
 0xf23   : > { %v8530_v34 = vpop.f32.mrb[242].mxu0 }
 0xf24   : > { %v8779_v53 = vpack.c.bf16 %v8530_v34, %v8527_v16  ;;  %v8532_v3 = vpop.f32.mrb[243].mxu0 }
 0xf26   : > { %8742 = vmatmul.mubr.bf16.gmra.mrb[92].mxu0 %v20786_v18  ;;  %15317 = vmatmul.mubr.msk.bf16.vlgmr.msra.gmra.mrb[164].mxu1 %vm3899_vm1, %v8779_v53  ;;  %v20801_v53 = vld [vmem:[%s22626_s3 + $0x210] ss:$8 sps:$4 sm:$0xff]  }
 0xf27   : > { %8749 = vmatprep.mubr.bf16.mxu0 %v20793_v4  ;;  %15325 = vmatpush3.bf16.msra.mxu1 %v20109_v2  ;;  %23301 = vst [vmem:[#allocation101_spill] sm:$0xff] %v20801_v53  ;;  %v20808_v4 = vld [vmem:[%s22626_s3 + $0x224] ss:$8 sps:$4 sm:$0xff]  }
 0xf28   : > { %15334 = vmatprep.subr.bf16.mxu1 %v20142_v62  ;;  %23302 = vst [vmem:[#allocation103_spill] sm:$0xff] %v20808_v4 }
 0xf29   : > { %v8535_v55 = vpop.f32.mrb[244].mxu0 }
 0xf2a   : > { %v8537_v16 = vpop.f32.mrb[245].mxu0 }
 0xf2b   : > { %v8538_v34 = vpop.f32.mrb[246].mxu0 }
 0xf2c   : > { %v8780_v3 = vpack.c.bf16 %v8538_v34, %v8535_v55  ;;  %v8540_v39 = vpop.f32.mrb[247].mxu0 }
 0xf2e   : > { %8750 = vmatmul.mubr.bf16.gmra.mrb[96].mxu0 %v20801_v53  ;;  %15320 = vmatprep.mubr.msk.bf16.mxu1 %vm3899_vm1, %v8780_v3  ;;  %v20821_v3 = vld [vmem:[%s22626_s3 + $0x234] ss:$8 sps:$4 sm:$0xff]  }
 0xf2f   : > { %8757 = vmatprep.mubr.bf16.mxu0 %v20808_v4  ;;  %23303 = vst [vmem:[#allocation102_spill] sm:$0xff] %v20821_v3 }
 0xf31   : > { %v8543_v16 = vpop.f32.mrb[248].mxu0 }
 0xf32   : > { %v8545_v18 = vpop.f32.mrb[249].mxu0 }
 0xf33   : > { %v8546_v55 = vpop.f32.mrb[250].mxu0  ;;  %v23304_v18 = vpack.c.bf16 %v20700_v43, %v20698_v36  ;;  %v23306_v36 = vpack.c.bf16 %v20736_v25, %v20734_v63  ;;  %v20846_v43 = vld [vmem:[%s22627_s4 + $0x18] sm:$0xff]   ;;  %v23307_v25 = vpack.c.bf16 %v20754_v50, %v20752_v21 }
 0xf34   : > { %v8781_v39 = vpack.c.bf16 %v8546_v55, %v8543_v16  ;;  %v8548_v34 = vpop.f32.mrb[251].mxu0 }
 0xf36   : > { %8758 = vmatmul.mubr.bf16.gmra.mrb[100].mxu0 %v20814_v23  ;;  %15321 = vmatmul.mubr.msk.bf16.gmra.mrb[168].mxu1 %vm3899_vm1, %v8781_v39  ;;  %v20831_v39 = vld [vmem:[%s22626_s3 + $0x230] ss:$8 sps:$4 sm:$0xff]  }
 0xf37   : > { %8765 = vmatprep.mubr.bf16.mxu0 %v20821_v3  ;;  %15326 = vmatprep.mubr.msk.bf16.mxu1 %vm3899_vm1, %v23304_v18  ;;  %v23305_v3 = vpack.c.bf16 %v20718_v41, %v20716_v26 }
 0xf39   : > { %v8551_v16 = vpop.f32.mrb[252].mxu0 }
 0xf3a   : > { %v8553_v55 = vpop.f32.mrb[253].mxu0 }
 0xf3b   : > { %v8554_v34 = vpop.f32.mrb[254].mxu0 }
 0xf3c   : > { %v8556_v4 = vpop.f32.mrb[255].mxu0  ;;  %v8782_v53 = vpack.c.bf16 %v8554_v34, %v8551_v16 }
 0xf3e   : > { %8766 = vmatmul.mubr.bf16.gmra.mrb[104].mxu0 %v20831_v39  ;;  %15327 = vmatmul.mubr.msk.bf16.vlgmr.msra.gmra.mrb[164].mxu1 %vm3899_vm1, %v23305_v3 }
 0xf3f   : > { %15330 = vmatprep.mubr.msk.bf16.mxu1 %vm3899_vm1, %v23306_v36  ;;  %15335 = vmatpush3.bf16.msra.mxu1 %v20142_v62 }
 0xf40   : > { %15344 = vmatprep.subr.bf16.mxu1 %v20846_v43  ;;  %9695 = vmatprep.mubr.bf16.mxu0 %v20304_v61 }
 0xf41   : > { %v8559_v4 = vpop.f32.mrb[0].mxu0 }
 0xf42   : > { %v8561_v41 = vpop.f32.mrb[1].mxu0 }
 0xf43   : > { %v8562_v26 = vpop.f32.mrb[2].mxu0 }
 0xf44   : > { %v8783_v3 = vpack.c.bf16 %v8562_v26, %v8559_v4  ;;  %v8564_v18 = vpop.f32.mrb[3].mxu0 }
 0xf46   : > { %15331 = vmatmul.mubr.msk.bf16.gmra.mrb[168].mxu1 %vm3899_vm1, %v23307_v25  ;;  %9696 = vmatmul.mubr.bf16.vlgmr.msra.gmra.mrb[108].mxu0 %v20341_v27  ;;  %v20866_v27 = vld [vmem:[%s22627_s4 + $0x20] sm:$0xff]  }
 0xf47   : > { %15336 = vmatprep.mubr.msk.bf16.mxu1 %vm3899_vm1, %v8782_v53  ;;  %9703 = vmatprep.mubr.bf16.mxu0 %v20348_v10 }
 0xf48   : > { %15535 = vmatpush3.bf16.msra.mxu0 %v19939_v47 }
 0xf49   : > { %v8567_v62 = vpop.f32.mrb[4].mxu0  ;;  %15544 = vmatprep.subr.bf16.mxu0 %v20109_v2 }
 0xf4a   : > { %v8569_v61 = vpop.f32.mrb[5].mxu0 }
 0xf4b   : > { %v8570_v63 = vpop.f32.mrb[6].mxu0 }
 0xf4c   : > { %v8784_v16 = vpack.c.bf16 %v8570_v63, %v8567_v62  ;;  %v8572_v55 = vpop.f32.mrb[7].mxu0 }
 0xf4e   : > { %15337 = vmatmul.mubr.msk.bf16.vlgmr.msra.gmra.mrb[164].mxu1 %vm3899_vm1, %v8783_v3  ;;  %9704 = vmatmul.mubr.bf16.gmra.mrb[112].mxu0 %v20357_v17 }
 0xf4f   : > { %15340 = vmatprep.mubr.msk.bf16.mxu1 %vm3899_vm1, %v8784_v16  ;;  %15345 = vmatpush3.bf16.msra.mxu1 %v20846_v43 }
 0xf50   : > { %15354 = vmatprep.subr.bf16.mxu1 %v20866_v27  ;;  %9711 = vmatprep.mubr.bf16.mxu0 %v20364_v60 }
 0xf51   : > { %v8575_v47 = vpop.f32.mrb[8].mxu0 }
 0xf52   : > { %v8577_v2 = vpop.f32.mrb[9].mxu0 }
 0xf53   : > { %v8578_v10 = vpop.f32.mrb[10].mxu0 }
 0xf54   : > { %v8785_v50 = vpack.c.bf16 %v8578_v10, %v8575_v47  ;;  %v8580_v21 = vpop.f32.mrb[11].mxu0 }
 0xf56   : > { %15341 = vmatmul.mubr.msk.bf16.gmra.mrb[168].mxu1 %vm3899_vm1, %v8785_v50  ;;  %9712 = vmatmul.mubr.bf16.gmra.mrb[116].mxu0 %v20373_v5  ;;  %v20883_v5 = vld [vmem:[%s22627_s4 + $0x28] sm:$0xff]  }
 0xf57   : > { %9719 = vmatprep.mubr.bf16.mxu0 %v20380_v40 }
 0xf59   : > { %v8583_v17 = vpop.f32.mrb[12].mxu0 }
 0xf5a   : > { %v8585_v53 = vpop.f32.mrb[13].mxu0 }
 0xf5b   : > { %v8586_v34 = vpop.f32.mrb[14].mxu0 }
 0xf5c   : > { %v8588_v36 = vpop.f32.mrb[15].mxu0  ;;  %v8786_v4 = vpack.c.bf16 %v8586_v34, %v8583_v17 }
 0xf5e   : > { %15346 = vmatprep.mubr.msk.bf16.mxu1 %vm3899_vm1, %v8786_v4  ;;  %9720 = vmatmul.mubr.bf16.gmra.mrb[120].mxu0 %v20389_v20 }
 0xf5f   : > { %9727 = vmatprep.mubr.bf16.mxu0 %v20396_v28 }
 0xf61   : > { %v8591_v60 = vpop.f32.mrb[16].mxu0 }
 0xf62   : > { %v8593_v41 = vpop.f32.mrb[17].mxu0 }
 0xf63   : > { %v8594_v26 = vpop.f32.mrb[18].mxu0 }
 0xf64   : > { %v8787_v3 = vpack.c.bf16 %v8594_v26, %v8591_v60  ;;  %v8596_v18 = vpop.f32.mrb[19].mxu0 }
 0xf66   : > { %15347 = vmatmul.mubr.msk.bf16.vlgmr.msra.gmra.mrb[164].mxu1 %vm3899_vm1, %v8787_v3  ;;  %9728 = vmatmul.mubr.bf16.gmra.mrb[124].mxu0 %v20405_v38 }
 0xf67   : > { %15355 = vmatpush3.bf16.msra.mxu1 %v20866_v27  ;;  %9735 = vmatprep.mubr.bf16.mxu0 %v20412_v49 }
 0xf68   : > { %15364 = vmatprep.subr.bf16.mxu1 %v20883_v5 }
 0xf69   : > { %v8599_v40 = vpop.f32.mrb[20].mxu0 }
 0xf6a   : > { %v8601_v20 = vpop.f32.mrb[21].mxu0 }
 0xf6b   : > { %v8602_v28 = vpop.f32.mrb[22].mxu0 }
 0xf6c   : > { %v8788_v25 = vpack.c.bf16 %v8602_v28, %v8599_v40  ;;  %v8604_v62 = vpop.f32.mrb[23].mxu0 }
 0xf6e   : > { %15350 = vmatprep.mubr.msk.bf16.mxu1 %vm3899_vm1, %v8788_v25  ;;  %9736 = vmatmul.mubr.bf16.gmra.mrb[128].mxu0 %v20421_v9 }
 0xf6f   : > { %9743 = vmatprep.mubr.bf16.mxu0 %v20428_v33 }
 0xf71   : > { %v8607_v38 = vpop.f32.mrb[24].mxu0 }
 0xf72   : > { %v8609_v49 = vpop.f32.mrb[25].mxu0 }
 0xf73   : > { %v8610_v61 = vpop.f32.mrb[26].mxu0 }
 0xf74   : > { %v8789_v63 = vpack.c.bf16 %v8610_v61, %v8607_v38  ;;  %v8612_v16 = vpop.f32.mrb[27].mxu0 }
 0xf76   : > { %15351 = vmatmul.mubr.msk.bf16.gmra.mrb[168].mxu1 %vm3899_vm1, %v8789_v63  ;;  %9744 = vmatmul.mubr.bf16.gmra.mrb[132].mxu0 %v20437_v13  ;;  %v20902_v13 = vld [vmem:[%s22627_s4 + $0x30] sm:$0xff]  }
 0xf77   : > { %9751 = vmatprep.mubr.bf16.mxu0 %v20444_v35 }
 0xf79   : > { %v8615_v55 = vpop.f32.mrb[28].mxu0 }
 0xf7a   : > { %v8617_v47 = vpop.f32.mrb[29].mxu0 }
 0xf7b   : > { %v8618_v2 = vpop.f32.mrb[30].mxu0 }
 0xf7c   : > { %v8790_v10 = vpack.c.bf16 %v8618_v2, %v8615_v55  ;;  %v8620_v50 = vpop.f32.mrb[31].mxu0 }
 0xf7e   : > { %15356 = vmatprep.mubr.msk.bf16.mxu1 %vm3899_vm1, %v8790_v10  ;;  %9752 = vmatmul.mubr.bf16.gmra.mrb[136].mxu0 %v20453_v56 }
 0xf7f   : > { %9759 = vmatprep.mubr.bf16.mxu0 %v20460_v32 }
 0xf81   : > { %v8623_v9 = vpop.f32.mrb[32].mxu0 }
 0xf82   : > { %v8625_v33 = vpop.f32.mrb[33].mxu0 }
 0xf83   : > { %v8626_v21 = vpop.f32.mrb[34].mxu0 }
 0xf84   : > { %v8791_v17 = vpack.c.bf16 %v8626_v21, %v8623_v9  ;;  %v8628_v53 = vpop.f32.mrb[35].mxu0 }
 0xf86   : > { %15357 = vmatmul.mubr.msk.bf16.vlgmr.msra.gmra.mrb[164].mxu1 %vm3899_vm1, %v8791_v17  ;;  %9760 = vmatmul.mubr.bf16.gmra.mrb[140].mxu0 %v20469_v58 }
 0xf87   : > { %15365 = vmatpush3.bf16.msra.mxu1 %v20883_v5  ;;  %9767 = vmatprep.mubr.bf16.mxu0 %v20475_v48 }
 0xf88   : > { %15374 = vmatprep.subr.bf16.mxu1 %v20902_v13 }
 0xf89   : > { %v8631_v35 = vpop.f32.mrb[36].mxu0 }
 0xf8a   : > { %v8633_v56 = vpop.f32.mrb[37].mxu0 }
 0xf8b   : > { %v8634_v32 = vpop.f32.mrb[38].mxu0 }
 0xf8c   : > { %v8792_v34 = vpack.c.bf16 %v8634_v32, %v8631_v35  ;;  %v8636_v36 = vpop.f32.mrb[39].mxu0 }
 0xf8e   : > { %15360 = vmatprep.mubr.msk.bf16.mxu1 %vm3899_vm1, %v8792_v34  ;;  %9768 = vmatmul.mubr.bf16.gmra.mrb[144].mxu0 %v20481_v30 }
 0xf8f   : > { %9775 = vmatprep.mubr.bf16.mxu0 %v20487_v15 }
 0xf91   : > { %v8639_v58 = vpop.f32.mrb[40].mxu0 }
 0xf92   : > { %v8641_v48 = vpop.f32.mrb[41].mxu0 }
 0xf93   : > { %v8642_v4 = vpop.f32.mrb[42].mxu0 }
 0xf94   : > { %v8793_v60 = vpack.c.bf16 %v8642_v4, %v8639_v58  ;;  %v8644_v41 = vpop.f32.mrb[43].mxu0 }
 0xf96   : > { %15361 = vmatmul.mubr.msk.bf16.gmra.mrb[168].mxu1 %vm3899_vm1, %v8793_v60  ;;  %9776 = vmatmul.mubr.bf16.gmra.mrb[148].mxu0 %v20493_v51  ;;  %v20921_v51 = vld [vmem:[%s22627_s4 + $0x38] sm:$0xff]  }
 0xf97   : > { %9783 = vmatprep.mubr.bf16.mxu0 %v20499_v0  ;;  %23308 = vst [vmem:[#allocation105_spill] sm:$0xff] %v20921_v51 }
 0xf99   : > { %v8647_v26 = vpop.f32.mrb[44].mxu0 }
 0xf9a   : > { %v8649_v3 = vpop.f32.mrb[45].mxu0 }
 0xf9b   : > { %v8650_v18 = vpop.f32.mrb[46].mxu0 }
 0xf9c   : > { %v8794_v40 = vpack.c.bf16 %v8650_v18, %v8647_v26  ;;  %v8652_v20 = vpop.f32.mrb[47].mxu0  ;;  %v23310_v18 = vld [vmem:[#allocation33_spill] sm:$0xff] }
 0xf9e   : > { %15366 = vmatprep.mubr.msk.bf16.mxu1 %vm3899_vm1, %v8794_v40  ;;  %9784 = vmatmul.mubr.bf16.gmra.mrb[152].mxu0 %v20505_v42  ;;  %v23311_v40 = vld [vmem:[#allocation36_spill] sm:$0xff] }
 0xf9f   : > { %9791 = vmatprep.mubr.bf16.mxu0 %v20511_v19 }
 0xfa1   : > { %v8655_v30 = vpop.f32.mrb[48].mxu0 }
 0xfa2   : > { %v8657_v15 = vpop.f32.mrb[49].mxu0 }
 0xfa3   : > { %v8658_v28 = vpop.f32.mrb[50].mxu0 }
 0xfa4   : > { %v8795_v25 = vpack.c.bf16 %v8658_v28, %v8655_v30  ;;  %v8660_v62 = vpop.f32.mrb[51].mxu0 }
 0xfa6   : > { %15367 = vmatmul.mubr.msk.bf16.vlgmr.msra.gmra.mrb[164].mxu1 %vm3899_vm1, %v8795_v25  ;;  %9792 = vmatmul.mubr.bf16.gmra.mrb[156].mxu0 %v20517_v57  ;;  %v23313_v25 = vld [vmem:[#allocation104_spill] sm:$0xff] }
 0xfa7   : > { %15375 = vmatpush3.bf16.msra.mxu1 %v20902_v13  ;;  %9799 = vmatprep.mubr.bf16.mxu0 %v20523_v11 }
 0xfa8   : > { %15384 = vmatprep.subr.bf16.mxu1 %v20921_v51 }
 0xfa9   : > { %v8663_v0 = vpop.f32.mrb[52].mxu0 }
 0xfaa   : > { %v8665_v42 = vpop.f32.mrb[53].mxu0 }
 0xfab   : > { %v8666_v19 = vpop.f32.mrb[54].mxu0 }
 0xfac   : > { %v8796_v38 = vpack.c.bf16 %v8666_v19, %v8663_v0  ;;  %v8668_v49 = vpop.f32.mrb[55].mxu0 }
 0xfad   : > { %v23314_v49 = vld [vmem:[#allocation106_spill] sm:$0xff] }
 0xfae   : > { %15370 = vmatprep.mubr.msk.bf16.mxu1 %vm3899_vm1, %v8796_v38  ;;  %9800 = vmatmul.mubr.bf16.gmra.mrb[160].mxu0 %v20529_v24 }
 0xfaf   : > { %9807 = vmatprep.mubr.bf16.mxu0 %v20535_v29 }
 0xfb1   : > { %v8671_v57 = vpop.f32.mrb[56].mxu0 }
 0xfb2   : > { %v8673_v11 = vpop.f32.mrb[57].mxu0 }
 0xfb3   : > { %v8674_v61 = vpop.f32.mrb[58].mxu0 }
 0xfb4   : > { %v8797_v63 = vpack.c.bf16 %v8674_v61, %v8671_v57  ;;  %v8676_v16 = vpop.f32.mrb[59].mxu0  ;;  %v23315_v57 = vld [vmem:[#allocation110_spill] sm:$0xff] }
 0xfb6   : > { %15371 = vmatmul.mubr.msk.bf16.gmra.mrb[168].mxu1 %vm3899_vm1, %v8797_v63  ;;  %9808 = vmatmul.mubr.bf16.gmra.mrb[164].mxu0 %v20541_v52  ;;  %v20940_v52 = vld [vmem:[%s22627_s4 + $0x40] sm:$0xff]  }
 0xfb7   : > { %9815 = vmatprep.mubr.bf16.mxu0 %v20547_v44  ;;  %23309 = vst [vmem:[#allocation6_spill] sm:$0xff] %v20940_v52 }
 0xfb9   : > { %v8679_v55 = vpop.f32.mrb[60].mxu0 }
 0xfba   : > { %v8681_v47 = vpop.f32.mrb[61].mxu0 }
 0xfbb   : > { %v8682_v2 = vpop.f32.mrb[62].mxu0  ;;  %v23316_v47 = vld [vmem:[#allocation109_spill] sm:$0xff] }
 0xfbc   : > { %v8798_v10 = vpack.c.bf16 %v8682_v2, %v8679_v55  ;;  %v8684_v50 = vpop.f32.mrb[63].mxu0  ;;  %v23317_v2 = vld [vmem:[#allocation112_spill] sm:$0xff] }
 0xfbe   : > { %15376 = vmatprep.mubr.msk.bf16.mxu1 %vm3899_vm1, %v8798_v10  ;;  %9816 = vmatmul.mubr.bf16.gmra.mrb[168].mxu0 %v20553_v22 }
 0xfbf   : > { %9823 = vmatprep.mubr.bf16.mxu0 %v20559_v46 }
 0xfc1   : > { %v8687_v24 = vpop.f32.mrb[64].mxu0 }
 0xfc2   : > { %v8689_v29 = vpop.f32.mrb[65].mxu0 }
 0xfc3   : > { %v8690_v9 = vpop.f32.mrb[66].mxu0 }
 0xfc4   : > { %v8799_v33 = vpack.c.bf16 %v8690_v9, %v8687_v24  ;;  %v8692_v21 = vpop.f32.mrb[67].mxu0 }
 0xfc5   : > { %v23319_v21 = vld [vmem:[#allocation114_spill] sm:$0xff] }
 0xfc6   : > { %15377 = vmatmul.mubr.msk.bf16.vlgmr.msra.gmra.mrb[164].mxu1 %vm3899_vm1, %v8799_v33  ;;  %9824 = vmatmul.mubr.bf16.gmra.mrb[172].mxu0 %v20565_v45  ;;  %v23318_v33 = vld [vmem:[#allocation111_spill] sm:$0xff] }
 0xfc7   : > { %15385 = vmatpush3.bf16.msra.mxu1 %v20921_v51  ;;  %9831 = vmatprep.mubr.bf16.mxu0 %v20571_v14 }
 0xfc8   : > { %15394 = vmatprep.subr.bf16.mxu1 %v20940_v52 }
 0xfc9   : > { %v8695_v44 = vpop.f32.mrb[68].mxu0 }
 0xfca   : > { %v8697_v22 = vpop.f32.mrb[69].mxu0 }
 0xfcb   : > { %v8698_v46 = vpop.f32.mrb[70].mxu0 }
 0xfcc   : > { %v8800_v17 = vpack.c.bf16 %v8698_v46, %v8695_v44  ;;  %v8700_v53 = vpop.f32.mrb[71].mxu0 }
 0xfce   : > { %15380 = vmatprep.mubr.msk.bf16.mxu1 %vm3899_vm1, %v8800_v17  ;;  %9832 = vmatmul.mubr.bf16.gmra.mrb[176].mxu0 %v20577_v37 }
 0xfcf   : > { %9839 = vmatprep.mubr.bf16.mxu0 %v20583_v31 }
 0xfd1   : > { %v8703_v45 = vpop.f32.mrb[72].mxu0 }
 0xfd2   : > { %v8705_v14 = vpop.f32.mrb[73].mxu0 }
 0xfd3   : > { %v8706_v35 = vpop.f32.mrb[74].mxu0  ;;  %v23321_v14 = vld [vmem:[#allocation116_spill] sm:$0xff] }
 0xfd4   : > { %v8801_v56 = vpack.c.bf16 %v8706_v35, %v8703_v45  ;;  %v8708_v32 = vpop.f32.mrb[75].mxu0  ;;  %v23320_v45 = vld [vmem:[#allocation113_spill] sm:$0xff]  ;;  %v23322_v35 = vld [vmem:[#allocation115_spill] sm:$0xff] }
 0xfd5   : > { %v23324_v32 = vld [vmem:[#allocation118_spill] sm:$0xff] }
 0xfd6   : > { %15381 = vmatmul.mubr.msk.bf16.gmra.mrb[168].mxu1 %vm3899_vm1, %v8801_v56  ;;  %9840 = vmatmul.mubr.bf16.gmra.mrb[180].mxu0 %v20589_v7  ;;  %v23323_v56 = vld [vmem:[#allocation107_spill] sm:$0xff] }
 0xfd7   : > { %9847 = vmatprep.mubr.bf16.mxu0 %v20595_v12 }
 0xfd9   : > { %v8711_v34 = vpop.f32.mrb[76].mxu0 }
 0xfda   : > { %v8713_v36 = vpop.f32.mrb[77].mxu0 }
 0xfdb   : > { %v8714_v58 = vpop.f32.mrb[78].mxu0  ;;  %v23326_v36 = vld [vmem:[#allocation120_spill] sm:$0xff] }
 0xfdc   : > { %v8802_v48 = vpack.c.bf16 %v8714_v58, %v8711_v34  ;;  %v8716_v4 = vpop.f32.mrb[79].mxu0  ;;  %v23325_v34 = vld [vmem:[#allocation117_spill] sm:$0xff]  ;;  %v23327_v58 = vld [vmem:[#allocation119_spill] sm:$0xff] }
 0xfdd   : > { %v23329_v4 = vld [vmem:[#allocation121_spill] sm:$0xff] }
 0xfde   : > { %15386 = vmatprep.mubr.msk.bf16.mxu1 %vm3899_vm1, %v8802_v48  ;;  %9848 = vmatmul.mubr.bf16.gmra.mrb[184].mxu0 %v20605_v8  ;;  %v23328_v48 = vld [vmem:[#allocation122_spill] sm:$0xff] }
 0xfdf   : > { %9855 = vmatprep.mubr.bf16.mxu0 %v20611_v59 }
 0xfe1   : > { %v8719_v37 = vpop.f32.mrb[80].mxu0 }
 0xfe2   : > { %v8721_v31 = vpop.f32.mrb[81].mxu0 }
 0xfe3   : > { %v8722_v60 = vpop.f32.mrb[82].mxu0  ;;  %v23331_v31 = vld [vmem:[#allocation123_spill] sm:$0xff] }
 0xfe4   : > { %v8803_v41 = vpack.c.bf16 %v8722_v60, %v8719_v37  ;;  %v8724_v26 = vpop.f32.mrb[83].mxu0  ;;  %v23330_v37 = vld [vmem:[#allocation124_spill] sm:$0xff]  ;;  %v23332_v60 = vld [vmem:[#allocation126_spill] sm:$0xff] }
 0xfe5   : > { %v23334_v26 = vld [vmem:[#allocation101_spill] sm:$0xff] }
 0xfe6   : > { %15387 = vmatmul.mubr.msk.bf16.vlgmr.msra.gmra.mrb[164].mxu1 %vm3899_vm1, %v8803_v41  ;;  %9856 = vmatmul.mubr.bf16.gmra.mrb[188].mxu0 %v20617_v1  ;;  %v23333_v41 = vld [vmem:[#allocation125_spill] sm:$0xff] }
 0xfe7   : > { %15395 = vmatpush3.bf16.msra.mxu1 %v20940_v52  ;;  %9863 = vmatprep.mubr.bf16.mxu0 %v20623_v54  ;;  %v23312_v54 = vld [vmem:[#allocation35_spill] sm:$0xff] }
 0xfe8   : > { %15404 = vmatprep.subr.bf16.mxu1 %v23233_v6 }
 0xfe9   : > { %v8727_v7 = vpop.f32.mrb[84].mxu0 }
 0xfea   : > { %v8729_v12 = vpop.f32.mrb[85].mxu0 }
 0xfeb   : > { %v8730_v8 = vpop.f32.mrb[86].mxu0  ;;  %v23336_v12 = vld [vmem:[#allocation102_spill] sm:$0xff] }
 0xfec   : > { %v8804_v3 = vpack.c.bf16 %v8730_v8, %v8727_v7  ;;  %v8732_v59 = vpop.f32.mrb[87].mxu0  ;;  %v23335_v7 = vld [vmem:[#allocation103_spill] sm:$0xff] }
 0xfee   : > { %15390 = vmatprep.mubr.msk.bf16.mxu1 %vm3899_vm1, %v8804_v3  ;;  %9864 = vmatmul.mubr.bf16.gmra.mrb[192].mxu0 %v23310_v18 }
 0xfef   : > { %9871 = vmatprep.mubr.bf16.mxu0 %v23311_v40 }
 0xff1   : > { %v8735_v20 = vpop.f32.mrb[88].mxu0 }
 0xff2   : > { %v8737_v30 = vpop.f32.mrb[89].mxu0 }
 0xff3   : > { %v8738_v1 = vpop.f32.mrb[90].mxu0 }
 0xff4   : > { %v8805_v15 = vpack.c.bf16 %v8738_v1, %v8735_v20  ;;  %v8740_v28 = vpop.f32.mrb[91].mxu0 }
 0xff6   : > { %15391 = vmatmul.mubr.msk.bf16.gmra.mrb[168].mxu1 %vm3899_vm1, %v8805_v15  ;;  %9872 = vmatmul.mubr.bf16.gmra.mrb[196].mxu0 %v23312_v54 }
 0xff7   : > { %9879 = vmatprep.mubr.bf16.mxu0 %v23313_v25 }
 0xff9   : > { %v8743_v62 = vpop.f32.mrb[92].mxu0 }
 0xffa   : > { %v8745_v0 = vpop.f32.mrb[93].mxu0 }
 0xffb   : > { %v8746_v42 = vpop.f32.mrb[94].mxu0 }
 0xffc   : > { %v8806_v19 = vpack.c.bf16 %v8746_v42, %v8743_v62  ;;  %v8748_v38 = vpop.f32.mrb[95].mxu0 }
 0xffd   : > { %v21017_v38 = vld [vmem:[%s22628_s5] ss:$0 sm:$0xff] }
 0xffe   : > { %15396 = vmatprep.mubr.msk.bf16.mxu1 %vm3899_vm1, %v8806_v19  ;;  %9880 = vmatmul.mubr.bf16.gmra.mrb[200].mxu0 %v23314_v49  ;;  %23337 = vst [vmem:[#allocation5_spill] sm:$0xff] %v21017_v38 }
 0xfff   : > { %9887 = vmatprep.mubr.bf16.mxu0 %v23315_v57 }
0x1001   : > { %v8751_v11 = vpop.f32.mrb[96].mxu0 }
0x1002   : > { %v8753_v61 = vpop.f32.mrb[97].mxu0 }
0x1003   : > { %v8754_v63 = vpop.f32.mrb[98].mxu0 }
0x1004   : > { %v8807_v16 = vpack.c.bf16 %v8754_v63, %v8751_v11  ;;  %v8756_v55 = vpop.f32.mrb[99].mxu0 }
0x1006   : > { %15397 = vmatmul.mubr.msk.bf16.vlgmr.msra.gmra.mrb[164].mxu1 %vm3899_vm1, %v8807_v16  ;;  %9888 = vmatmul.mubr.bf16.gmra.mrb[204].mxu0 %v23316_v47 }
0x1007   : > { %9895 = vmatprep.mubr.bf16.mxu0 %v23317_v2 }
0x1009   : > { %v8759_v10 = vpop.f32.mrb[100].mxu0 }
0x100a   : > { %v8761_v50 = vpop.f32.mrb[101].mxu0 }
0x100b   : > { %v8762_v24 = vpop.f32.mrb[102].mxu0 }
0x100c   : > { %v8808_v29 = vpack.c.bf16 %v8762_v24, %v8759_v10  ;;  %v8764_v9 = vpop.f32.mrb[103].mxu0 }
0x100e   : > { %15400 = vmatprep.mubr.msk.bf16.mxu1 %vm3899_vm1, %v8808_v29  ;;  %9896 = vmatmul.mubr.bf16.gmra.mrb[208].mxu0 %v23318_v33 }
0x100f   : > { %9903 = vmatprep.mubr.bf16.mxu0 %v23319_v21 }
0x1011   : > { %v8767_v44 = vpop.f32.mrb[104].mxu0 }
0x1012   : > { %v8769_v22 = vpop.f32.mrb[105].mxu0 }
0x1013   : > { %v8770_v46 = vpop.f32.mrb[106].mxu0 }
0x1014   : > { %v8809_v17 = vpack.c.bf16 %v8770_v46, %v8767_v44  ;;  %v8772_v53 = vpop.f32.mrb[107].mxu0 }
0x1016   : > { %15401 = vmatmul.mubr.msk.bf16.gmra.mrb[168].mxu1 %vm3899_vm1, %v8809_v17  ;;  %9904 = vmatmul.mubr.bf16.gmra.mrb[212].mxu0 %v23320_v45 }
0x1017   : > { %15412 = vmatprep.mubr.msk.bf16.mxu1 %vm16968_vm2, %v23233_v6  ;;  %9911 = vmatprep.mubr.bf16.mxu0 %v23321_v14 }
0x1019   : > { %v20994_v8 = vpop.f32.mrb[108].mxu0 }
0x101a   : > { %v9699_v3 = vpop.f32.mrb[109].mxu0 }
0x101b   : > { %v20996_v59 = vpop.f32.mrb[110].mxu0 }
0x101c   : > { %v9702_v40 = vpop.f32.mrb[111].mxu0 }
0x101e   : > { %9912 = vmatmul.mubr.bf16.gmra.mrb[216].mxu0 %v23322_v35 }
0x101f   : > { %9919 = vmatprep.mubr.bf16.mxu0 %v23323_v56 }
0x1021   : > { %v21000_v20 = vpop.f32.mrb[112].mxu0 }
0x1022   : > { %v9707_v30 = vpop.f32.mrb[113].mxu0 }
0x1023   : > { %v21002_v1 = vpop.f32.mrb[114].mxu0 }
0x1024   : > { %v9710_v15 = vpop.f32.mrb[115].mxu0 }
0x1026   : > { %9920 = vmatmul.mubr.bf16.gmra.mrb[220].mxu0 %v23324_v32 }
0x1027   : > { %9927 = vmatprep.mubr.bf16.mxu0 %v23325_v34 }
0x1029   : > { %v21006_v28 = vpop.f32.mrb[116].mxu0 }
0x102e   : > { %9928 = vmatmul.mubr.bf16.gmra.mrb[224].mxu0 %v23326_v36 }
0x102f   : > { %9935 = vmatprep.mubr.bf16.mxu0 %v23327_v58 }
0x1036   : > { %9936 = vmatmul.mubr.bf16.gmra.mrb[228].mxu0 %v23328_v48 }
0x1037   : > { %9943 = vmatprep.mubr.bf16.mxu0 %v23329_v4 }
0x103e   : > { %9944 = vmatmul.mubr.bf16.gmra.mrb[232].mxu0 %v23330_v37 }
0x103f   : > { %9951 = vmatprep.mubr.bf16.mxu0 %v23331_v31 }
0x1046   : > { %9952 = vmatmul.mubr.bf16.gmra.mrb[236].mxu0 %v23332_v60 }
0x1047   : > { %9959 = vmatprep.mubr.bf16.mxu0 %v23333_v41 }
0x104e   : > { %9960 = vmatmul.mubr.bf16.gmra.mrb[240].mxu0 %v23334_v26 }
0x104f   : > { %9967 = vmatprep.mubr.bf16.mxu0 %v23335_v7 }
0x1056   : > { %9968 = vmatmul.mubr.bf16.gmra.mrb[244].mxu0 %v20814_v23 }
0x1057   : > { %9975 = vmatprep.mubr.bf16.mxu0 %v23336_v12 }
0x105e   : > { %9976 = vmatmul.mubr.bf16.gmra.mrb[248].mxu0 %v20831_v39  ;;  %v9715_v39 = vpop.f32.mrb[117].mxu0 }
0x105f   : > { %v21008_v54 = vpop.f32.mrb[118].mxu0 }
0x1060   : > { %v9718_v62 = vpop.f32.mrb[119].mxu0 }
0x1061   : > { %v21012_v0 = vpop.f32.mrb[120].mxu0 }
0x1062   : > { %v9723_v42 = vpop.f32.mrb[121].mxu0 }
0x1063   : > { %v21020_v11 = vpop.f32.mrb[122].mxu0 }
0x1064   : > { %v9726_v16 = vpop.f32.mrb[123].mxu0 }
0x1065   : > { %v21027_v21 = vpop.f32.mrb[124].mxu0 }
0x1066   : > { %v9731_v22 = vpop.f32.mrb[125].mxu0 }
0x1067   : > { %v21029_v46 = vpop.f32.mrb[126].mxu0 }
0x1068   : > { %v9734_v17 = vpop.f32.mrb[127].mxu0 }
0x1069   : > { %v21035_v45 = vpop.f32.mrb[128].mxu0 }
0x106a   : > { %v9739_v35 = vpop.f32.mrb[129].mxu0 }
0x106b   : > { %v21038_v34 = vpop.f32.mrb[130].mxu0 }
0x106c   : > { %v9742_v48 = vpop.f32.mrb[131].mxu0 }
0x106d   : > { %v21045_v40 = vpop.f32.mrb[132].mxu0 }
0x106e   : > { %v9747_v15 = vpop.f32.mrb[133].mxu0 }
0x106f   : > { %v21047_v39 = vpop.f32.mrb[134].mxu0 }
0x1070   : > { %v9750_v62 = vpop.f32.mrb[135].mxu0 }
0x10d9   : > { %v15398_v19 = vpop.f32.mrb[164].mxu1 }
0x10da   : > { %v9561_v49 = vadd.f32 %v21017_v38, %v15398_v19  ;;  %v9520_v57 = vpop.f32.mrb[165].mxu1  ;;  %v21053_v19 = vpop.f32.mrb[136].mxu0 }
0x10db   : > { %v9559_v61 = vadd.f32 %v21017_v38, %v9520_v57  ;;  %v15399_v63 = vpop.f32.mrb[166].mxu1  ;;  %v21058_v57 = vld [vmem:[%s22629_s6] sm:$0x1] }
0x10dc   : > { %v9562_v55 = vadd.f32 %v21017_v38, %v15399_v63  ;;  %v9523_v47 = vpop.f32.mrb[167].mxu1  ;;  %v9569_v50 = vmax.f32 %v9561_v49, 0.0  ;;  %v9755_v49 = vpop.f32.mrb[137].mxu0  ;;  %23338 = vst [vmem:[#allocation13_spill] sm:$0xff] %v21058_v57  ;;  %v21067_v63 = vld [vmem:[%s22630_s7] sm:$0xff]  }
0x10dd   : > { %v9560_v10 = vadd.f32 %v21017_v38, %v9523_v47  ;;  %v9567_v29 = vmax.f32 %v9559_v61, 0.0  ;;  %v21062_v61 = vpop.f32.mrb[138].mxu0  ;;  %23339 = vst [vmem:[#allocation14_spill] sm:$0xff] %v21067_v63  ;;  %v21078_v47 = vld [vmem:[%s22630_s7 + $0x8] sm:$0xff]  }
0x10de   : > { %v9570_v24 = vmax.f32 %v9562_v55, 0.0  ;;  %v9758_v16 = vpop.f32.mrb[139].mxu0  ;;  %23340 = vst [vmem:[#allocation8_spill] sm:$0xff] %v21078_v47 }
0x10df   : > { %v9568_v9 = vmax.f32 %v9560_v10, 0.0  ;;  %v21084_v10 = vld [vmem:[%s22627_s4 + $0x8] sm:$0xff]  }
0x10e0   : > { %v9576_v33 = vpack.c.bf16 %v9570_v24, %v9569_v50  ;;  %v21087_v50 = vpop.f32.mrb[140].mxu0 }
0x10e1   : > { %v9575_v44 = vpack.c.bf16 %v9568_v9, %v9567_v29  ;;  %v9763_v24 = vpop.f32.mrb[141].mxu0 }
0x10e2   : > { %v21089_v29 = vpop.f32.mrb[142].mxu0 }
0x10e3   : > { %15405 = vmatpush3.bf16.msra.mxu1 %v9575_v44  ;;  %v9766_v9 = vpop.f32.mrb[143].mxu0 }
0x10e4   : > { %15406 = vmatprep.subr.bf16.mxu1 %v23233_v6  ;;  %v21093_v44 = vpop.f32.mrb[144].mxu0 }
0x10e5   : > { %v9771_v22 = vpop.f32.mrb[145].mxu0 }
0x10e6   : > { %v21095_v17 = vpop.f32.mrb[146].mxu0 }
0x10e7   : > { %15407 = vmatpush3.bf16.msra.mxu1 %v9576_v33 }
0x10e8   : > { %15408 = vmatprep.subr.bf16.mxu1 %v23233_v6 }
0x10e9   : > { %v15402_v14 = vpop.f32.mrb[168].mxu1 }
0x10ea   : > { %v9565_v56 = vadd.f32 %v21017_v38, %v15402_v14  ;;  %v9536_v32 = vpop.f32.mrb[169].mxu1  ;;  %v9774_v14 = vpop.f32.mrb[147].mxu0 }
0x10eb   : > { %v9563_v36 = vadd.f32 %v21017_v38, %v9536_v32  ;;  %v15403_v58 = vpop.f32.mrb[170].mxu1 }
0x10ec   : > { %v9566_v4 = vadd.f32 %v21017_v38, %v15403_v58  ;;  %v9539_v37 = vpop.f32.mrb[171].mxu1  ;;  %v9573_v41 = vmax.f32 %v9565_v56, 0.0  ;;  %v21099_v56 = vpop.f32.mrb[148].mxu0 }
0x10ed   : > { %v9564_v60 = vadd.f32 %v21017_v38, %v9539_v37  ;;  %v9571_v7 = vmax.f32 %v9563_v36, 0.0  ;;  %v9779_v32 = vpop.f32.mrb[149].mxu0 }
0x10ee   : > { %v9574_v26 = vmax.f32 %v9566_v4, 0.0  ;;  %v21101_v36 = vpop.f32.mrb[150].mxu0 }
0x10ef   : > { %v9572_v12 = vmax.f32 %v9564_v60, 0.0  ;;  %v9782_v58 = vpop.f32.mrb[151].mxu0 }
0x10f0   : > { %v9578_v3 = vpack.c.bf16 %v9574_v26, %v9573_v41  ;;  %v21105_v4 = vpop.f32.mrb[152].mxu0 }
0x10f1   : > { %v9577_v30 = vpack.c.bf16 %v9572_v12, %v9571_v7  ;;  %v9787_v37 = vpop.f32.mrb[153].mxu0 }
0x10f2   : > { %v21107_v60 = vpop.f32.mrb[154].mxu0 }
0x10f3   : > { %15409 = vmatpush3.bf16.msra.mxu1 %v9577_v30  ;;  %v9790_v41 = vpop.f32.mrb[155].mxu0 }
0x10f4   : > { %15410 = vmatprep.subr.bf16.mxu1 %v23233_v6  ;;  %v21111_v7 = vpop.f32.mrb[156].mxu0 }
0x10f5   : > { %v9795_v12 = vpop.f32.mrb[157].mxu0 }
0x10f7   : > { %15411 = vmatpush3.bf16.msra.mxu1 %v9578_v3  ;;  %v21113_v3 = vpop.f32.mrb[158].mxu0 }
0x10f8   : > { %15416 = vmatprep.subr.bf16.mxu1 %v23233_v6  ;;  %v9798_v30 = vpop.f32.mrb[159].mxu0 }
0x10f9   : > { %v21117_v62 = vpop.f32.mrb[160].mxu0 }
0x10fa   : > { %15413 = vmatmul.mubr.msk.bf16.vlgmr.msra.gmra.mrb[172].mxu1 %vm4723_vm3, %v21058_v57  ;;  %v9803_v49 = vpop.f32.mrb[161].mxu0 }
0x10fb   : > { %15417 = vmatpush3.bf16.msra.mxu1 %v21067_v63  ;;  %15420 = vmatprep.mubr.msk.bf16.mxu1 %vm16968_vm2, %v23233_v6  ;;  %v21119_v16 = vpop.f32.mrb[162].mxu0 }
0x10fc   : > { %15418 = vmatprep.subr.bf16.mxu1 %v23233_v6  ;;  %v9806_v24 = vpop.f32.mrb[163].mxu0 }
0x10fd   : > { %v21123_v22 = vpop.f32.mrb[164].mxu0 }
0x10fe   : > { %v9811_v14 = vpop.f32.mrb[165].mxu0 }
0x10ff   : > { %15419 = vmatpush3.bf16.msra.mxu1 %v21078_v47  ;;  %v21125_v32 = vpop.f32.mrb[166].mxu0 }
0x1100   : > { %15424 = vmatprep.subr.bf16.mxu1 %v21084_v10  ;;  %v9814_v58 = vpop.f32.mrb[167].mxu0 }
0x1101   : > { %v21129_v41 = vpop.f32.mrb[168].mxu0 }
0x1102   : > { %v9819_v12 = vpop.f32.mrb[169].mxu0 }
0x1103   : > { %v21131_v30 = vpop.f32.mrb[170].mxu0 }
0x1104   : > { %v9822_v49 = vpop.f32.mrb[171].mxu0 }
0x1105   : > { %v21135_v15 = vpop.f32.mrb[172].mxu0 }
0x1106   : > { %v9827_v9 = vpop.f32.mrb[173].mxu0 }
0x1107   : > { %v21137_v26 = vpop.f32.mrb[174].mxu0 }
0x1108   : > { %v9830_v14 = vpop.f32.mrb[175].mxu0 }
0x1109   : > { %v21141_v48 = vpop.f32.mrb[176].mxu0 }
0x110a   : > { %v9835_v37 = vpop.f32.mrb[177].mxu0 }
0x110b   : > { %v21143_v35 = vpop.f32.mrb[178].mxu0 }
0x110c   : > { %v9838_v12 = vpop.f32.mrb[179].mxu0 }
0x110d   : > { %v21147_v33 = vpop.f32.mrb[180].mxu0 }
0x110e   : > { %v9843_v24 = vpop.f32.mrb[181].mxu0 }
0x110f   : > { %v21149_v2 = vpop.f32.mrb[182].mxu0 }
0x1110   : > { %v9846_v9 = vpop.f32.mrb[183].mxu0 }
0x1111   : > { %v21153_v25 = vpop.f32.mrb[184].mxu0 }
0x1112   : > { %v9851_v58 = vpop.f32.mrb[185].mxu0 }
0x1113   : > { %v21155_v23 = vpop.f32.mrb[186].mxu0 }
0x1114   : > { %v9854_v37 = vpop.f32.mrb[187].mxu0 }
0x1115   : > { %v21159_v18 = vpop.f32.mrb[188].mxu0 }
0x1116   : > { %v9859_v49 = vpop.f32.mrb[189].mxu0 }
0x1117   : > { %v21161_v55 = vpop.f32.mrb[190].mxu0 }
0x1118   : > { %v9862_v24 = vpop.f32.mrb[191].mxu0 }
0x1119   : > { %v21165_v42 = vpop.f32.mrb[192].mxu0 }
0x111a   : > { %v9867_v14 = vpop.f32.mrb[193].mxu0 }
0x111b   : > { %v21167_v31 = vpop.f32.mrb[194].mxu0 }
0x111c   : > { %v9870_v58 = vpop.f32.mrb[195].mxu0 }
0x111d   : > { %v21171_v53 = vpop.f32.mrb[196].mxu0 }
0x111e   : > { %23341 = vst [vmem:[#allocation15_spill] sm:$0xff] %v21171_v53  ;;  %v9875_v12 = vpop.f32.mrb[197].mxu0 }
0x111f   : > { %v21173_v47 = vpop.f32.mrb[198].mxu0 }
0x1120   : > { %v9878_v49 = vpop.f32.mrb[199].mxu0 }
0x1121   : > { %v21177_v63 = vpop.f32.mrb[200].mxu0 }
0x1122   : > { %23342 = vst [vmem:[#allocation16_spill] sm:$0xff] %v21177_v63  ;;  %v9883_v9 = vpop.f32.mrb[201].mxu0 }
0x1123   : > { %v21179_v57 = vpop.f32.mrb[202].mxu0 }
0x1124   : > { %23343 = vst [vmem:[#allocation17_spill] sm:$0xff] %v21179_v57  ;;  %v9886_v14 = vpop.f32.mrb[203].mxu0 }
0x1125   : > { %v21183_v38 = vpop.f32.mrb[204].mxu0 }
0x1126   : > { %23344 = vst [vmem:[#allocation18_spill] sm:$0xff] %v21183_v38  ;;  %v9891_v37 = vpop.f32.mrb[205].mxu0 }
0x1127   : > { %v21185_v6 = vpop.f32.mrb[206].mxu0 }
0x1128   : > { %23345 = vst [vmem:[#allocation19_spill] sm:$0xff] %v21185_v6  ;;  %v9894_v12 = vpop.f32.mrb[207].mxu0 }
0x1129   : > { %v21189_v52 = vpop.f32.mrb[208].mxu0 }
0x112a   : > { %23346 = vst [vmem:[#allocation20_spill] sm:$0xff] %v21189_v52  ;;  %v9899_v24 = vpop.f32.mrb[209].mxu0 }
0x112b   : > { %v21191_v51 = vpop.f32.mrb[210].mxu0 }
0x112c   : > { %23347 = vst [vmem:[#allocation21_spill] sm:$0xff] %v21191_v51  ;;  %v9902_v9 = vpop.f32.mrb[211].mxu0 }
0x112d   : > { %v21195_v53 = vpop.f32.mrb[212].mxu0 }
0x112e   : > { %23348 = vst [vmem:[#allocation22_spill] sm:$0xff] %v21195_v53  ;;  %v9907_v58 = vpop.f32.mrb[213].mxu0 }
0x112f   : > { %v21197_v63 = vpop.f32.mrb[214].mxu0 }
0x1130   : > { %23349 = vst [vmem:[#allocation7_spill] sm:$0xff] %v21197_v63  ;;  %v9910_v37 = vpop.f32.mrb[215].mxu0 }
0x1131   : > { %v21201_v57 = vpop.f32.mrb[216].mxu0 }
0x1132   : > { %23350 = vst [vmem:[#allocation23_spill] sm:$0xff] %v21201_v57  ;;  %v9915_v49 = vpop.f32.mrb[217].mxu0 }
0x1133   : > { %v21203_v38 = vpop.f32.mrb[218].mxu0 }
0x1134   : > { %23351 = vst [vmem:[#allocation24_spill] sm:$0xff] %v21203_v38  ;;  %v9918_v24 = vpop.f32.mrb[219].mxu0 }
0x1135   : > { %v21207_v6 = vpop.f32.mrb[220].mxu0 }
0x1136   : > { %23352 = vst [vmem:[#allocation25_spill] sm:$0xff] %v21207_v6  ;;  %v9923_v14 = vpop.f32.mrb[221].mxu0 }
0x1137   : > { %v21209_v52 = vpop.f32.mrb[222].mxu0 }
0x1138   : > { %23353 = vst [vmem:[#allocation26_spill] sm:$0xff] %v21209_v52  ;;  %v9926_v58 = vpop.f32.mrb[223].mxu0 }
0x1139   : > { %v21213_v51 = vpop.f32.mrb[224].mxu0 }
0x113a   : > { %23354 = vst [vmem:[#allocation27_spill] sm:$0xff] %v21213_v51  ;;  %v9931_v12 = vpop.f32.mrb[225].mxu0 }
0x113b   : > { %v21215_v53 = vpop.f32.mrb[226].mxu0 }
0x113c   : > { %23355 = vst [vmem:[#allocation28_spill] sm:$0xff] %v21215_v53  ;;  %v9934_v49 = vpop.f32.mrb[227].mxu0 }
0x113d   : > { %v21219_v63 = vpop.f32.mrb[228].mxu0 }
0x113e   : > { %23356 = vst [vmem:[#allocation29_spill] sm:$0xff] %v21219_v63  ;;  %v9939_v9 = vpop.f32.mrb[229].mxu0 }
0x113f   : > { %v21221_v57 = vpop.f32.mrb[230].mxu0 }
0x1140   : > { %23357 = vst [vmem:[#allocation30_spill] sm:$0xff] %v21221_v57  ;;  %v9942_v14 = vpop.f32.mrb[231].mxu0 }
0x1141   : > { %v21225_v38 = vpop.f32.mrb[232].mxu0 }
0x1142   : > { %23358 = vst [vmem:[#allocation31_spill] sm:$0xff] %v21225_v38  ;;  %v9947_v37 = vpop.f32.mrb[233].mxu0 }
0x1143   : > { %v21227_v6 = vpop.f32.mrb[234].mxu0 }
0x1144   : > { %23359 = vst [vmem:[#allocation32_spill] sm:$0xff] %v21227_v6  ;;  %v9950_v12 = vpop.f32.mrb[235].mxu0 }
0x1145   : > { %v21231_v52 = vpop.f32.mrb[236].mxu0  ;;  %v21254_v12 = vld [vmem:[%s22627_s4] sm:$0xff]  }
0x1146   : > { %v9955_v24 = vpop.f32.mrb[237].mxu0 }
0x1147   : > { %v21233_v51 = vpop.f32.mrb[238].mxu0 }
0x1148   : > { %v9958_v9 = vpop.f32.mrb[239].mxu0  ;;  %v10016_v14 = vpack.c.bf16 %v21233_v51, %v21231_v52 }
0x1149   : > { %v21237_v53 = vpop.f32.mrb[240].mxu0 }
0x114a   : > { %v9963_v58 = vpop.f32.mrb[241].mxu0 }
0x114b   : > { %v21239_v63 = vpop.f32.mrb[242].mxu0  ;;  %v23360_v58 = vpack.c.bf16 %v21029_v46, %v21027_v21  ;;  %v23362_v46 = vpack.c.bf16 %v21047_v39, %v21045_v40  ;;  %v23364_v40 = vpack.c.bf16 %v20996_v59, %v20994_v8  ;;  %v23365_v39 = vpack.c.bf16 %v21002_v1, %v21000_v20 }
0x114c   : > { %v9966_v37 = vpop.f32.mrb[243].mxu0  ;;  %v23368_v8 = vpack.c.bf16 %v21089_v29, %v21087_v50  ;;  %v23369_v59 = vpack.c.bf16 %v21095_v17, %v21093_v44  ;;  %v23370_v20 = vpack.c.bf16 %v21101_v36, %v21099_v56  ;;  %v23371_v1 = vpack.c.bf16 %v21107_v60, %v21105_v4  ;;  %v23395_v36 = vld [vmem:[#allocation22_spill] sm:$0xff]  ;;  %v23398_v4 = vld [vmem:[#allocation24_spill] sm:$0xff]  ;;  %v23399_v60 = vld [vmem:[#allocation23_spill] sm:$0xff] }
0x114d   : > { %v21244_v24 = vpop.f32.mrb[244].mxu0  ;;  %v23379_v50 = vpack.c.bf16 %v21155_v23, %v21153_v25  ;;  %v23380_v29 = vpack.c.bf16 %v21161_v55, %v21159_v18  ;;  %v23381_v44 = vpack.c.bf16 %v21167_v31, %v21165_v42  ;;  %v23384_v23 = vld [vmem:[#allocation105_spill] sm:$0xff]  ;;  %v23388_v18 = vld [vmem:[#allocation19_spill] sm:$0xff]  ;;  %v23389_v55 = vld [vmem:[#allocation18_spill] sm:$0xff] }
0x114e   : > { %v9971_v37 = vpop.f32.mrb[245].mxu0  ;;  %v23385_v25 = vld [vmem:[#allocation17_spill] sm:$0xff]  ;;  %v23392_v42 = vld [vmem:[#allocation20_spill] sm:$0xff] }
0x114f   : > { %v23366_v37 = vpack.c.bf16 %v21008_v54, %v21006_v28  ;;  %v23372_v28 = vpack.c.bf16 %v21113_v3, %v21111_v7  ;;  %v23373_v54 = vpack.c.bf16 %v21119_v16, %v21117_v62  ;;  %v23391_v31 = vld [vmem:[#allocation21_spill] sm:$0xff]  ;;  %v23401_v7 = vld [vmem:[#allocation26_spill] sm:$0xff]  ;;  %v23404_v62 = vld [vmem:[#allocation28_spill] sm:$0xff] }
0x1150   : > { %v23393_v56 = vpack.c.bf16 %v23391_v31, %v23392_v42  ;;  %v23402_v3 = vld [vmem:[#allocation25_spill] sm:$0xff]  ;;  %v23405_v16 = vld [vmem:[#allocation27_spill] sm:$0xff]  ;;  %v23418_v42 = vld [vmem:[#allocation14_spill] sm:$0xff] }
0x1151   : > { %v23417_v31 = vld [vmem:[#allocation13_spill] sm:$0xff] }
0x11cd   : > { %v9613_v57 = vpop.f32.mrb[172].mxu1 }
0x11ce   : > { %v9619_v49 = vpack.c.bf16 %v9613_v57, %v9613_v57  ;;  %v15414_v38 = vpop.f32.mrb[173].mxu1 }
0x11cf   : > { %v9616_v6 = vpop.f32.mrb[174].mxu1 }
0x11d0   : > { %15421 = vmatmul.mubr.msk.bf16.vlgmr.msra.gmra.mrb[176].mxu1 %vm1253_vm0, %v9619_v49  ;;  %v15415_v9 = vpop.f32.mrb[175].mxu1  ;;  %v9972_v6 = vpop.f32.mrb[246].mxu0 }
0x11d1   : > { %15425 = vmatpush3.bf16.msra.mxu1 %v21084_v10  ;;  %15426 = vmatprep.mubr.msk.bf16.mxu1 %vm3899_vm1, %v23360_v58  ;;  %v9974_v38 = vpop.f32.mrb[247].mxu0  ;;  %v10018_v57 = vpack.c.bf16 %v9972_v6, %v21244_v24  ;;  %v23361_v10 = vpack.c.bf16 %v21038_v34, %v21035_v45  ;;  %v21270_v9 = vld [vmem:[%s22627_s4 + $0x10] sm:$0xff]   ;;  %v23363_v58 = vpack.c.bf16 %v21062_v61, %v21053_v19  ;;  %v23410_v6 = vmov 0.0  }
0x11d2   : > { %15434 = vmatprep.subr.bf16.mxu1 %v21254_v12  ;;  %v9977_v21 = vpop.f32.mrb[248].mxu0  ;;  %v23367_v19 = vpack.c.bf16 %v21020_v11, %v21012_v0  ;;  %v23375_v0 = vpack.c.bf16 %v21131_v30, %v21129_v41  ;;  %v23376_v11 = vpack.c.bf16 %v21137_v26, %v21135_v15  ;;  %v23377_v61 = vpack.c.bf16 %v21143_v35, %v21141_v48  ;;  %v23397_v48 = vld [vmem:[#allocation6_spill] sm:$0xff]  ;;  %v23408_v41 = vld [vmem:[#allocation29_spill] sm:$0xff]  ;;  %v23411_v38 = vld [vmem:[#allocation32_spill] sm:$0xff] }
0x11d3   : > { %v9979_v49 = vpop.f32.mrb[249].mxu0  ;;  %v23390_v35 = vpack.c.bf16 %v23388_v18, %v23389_v55  ;;  %v23400_v26 = vpack.c.bf16 %v23398_v4, %v23399_v60  ;;  %v23403_v15 = vpack.c.bf16 %v23401_v7, %v23402_v3  ;;  %v21449_v7 = vld [vmem:[%s22626_s3 + $0x4] ss:$8 sps:$4 sm:$0xff]   ;;  %v23422_v3 = vld [vmem:[#allocation69_spill] sm:$0xff] }
0x11d4   : > { %v9980_v24 = vpop.f32.mrb[250].mxu0 }
0x11d5   : > { %v10019_v45 = vpack.c.bf16 %v9980_v24, %v9977_v21  ;;  %v9982_v34 = vpop.f32.mrb[251].mxu0  ;;  %v21418_v24 = vld [vmem:[%s22631_s8] sm:$0x1] }
0x11d6   : > { %v23415_v34 = vld [vmem:[#allocation34_spill] sm:$0xff] }
0x11d8   : > { %15427 = vmatmul.mubr.msk.bf16.vlgmr.msra.gmra.mrb[180].mxu1 %vm3899_vm1, %v23361_v10  ;;  %v23412_v10 = vld [vmem:[#allocation31_spill] sm:$0xff] }
0x11d9   : > { %15430 = vmatprep.mubr.msk.bf16.mxu1 %vm3899_vm1, %v23362_v46  ;;  %15435 = vmatpush3.bf16.msra.mxu1 %v21254_v12  ;;  %v23413_v21 = vpack.c.bf16 %v23411_v38, %v23412_v10  ;;  %v23414_v46 = vpack.c.bf16 %v21239_v63, %v21237_v53  ;;  %v23430_v38 = vld [vmem:[#allocation77_spill] sm:$0xff]  ;;  %v23431_v10 = vld [vmem:[#allocation80_spill] sm:$0xff] }
0x11da   : > { %15444 = vmatprep.subr.bf16.mxu1 %v21270_v9 }
0x11e0   : > { %15431 = vmatmul.mubr.msk.bf16.gmra.mrb[184].mxu1 %vm3899_vm1, %v23363_v58  ;;  %v23416_v58 = vld [vmem:[#allocation5_spill] sm:$0xff] }
0x11e1   : > { %15436 = vmatprep.mubr.msk.bf16.mxu1 %vm3899_vm1, %v23364_v40 }
0x11e8   : > { %15437 = vmatmul.mubr.msk.bf16.vlgmr.msra.gmra.mrb[180].mxu1 %vm3899_vm1, %v23365_v39 }
0x11e9   : > { %15440 = vmatprep.mubr.msk.bf16.mxu1 %vm3899_vm1, %v23366_v37  ;;  %15445 = vmatpush3.bf16.msra.mxu1 %v21270_v9 }
0x11ea   : > { %15454 = vmatprep.subr.bf16.mxu1 %v20846_v43 }
0x11f0   : > { %15441 = vmatmul.mubr.msk.bf16.gmra.mrb[184].mxu1 %vm3899_vm1, %v23367_v19 }
0x11f1   : > { %15446 = vmatprep.mubr.msk.bf16.mxu1 %vm3899_vm1, %v23368_v8 }
0x11f8   : > { %15447 = vmatmul.mubr.msk.bf16.vlgmr.msra.gmra.mrb[180].mxu1 %vm3899_vm1, %v23369_v59 }
0x11f9   : > { %15450 = vmatprep.mubr.msk.bf16.mxu1 %vm3899_vm1, %v23370_v20  ;;  %15455 = vmatpush3.bf16.msra.mxu1 %v20846_v43  ;;  %v23374_v43 = vpack.c.bf16 %v21125_v32, %v21123_v22  ;;  %v23406_v22 = vpack.c.bf16 %v23404_v62, %v23405_v16  ;;  %v23407_v32 = vld [vmem:[#allocation30_spill] sm:$0xff]  ;;  %v23424_v62 = vld [vmem:[#allocation71_spill] sm:$0xff] }
0x11fa   : > { %15464 = vmatprep.subr.bf16.mxu1 %v20866_v27  ;;  %v23409_v30 = vpack.c.bf16 %v23407_v32, %v23408_v41  ;;  %v23425_v16 = vld [vmem:[#allocation74_spill] sm:$0xff]  ;;  %v23427_v32 = vld [vmem:[#allocation76_spill] sm:$0xff]  ;;  %v23428_v41 = vld [vmem:[#allocation75_spill] sm:$0xff] }
0x1200   : > { %15451 = vmatmul.mubr.msk.bf16.gmra.mrb[184].mxu1 %vm3899_vm1, %v23371_v1 }
0x1201   : > { %15456 = vmatprep.mubr.msk.bf16.mxu1 %vm3899_vm1, %v23372_v28 }
0x1208   : > { %15457 = vmatmul.mubr.msk.bf16.vlgmr.msra.gmra.mrb[180].mxu1 %vm3899_vm1, %v23373_v54 }
0x1209   : > { %15460 = vmatprep.mubr.msk.bf16.mxu1 %vm3899_vm1, %v23374_v43  ;;  %15465 = vmatpush3.bf16.msra.mxu1 %v20866_v27  ;;  %v23378_v27 = vpack.c.bf16 %v21149_v2, %v21147_v33  ;;  %v23382_v2 = vld [vmem:[#allocation15_spill] sm:$0xff]  ;;  %v23386_v33 = vld [vmem:[#allocation16_spill] sm:$0xff] }
0x120a   : > { %15474 = vmatprep.subr.bf16.mxu1 %v20883_v5  ;;  %v23387_v17 = vpack.c.bf16 %v23385_v25, %v23386_v33 }
0x1210   : > { %15461 = vmatmul.mubr.msk.bf16.gmra.mrb[184].mxu1 %vm3899_vm1, %v23375_v0 }
0x1211   : > { %15466 = vmatprep.mubr.msk.bf16.mxu1 %vm3899_vm1, %v23376_v11 }
0x1218   : > { %15467 = vmatmul.mubr.msk.bf16.vlgmr.msra.gmra.mrb[180].mxu1 %vm3899_vm1, %v23377_v61 }
0x1219   : > { %15470 = vmatprep.mubr.msk.bf16.mxu1 %vm3899_vm1, %v23378_v27  ;;  %15475 = vmatpush3.bf16.msra.mxu1 %v20883_v5  ;;  %v23383_v5 = vpack.c.bf16 %v21173_v47, %v23382_v2  ;;  %v23394_v47 = vld [vmem:[#allocation7_spill] sm:$0xff] }
0x121a   : > { %15484 = vmatprep.subr.bf16.mxu1 %v20902_v13 }
0x1220   : > { %15471 = vmatmul.mubr.msk.bf16.gmra.mrb[184].mxu1 %vm3899_vm1, %v23379_v50 }
0x1221   : > { %15476 = vmatprep.mubr.msk.bf16.mxu1 %vm3899_vm1, %v23380_v29 }
0x1228   : > { %15477 = vmatmul.mubr.msk.bf16.vlgmr.msra.gmra.mrb[180].mxu1 %vm3899_vm1, %v23381_v44 }
0x1229   : > { %15480 = vmatprep.mubr.msk.bf16.mxu1 %vm3899_vm1, %v23383_v5  ;;  %15485 = vmatpush3.bf16.msra.mxu1 %v20902_v13  ;;  %v23396_v13 = vpack.c.bf16 %v23394_v47, %v23395_v36  ;;  %v23420_v47 = vmov 0  }
0x122a   : > { %15494 = vmatprep.subr.bf16.mxu1 %v23384_v23 }
0x1230   : > { %15481 = vmatmul.mubr.msk.bf16.gmra.mrb[184].mxu1 %vm3899_vm1, %v23387_v17 }
0x1231   : > { %15486 = vmatprep.mubr.msk.bf16.mxu1 %vm3899_vm1, %v23390_v35 }
0x1238   : > { %15487 = vmatmul.mubr.msk.bf16.vlgmr.msra.gmra.mrb[180].mxu1 %vm3899_vm1, %v23393_v56  ;;  %v23419_v56 = vld [vmem:[#allocation8_spill] sm:$0xff] }
0x1239   : > { %15490 = vmatprep.mubr.msk.bf16.mxu1 %vm3899_vm1, %v23396_v13  ;;  %15495 = vmatpush3.bf16.msra.mxu1 %v23384_v23 }
0x123a   : > { %15504 = vmatprep.subr.bf16.mxu1 %v23397_v48 }
0x1240   : > { %15491 = vmatmul.mubr.msk.bf16.gmra.mrb[184].mxu1 %vm3899_vm1, %v23400_v26  ;;  %v23421_v26 = vld [vmem:[#allocation70_spill] sm:$0xff] }
0x1241   : > { %15496 = vmatprep.mubr.msk.bf16.mxu1 %vm3899_vm1, %v23403_v15  ;;  %v23423_v15 = vld [vmem:[#allocation72_spill] sm:$0xff] }
0x1248   : > { %15497 = vmatmul.mubr.msk.bf16.vlgmr.msra.gmra.mrb[180].mxu1 %vm3899_vm1, %v23406_v22  ;;  %v23426_v22 = vld [vmem:[#allocation73_spill] sm:$0xff] }
0x1249   : > { %15500 = vmatprep.mubr.msk.bf16.mxu1 %vm3899_vm1, %v23409_v30  ;;  %15505 = vmatpush3.bf16.msra.mxu1 %v23397_v48  ;;  %v23429_v30 = vld [vmem:[#allocation78_spill] sm:$0xff] }
0x124a   : > { %15514 = vmatprep.subr.bf16.mxu1 %v23410_v6 }
0x1250   : > { %15501 = vmatmul.mubr.msk.bf16.gmra.mrb[184].mxu1 %vm3899_vm1, %v23413_v21  ;;  %v23432_v21 = vld [vmem:[#allocation79_spill] sm:$0xff] }
0x1251   : > { %15506 = vmatprep.mubr.msk.bf16.mxu1 %vm3899_vm1, %v10016_v14 }
0x1258   : > { %15507 = vmatmul.mubr.msk.bf16.vlgmr.msra.gmra.mrb[180].mxu1 %vm3899_vm1, %v23414_v46  ;;  %v23433_v46 = vld [vmem:[#allocation82_spill] sm:$0xff] }
0x1259   : > { %15510 = vmatprep.mubr.msk.bf16.mxu1 %vm3899_vm1, %v10018_v57 }
0x1260   : > { %15511 = vmatmul.mubr.msk.bf16.gmra.mrb[184].mxu1 %vm3899_vm1, %v10019_v45 }
0x1261   : > { %15522 = vmatprep.mubr.msk.bf16.mxu1 %vm16968_vm2, %v23410_v6 }
0x12a3   : > { %v9657_v49 = vpop.f32.mrb[176].mxu1 }
0x12a4   : > { %v9658_v51 = vadd.f32 %v21418_v24, %v9657_v49  ;;  %v15422_v52 = vpop.f32.mrb[177].mxu1  ;;  %v23434_v49 = vld [vmem:[#allocation81_spill] sm:$0xff] }
0x12a5   : > { %v9660_v53 = vpop.f32.mrb[178].mxu1  ;;  %v23436_v52 = vld [vmem:[#allocation83_spill] sm:$0xff] }
0x12a6   : > { %v13303_v63 = vrot.slane %v9658_v51, 4  ;;  %v15423_v14 = vpop.f32.mrb[179].mxu1  ;;  %v23435_v51 = vld [vmem:[#allocation84_spill] sm:$0xff] }
0x12a7   : > { %v21486_v53 = vld [vmem:[%s22626_s3] ss:$8 sps:$4 sm:$0xff]   ;;  %v21493_v14 = vld [vmem:[%s22626_s3 + $0x14] ss:$8 sps:$4 sm:$0xff]  }
0x12a8   : > { %v21422_v57 = vsel %vm13320_vm7, %v23415_v34, %v13303_v63  ;;  %v23437_v63 = vld [vmem:[#allocation86_spill] sm:$0xff]  ;;  %v23438_v34 = vld [vmem:[#allocation85_spill] sm:$0xff] }
0x132b   : > { %v15508_v45 = vpop.f32.mrb[180].mxu1 }
0x132c   : > { %v10771_v40 = vadd.f32 %v23416_v58, %v15508_v45  ;;  %v10730_v39 = vpop.f32.mrb[181].mxu1  ;;  %v21502_v45 = vld [vmem:[%s22626_s3 + $0x10] ss:$8 sps:$4 sm:$0xff]  }
0x132d   : > { %v10769_v37 = vadd.f32 %v23416_v58, %v10730_v39  ;;  %v15509_v19 = vpop.f32.mrb[182].mxu1  ;;  %v23440_v39 = vld [vmem:[#allocation87_spill] sm:$0xff] }
0x132e   : > { %v10772_v8 = vadd.f32 %v23416_v58, %v15509_v19  ;;  %v10733_v59 = vpop.f32.mrb[183].mxu1  ;;  %v10779_v1 = vmax.f32 %v10771_v40, 0.0  ;;  %v21509_v40 = vld [vmem:[%s22626_s3 + $0x24] ss:$8 sps:$4 sm:$0xff]   ;;  %v23441_v19 = vld [vmem:[#allocation90_spill] sm:$0xff] }
0x132f   : > { %v10770_v20 = vadd.f32 %v23416_v58, %v10733_v59  ;;  %v10777_v54 = vmax.f32 %v10769_v37, 0.0  ;;  %v21518_v37 = vld [vmem:[%s22626_s3 + $0x20] ss:$8 sps:$4 sm:$0xff]   ;;  %v23442_v59 = vld [vmem:[#allocation89_spill] sm:$0xff] }
0x1330   : > { %v10780_v28 = vmax.f32 %v10772_v8, 0.0  ;;  %v21525_v8 = vld [vmem:[%s22626_s3 + $0x34] ss:$8 sps:$4 sm:$0xff]  }
0x1331   : > { %v10778_v43 = vmax.f32 %v10770_v20, 0.0  ;;  %v21534_v20 = vld [vmem:[%s22626_s3 + $0x30] ss:$8 sps:$4 sm:$0xff]  }
0x1332   : > { %v10786_v0 = vpack.c.bf16 %v10780_v28, %v10779_v1  ;;  %v23443_v1 = vld [vmem:[#allocation92_spill] sm:$0xff] }
0x1333   : > { %v10785_v11 = vpack.c.bf16 %v10778_v43, %v10777_v54  ;;  %v15512_v61 = vpop.f32.mrb[184].mxu1  ;;  %v21541_v28 = vld [vmem:[%s22626_s3 + $0x44] ss:$8 sps:$4 sm:$0xff]   ;;  %v21550_v43 = vld [vmem:[%s22626_s3 + $0x40] ss:$8 sps:$4 sm:$0xff]  }
0x1334   : > { %v10775_v27 = vadd.f32 %v23416_v58, %v15512_v61  ;;  %v10746_v50 = vpop.f32.mrb[185].mxu1  ;;  %v23444_v54 = vld [vmem:[#allocation91_spill] sm:$0xff]  ;;  %v23446_v61 = vld [vmem:[#allocation93_spill] sm:$0xff] }
0x1335   : > { %v10773_v29 = vadd.f32 %v23416_v58, %v10746_v50  ;;  %v15513_v44 = vpop.f32.mrb[186].mxu1  ;;  %15515 = vmatpush3.bf16.msra.mxu1 %v10785_v11  ;;  %v21557_v11 = vld [vmem:[%s22626_s3 + $0x54] ss:$8 sps:$4 sm:$0xff]   ;;  %v23447_v50 = vld [vmem:[#allocation96_spill] sm:$0xff] }
0x1336   : > { %v10776_v2 = vadd.f32 %v23416_v58, %v15513_v44  ;;  %v10749_v5 = vpop.f32.mrb[187].mxu1  ;;  %15516 = vmatprep.subr.bf16.mxu1 %v23410_v6  ;;  %v10783_v25 = vmax.f32 %v10775_v27, 0.0  ;;  %v21566_v27 = vld [vmem:[%s22626_s3 + $0x50] ss:$8 sps:$4 sm:$0xff]   ;;  %v23448_v44 = vld [vmem:[#allocation95_spill] sm:$0xff] }
0x1337   : > { %v10774_v23 = vadd.f32 %v23416_v58, %v10749_v5  ;;  %v10781_v17 = vmax.f32 %v10773_v29, 0.0  ;;  %v23439_v58 = vld [vmem:[#allocation88_spill] sm:$0xff]  ;;  %v23449_v5 = vld [vmem:[#allocation98_spill] sm:$0xff] }
0x1338   : > { %v10784_v33 = vmax.f32 %v10776_v2, 0.0  ;;  %v21573_v29 = vld [vmem:[%s22626_s3 + $0x64] ss:$8 sps:$4 sm:$0xff]   ;;  %v21582_v2 = vld [vmem:[%s22626_s3 + $0x60] ss:$8 sps:$4 sm:$0xff]  }
0x1339   : > { %v10782_v18 = vmax.f32 %v10774_v23, 0.0  ;;  %15517 = vmatpush3.bf16.msra.mxu1 %v10786_v0  ;;  %v23445_v0 = vld [vmem:[#allocation94_spill] sm:$0xff] }
0x133a   : > { %v10788_v55 = vpack.c.bf16 %v10784_v33, %v10783_v25  ;;  %15518 = vmatprep.subr.bf16.mxu1 %v23410_v6  ;;  %v21589_v23 = vld [vmem:[%s22626_s3 + $0x74] ss:$8 sps:$4 sm:$0xff]   ;;  %v21598_v33 = vld [vmem:[%s22626_s3 + $0x70] ss:$8 sps:$4 sm:$0xff]  }
0x133b   : > { %v10787_v35 = vpack.c.bf16 %v10782_v18, %v10781_v17  ;;  %v23450_v25 = vld [vmem:[#allocation97_spill] sm:$0xff]  ;;  %v23451_v17 = vld [vmem:[#allocation100_spill] sm:$0xff] }
0x133c   : > { %v21605_v18 = vld [vmem:[%s22626_s3 + $0x84] ss:$8 sps:$4 sm:$0xff]  }
0x133d   : > { %15519 = vmatpush3.bf16.msra.mxu1 %v10787_v35  ;;  %v21613_v35 = vld [vmem:[%s22626_s3 + $0x80] ss:$8 sps:$4 sm:$0xff]  }
0x133e   : > { %15520 = vmatprep.subr.bf16.mxu1 %v23410_v6 }
0x1341   : > { %15521 = vmatpush3.bf16.msra.mxu1 %v10788_v55  ;;  %v23452_v55 = vld [vmem:[#allocation99_spill] sm:$0xff] }
0x1342   : > { %15526 = vmatprep.subr.bf16.mxu1 %v23410_v6 }
0x1344   : > { %15523 = vmatmul.mubr.msk.bf16.vlgmr.msra.gmra.mrb[188].mxu1 %vm4723_vm3, %v23417_v31  ;;  %v21619_v31 = vld [vmem:[%s22626_s3 + $0x94] ss:$8 sps:$4 sm:$0xff]  }
0x1345   : > { %15527 = vmatpush3.bf16.msra.mxu1 %v23418_v42  ;;  %15530 = vmatprep.mubr.msk.bf16.mxu1 %vm16968_vm2, %v23410_v6  ;;  %v21625_v42 = vld [vmem:[%s22626_s3 + $0x90] ss:$8 sps:$4 sm:$0xff]  }
0x1346   : > { %15528 = vmatprep.subr.bf16.mxu1 %v23410_v6 }
0x1349   : > { %15529 = vmatpush3.bf16.msra.mxu1 %v23419_v56  ;;  %v21631_v56 = vld [vmem:[%s22626_s3 + $0xa4] ss:$8 sps:$4 sm:$0xff]  }
0x134a   : > { %10873 = vmatprep.subr.bf16.mxu1 %v23420_v47 }
0x1417   : > { %v10823_v36 = vpop.f32.mrb[188].mxu1 }
0x1418   : > { %v10829_v13 = vpack.c.bf16 %v10823_v36, %v10823_v36  ;;  %v15524_v48 = vpop.f32.mrb[189].mxu1  ;;  %v21643_v36 = vld [vmem:[%s22626_s3 + $0xb4] ss:$8 sps:$4 sm:$0xff]  }
0x1419   : > { %v10826_v4 = vpop.f32.mrb[190].mxu1  ;;  %v21655_v48 = vld [vmem:[%s22626_s3 + $0xc4] ss:$8 sps:$4 sm:$0xff]  }
0x141a   : > { %15531 = vmatmul.mubr.msk.bf16.vlgmr.msra.gmra.mrb[192].mxu1 %vm1253_vm0, %v10829_v13  ;;  %v15525_v60 = vpop.f32.mrb[191].mxu1  ;;  %v21649_v13 = vld [vmem:[%s22626_s3 + $0xb0] ss:$8 sps:$4 sm:$0xff]   ;;  %v21661_v4 = vld [vmem:[%s22626_s3 + $0xc0] ss:$8 sps:$4 sm:$0xff]  }
0x141b   : > { %10874 = vmatpush1.bf16.msra.mxu1 %v23421_v26  ;;  %10905 = vmatprep.mubr.bf16.mxu1 %v21449_v7  ;;  %v21667_v60 = vld [vmem:[%s22626_s3 + $0xd4] ss:$8 sps:$4 sm:$0xff]   ;;  %v21673_v26 = vld [vmem:[%s22626_s3 + $0xd0] ss:$8 sps:$4 sm:$0xff]  }
0x141c   : > { %10875 = vmatprep.subr.bf16.mxu1 %v23420_v47 }
0x141f   : > { %10876 = vmatpush1.bf16.msra.mxu1 %v23422_v3  ;;  %v21679_v3 = vld [vmem:[%s22626_s3 + $0xe4] ss:$8 sps:$4 sm:$0xff]  }
0x1420   : > { %10877 = vmatprep.subr.bf16.mxu1 %v23420_v47 }
0x1423   : > { %10878 = vmatpush1.bf16.msra.mxu1 %v23423_v15  ;;  %v21685_v15 = vld [vmem:[%s22626_s3 + $0xe0] ss:$8 sps:$4 sm:$0xff]  }
0x1424   : > { %10879 = vmatprep.subr.bf16.mxu1 %v23420_v47 }
0x1427   : > { %10880 = vmatpush1.bf16.msra.mxu1 %v23424_v62  ;;  %v21691_v62 = vld [vmem:[%s22626_s3 + $0xf4] ss:$8 sps:$4 sm:$0xff]  }
0x1428   : > { %10881 = vmatprep.subr.bf16.mxu1 %v23420_v47 }
0x142b   : > { %10882 = vmatpush1.bf16.msra.mxu1 %v23425_v16  ;;  %v21697_v16 = vld [vmem:[%s22626_s3 + $0xf0] ss:$8 sps:$4 sm:$0xff]  }
0x142c   : > { %10883 = vmatprep.subr.bf16.mxu1 %v23420_v47 }
0x142f   : > { %10884 = vmatpush1.bf16.msra.mxu1 %v23426_v22  ;;  %v21703_v22 = vld [vmem:[%s22626_s3 + $0x104] ss:$8 sps:$4 sm:$0xff]  }
0x1430   : > { %10885 = vmatprep.subr.bf16.mxu1 %v23420_v47 }
0x1433   : > { %10886 = vmatpush1.bf16.msra.mxu1 %v23427_v32  ;;  %v21709_v32 = vld [vmem:[%s22626_s3 + $0x100] ss:$8 sps:$4 sm:$0xff]  }
0x1434   : > { %10887 = vmatprep.subr.bf16.mxu1 %v23420_v47 }
0x1437   : > { %10888 = vmatpush1.bf16.msra.mxu1 %v23428_v41  ;;  %v21715_v41 = vld [vmem:[%s22626_s3 + $0x114] ss:$8 sps:$4 sm:$0xff]  }
0x1438   : > { %10889 = vmatprep.subr.bf16.mxu1 %v23420_v47 }
0x143b   : > { %10890 = vmatpush1.bf16.msra.mxu1 %v23429_v30  ;;  %v21721_v30 = vld [vmem:[%s22626_s3 + $0x110] ss:$8 sps:$4 sm:$0xff]  }
0x143c   : > { %10891 = vmatprep.subr.bf16.mxu1 %v23420_v47 }
0x143f   : > { %10892 = vmatpush1.bf16.msra.mxu1 %v23430_v38  ;;  %v21727_v38 = vld [vmem:[%s22626_s3 + $0x124] ss:$8 sps:$4 sm:$0xff]  }
0x1440   : > { %10893 = vmatprep.subr.bf16.mxu1 %v23420_v47 }
0x1443   : > { %10894 = vmatpush1.bf16.msra.mxu1 %v23431_v10  ;;  %v21733_v10 = vld [vmem:[%s22626_s3 + $0x120] ss:$8 sps:$4 sm:$0xff]  }
0x1444   : > { %10895 = vmatprep.subr.bf16.mxu1 %v23420_v47 }
0x1447   : > { %10896 = vmatpush1.bf16.msra.mxu1 %v23432_v21  ;;  %v21739_v21 = vld [vmem:[%s22626_s3 + $0x134] ss:$8 sps:$4 sm:$0xff]  }
0x1448   : > { %10897 = vmatprep.subr.bf16.mxu1 %v23420_v47 }
0x144b   : > { %10898 = vmatpush1.bf16.msra.mxu1 %v23433_v46 }
0x144c   : > { %10899 = vmatprep.subr.bf16.mxu1 %v23420_v47 }
0x144f   : > { %10900 = vmatpush1.bf16.msra.mxu1 %v23434_v49 }
0x1450   : > { %10901 = vmatprep.subr.bf16.mxu1 %v23420_v47 }
0x1453   : > { %10902 = vmatpush1.bf16.msra.mxu1 %v23435_v51 }
0x1454   : > { %10903 = vmatprep.subr.bf16.mxu1 %v23420_v47 }
0x1457   : > { %10904 = vmatpush1.bf16.msra.mxu1 %v23436_v52 }
0x1458   : > { %12083 = vmatprep.subr.bf16.mxu1 %v23420_v47 }
0x145a   : > { %10906 = vmatmul.mubr.bf16.vlgmr.msra.gmra.mrb[196].mxu1 %v21486_v53 }
0x145b   : > { %12084 = vmatpush1.bf16.msra.mxu1 %v23437_v63  ;;  %10913 = vmatprep.mubr.bf16.mxu1 %v21493_v14 }
0x145c   : > { %12085 = vmatprep.subr.bf16.mxu1 %v23420_v47 }
0x145f   : > { %12086 = vmatpush1.bf16.msra.mxu1 %v23438_v34 }
0x1460   : > { %12087 = vmatprep.subr.bf16.mxu1 %v23420_v47 }
0x1462   : > { %10914 = vmatmul.mubr.bf16.gmra.mrb[200].mxu1 %v21502_v45 }
0x1463   : > { %12088 = vmatpush1.bf16.msra.mxu1 %v23439_v58  ;;  %10921 = vmatprep.mubr.bf16.mxu1 %v21509_v40  ;;  %v21746_v58 = vld [vmem:[%s22626_s3 + $0x130] ss:$8 sps:$4 sm:$0xff]  }
0x1464   : > { %12089 = vmatprep.subr.bf16.mxu1 %v23420_v47 }
0x1467   : > { %12090 = vmatpush1.bf16.msra.mxu1 %v23440_v39 }
0x1468   : > { %12091 = vmatprep.subr.bf16.mxu1 %v23420_v47 }
0x146a   : > { %10922 = vmatmul.mubr.bf16.gmra.mrb[204].mxu1 %v21518_v37 }
0x146b   : > { %12092 = vmatpush1.bf16.msra.mxu1 %v23441_v19  ;;  %10929 = vmatprep.mubr.bf16.mxu1 %v21525_v8  ;;  %v21755_v19 = vld [vmem:[%s22626_s3 + $0x144] ss:$8 sps:$4 sm:$0xff]  }
0x146c   : > { %12093 = vmatprep.subr.bf16.mxu1 %v23420_v47 }
0x146f   : > { %12094 = vmatpush1.bf16.msra.mxu1 %v23442_v59  ;;  %v21767_v59 = vld [vmem:[%s22626_s3 + $0x154] ss:$8 sps:$4 sm:$0xff]  }
0x1470   : > { %12095 = vmatprep.subr.bf16.mxu1 %v23420_v47 }
0x1472   : > { %10930 = vmatmul.mubr.bf16.gmra.mrb[208].mxu1 %v21534_v20 }
0x1473   : > { %12096 = vmatpush1.bf16.msra.mxu1 %v23443_v1  ;;  %10937 = vmatprep.mubr.bf16.mxu1 %v21541_v28  ;;  %v21779_v1 = vld [vmem:[%s22626_s3 + $0x164] ss:$8 sps:$4 sm:$0xff]  }
0x1474   : > { %12097 = vmatprep.subr.bf16.mxu1 %v23420_v47  ;;  %23454 = vst [vmem:[#allocation10_spill] sm:$0xff] %v21779_v1 }
0x1477   : > { %12098 = vmatpush1.bf16.msra.mxu1 %v23444_v54  ;;  %v21785_v54 = vld [vmem:[%s22626_s3 + $0x160] ss:$8 sps:$4 sm:$0xff]  }
0x1478   : > { %12099 = vmatprep.subr.bf16.mxu1 %v23420_v47  ;;  %23455 = vst [vmem:[#allocation9_spill] sm:$0xff] %v21785_v54 }
0x147a   : > { %10938 = vmatmul.mubr.bf16.gmra.mrb[212].mxu1 %v21550_v43 }
0x147b   : > { %12100 = vmatpush1.bf16.msra.mxu1 %v23445_v0  ;;  %10945 = vmatprep.mubr.bf16.mxu1 %v21557_v11  ;;  %v21791_v0 = vld [vmem:[%s22626_s3 + $0x174] ss:$8 sps:$4 sm:$0xff]  }
0x147c   : > { %12101 = vmatprep.subr.bf16.mxu1 %v23420_v47  ;;  %23456 = vst [vmem:[#allocation12_spill] sm:$0xff] %v21791_v0 }
0x147f   : > { %12102 = vmatpush1.bf16.msra.mxu1 %v23446_v61  ;;  %v21797_v61 = vld [vmem:[%s22626_s3 + $0x170] ss:$8 sps:$4 sm:$0xff]  }
0x1480   : > { %12103 = vmatprep.subr.bf16.mxu1 %v23420_v47  ;;  %23457 = vst [vmem:[#allocation11_spill] sm:$0xff] %v21797_v61 }
0x1482   : > { %10946 = vmatmul.mubr.bf16.gmra.mrb[216].mxu1 %v21566_v27 }
0x1483   : > { %12104 = vmatpush1.bf16.msra.mxu1 %v23447_v50  ;;  %10953 = vmatprep.mubr.bf16.mxu1 %v21573_v29  ;;  %v21803_v50 = vld [vmem:[%s22626_s3 + $0x184] ss:$8 sps:$4 sm:$0xff]  }
0x1484   : > { %12105 = vmatprep.subr.bf16.mxu1 %v23420_v47  ;;  %23458 = vst [vmem:[#allocation38_spill] sm:$0xff] %v21803_v50 }
0x1487   : > { %12106 = vmatpush1.bf16.msra.mxu1 %v23448_v44  ;;  %v21809_v44 = vld [vmem:[%s22626_s3 + $0x180] ss:$8 sps:$4 sm:$0xff]  }
0x1488   : > { %12107 = vmatprep.subr.bf16.mxu1 %v23420_v47  ;;  %23459 = vst [vmem:[#allocation37_spill] sm:$0xff] %v21809_v44 }
0x148a   : > { %10954 = vmatmul.mubr.bf16.gmra.mrb[220].mxu1 %v21582_v2 }
0x148b   : > { %12108 = vmatpush1.bf16.msra.mxu1 %v23449_v5  ;;  %10961 = vmatprep.mubr.bf16.mxu1 %v21589_v23  ;;  %v21815_v5 = vld [vmem:[%s22626_s3 + $0x194] ss:$8 sps:$4 sm:$0xff]  }
0x148c   : > { %12109 = vmatprep.subr.bf16.mxu1 %v23420_v47  ;;  %23460 = vst [vmem:[#allocation40_spill] sm:$0xff] %v21815_v5 }
0x148f   : > { %12110 = vmatpush1.bf16.msra.mxu1 %v23450_v25  ;;  %v21821_v25 = vld [vmem:[%s22626_s3 + $0x190] ss:$8 sps:$4 sm:$0xff]  }
0x1490   : > { %12111 = vmatprep.subr.bf16.mxu1 %v23420_v47  ;;  %23461 = vst [vmem:[#allocation39_spill] sm:$0xff] %v21821_v25 }
0x1492   : > { %10962 = vmatmul.mubr.bf16.gmra.mrb[224].mxu1 %v21598_v33 }
0x1493   : > { %12112 = vmatpush1.bf16.msra.mxu1 %v23451_v17  ;;  %10969 = vmatprep.mubr.bf16.mxu1 %v21605_v18  ;;  %v21827_v17 = vld [vmem:[%s22626_s3 + $0x1a4] ss:$8 sps:$4 sm:$0xff]  }
0x1494   : > { %12113 = vmatprep.subr.bf16.mxu1 %v23420_v47  ;;  %v21637_v47 = vld [vmem:[%s22626_s3 + $0xa0] ss:$8 sps:$4 sm:$0xff]   ;;  %23462 = vst [vmem:[#allocation42_spill] sm:$0xff] %v21827_v17 }
0x1497   : > { %12114 = vmatpush1.bf16.msra.mxu1 %v23452_v55  ;;  %v21833_v55 = vld [vmem:[%s22626_s3 + $0x1a0] ss:$8 sps:$4 sm:$0xff]  }
0x1498   : > { %23463 = vst [vmem:[#allocation41_spill] sm:$0xff] %v21833_v55 }
0x149a   : > { %10970 = vmatmul.mubr.bf16.gmra.mrb[228].mxu1 %v21613_v35 }
0x149b   : > { %10977 = vmatprep.mubr.bf16.mxu1 %v21619_v31 }
0x14a2   : > { %10978 = vmatmul.mubr.bf16.gmra.mrb[232].mxu1 %v21625_v42 }
0x14a3   : > { %10985 = vmatprep.mubr.bf16.mxu1 %v21631_v56 }
0x14aa   : > { %10986 = vmatmul.mubr.bf16.gmra.mrb[236].mxu1 %v21637_v47 }
0x14ab   : > { %10993 = vmatprep.mubr.bf16.mxu1 %v21643_v36 }
0x14b2   : > { %10994 = vmatmul.mubr.bf16.gmra.mrb[240].mxu1 %v21649_v13 }
0x14b3   : > { %11001 = vmatprep.mubr.bf16.mxu1 %v21655_v48 }
0x14ba   : > { %11002 = vmatmul.mubr.bf16.gmra.mrb[244].mxu1 %v21661_v4 }
0x14bb   : > { %11009 = vmatprep.mubr.bf16.mxu1 %v21667_v60 }
0x14c2   : > { %11010 = vmatmul.mubr.bf16.gmra.mrb[248].mxu1 %v21673_v26 }
0x14c3   : > { %11017 = vmatprep.mubr.bf16.mxu1 %v21679_v3 }
0x14ca   : > { %11018 = vmatmul.mubr.bf16.gmra.mrb[252].mxu1 %v21685_v15 }
0x14cb   : > { %11025 = vmatprep.mubr.bf16.mxu1 %v21691_v62 }
0x14d2   : > { %11026 = vmatmul.mubr.bf16.gmra.mrb[0].mxu1 %v21697_v16 }
0x14d3   : > { %11033 = vmatprep.mubr.bf16.mxu1 %v21703_v22 }
0x14da   : > { %11034 = vmatmul.mubr.bf16.gmra.mrb[4].mxu1 %v21709_v32 }
0x14db   : > { %11041 = vmatprep.mubr.bf16.mxu1 %v21715_v41 }
0x14e2   : > { %11042 = vmatmul.mubr.bf16.gmra.mrb[8].mxu1 %v21721_v30 }
0x14e3   : > { %11049 = vmatprep.mubr.bf16.mxu1 %v21727_v38 }
0x14ea   : > { %11050 = vmatmul.mubr.bf16.gmra.mrb[12].mxu1 %v21733_v10 }
0x14eb   : > { %11057 = vmatprep.mubr.bf16.mxu1 %v21739_v21 }
0x14ed   : > { %v10867_v46 = vpop.f32.mrb[192].mxu1 }
0x14ee   : > { %v10868_v49 = vadd.f32 %v21418_v24, %v10867_v46  ;;  %v15532_v51 = vpop.f32.mrb[193].mxu1  ;;  %v21761_v24 = vld [vmem:[%s22626_s3 + $0x140] ss:$8 sps:$4 sm:$0xff]   ;;  %v21839_v46 = vld [vmem:[%s22626_s3 + $0x1b4] ss:$8 sps:$4 sm:$0xff]  }
0x14ef   : > { %v10870_v52 = vpop.f32.mrb[194].mxu1  ;;  %23464 = vst [vmem:[#allocation44_spill] sm:$0xff] %v21839_v46 }
0x14f0   : > { %v13306_v63 = vrot.slane %v10868_v49, 3  ;;  %v15533_v34 = vpop.f32.mrb[195].mxu1 }
0x14f2   : > { %11058 = vmatmul.mubr.bf16.gmra.mrb[16].mxu1 %v21746_v58  ;;  %v21750_v39 = vsel %vm13322_vm8, %v21422_v57, %v13306_v63  ;;  %v21773_v57 = vld [vmem:[%s22626_s3 + $0x150] ss:$8 sps:$4 sm:$0xff]  }
0x14f3   : > { %23453 = vst [vmem:[#allocation108_spill] sm:$0xff] %v21750_v39  ;;  %11065 = vmatprep.mubr.bf16.mxu1 %v21755_v19  ;;  %v21851_v39 = vld [vmem:[%s22626_s3 + $0x1b0] ss:$8 sps:$4 sm:$0xff]  }
0x14f4   : > { %23465 = vst [vmem:[#allocation43_spill] sm:$0xff] %v21851_v39 }
0x14fa   : > { %11066 = vmatmul.mubr.bf16.gmra.mrb[20].mxu1 %v21761_v24 }
0x14fb   : > { %11073 = vmatprep.mubr.bf16.mxu1 %v21767_v59 }
0x1502   : > { %11074 = vmatmul.mubr.bf16.gmra.mrb[24].mxu1 %v21773_v57 }
0x1503   : > { %11081 = vmatprep.mubr.bf16.mxu1 %v21779_v1  ;;  %v21930_v1 = vld [vmem:[%s22626_s3 + $0x200] ss:$8 sps:$4 sm:$0xff]  }
0x1504   : > { %23474 = vst [vmem:[#allocation54_spill] sm:$0xff] %v21930_v1 }
0x150a   : > { %11082 = vmatmul.mubr.bf16.gmra.mrb[28].mxu1 %v21785_v54 }
0x150b   : > { %11089 = vmatprep.mubr.bf16.mxu1 %v21791_v0 }
0x1512   : > { %11090 = vmatmul.mubr.bf16.gmra.mrb[32].mxu1 %v21797_v61 }
0x1513   : > { %11097 = vmatprep.mubr.bf16.mxu1 %v21803_v50 }
0x151a   : > { %11098 = vmatmul.mubr.bf16.gmra.mrb[36].mxu1 %v21809_v44 }
0x151b   : > { %11105 = vmatprep.mubr.bf16.mxu1 %v21815_v5 }
0x1522   : > { %11106 = vmatmul.mubr.bf16.gmra.mrb[40].mxu1 %v21821_v25 }
0x1523   : > { %11113 = vmatprep.mubr.bf16.mxu1 %v21827_v17 }
0x152a   : > { %11114 = vmatmul.mubr.bf16.gmra.mrb[44].mxu1 %v21833_v55 }
0x152b   : > { %11121 = vmatprep.mubr.bf16.mxu1 %v21839_v46  ;;  %v21857_v46 = vld [vmem:[%s22626_s3 + $0x1c4] ss:$8 sps:$4 sm:$0xff]  }
0x152c   : > { %23466 = vst [vmem:[#allocation46_spill] sm:$0xff] %v21857_v46 }
0x152d   : > { %v21842_v49 = vpop.f32.mrb[196].mxu1 }
0x152e   : > { %v10909_v51 = vpop.f32.mrb[197].mxu1 }
0x152f   : > { %v21844_v52 = vpop.f32.mrb[198].mxu1 }
0x1530   : > { %v10912_v34 = vpop.f32.mrb[199].mxu1 }
0x1532   : > { %11122 = vmatmul.mubr.bf16.gmra.mrb[48].mxu1 %v21851_v39  ;;  %v21869_v39 = vld [vmem:[%s22626_s3 + $0x1c0] ss:$8 sps:$4 sm:$0xff]  }
0x1533   : > { %11129 = vmatprep.mubr.bf16.mxu1 %v21857_v46  ;;  %23467 = vst [vmem:[#allocation45_spill] sm:$0xff] %v21869_v39  ;;  %v21875_v46 = vld [vmem:[%s22626_s3 + $0x1d4] ss:$8 sps:$4 sm:$0xff]  }
0x1534   : > { %23468 = vst [vmem:[#allocation48_spill] sm:$0xff] %v21875_v46 }
0x1535   : > { %v21860_v51 = vpop.f32.mrb[200].mxu1 }
0x1536   : > { %v10917_v55 = vpop.f32.mrb[201].mxu1 }
0x1537   : > { %v21862_v17 = vpop.f32.mrb[202].mxu1 }
0x1538   : > { %v10920_v63 = vpop.f32.mrb[203].mxu1 }
0x153a   : > { %11130 = vmatmul.mubr.bf16.gmra.mrb[52].mxu1 %v21869_v39  ;;  %v21887_v39 = vld [vmem:[%s22626_s3 + $0x1d0] ss:$8 sps:$4 sm:$0xff]  }
0x153b   : > { %11137 = vmatprep.mubr.bf16.mxu1 %v21875_v46  ;;  %23469 = vst [vmem:[#allocation47_spill] sm:$0xff] %v21887_v39  ;;  %v21893_v46 = vld [vmem:[%s22626_s3 + $0x1e4] ss:$8 sps:$4 sm:$0xff]  }
0x153c   : > { %23470 = vst [vmem:[#allocation50_spill] sm:$0xff] %v21893_v46 }
0x153d   : > { %v21878_v55 = vpop.f32.mrb[204].mxu1 }
0x153e   : > { %v10925_v25 = vpop.f32.mrb[205].mxu1 }
0x153f   : > { %v21880_v5 = vpop.f32.mrb[206].mxu1 }
0x1540   : > { %v10928_v34 = vpop.f32.mrb[207].mxu1 }
0x1542   : > { %11138 = vmatmul.mubr.bf16.gmra.mrb[56].mxu1 %v21887_v39  ;;  %v21905_v39 = vld [vmem:[%s22626_s3 + $0x1e0] ss:$8 sps:$4 sm:$0xff]  }
0x1543   : > { %11145 = vmatprep.mubr.bf16.mxu1 %v21893_v46  ;;  %23471 = vst [vmem:[#allocation49_spill] sm:$0xff] %v21905_v39  ;;  %v21911_v46 = vld [vmem:[%s22626_s3 + $0x1f4] ss:$8 sps:$4 sm:$0xff]  }
0x1544   : > { %23472 = vst [vmem:[#allocation52_spill] sm:$0xff] %v21911_v46 }
0x1545   : > { %v21896_v25 = vpop.f32.mrb[208].mxu1 }
0x1546   : > { %v10933_v44 = vpop.f32.mrb[209].mxu1 }
0x1547   : > { %v21898_v50 = vpop.f32.mrb[210].mxu1 }
0x1548   : > { %v10936_v63 = vpop.f32.mrb[211].mxu1 }
0x1549   : > { %v21917_v63 = vld [vmem:[%s22626_s3 + $0x1f0] ss:$8 sps:$4 sm:$0xff]  }
0x154a   : > { %11146 = vmatmul.mubr.bf16.gmra.mrb[60].mxu1 %v21905_v39  ;;  %v21924_v39 = vld [vmem:[%s22626_s3 + $0x204] ss:$8 sps:$4 sm:$0xff]  }
0x154b   : > { %11153 = vmatprep.mubr.bf16.mxu1 %v21911_v46  ;;  %23473 = vst [vmem:[#allocation51_spill] sm:$0xff] %v21924_v39 }
0x154d   : > { %v10939_v44 = vpop.f32.mrb[212].mxu1 }
0x154e   : > { %v10941_v61 = vpop.f32.mrb[213].mxu1 }
0x154f   : > { %v10942_v0 = vpop.f32.mrb[214].mxu1 }
0x1550   : > { %v11198_v54 = vpack.c.bf16 %v10942_v0, %v10939_v44  ;;  %v10944_v34 = vpop.f32.mrb[215].mxu1 }
0x1552   : > { %11154 = vmatmul.mubr.bf16.gmra.mrb[64].mxu1 %v21917_v63  ;;  %15536 = vmatprep.mubr.msk.bf16.mxu0 %vm3899_vm1, %v11198_v54  ;;  %v21937_v54 = vld [vmem:[%s22626_s3 + $0x214] ss:$8 sps:$4 sm:$0xff]  }
0x1553   : > { %11161 = vmatprep.mubr.bf16.mxu1 %v21924_v39  ;;  %23475 = vst [vmem:[#allocation53_spill] sm:$0xff] %v21937_v54 }
0x1555   : > { %v10947_v61 = vpop.f32.mrb[216].mxu1 }
0x1556   : > { %v10949_v46 = vpop.f32.mrb[217].mxu1 }
0x1557   : > { %v10950_v0 = vpop.f32.mrb[218].mxu1 }
0x1558   : > { %v11199_v34 = vpack.c.bf16 %v10950_v0, %v10947_v61  ;;  %v10952_v44 = vpop.f32.mrb[219].mxu1 }
0x155a   : > { %11162 = vmatmul.mubr.bf16.gmra.mrb[68].mxu1 %v21930_v1  ;;  %15537 = vmatmul.mubr.msk.bf16.vlgmr.msra.gmra.mrb[252].mxu0 %vm3899_vm1, %v11199_v34  ;;  %v21945_v34 = vld [vmem:[%s22626_s3 + $0x210] ss:$8 sps:$4 sm:$0xff]   ;;  %v21958_v1 = vld [vmem:[%s22626_s3 + $0x220] ss:$8 sps:$4 sm:$0xff]  }
0x155b   : > { %11169 = vmatprep.mubr.bf16.mxu1 %v21937_v54  ;;  %15545 = vmatpush3.bf16.msra.mxu0 %v21254_v12  ;;  %23476 = vst [vmem:[#allocation56_spill] sm:$0xff] %v21945_v34  ;;  %v21952_v12 = vld [vmem:[%s22626_s3 + $0x224] ss:$8 sps:$4 sm:$0xff]  }
0x155c   : > { %15554 = vmatprep.subr.bf16.mxu0 %v21270_v9  ;;  %23477 = vst [vmem:[#allocation55_spill] sm:$0xff] %v21952_v12 }
0x155d   : > { %v10955_v46 = vpop.f32.mrb[220].mxu1 }
0x155e   : > { %v10957_v61 = vpop.f32.mrb[221].mxu1 }
0x155f   : > { %v10958_v0 = vpop.f32.mrb[222].mxu1 }
0x1560   : > { %v11200_v44 = vpack.c.bf16 %v10958_v0, %v10955_v46  ;;  %v10960_v39 = vpop.f32.mrb[223].mxu1 }
0x1562   : > { %11170 = vmatmul.mubr.bf16.gmra.mrb[72].mxu1 %v21945_v34  ;;  %15540 = vmatprep.mubr.msk.bf16.mxu0 %vm3899_vm1, %v11200_v44  ;;  %v21965_v44 = vld [vmem:[%s22626_s3 + $0x234] ss:$8 sps:$4 sm:$0xff]  }
0x1563   : > { %11177 = vmatprep.mubr.bf16.mxu1 %v21952_v12  ;;  %23478 = vst [vmem:[#allocation58_spill] sm:$0xff] %v21965_v44 }
0x1565   : > { %v10963_v61 = vpop.f32.mrb[224].mxu1 }
0x1566   : > { %v10965_v54 = vpop.f32.mrb[225].mxu1 }
0x1567   : > { %v10966_v46 = vpop.f32.mrb[226].mxu1  ;;  %v23479_v54 = vpack.c.bf16 %v21844_v52, %v21842_v49  ;;  %v23481_v49 = vpack.c.bf16 %v21880_v5, %v21878_v55  ;;  %v21990_v52 = vld [vmem:[%s22627_s4 + $0x18] sm:$0xff]   ;;  %v23482_v5 = vpack.c.bf16 %v21898_v50, %v21896_v25 }
0x1568   : > { %v11201_v39 = vpack.c.bf16 %v10966_v46, %v10963_v61  ;;  %v10968_v0 = vpop.f32.mrb[227].mxu1 }
0x156a   : > { %11178 = vmatmul.mubr.bf16.gmra.mrb[76].mxu1 %v21958_v1  ;;  %15541 = vmatmul.mubr.msk.bf16.gmra.mrb[0].mxu0 %vm3899_vm1, %v11201_v39  ;;  %v21975_v39 = vld [vmem:[%s22626_s3 + $0x230] ss:$8 sps:$4 sm:$0xff]  }
0x156b   : > { %11185 = vmatprep.mubr.bf16.mxu1 %v21965_v44  ;;  %15546 = vmatprep.mubr.msk.bf16.mxu0 %vm3899_vm1, %v23479_v54  ;;  %v23480_v44 = vpack.c.bf16 %v21862_v17, %v21860_v51 }
0x156d   : > { %v10971_v61 = vpop.f32.mrb[228].mxu1 }
0x156e   : > { %v10973_v46 = vpop.f32.mrb[229].mxu1 }
0x156f   : > { %v10974_v0 = vpop.f32.mrb[230].mxu1 }
0x1570   : > { %v11202_v12 = vpack.c.bf16 %v10974_v0, %v10971_v61  ;;  %v10976_v34 = vpop.f32.mrb[231].mxu1 }
0x1572   : > { %11186 = vmatmul.mubr.bf16.gmra.mrb[80].mxu1 %v21975_v39  ;;  %15547 = vmatmul.mubr.msk.bf16.vlgmr.msra.gmra.mrb[252].mxu0 %vm3899_vm1, %v23480_v44 }
0x1573   : > { %15550 = vmatprep.mubr.msk.bf16.mxu0 %vm3899_vm1, %v23481_v49  ;;  %15555 = vmatpush3.bf16.msra.mxu0 %v21270_v9 }
0x1574   : > { %15564 = vmatprep.subr.bf16.mxu0 %v21990_v52  ;;  %12115 = vmatprep.mubr.bf16.mxu1 %v21449_v7 }
0x1575   : > { %v10979_v34 = vpop.f32.mrb[232].mxu1 }
0x1576   : > { %v10981_v17 = vpop.f32.mrb[233].mxu1 }
0x1577   : > { %v10982_v51 = vpop.f32.mrb[234].mxu1 }
0x1578   : > { %v11203_v44 = vpack.c.bf16 %v10982_v51, %v10979_v34  ;;  %v10984_v54 = vpop.f32.mrb[235].mxu1 }
0x157a   : > { %15551 = vmatmul.mubr.msk.bf16.gmra.mrb[0].mxu0 %vm3899_vm1, %v23482_v5  ;;  %12116 = vmatmul.mubr.bf16.vlgmr.msra.gmra.mrb[84].mxu1 %v21486_v53  ;;  %v22008_v53 = vld [vmem:[%s22627_s4 + $0x20] sm:$0xff]  }
0x157b   : > { %15556 = vmatprep.mubr.msk.bf16.mxu0 %vm3899_vm1, %v11202_v12  ;;  %12123 = vmatprep.mubr.bf16.mxu1 %v21493_v14 }
0x157d   : > { %v10987_v9 = vpop.f32.mrb[236].mxu1 }
0x157e   : > { %v10989_v55 = vpop.f32.mrb[237].mxu1 }
0x157f   : > { %v10990_v61 = vpop.f32.mrb[238].mxu1 }
0x1580   : > { %v11204_v7 = vpack.c.bf16 %v10990_v61, %v10987_v9  ;;  %v10992_v46 = vpop.f32.mrb[239].mxu1 }
0x1582   : > { %15557 = vmatmul.mubr.msk.bf16.vlgmr.msra.gmra.mrb[252].mxu0 %vm3899_vm1, %v11203_v44  ;;  %12124 = vmatmul.mubr.bf16.gmra.mrb[88].mxu1 %v21502_v45 }
0x1583   : > { %15560 = vmatprep.mubr.msk.bf16.mxu0 %vm3899_vm1, %v11204_v7  ;;  %15565 = vmatpush3.bf16.msra.mxu0 %v21990_v52 }
0x1584   : > { %15574 = vmatprep.subr.bf16.mxu0 %v22008_v53  ;;  %12131 = vmatprep.mubr.bf16.mxu1 %v21509_v40 }
0x1585   : > { %v10995_v14 = vpop.f32.mrb[240].mxu1 }
0x1586   : > { %v10997_v50 = vpop.f32.mrb[241].mxu1 }
0x1587   : > { %v10998_v25 = vpop.f32.mrb[242].mxu1 }
0x1588   : > { %v11205_v12 = vpack.c.bf16 %v10998_v25, %v10995_v14  ;;  %v11000_v0 = vpop.f32.mrb[243].mxu1 }
0x158a   : > { %15561 = vmatmul.mubr.msk.bf16.gmra.mrb[0].mxu0 %vm3899_vm1, %v11205_v12  ;;  %12132 = vmatmul.mubr.bf16.gmra.mrb[92].mxu1 %v21518_v37  ;;  %v22025_v37 = vld [vmem:[%s22627_s4 + $0x28] sm:$0xff]  }
0x158b   : > { %12139 = vmatprep.mubr.bf16.mxu1 %v21525_v8 }
0x158d   : > { %v11003_v45 = vpop.f32.mrb[244].mxu1 }
0x158e   : > { %v11005_v49 = vpop.f32.mrb[245].mxu1 }
0x158f   : > { %v11006_v34 = vpop.f32.mrb[246].mxu1 }
0x1590   : > { %v11206_v17 = vpack.c.bf16 %v11006_v34, %v11003_v45  ;;  %v11008_v51 = vpop.f32.mrb[247].mxu1 }
0x1592   : > { %15566 = vmatprep.mubr.msk.bf16.mxu0 %vm3899_vm1, %v11206_v17  ;;  %12140 = vmatmul.mubr.bf16.gmra.mrb[96].mxu1 %v21534_v20 }
0x1593   : > { %12147 = vmatprep.mubr.bf16.mxu1 %v21541_v28 }
0x1595   : > { %v11011_v40 = vpop.f32.mrb[248].mxu1 }
0x1596   : > { %v11013_v44 = vpop.f32.mrb[249].mxu1 }
0x1597   : > { %v11014_v54 = vpop.f32.mrb[250].mxu1 }
0x1598   : > { %v11207_v5 = vpack.c.bf16 %v11014_v54, %v11011_v40  ;;  %v11016_v9 = vpop.f32.mrb[251].mxu1 }
0x159a   : > { %15567 = vmatmul.mubr.msk.bf16.vlgmr.msra.gmra.mrb[252].mxu0 %vm3899_vm1, %v11207_v5  ;;  %12148 = vmatmul.mubr.bf16.gmra.mrb[100].mxu1 %v21550_v43 }
0x159b   : > { %15575 = vmatpush3.bf16.msra.mxu0 %v22008_v53  ;;  %12155 = vmatprep.mubr.bf16.mxu1 %v21557_v11 }
0x159c   : > { %15584 = vmatprep.subr.bf16.mxu0 %v22025_v37 }
0x159d   : > { %v11019_v8 = vpop.f32.mrb[252].mxu1 }
0x159e   : > { %v11021_v20 = vpop.f32.mrb[253].mxu1 }
0x159f   : > { %v11022_v28 = vpop.f32.mrb[254].mxu1 }
0x15a0   : > { %v11208_v55 = vpack.c.bf16 %v11022_v28, %v11019_v8  ;;  %v11024_v61 = vpop.f32.mrb[255].mxu1 }
0x15a2   : > { %15570 = vmatprep.mubr.msk.bf16.mxu0 %vm3899_vm1, %v11208_v55  ;;  %12156 = vmatmul.mubr.bf16.gmra.mrb[104].mxu1 %v21566_v27 }
0x15a3   : > { %12163 = vmatprep.mubr.bf16.mxu1 %v21573_v29 }
0x15a5   : > { %v11027_v43 = vpop.f32.mrb[0].mxu1 }
0x15a6   : > { %v11029_v11 = vpop.f32.mrb[1].mxu1 }
0x15a7   : > { %v11030_v7 = vpop.f32.mrb[2].mxu1 }
0x15a8   : > { %v11209_v46 = vpack.c.bf16 %v11030_v7, %v11027_v43  ;;  %v11032_v14 = vpop.f32.mrb[3].mxu1 }
0x15aa   : > { %15571 = vmatmul.mubr.msk.bf16.gmra.mrb[0].mxu0 %vm3899_vm1, %v11209_v46  ;;  %12164 = vmatmul.mubr.bf16.gmra.mrb[108].mxu1 %v21582_v2  ;;  %v22044_v2 = vld [vmem:[%s22627_s4 + $0x30] sm:$0xff]  }
0x15ab   : > { %12171 = vmatprep.mubr.bf16.mxu1 %v21589_v23 }
0x15ad   : > { %v11035_v50 = vpop.f32.mrb[4].mxu1 }
0x15ae   : > { %v11037_v25 = vpop.f32.mrb[5].mxu1 }
0x15af   : > { %v11038_v12 = vpop.f32.mrb[6].mxu1 }
0x15b0   : > { %v11210_v0 = vpack.c.bf16 %v11038_v12, %v11035_v50  ;;  %v11040_v45 = vpop.f32.mrb[7].mxu1 }
0x15b2   : > { %15576 = vmatprep.mubr.msk.bf16.mxu0 %vm3899_vm1, %v11210_v0  ;;  %12172 = vmatmul.mubr.bf16.gmra.mrb[112].mxu1 %v21598_v33 }
0x15b3   : > { %12179 = vmatprep.mubr.bf16.mxu1 %v21605_v18 }
0x15b5   : > { %v11043_v27 = vpop.f32.mrb[8].mxu1 }
0x15b6   : > { %v11045_v29 = vpop.f32.mrb[9].mxu1 }
0x15b7   : > { %v11046_v49 = vpop.f32.mrb[10].mxu1 }
0x15b8   : > { %v11211_v34 = vpack.c.bf16 %v11046_v49, %v11043_v27  ;;  %v11048_v17 = vpop.f32.mrb[11].mxu1 }
0x15ba   : > { %15577 = vmatmul.mubr.msk.bf16.vlgmr.msra.gmra.mrb[252].mxu0 %vm3899_vm1, %v11211_v34  ;;  %12180 = vmatmul.mubr.bf16.gmra.mrb[116].mxu1 %v21613_v35 }
0x15bb   : > { %15585 = vmatpush3.bf16.msra.mxu0 %v22025_v37  ;;  %12187 = vmatprep.mubr.bf16.mxu1 %v21619_v31 }
0x15bc   : > { %15594 = vmatprep.subr.bf16.mxu0 %v22044_v2 }
0x15bd   : > { %v11051_v23 = vpop.f32.mrb[12].mxu1 }
0x15be   : > { %v11053_v33 = vpop.f32.mrb[13].mxu1 }
0x15bf   : > { %v11054_v18 = vpop.f32.mrb[14].mxu1 }
0x15c0   : > { %v11212_v51 = vpack.c.bf16 %v11054_v18, %v11051_v23  ;;  %v11056_v40 = vpop.f32.mrb[15].mxu1 }
0x15c2   : > { %15580 = vmatprep.mubr.msk.bf16.mxu0 %vm3899_vm1, %v11212_v51  ;;  %12188 = vmatmul.mubr.bf16.gmra.mrb[120].mxu1 %v21625_v42 }
0x15c3   : > { %12195 = vmatprep.mubr.bf16.mxu1 %v21631_v56 }
0x15c5   : > { %v11059_v35 = vpop.f32.mrb[16].mxu1 }
0x15c6   : > { %v11061_v31 = vpop.f32.mrb[17].mxu1 }
0x15c7   : > { %v11062_v44 = vpop.f32.mrb[18].mxu1 }
0x15c8   : > { %v11213_v54 = vpack.c.bf16 %v11062_v44, %v11059_v35  ;;  %v11064_v5 = vpop.f32.mrb[19].mxu1 }
0x15ca   : > { %15581 = vmatmul.mubr.msk.bf16.gmra.mrb[0].mxu0 %vm3899_vm1, %v11213_v54  ;;  %12196 = vmatmul.mubr.bf16.gmra.mrb[124].mxu1 %v21637_v47  ;;  %v22063_v47 = vld [vmem:[%s22627_s4 + $0x38] sm:$0xff]  }
0x15cb   : > { %12203 = vmatprep.mubr.bf16.mxu1 %v21643_v36  ;;  %23483 = vst [vmem:[#allocation57_spill] sm:$0xff] %v22063_v47 }
0x15cd   : > { %v11067_v9 = vpop.f32.mrb[20].mxu1 }
0x15ce   : > { %v11069_v8 = vpop.f32.mrb[21].mxu1 }
0x15cf   : > { %v11070_v20 = vpop.f32.mrb[22].mxu1 }
0x15d0   : > { %v11214_v28 = vpack.c.bf16 %v11070_v20, %v11067_v9  ;;  %v11072_v55 = vpop.f32.mrb[23].mxu1 }
0x15d1   : > { %v23485_v55 = vld [vmem:[#allocation10_spill] sm:$0xff] }
0x15d2   : > { %15586 = vmatprep.mubr.msk.bf16.mxu0 %vm3899_vm1, %v11214_v28  ;;  %12204 = vmatmul.mubr.bf16.gmra.mrb[128].mxu1 %v21649_v13 }
0x15d3   : > { %12211 = vmatprep.mubr.bf16.mxu1 %v21655_v48 }
0x15d5   : > { %v11075_v42 = vpop.f32.mrb[24].mxu1 }
0x15d6   : > { %v11077_v56 = vpop.f32.mrb[25].mxu1 }
0x15d7   : > { %v11078_v61 = vpop.f32.mrb[26].mxu1 }
0x15d8   : > { %v11215_v43 = vpack.c.bf16 %v11078_v61, %v11075_v42  ;;  %v11080_v11 = vpop.f32.mrb[27].mxu1 }
0x15d9   : > { %v23487_v11 = vld [vmem:[#allocation12_spill] sm:$0xff] }
0x15da   : > { %15587 = vmatmul.mubr.msk.bf16.vlgmr.msra.gmra.mrb[252].mxu0 %vm3899_vm1, %v11215_v43  ;;  %12212 = vmatmul.mubr.bf16.gmra.mrb[132].mxu1 %v21661_v4 }
0x15db   : > { %15595 = vmatpush3.bf16.msra.mxu0 %v22044_v2  ;;  %12219 = vmatprep.mubr.bf16.mxu1 %v21667_v60 }
0x15dc   : > { %15604 = vmatprep.subr.bf16.mxu0 %v22063_v47 }
0x15dd   : > { %v11083_v36 = vpop.f32.mrb[28].mxu1 }
0x15de   : > { %v11085_v13 = vpop.f32.mrb[29].mxu1 }
0x15df   : > { %v11086_v48 = vpop.f32.mrb[30].mxu1 }
0x15e0   : > { %v11216_v7 = vpack.c.bf16 %v11086_v48, %v11083_v36  ;;  %v11088_v46 = vpop.f32.mrb[31].mxu1 }
0x15e2   : > { %15590 = vmatprep.mubr.msk.bf16.mxu0 %vm3899_vm1, %v11216_v7  ;;  %12220 = vmatmul.mubr.bf16.gmra.mrb[136].mxu1 %v21673_v26 }
0x15e3   : > { %12227 = vmatprep.mubr.bf16.mxu1 %v21679_v3 }
0x15e5   : > { %v11091_v4 = vpop.f32.mrb[32].mxu1 }
0x15e6   : > { %v11093_v60 = vpop.f32.mrb[33].mxu1 }
0x15e7   : > { %v11094_v14 = vpop.f32.mrb[34].mxu1 }
0x15e8   : > { %v11217_v50 = vpack.c.bf16 %v11094_v14, %v11091_v4  ;;  %v11096_v25 = vpop.f32.mrb[35].mxu1  ;;  %v23489_v4 = vld [vmem:[#allocation38_spill] sm:$0xff] }
0x15ea   : > { %15591 = vmatmul.mubr.msk.bf16.gmra.mrb[0].mxu0 %vm3899_vm1, %v11217_v50  ;;  %12228 = vmatmul.mubr.bf16.gmra.mrb[140].mxu1 %v21685_v15  ;;  %v22082_v15 = vld [vmem:[%s22627_s4 + $0x40] sm:$0xff]  }
0x15eb   : > { %12235 = vmatprep.mubr.bf16.mxu1 %v21691_v62  ;;  %23484 = vst [vmem:[#allocation60_spill] sm:$0xff] %v22082_v15 }
0x15ed   : > { %v11099_v12 = vpop.f32.mrb[36].mxu1 }
0x15ee   : > { %v11101_v0 = vpop.f32.mrb[37].mxu1 }
0x15ef   : > { %v11102_v45 = vpop.f32.mrb[38].mxu1  ;;  %v23490_v0 = vld [vmem:[#allocation37_spill] sm:$0xff] }
0x15f0   : > { %v11218_v27 = vpack.c.bf16 %v11102_v45, %v11099_v12  ;;  %v11104_v29 = vpop.f32.mrb[39].mxu1  ;;  %v23491_v45 = vld [vmem:[#allocation40_spill] sm:$0xff] }
0x15f2   : > { %15596 = vmatprep.mubr.msk.bf16.mxu0 %vm3899_vm1, %v11218_v27  ;;  %12236 = vmatmul.mubr.bf16.gmra.mrb[144].mxu1 %v21697_v16 }
0x15f3   : > { %12243 = vmatprep.mubr.bf16.mxu1 %v21703_v22 }
0x15f5   : > { %v11107_v26 = vpop.f32.mrb[40].mxu1 }
0x15f6   : > { %v11109_v3 = vpop.f32.mrb[41].mxu1 }
0x15f7   : > { %v11110_v49 = vpop.f32.mrb[42].mxu1 }
0x15f8   : > { %v11219_v34 = vpack.c.bf16 %v11110_v49, %v11107_v26  ;;  %v11112_v17 = vpop.f32.mrb[43].mxu1 }
0x15f9   : > { %v23493_v17 = vld [vmem:[#allocation42_spill] sm:$0xff] }
0x15fa   : > { %15597 = vmatmul.mubr.msk.bf16.vlgmr.msra.gmra.mrb[252].mxu0 %vm3899_vm1, %v11219_v34  ;;  %12244 = vmatmul.mubr.bf16.gmra.mrb[148].mxu1 %v21709_v32  ;;  %v23492_v34 = vld [vmem:[#allocation39_spill] sm:$0xff] }
0x15fb   : > { %15605 = vmatpush3.bf16.msra.mxu0 %v22063_v47  ;;  %12251 = vmatprep.mubr.bf16.mxu1 %v21715_v41 }
0x15fc   : > { %15614 = vmatprep.subr.bf16.mxu0 %v22082_v15 }
0x15fd   : > { %v11115_v62 = vpop.f32.mrb[44].mxu1 }
0x15fe   : > { %v11117_v16 = vpop.f32.mrb[45].mxu1 }
0x15ff   : > { %v11118_v22 = vpop.f32.mrb[46].mxu1 }
0x1600   : > { %v11220_v23 = vpack.c.bf16 %v11118_v22, %v11115_v62  ;;  %v11120_v33 = vpop.f32.mrb[47].mxu1 }
0x1602   : > { %15600 = vmatprep.mubr.msk.bf16.mxu0 %vm3899_vm1, %v11220_v23  ;;  %12252 = vmatmul.mubr.bf16.gmra.mrb[152].mxu1 %v21721_v30 }
0x1603   : > { %12259 = vmatprep.mubr.bf16.mxu1 %v21727_v38 }
0x1605   : > { %v11123_v32 = vpop.f32.mrb[48].mxu1 }
0x1606   : > { %v11125_v41 = vpop.f32.mrb[49].mxu1 }
0x1607   : > { %v11126_v18 = vpop.f32.mrb[50].mxu1  ;;  %v23495_v41 = vld [vmem:[#allocation44_spill] sm:$0xff] }
0x1608   : > { %v11221_v51 = vpack.c.bf16 %v11126_v18, %v11123_v32  ;;  %v11128_v40 = vpop.f32.mrb[51].mxu1  ;;  %v23494_v32 = vld [vmem:[#allocation41_spill] sm:$0xff]  ;;  %v23496_v18 = vld [vmem:[#allocation43_spill] sm:$0xff] }
0x1609   : > { %v23498_v40 = vld [vmem:[#allocation45_spill] sm:$0xff] }
0x160a   : > { %15601 = vmatmul.mubr.msk.bf16.gmra.mrb[0].mxu0 %vm3899_vm1, %v11221_v51  ;;  %12260 = vmatmul.mubr.bf16.gmra.mrb[156].mxu1 %v21733_v10  ;;  %v23497_v51 = vld [vmem:[#allocation46_spill] sm:$0xff] }
0x160b   : > { %12267 = vmatprep.mubr.bf16.mxu1 %v21739_v21 }
0x160d   : > { %v11131_v35 = vpop.f32.mrb[52].mxu1 }
0x160e   : > { %v11133_v31 = vpop.f32.mrb[53].mxu1 }
0x160f   : > { %v11134_v44 = vpop.f32.mrb[54].mxu1  ;;  %v23500_v31 = vld [vmem:[#allocation47_spill] sm:$0xff] }
0x1610   : > { %v11222_v54 = vpack.c.bf16 %v11134_v44, %v11131_v35  ;;  %v11136_v5 = vpop.f32.mrb[55].mxu1  ;;  %v23499_v35 = vld [vmem:[#allocation48_spill] sm:$0xff]  ;;  %v23501_v44 = vld [vmem:[#allocation50_spill] sm:$0xff] }
0x1611   : > { %v23503_v5 = vld [vmem:[#allocation52_spill] sm:$0xff] }
0x1612   : > { %15606 = vmatprep.mubr.msk.bf16.mxu0 %vm3899_vm1, %v11222_v54  ;;  %12268 = vmatmul.mubr.bf16.gmra.mrb[160].mxu1 %v21746_v58  ;;  %v23502_v54 = vld [vmem:[#allocation49_spill] sm:$0xff] }
0x1613   : > { %12275 = vmatprep.mubr.bf16.mxu1 %v21755_v19 }
0x1615   : > { %v11139_v30 = vpop.f32.mrb[56].mxu1 }
0x1616   : > { %v11141_v38 = vpop.f32.mrb[57].mxu1 }
0x1617   : > { %v11142_v9 = vpop.f32.mrb[58].mxu1  ;;  %v23505_v38 = vld [vmem:[#allocation54_spill] sm:$0xff] }
0x1618   : > { %v11223_v8 = vpack.c.bf16 %v11142_v9, %v11139_v30  ;;  %v11144_v20 = vpop.f32.mrb[59].mxu1  ;;  %v23504_v30 = vld [vmem:[#allocation51_spill] sm:$0xff]  ;;  %v23506_v9 = vld [vmem:[#allocation53_spill] sm:$0xff] }
0x1619   : > { %v23508_v20 = vld [vmem:[#allocation55_spill] sm:$0xff] }
0x161a   : > { %15607 = vmatmul.mubr.msk.bf16.vlgmr.msra.gmra.mrb[252].mxu0 %vm3899_vm1, %v11223_v8  ;;  %12276 = vmatmul.mubr.bf16.gmra.mrb[164].mxu1 %v21761_v24  ;;  %v23507_v8 = vld [vmem:[#allocation56_spill] sm:$0xff] }
0x161b   : > { %15615 = vmatpush3.bf16.msra.mxu0 %v22082_v15  ;;  %12283 = vmatprep.mubr.bf16.mxu1 %v21767_v59  ;;  %v23486_v59 = vld [vmem:[#allocation9_spill] sm:$0xff] }
0x161c   : > { %15624 = vmatprep.subr.bf16.mxu0 %v23410_v6 }
0x161d   : > { %v11147_v10 = vpop.f32.mrb[60].mxu1 }
0x161e   : > { %v11149_v21 = vpop.f32.mrb[61].mxu1 }
0x161f   : > { %v11150_v58 = vpop.f32.mrb[62].mxu1 }
0x1620   : > { %v11224_v28 = vpack.c.bf16 %v11150_v58, %v11147_v10  ;;  %v11152_v19 = vpop.f32.mrb[63].mxu1  ;;  %v23509_v10 = vld [vmem:[#allocation58_spill] sm:$0xff] }
0x1622   : > { %15610 = vmatprep.mubr.msk.bf16.mxu0 %vm3899_vm1, %v11224_v28  ;;  %12284 = vmatmul.mubr.bf16.gmra.mrb[168].mxu1 %v21773_v57  ;;  %v23488_v57 = vld [vmem:[#allocation11_spill] sm:$0xff] }
0x1623   : > { %12291 = vmatprep.mubr.bf16.mxu1 %v23485_v55 }
0x1625   : > { %v11155_v42 = vpop.f32.mrb[64].mxu1 }
0x1626   : > { %v11157_v56 = vpop.f32.mrb[65].mxu1 }
0x1627   : > { %v11158_v24 = vpop.f32.mrb[66].mxu1 }
0x1628   : > { %v11225_v61 = vpack.c.bf16 %v11158_v24, %v11155_v42  ;;  %v11160_v43 = vpop.f32.mrb[67].mxu1 }
0x162a   : > { %15611 = vmatmul.mubr.msk.bf16.gmra.mrb[0].mxu0 %vm3899_vm1, %v11225_v61  ;;  %12292 = vmatmul.mubr.bf16.gmra.mrb[172].mxu1 %v23486_v59 }
0x162b   : > { %12299 = vmatprep.mubr.bf16.mxu1 %v23487_v11 }
0x162d   : > { %v11163_v36 = vpop.f32.mrb[68].mxu1 }
0x162e   : > { %v11165_v13 = vpop.f32.mrb[69].mxu1 }
0x162f   : > { %v11166_v48 = vpop.f32.mrb[70].mxu1 }
0x1630   : > { %v11226_v7 = vpack.c.bf16 %v11166_v48, %v11163_v36  ;;  %v11168_v46 = vpop.f32.mrb[71].mxu1 }
0x1632   : > { %15616 = vmatprep.mubr.msk.bf16.mxu0 %vm3899_vm1, %v11226_v7  ;;  %12300 = vmatmul.mubr.bf16.gmra.mrb[176].mxu1 %v23488_v57  ;;  %v22159_v7 = vld [vmem:[%s22628_s5] ss:$0 sm:$0xff] }
0x1633   : > { %12307 = vmatprep.mubr.bf16.mxu1 %v23489_v4  ;;  %23510 = vst [vmem:[#allocation59_spill] sm:$0xff] %v22159_v7 }
0x1635   : > { %v11171_v60 = vpop.f32.mrb[72].mxu1 }
0x1636   : > { %v11173_v14 = vpop.f32.mrb[73].mxu1 }
0x1637   : > { %v11174_v50 = vpop.f32.mrb[74].mxu1 }
0x1638   : > { %v11227_v25 = vpack.c.bf16 %v11174_v50, %v11171_v60  ;;  %v11176_v12 = vpop.f32.mrb[75].mxu1 }
0x163a   : > { %15617 = vmatmul.mubr.msk.bf16.vlgmr.msra.gmra.mrb[252].mxu0 %vm3899_vm1, %v11227_v25  ;;  %12308 = vmatmul.mubr.bf16.gmra.mrb[180].mxu1 %v23490_v0 }
0x163b   : > { %12315 = vmatprep.mubr.bf16.mxu1 %v23491_v45 }
0x163d   : > { %v11179_v27 = vpop.f32.mrb[76].mxu1 }
0x163e   : > { %v11181_v29 = vpop.f32.mrb[77].mxu1 }
0x163f   : > { %v11182_v26 = vpop.f32.mrb[78].mxu1 }
0x1640   : > { %v11228_v3 = vpack.c.bf16 %v11182_v26, %v11179_v27  ;;  %v11184_v49 = vpop.f32.mrb[79].mxu1 }
0x1642   : > { %15620 = vmatprep.mubr.msk.bf16.mxu0 %vm3899_vm1, %v11228_v3  ;;  %12316 = vmatmul.mubr.bf16.gmra.mrb[184].mxu1 %v23492_v34 }
0x1643   : > { %12323 = vmatprep.mubr.bf16.mxu1 %v23493_v17 }
0x1645   : > { %v11187_v62 = vpop.f32.mrb[80].mxu1 }
0x1646   : > { %v11189_v16 = vpop.f32.mrb[81].mxu1 }
0x1647   : > { %v11190_v22 = vpop.f32.mrb[82].mxu1 }
0x1648   : > { %v11229_v23 = vpack.c.bf16 %v11190_v22, %v11187_v62  ;;  %v11192_v33 = vpop.f32.mrb[83].mxu1 }
0x164a   : > { %15621 = vmatmul.mubr.msk.bf16.gmra.mrb[0].mxu0 %vm3899_vm1, %v11229_v23  ;;  %12324 = vmatmul.mubr.bf16.gmra.mrb[188].mxu1 %v23494_v32 }
0x164b   : > { %15632 = vmatprep.mubr.msk.bf16.mxu0 %vm16968_vm2, %v23410_v6  ;;  %12331 = vmatprep.mubr.bf16.mxu1 %v23495_v41 }
0x164d   : > { %v22136_v21 = vpop.f32.mrb[84].mxu1 }
0x164e   : > { %v12119_v58 = vpop.f32.mrb[85].mxu1 }
0x1652   : > { %12332 = vmatmul.mubr.bf16.gmra.mrb[192].mxu1 %v23496_v18 }
0x1653   : > { %12339 = vmatprep.mubr.bf16.mxu1 %v23497_v51 }
0x165a   : > { %12340 = vmatmul.mubr.bf16.gmra.mrb[196].mxu1 %v23498_v40 }
0x165b   : > { %12347 = vmatprep.mubr.bf16.mxu1 %v23499_v35 }
0x1662   : > { %12348 = vmatmul.mubr.bf16.gmra.mrb[200].mxu1 %v23500_v31 }
0x1663   : > { %12355 = vmatprep.mubr.bf16.mxu1 %v23501_v44 }
0x166a   : > { %12356 = vmatmul.mubr.bf16.gmra.mrb[204].mxu1 %v23502_v54 }
0x166b   : > { %12363 = vmatprep.mubr.bf16.mxu1 %v23503_v5 }
0x1672   : > { %12364 = vmatmul.mubr.bf16.gmra.mrb[208].mxu1 %v21917_v63  ;;  %v22138_v63 = vpop.f32.mrb[86].mxu1 }
0x1673   : > { %12371 = vmatprep.mubr.bf16.mxu1 %v23504_v30  ;;  %v12122_v19 = vpop.f32.mrb[87].mxu1 }
0x1674   : > { %v22142_v55 = vpop.f32.mrb[88].mxu1 }
0x1675   : > { %v12127_v42 = vpop.f32.mrb[89].mxu1 }
0x1676   : > { %v22144_v56 = vpop.f32.mrb[90].mxu1 }
0x1677   : > { %v12130_v24 = vpop.f32.mrb[91].mxu1 }
0x1678   : > { %v22148_v61 = vpop.f32.mrb[92].mxu1 }
0x167a   : > { %12372 = vmatmul.mubr.bf16.gmra.mrb[212].mxu1 %v23505_v38 }
0x167b   : > { %12379 = vmatprep.mubr.bf16.mxu1 %v23506_v9 }
0x1682   : > { %12380 = vmatmul.mubr.bf16.gmra.mrb[216].mxu1 %v23507_v8 }
0x1683   : > { %12387 = vmatprep.mubr.bf16.mxu1 %v23508_v20 }
0x168a   : > { %12388 = vmatmul.mubr.bf16.gmra.mrb[220].mxu1 %v21958_v1 }
0x168b   : > { %12395 = vmatprep.mubr.bf16.mxu1 %v23509_v10 }
0x1692   : > { %12396 = vmatmul.mubr.bf16.gmra.mrb[224].mxu1 %v21975_v39  ;;  %v12135_v39 = vpop.f32.mrb[93].mxu1 }
0x1693   : > { %v22150_v43 = vpop.f32.mrb[94].mxu1 }
0x1694   : > { %v12138_v11 = vpop.f32.mrb[95].mxu1 }
0x1695   : > { %v22154_v36 = vpop.f32.mrb[96].mxu1 }
0x1696   : > { %v12143_v13 = vpop.f32.mrb[97].mxu1 }
0x1697   : > { %v22162_v4 = vpop.f32.mrb[98].mxu1 }
0x1698   : > { %v12146_v50 = vpop.f32.mrb[99].mxu1 }
0x1699   : > { %v22169_v34 = vpop.f32.mrb[100].mxu1 }
0x169a   : > { %v12151_v62 = vpop.f32.mrb[101].mxu1 }
0x169b   : > { %v22171_v16 = vpop.f32.mrb[102].mxu1 }
0x169c   : > { %v12154_v22 = vpop.f32.mrb[103].mxu1 }
0x169d   : > { %v22177_v33 = vpop.f32.mrb[104].mxu1 }
0x169e   : > { %v12159_v41 = vpop.f32.mrb[105].mxu1 }
0x169f   : > { %v22180_v40 = vpop.f32.mrb[106].mxu1 }
0x16a0   : > { %v12162_v44 = vpop.f32.mrb[107].mxu1 }
0x16a1   : > { %v22187_v19 = vpop.f32.mrb[108].mxu1 }
0x16a2   : > { %v12167_v24 = vpop.f32.mrb[109].mxu1 }
0x16a3   : > { %v22189_v39 = vpop.f32.mrb[110].mxu1 }
0x16a4   : > { %v12170_v11 = vpop.f32.mrb[111].mxu1 }
0x170d   : > { %v15618_v48 = vpop.f32.mrb[252].mxu0 }
0x170e   : > { %v11981_v46 = vadd.f32 %v22159_v7, %v15618_v48  ;;  %v11940_v57 = vpop.f32.mrb[253].mxu0  ;;  %v22195_v48 = vpop.f32.mrb[112].mxu1 }
0x170f   : > { %v11979_v60 = vadd.f32 %v22159_v7, %v11940_v57  ;;  %v15619_v14 = vpop.f32.mrb[254].mxu0  ;;  %v22200_v57 = vld [vmem:[%s22629_s6] sm:$0x1] }
0x1710   : > { %v11982_v25 = vadd.f32 %v22159_v7, %v15619_v14  ;;  %v11943_v12 = vpop.f32.mrb[255].mxu0  ;;  %v11989_v27 = vmax.f32 %v11981_v46, 0.0  ;;  %v12175_v46 = vpop.f32.mrb[113].mxu1  ;;  %23511 = vst [vmem:[#allocation62_spill] sm:$0xff] %v22200_v57  ;;  %v22209_v14 = vld [vmem:[%s22630_s7] sm:$0xff]  }
0x1711   : > { %v11980_v45 = vadd.f32 %v22159_v7, %v11943_v12  ;;  %v11987_v26 = vmax.f32 %v11979_v60, 0.0  ;;  %v22204_v60 = vpop.f32.mrb[114].mxu1  ;;  %23512 = vst [vmem:[#allocation61_spill] sm:$0xff] %v22209_v14  ;;  %v22220_v12 = vld [vmem:[%s22630_s7 + $0x8] sm:$0xff]  }
0x1712   : > { %v11990_v29 = vmax.f32 %v11982_v25, 0.0  ;;  %v12178_v50 = vpop.f32.mrb[115].mxu1  ;;  %23513 = vst [vmem:[#allocation64_spill] sm:$0xff] %v22220_v12 }
0x1713   : > { %v11988_v3 = vmax.f32 %v11980_v45, 0.0  ;;  %v22226_v45 = vld [vmem:[%s22627_s4 + $0x8] sm:$0xff]  }
0x1714   : > { %v11996_v49 = vpack.c.bf16 %v11990_v29, %v11989_v27  ;;  %v22229_v27 = vpop.f32.mrb[116].mxu1 }
0x1715   : > { %v11995_v17 = vpack.c.bf16 %v11988_v3, %v11987_v26  ;;  %v12183_v29 = vpop.f32.mrb[117].mxu1 }
0x1716   : > { %v22231_v26 = vpop.f32.mrb[118].mxu1 }
0x1717   : > { %15625 = vmatpush3.bf16.msra.mxu0 %v11995_v17  ;;  %v12186_v3 = vpop.f32.mrb[119].mxu1 }
0x1718   : > { %15626 = vmatprep.subr.bf16.mxu0 %v23410_v6  ;;  %v22235_v17 = vpop.f32.mrb[120].mxu1 }
0x1719   : > { %v12191_v62 = vpop.f32.mrb[121].mxu1 }
0x171a   : > { %v22237_v22 = vpop.f32.mrb[122].mxu1 }
0x171b   : > { %15627 = vmatpush3.bf16.msra.mxu0 %v11996_v49 }
0x171c   : > { %15628 = vmatprep.subr.bf16.mxu0 %v23410_v6 }
0x171d   : > { %v15622_v32 = vpop.f32.mrb[0].mxu0 }
0x171e   : > { %v11985_v18 = vadd.f32 %v22159_v7, %v15622_v32  ;;  %v11956_v51 = vpop.f32.mrb[1].mxu0  ;;  %v12194_v32 = vpop.f32.mrb[123].mxu1 }
0x171f   : > { %v11983_v35 = vadd.f32 %v22159_v7, %v11956_v51  ;;  %v15623_v31 = vpop.f32.mrb[2].mxu0 }
0x1720   : > { %v11986_v54 = vadd.f32 %v22159_v7, %v15623_v31  ;;  %v11959_v5 = vpop.f32.mrb[3].mxu0  ;;  %v11993_v9 = vmax.f32 %v11985_v18, 0.0  ;;  %v22241_v18 = vpop.f32.mrb[124].mxu1 }
0x1721   : > { %v11984_v38 = vadd.f32 %v22159_v7, %v11959_v5  ;;  %v11991_v20 = vmax.f32 %v11983_v35, 0.0  ;;  %v12199_v51 = vpop.f32.mrb[125].mxu1 }
0x1722   : > { %v11994_v8 = vmax.f32 %v11986_v54, 0.0  ;;  %v22243_v35 = vpop.f32.mrb[126].mxu1 }
0x1723   : > { %v11992_v10 = vmax.f32 %v11984_v38, 0.0  ;;  %v12202_v31 = vpop.f32.mrb[127].mxu1 }
0x1724   : > { %v11998_v58 = vpack.c.bf16 %v11994_v8, %v11993_v9  ;;  %v22247_v54 = vpop.f32.mrb[128].mxu1 }
0x1725   : > { %v11997_v42 = vpack.c.bf16 %v11992_v10, %v11991_v20  ;;  %v12207_v5 = vpop.f32.mrb[129].mxu1 }
0x1726   : > { %v22249_v38 = vpop.f32.mrb[130].mxu1 }
0x1727   : > { %15629 = vmatpush3.bf16.msra.mxu0 %v11997_v42  ;;  %v12210_v9 = vpop.f32.mrb[131].mxu1 }
0x1728   : > { %15630 = vmatprep.subr.bf16.mxu0 %v23410_v6  ;;  %v22253_v20 = vpop.f32.mrb[132].mxu1 }
0x1729   : > { %v12215_v10 = vpop.f32.mrb[133].mxu1 }
0x172b   : > { %15631 = vmatpush3.bf16.msra.mxu0 %v11998_v58  ;;  %v22255_v58 = vpop.f32.mrb[134].mxu1 }
0x172c   : > { %15636 = vmatprep.subr.bf16.mxu0 %v23410_v6  ;;  %v12218_v42 = vpop.f32.mrb[135].mxu1 }
0x172d   : > { %v22259_v11 = vpop.f32.mrb[136].mxu1 }
0x172e   : > { %15633 = vmatmul.mubr.msk.bf16.vlgmr.msra.gmra.mrb[4].mxu0 %vm4723_vm3, %v22200_v57  ;;  %v12223_v46 = vpop.f32.mrb[137].mxu1 }
0x172f   : > { %15637 = vmatpush3.bf16.msra.mxu0 %v22209_v14  ;;  %15640 = vmatprep.mubr.msk.bf16.mxu0 %vm16968_vm2, %v23410_v6  ;;  %v22261_v50 = vpop.f32.mrb[138].mxu1 }
0x1730   : > { %15638 = vmatprep.subr.bf16.mxu0 %v23410_v6  ;;  %v12226_v29 = vpop.f32.mrb[139].mxu1 }
0x1731   : > { %v22265_v62 = vpop.f32.mrb[140].mxu1 }
0x1732   : > { %v12231_v32 = vpop.f32.mrb[141].mxu1 }
0x1733   : > { %15639 = vmatpush3.bf16.msra.mxu0 %v22220_v12  ;;  %v22267_v51 = vpop.f32.mrb[142].mxu1 }
0x1734   : > { %15644 = vmatprep.subr.bf16.mxu0 %v22226_v45  ;;  %v12234_v31 = vpop.f32.mrb[143].mxu1 }
0x1735   : > { %v22271_v9 = vpop.f32.mrb[144].mxu1 }
0x1736   : > { %v12239_v10 = vpop.f32.mrb[145].mxu1 }
0x1737   : > { %v22273_v42 = vpop.f32.mrb[146].mxu1 }
0x1738   : > { %v12242_v46 = vpop.f32.mrb[147].mxu1 }
0x1739   : > { %v22277_v24 = vpop.f32.mrb[148].mxu1 }
0x173a   : > { %v12247_v3 = vpop.f32.mrb[149].mxu1 }
0x173b   : > { %v22279_v8 = vpop.f32.mrb[150].mxu1 }
0x173c   : > { %v12250_v32 = vpop.f32.mrb[151].mxu1 }
0x173d   : > { %v22283_v44 = vpop.f32.mrb[152].mxu1 }
0x173e   : > { %v12255_v5 = vpop.f32.mrb[153].mxu1 }
0x173f   : > { %v22285_v41 = vpop.f32.mrb[154].mxu1 }
0x1740   : > { %v12258_v10 = vpop.f32.mrb[155].mxu1 }
0x1741   : > { %v22289_v49 = vpop.f32.mrb[156].mxu1 }
0x1742   : > { %v12263_v29 = vpop.f32.mrb[157].mxu1 }
0x1743   : > { %v22291_v0 = vpop.f32.mrb[158].mxu1 }
0x1744   : > { %v12266_v3 = vpop.f32.mrb[159].mxu1 }
0x1745   : > { %v22295_v59 = vpop.f32.mrb[160].mxu1 }
0x1746   : > { %v12271_v31 = vpop.f32.mrb[161].mxu1 }
0x1747   : > { %v22297_v1 = vpop.f32.mrb[162].mxu1 }
0x1748   : > { %v12274_v5 = vpop.f32.mrb[163].mxu1 }
0x1749   : > { %v22301_v28 = vpop.f32.mrb[164].mxu1 }
0x174a   : > { %v12279_v46 = vpop.f32.mrb[165].mxu1 }
0x174b   : > { %v22303_v25 = vpop.f32.mrb[166].mxu1 }
0x174c   : > { %v12282_v29 = vpop.f32.mrb[167].mxu1 }
0x174d   : > { %v22307_v13 = vpop.f32.mrb[168].mxu1 }
0x174e   : > { %v12287_v32 = vpop.f32.mrb[169].mxu1 }
0x174f   : > { %v22309_v30 = vpop.f32.mrb[170].mxu1 }
0x1750   : > { %v12290_v31 = vpop.f32.mrb[171].mxu1 }
0x1751   : > { %v22313_v23 = vpop.f32.mrb[172].mxu1 }
0x1752   : > { %23514 = vst [vmem:[#allocation63_spill] sm:$0xff] %v22313_v23  ;;  %v12295_v10 = vpop.f32.mrb[173].mxu1 }
0x1753   : > { %v22315_v12 = vpop.f32.mrb[174].mxu1 }
0x1754   : > { %v12298_v46 = vpop.f32.mrb[175].mxu1 }
0x1755   : > { %v22319_v14 = vpop.f32.mrb[176].mxu1 }
0x1756   : > { %23515 = vst [vmem:[#allocation66_spill] sm:$0xff] %v22319_v14  ;;  %v12303_v3 = vpop.f32.mrb[177].mxu1 }
0x1757   : > { %v22321_v57 = vpop.f32.mrb[178].mxu1 }
0x1758   : > { %23516 = vst [vmem:[#allocation65_spill] sm:$0xff] %v22321_v57  ;;  %v12306_v32 = vpop.f32.mrb[179].mxu1 }
0x1759   : > { %v22325_v7 = vpop.f32.mrb[180].mxu1 }
0x175a   : > { %23517 = vst [vmem:[#allocation68_spill] sm:$0xff] %v22325_v7  ;;  %v12311_v5 = vpop.f32.mrb[181].mxu1 }
0x175b   : > { %v22327_v6 = vpop.f32.mrb[182].mxu1 }
0x175c   : > { %23518 = vst [vmem:[#allocation67_spill] sm:$0xff] %v22327_v6  ;;  %v12314_v10 = vpop.f32.mrb[183].mxu1 }
0x175d   : > { %v22331_v15 = vpop.f32.mrb[184].mxu1 }
0x175e   : > { %23519 = vst [vmem:[#allocation33_spill] sm:$0xff] %v22331_v15  ;;  %v12319_v29 = vpop.f32.mrb[185].mxu1 }
0x175f   : > { %v22333_v47 = vpop.f32.mrb[186].mxu1 }
0x1760   : > { %23520 = vst [vmem:[#allocation36_spill] sm:$0xff] %v22333_v47  ;;  %v12322_v3 = vpop.f32.mrb[187].mxu1 }
0x1761   : > { %v22337_v23 = vpop.f32.mrb[188].mxu1 }
0x1762   : > { %23521 = vst [vmem:[#allocation35_spill] sm:$0xff] %v22337_v23  ;;  %v12327_v31 = vpop.f32.mrb[189].mxu1 }
0x1763   : > { %v22339_v14 = vpop.f32.mrb[190].mxu1 }
0x1764   : > { %23522 = vst [vmem:[#allocation104_spill] sm:$0xff] %v22339_v14  ;;  %v12330_v5 = vpop.f32.mrb[191].mxu1 }
0x1765   : > { %v22343_v57 = vpop.f32.mrb[192].mxu1 }
0x1766   : > { %23523 = vst [vmem:[#allocation106_spill] sm:$0xff] %v22343_v57  ;;  %v12335_v46 = vpop.f32.mrb[193].mxu1 }
0x1767   : > { %v22345_v7 = vpop.f32.mrb[194].mxu1 }
0x1768   : > { %23524 = vst [vmem:[#allocation110_spill] sm:$0xff] %v22345_v7  ;;  %v12338_v29 = vpop.f32.mrb[195].mxu1 }
0x1769   : > { %v22349_v6 = vpop.f32.mrb[196].mxu1 }
0x176a   : > { %23525 = vst [vmem:[#allocation109_spill] sm:$0xff] %v22349_v6  ;;  %v12343_v32 = vpop.f32.mrb[197].mxu1 }
0x176b   : > { %v22351_v15 = vpop.f32.mrb[198].mxu1 }
0x176c   : > { %23526 = vst [vmem:[#allocation112_spill] sm:$0xff] %v22351_v15  ;;  %v12346_v31 = vpop.f32.mrb[199].mxu1 }
0x176d   : > { %v22355_v47 = vpop.f32.mrb[200].mxu1 }
0x176e   : > { %23527 = vst [vmem:[#allocation111_spill] sm:$0xff] %v22355_v47  ;;  %v12351_v10 = vpop.f32.mrb[201].mxu1 }
0x176f   : > { %v22357_v23 = vpop.f32.mrb[202].mxu1 }
0x1770   : > { %23528 = vst [vmem:[#allocation114_spill] sm:$0xff] %v22357_v23  ;;  %v12354_v46 = vpop.f32.mrb[203].mxu1 }
0x1771   : > { %v22361_v14 = vpop.f32.mrb[204].mxu1 }
0x1772   : > { %23529 = vst [vmem:[#allocation113_spill] sm:$0xff] %v22361_v14  ;;  %v12359_v3 = vpop.f32.mrb[205].mxu1 }
0x1773   : > { %v22363_v57 = vpop.f32.mrb[206].mxu1 }
0x1774   : > { %23530 = vst [vmem:[#allocation116_spill] sm:$0xff] %v22363_v57  ;;  %v12362_v32 = vpop.f32.mrb[207].mxu1 }
0x1775   : > { %v22367_v7 = vpop.f32.mrb[208].mxu1 }
0x1776   : > { %23531 = vst [vmem:[#allocation115_spill] sm:$0xff] %v22367_v7  ;;  %v12367_v5 = vpop.f32.mrb[209].mxu1 }
0x1777   : > { %v22369_v6 = vpop.f32.mrb[210].mxu1 }
0x1778   : > { %23532 = vst [vmem:[#allocation107_spill] sm:$0xff] %v22369_v6  ;;  %v12370_v10 = vpop.f32.mrb[211].mxu1 }
0x1779   : > { %v22373_v15 = vpop.f32.mrb[212].mxu1  ;;  %v16899_v10 = vld [vmem:[%s22627_s4] sm:$0xff]  }
0x177a   : > { %v12375_v29 = vpop.f32.mrb[213].mxu1 }
0x177b   : > { %v22375_v47 = vpop.f32.mrb[214].mxu1 }
0x177c   : > { %v12378_v3 = vpop.f32.mrb[215].mxu1  ;;  %v12436_v32 = vpack.c.bf16 %v22375_v47, %v22373_v15 }
0x177d   : > { %v22379_v23 = vpop.f32.mrb[216].mxu1 }
0x177e   : > { %v12383_v31 = vpop.f32.mrb[217].mxu1 }
0x177f   : > { %v22381_v14 = vpop.f32.mrb[218].mxu1  ;;  %v23533_v31 = vpack.c.bf16 %v22171_v16, %v22169_v34  ;;  %v23535_v34 = vpack.c.bf16 %v22189_v39, %v22187_v19  ;;  %v23538_v19 = vpack.c.bf16 %v22144_v56, %v22142_v55  ;;  %v23539_v39 = vpack.c.bf16 %v22150_v43, %v22148_v61 }
0x1780   : > { %v12386_v5 = vpop.f32.mrb[219].mxu1  ;;  %v23543_v55 = vpack.c.bf16 %v22243_v35, %v22241_v18  ;;  %v23544_v56 = vpack.c.bf16 %v22249_v38, %v22247_v54  ;;  %v23545_v61 = vpack.c.bf16 %v22255_v58, %v22253_v20  ;;  %v23546_v43 = vpack.c.bf16 %v22261_v50, %v22259_v11  ;;  %v23568_v35 = vld [vmem:[#allocation35_spill] sm:$0xff]  ;;  %v23571_v54 = vld [vmem:[#allocation110_spill] sm:$0xff]  ;;  %v23574_v20 = vld [vmem:[#allocation112_spill] sm:$0xff] }
0x1781   : > { %v22386_v29 = vpop.f32.mrb[220].mxu1  ;;  %v23572_v38 = vld [vmem:[#allocation106_spill] sm:$0xff]  ;;  %v23575_v58 = vld [vmem:[#allocation109_spill] sm:$0xff]  ;;  %v23578_v50 = vld [vmem:[#allocation111_spill] sm:$0xff] }
0x1782   : > { %v12391_v5 = vpop.f32.mrb[221].mxu1  ;;  %v23577_v11 = vld [vmem:[#allocation114_spill] sm:$0xff] }
0x1801   : > { %v12033_v57 = vpop.f32.mrb[4].mxu0 }
0x1802   : > { %v12039_v46 = vpack.c.bf16 %v12033_v57, %v12033_v57  ;;  %v15634_v7 = vpop.f32.mrb[5].mxu0 }
0x1803   : > { %v12036_v6 = vpop.f32.mrb[6].mxu0  ;;  %v12392_v7 = vpop.f32.mrb[222].mxu1 }
0x1804   : > { %15641 = vmatmul.mubr.msk.bf16.vlgmr.msra.gmra.mrb[8].mxu0 %vm1253_vm0, %v12039_v46  ;;  %v15635_v3 = vpop.f32.mrb[7].mxu0  ;;  %v12394_v6 = vpop.f32.mrb[223].mxu1  ;;  %v12438_v57 = vpack.c.bf16 %v12392_v7, %v22386_v29  ;;  %v23534_v46 = vpack.c.bf16 %v22180_v40, %v22177_v33  ;;  %v23536_v33 = vpack.c.bf16 %v22204_v60, %v22195_v48  ;;  %v23537_v40 = vpack.c.bf16 %v22138_v63, %v22136_v21  ;;  %v23584_v7 = vld [vmem:[#allocation107_spill] sm:$0xff] }
0x1805   : > { %15645 = vmatpush3.bf16.msra.mxu0 %v22226_v45  ;;  %15646 = vmatprep.mubr.msk.bf16.mxu0 %vm3899_vm1, %v23533_v31  ;;  %v12397_v45 = vpop.f32.mrb[224].mxu1  ;;  %v16900_v3 = vld [vmem:[%s22627_s4 + $0x10] sm:$0xff]   ;;  %v23540_v48 = vpack.c.bf16 %v22162_v4, %v22154_v36  ;;  %v23541_v21 = vpack.c.bf16 %v22231_v26, %v22229_v27  ;;  %v23542_v63 = vpack.c.bf16 %v22237_v22, %v22235_v17  ;;  %v23585_v6 = vld [vmem:[#allocation115_spill] sm:$0xff] }
0x1806   : > { %15654 = vmatprep.subr.bf16.mxu0 %v16899_v10  ;;  %v12399_v16 = vpop.f32.mrb[225].mxu1  ;;  %v23548_v36 = vpack.c.bf16 %v22273_v42, %v22271_v9  ;;  %v23549_v4 = vpack.c.bf16 %v22279_v8, %v22277_v24  ;;  %v23550_v60 = vpack.c.bf16 %v22285_v41, %v22283_v44  ;;  %v23552_v27 = vpack.c.bf16 %v22297_v1, %v22295_v59  ;;  %v23557_v1 = vld [vmem:[#allocation57_spill] sm:$0xff]  ;;  %v23570_v44 = vld [vmem:[#allocation60_spill] sm:$0xff] }
0x1807   : > { %v12400_v31 = vpop.f32.mrb[226].mxu1  ;;  %v23553_v26 = vpack.c.bf16 %v22303_v25, %v22301_v28  ;;  %v23554_v17 = vpack.c.bf16 %v22309_v30, %v22307_v13  ;;  %v23558_v59 = vld [vmem:[#allocation65_spill] sm:$0xff]  ;;  %v23561_v28 = vld [vmem:[#allocation67_spill] sm:$0xff]  ;;  %v23562_v25 = vld [vmem:[#allocation68_spill] sm:$0xff]  ;;  %v23573_v8 = vpack.c.bf16 %v23571_v54, %v23572_v38  ;;  %v23576_v24 = vpack.c.bf16 %v23574_v20, %v23575_v58 }
0x1808   : > { %v12439_v29 = vpack.c.bf16 %v12400_v31, %v12397_v45  ;;  %v12402_v5 = vpop.f32.mrb[227].mxu1  ;;  %v23563_v41 = vpack.c.bf16 %v23561_v28, %v23562_v25  ;;  %v23564_v30 = vld [vmem:[#allocation36_spill] sm:$0xff]  ;;  %v23565_v13 = vld [vmem:[#allocation33_spill] sm:$0xff]  ;;  %v23587_v45 = vpack.c.bf16 %v22381_v14, %v22379_v23  ;;  %v16901_v16 = vld [vmem:[%s22631_s8] sm:$0x1] }
0x1809   : > { %v23566_v18 = vpack.c.bf16 %v23564_v30, %v23565_v13  ;;  %v23581_v9 = vld [vmem:[#allocation113_spill] sm:$0xff]  ;;  %v23588_v14 = vld [vmem:[#allocation108_spill] sm:$0xff]  ;;  %v23589_v5 = vld [vmem:[#allocation59_spill] sm:$0xff] }
0x180a   : > { %v23590_v25 = vld [vmem:[#allocation62_spill] sm:$0xff]  ;;  %v23592_v30 = vld [vmem:[#allocation64_spill] sm:$0xff] }
0x180c   : > { %15647 = vmatmul.mubr.msk.bf16.vlgmr.msra.gmra.mrb[12].mxu0 %vm3899_vm1, %v23534_v46  ;;  %v23586_v46 = vpack.c.bf16 %v23584_v7, %v23585_v6 }
0x180d   : > { %15650 = vmatprep.mubr.msk.bf16.mxu0 %vm3899_vm1, %v23535_v34  ;;  %15655 = vmatpush3.bf16.msra.mxu0 %v16899_v10  ;;  %v23583_v10 = vmov 0.0  }
0x180e   : > { %15664 = vmatprep.subr.bf16.mxu0 %v16900_v3 }
0x1814   : > { %15651 = vmatmul.mubr.msk.bf16.gmra.mrb[16].mxu0 %vm3899_vm1, %v23536_v33 }
0x1815   : > { %15656 = vmatprep.mubr.msk.bf16.mxu0 %vm3899_vm1, %v23537_v40 }
0x181c   : > { %15657 = vmatmul.mubr.msk.bf16.vlgmr.msra.gmra.mrb[12].mxu0 %vm3899_vm1, %v23538_v19 }
0x181d   : > { %15660 = vmatprep.mubr.msk.bf16.mxu0 %vm3899_vm1, %v23539_v39  ;;  %15665 = vmatpush3.bf16.msra.mxu0 %v16900_v3 }
0x181e   : > { %15674 = vmatprep.subr.bf16.mxu0 %v21990_v52 }
0x1824   : > { %15661 = vmatmul.mubr.msk.bf16.gmra.mrb[16].mxu0 %vm3899_vm1, %v23540_v48 }
0x1825   : > { %15666 = vmatprep.mubr.msk.bf16.mxu0 %vm3899_vm1, %v23541_v21 }
0x182c   : > { %15667 = vmatmul.mubr.msk.bf16.vlgmr.msra.gmra.mrb[12].mxu0 %vm3899_vm1, %v23542_v63 }
0x182d   : > { %15670 = vmatprep.mubr.msk.bf16.mxu0 %vm3899_vm1, %v23543_v55  ;;  %15675 = vmatpush3.bf16.msra.mxu0 %v21990_v52  ;;  %v23547_v52 = vpack.c.bf16 %v22267_v51, %v22265_v62  ;;  %v23579_v62 = vpack.c.bf16 %v23577_v11, %v23578_v50  ;;  %v23580_v51 = vld [vmem:[#allocation116_spill] sm:$0xff] }
0x182e   : > { %15684 = vmatprep.subr.bf16.mxu0 %v22008_v53  ;;  %v23582_v42 = vpack.c.bf16 %v23580_v51, %v23581_v9 }
0x1834   : > { %15671 = vmatmul.mubr.msk.bf16.gmra.mrb[16].mxu0 %vm3899_vm1, %v23544_v56 }
0x1835   : > { %15676 = vmatprep.mubr.msk.bf16.mxu0 %vm3899_vm1, %v23545_v61 }
0x183c   : > { %15677 = vmatmul.mubr.msk.bf16.vlgmr.msra.gmra.mrb[12].mxu0 %vm3899_vm1, %v23546_v43 }
0x183d   : > { %15680 = vmatprep.mubr.msk.bf16.mxu0 %vm3899_vm1, %v23547_v52  ;;  %15685 = vmatpush3.bf16.msra.mxu0 %v22008_v53  ;;  %v23551_v53 = vpack.c.bf16 %v22291_v0, %v22289_v49  ;;  %v23555_v0 = vld [vmem:[#allocation63_spill] sm:$0xff]  ;;  %v23559_v49 = vld [vmem:[#allocation66_spill] sm:$0xff] }
0x183e   : > { %15694 = vmatprep.subr.bf16.mxu0 %v22025_v37  ;;  %v23560_v22 = vpack.c.bf16 %v23558_v59, %v23559_v49 }
0x1844   : > { %15681 = vmatmul.mubr.msk.bf16.gmra.mrb[16].mxu0 %vm3899_vm1, %v23548_v36 }
0x1845   : > { %15686 = vmatprep.mubr.msk.bf16.mxu0 %vm3899_vm1, %v23549_v4 }
0x184c   : > { %15687 = vmatmul.mubr.msk.bf16.vlgmr.msra.gmra.mrb[12].mxu0 %vm3899_vm1, %v23550_v60 }
0x184d   : > { %15690 = vmatprep.mubr.msk.bf16.mxu0 %vm3899_vm1, %v23551_v53  ;;  %15695 = vmatpush3.bf16.msra.mxu0 %v22025_v37  ;;  %v23556_v37 = vpack.c.bf16 %v22315_v12, %v23555_v0  ;;  %v23567_v12 = vld [vmem:[#allocation104_spill] sm:$0xff] }
0x184e   : > { %15704 = vmatprep.subr.bf16.mxu0 %v22044_v2 }
0x1854   : > { %15691 = vmatmul.mubr.msk.bf16.gmra.mrb[16].mxu0 %vm3899_vm1, %v23552_v27 }
0x1855   : > { %15696 = vmatprep.mubr.msk.bf16.mxu0 %vm3899_vm1, %v23553_v26 }
0x185c   : > { %15697 = vmatmul.mubr.msk.bf16.vlgmr.msra.gmra.mrb[12].mxu0 %vm3899_vm1, %v23554_v17 }
0x185d   : > { %15700 = vmatprep.mubr.msk.bf16.mxu0 %vm3899_vm1, %v23556_v37  ;;  %15705 = vmatpush3.bf16.msra.mxu0 %v22044_v2  ;;  %v23569_v2 = vpack.c.bf16 %v23567_v12, %v23568_v35 }
0x185e   : > { %15714 = vmatprep.subr.bf16.mxu0 %v23557_v1 }
0x1864   : > { %15701 = vmatmul.mubr.msk.bf16.gmra.mrb[16].mxu0 %vm3899_vm1, %v23560_v22 }
0x1865   : > { %15706 = vmatprep.mubr.msk.bf16.mxu0 %vm3899_vm1, %v23563_v41  ;;  %v23591_v41 = vld [vmem:[#allocation61_spill] sm:$0xff] }
0x186c   : > { %15707 = vmatmul.mubr.msk.bf16.vlgmr.msra.gmra.mrb[12].mxu0 %vm3899_vm1, %v23566_v18 }
0x186d   : > { %15710 = vmatprep.mubr.msk.bf16.mxu0 %vm3899_vm1, %v23569_v2  ;;  %15715 = vmatpush3.bf16.msra.mxu0 %v23557_v1 }
0x186e   : > { %15724 = vmatprep.subr.bf16.mxu0 %v23570_v44 }
0x1874   : > { %15711 = vmatmul.mubr.msk.bf16.gmra.mrb[16].mxu0 %vm3899_vm1, %v23573_v8 }
0x1875   : > { %15716 = vmatprep.mubr.msk.bf16.mxu0 %vm3899_vm1, %v23576_v24 }
0x187c   : > { %15717 = vmatmul.mubr.msk.bf16.vlgmr.msra.gmra.mrb[12].mxu0 %vm3899_vm1, %v23579_v62 }
0x187d   : > { %15720 = vmatprep.mubr.msk.bf16.mxu0 %vm3899_vm1, %v23582_v42  ;;  %15725 = vmatpush3.bf16.msra.mxu0 %v23570_v44 }
0x187e   : > { %15734 = vmatprep.subr.bf16.mxu0 %v23583_v10 }
0x1884   : > { %15721 = vmatmul.mubr.msk.bf16.gmra.mrb[16].mxu0 %vm3899_vm1, %v23586_v46 }
0x1885   : > { %15726 = vmatprep.mubr.msk.bf16.mxu0 %vm3899_vm1, %v12436_v32 }
0x188c   : > { %15727 = vmatmul.mubr.msk.bf16.vlgmr.msra.gmra.mrb[12].mxu0 %vm3899_vm1, %v23587_v45 }
0x188d   : > { %15730 = vmatprep.mubr.msk.bf16.mxu0 %vm3899_vm1, %v12438_v57 }
0x1894   : > { %15731 = vmatmul.mubr.msk.bf16.gmra.mrb[16].mxu0 %vm3899_vm1, %v12439_v29 }
0x1895   : > { %15742 = vmatprep.mubr.msk.bf16.mxu0 %vm16968_vm2, %v23583_v10 }
0x18d7   : > { %v12077_v34 = vpop.f32.mrb[8].mxu0 }
0x18d8   : > { %v12078_v47 = vadd.f32 %v16901_v16, %v12077_v34  ;;  %v15642_v15 = vpop.f32.mrb[9].mxu0 }
0x18d9   : > { %v12080_v32 = vpop.f32.mrb[10].mxu0 }
0x18da   : > { %v13309_v3 = vrot.slane %v12078_v47, 2  ;;  %v15643_v23 = vpop.f32.mrb[11].mxu0 }
0x18dc   : > { %v22553_v31 = vsel %vm13324_vm9, %v23588_v14, %v13309_v3 }
0x195f   : > { %v15728_v57 = vpop.f32.mrb[12].mxu0 }
0x1960   : > { %v13191_v29 = vadd.f32 %v23589_v5, %v15728_v57  ;;  %v13150_v33 = vpop.f32.mrb[13].mxu0 }
0x1961   : > { %v13189_v40 = vadd.f32 %v23589_v5, %v13150_v33  ;;  %v15729_v19 = vpop.f32.mrb[14].mxu0 }
0x1962   : > { %v13192_v39 = vadd.f32 %v23589_v5, %v15729_v19  ;;  %v13153_v48 = vpop.f32.mrb[15].mxu0  ;;  %v13199_v63 = vmax.f32 %v13191_v29, 0.0 }
0x1963   : > { %v13190_v21 = vadd.f32 %v23589_v5, %v13153_v48  ;;  %v13197_v56 = vmax.f32 %v13189_v40, 0.0 }
0x1964   : > { %v13200_v55 = vmax.f32 %v13192_v39, 0.0 }
0x1965   : > { %v13198_v61 = vmax.f32 %v13190_v21, 0.0 }
0x1966   : > { %v13206_v43 = vpack.c.bf16 %v13200_v55, %v13199_v63 }
0x1967   : > { %v13205_v52 = vpack.c.bf16 %v13198_v61, %v13197_v56  ;;  %v15732_v36 = vpop.f32.mrb[16].mxu0 }
0x1968   : > { %v13195_v4 = vadd.f32 %v23589_v5, %v15732_v36  ;;  %v13166_v60 = vpop.f32.mrb[17].mxu0 }
0x1969   : > { %v13193_v53 = vadd.f32 %v23589_v5, %v13166_v60  ;;  %v15733_v27 = vpop.f32.mrb[18].mxu0  ;;  %15735 = vmatpush3.bf16.msra.mxu0 %v13205_v52 }
0x196a   : > { %v13196_v26 = vadd.f32 %v23589_v5, %v15733_v27  ;;  %v13169_v17 = vpop.f32.mrb[19].mxu0  ;;  %15736 = vmatprep.subr.bf16.mxu0 %v23583_v10  ;;  %v13203_v37 = vmax.f32 %v13195_v4, 0.0 }
0x196b   : > { %v13194_v0 = vadd.f32 %v23589_v5, %v13169_v17  ;;  %v13201_v59 = vmax.f32 %v13193_v53, 0.0 }
0x196c   : > { %v13204_v1 = vmax.f32 %v13196_v26, 0.0 }
0x196d   : > { %v13202_v49 = vmax.f32 %v13194_v0, 0.0  ;;  %15737 = vmatpush3.bf16.msra.mxu0 %v13206_v43 }
0x196e   : > { %v13208_v22 = vpack.c.bf16 %v13204_v1, %v13203_v37  ;;  %15738 = vmatprep.subr.bf16.mxu0 %v23583_v10 }
0x196f   : > { %v13207_v28 = vpack.c.bf16 %v13202_v49, %v13201_v59 }
0x1971   : > { %15739 = vmatpush3.bf16.msra.mxu0 %v13207_v28 }
0x1972   : > { %15740 = vmatprep.subr.bf16.mxu0 %v23583_v10 }
0x1975   : > { %15741 = vmatpush3.bf16.msra.mxu0 %v13208_v22 }
0x1976   : > { %15746 = vmatprep.subr.bf16.mxu0 %v23583_v10 }
0x1978   : > { %15743 = vmatmul.mubr.msk.bf16.vlgmr.msra.gmra.mrb[20].mxu0 %vm4723_vm3, %v23590_v25 }
0x1979   : > { %15747 = vmatpush3.bf16.msra.mxu0 %v23591_v41  ;;  %15750 = vmatprep.mubr.msk.bf16.mxu0 %vm16968_vm2, %v23583_v10 }
0x197a   : > { %15748 = vmatprep.subr.bf16.mxu0 %v23583_v10 }
0x197d   : > { %15749 = vmatpush3.bf16.msra.mxu0 %v23592_v30 }
0x1a4b   : > { %v13243_v13 = vpop.f32.mrb[20].mxu0 }
0x1a4c   : > { %v13249_v18 = vpack.c.bf16 %v13243_v13, %v13243_v13  ;;  %v15744_v12 = vpop.f32.mrb[21].mxu0 }
0x1a4d   : > { %v13246_v35 = vpop.f32.mrb[22].mxu0 }
0x1a4e   : > { %15751 = vmatmul.mubr.msk.bf16.vlgmr.msra.gmra.mrb[24].mxu0 %vm1253_vm0, %v13249_v18  ;;  %v15745_v2 = vpop.f32.mrb[23].mxu0 }
0x1b21   : > { %v13287_v44 = vpop.f32.mrb[24].mxu0 }
0x1b22   : > { %v13288_v54 = vadd.f32 %v16901_v16, %v13287_v44  ;;  %v15752_v38 = vpop.f32.mrb[25].mxu0 }
0x1b23   : > { %v13290_v8 = vpop.f32.mrb[26].mxu0 }
0x1b24   : > { %v13312_v20 = vrot.slane %v13288_v54, 1  ;;  %v15753_v58 = vpop.f32.mrb[27].mxu0 }
0x1b26   : > { %v13327_v24 = vsel %vm13326_vm10, %v22553_v31, %v13312_v20 }
0x1b27   : > { %13328 = vst [vmem:[%s326_s23] sm:$0xff] %v13327_v24 }
0x1b28   : > { %16915 = shalt.err (!%p16912_p3)
}
0x1b29   : > { %s16916_s17 = scalar_lea.hbm %s22580_s27, 128  ;;  %s16920_s23 = scalar_lea.hbm %s22632_s9, 256 }
0x1b2a   : > { %p16917_p4 = scmp.ne.s32.totalorder %s22580_s27, %s16916_s17  ;;  %p16921_p9 = scmp.lt.u32.totalorder %s22580_s27, %s22632_s9 }
0x1b2b   : > { %p16922_p10 = scmp.lt.u32.totalorder %s16920_s23, %s16916_s17  ;;  %p16924_p12 = scmp.lt.u32.totalorder %s16916_s17, %s22580_s27 }
0x1b2c   : > { %p16918_p7 = pnand %p16917_p4, %p17058_p5 }
0x1b2d   : > { %p16923_p11 = por %p16922_p10, %p16921_p9 }
0x1b2e   : > { %p16919_p8 = pneg %p16918_p7 }
0x1b2f   : > { %p16925_p13 = por %p16924_p12, %p16923_p11 }
0x1b31   : > { %p16926_p0 = pnand %p16925_p13, %p16919_p8 }
0x1b33   : > { %16929 = shalt.err (!%p16926_p0)
}
0x1b34   : > { %16298 = dma.vmem_to_hbm [thread:$0]  (%p17058_p5), %s22582_s24, 128, %s22580_s27, %s13330_s13  }
0x1b35 PF: > { %p16304_p1 = scmp.ge.s32.totalorder %s16964_s12, 2  ;;  %s13355_s29 = sand.u32 1, %s16952_s30  }
0x1b36   : > { %s13356_s28 = scalar_lea.sflag [#allocation3], %s13355_s29 }
0x1b37   : > { %p16301_p2 = pnand %p16304_p1, %p17062_p6 }
0x1b39   : > { %16947 = dma.done.wait (!%p16301_p2), %s13356_s28, 128  }
0x1b3a   : > { %16949 = vsyncadd (!%p16301_p2), %s13356_s28, 4294967168  ;;  %p19_p3 = scmp.ge.s32.totalorder %s17045_s15, 4   ;;  %s23593_s30 = smov %s16956_s10 }
0x1b3b   : > { %s23594_s10 = smov %s16960_s11  ;;  %s23595_s11 = smov %s17056_s18 }
0x1b3c   : > { %s23596_s12 = smov %s17045_s15  ;;  %21 = sbr.rel (!%p19_p3) target bundleno = 3 (0x3), region = 91 }
0x1b43   :  { %13361 = vsyncpa [#allocation3], 1 }
0x1b44   :  { %13363 = vsyncpa [#allocation3 + $0x1], 1 }

</bundles_post_ra>
